<compile_context>
chip_gen: v7x
topology: tpu7x:2x2x1
jax: 0.10.0
libtpu: 0.0.40
codegen_flags: <defaults>
</compile_context>

<pallas_src>
import functools

import jax
import jax.numpy as jnp
from jax.experimental import pallas as pl
from jax.experimental.pallas import tpu as pltpu

_LANE = 128
_PADW = 8  # sublane-aligned left halo offset inside the y1 VMEM scratch


# ----------------------------------------------------------------------------- helpers
def _round_up(x, m):
    return (x + m - 1) // m * m


def _pad_dim(a, axis, size):
    if a.shape[axis] == size:
        return a
    widths = [(0, 0)] * a.ndim
    widths[axis] = (0, size - a.shape[axis])
    return jnp.pad(a, widths)


def _min_grid_steps():
    """>=2 grid steps per TensorCore on dual-core chips (v4/v5p/v7x); single-core
    chips (v5e/v6e) prefer the largest tile (per-step overhead dominates)."""
    try:
        kind = jax.devices()[0].device_kind.lower()
    except Exception:
        return 2
    if any(t in kind for t in ("v4", "v5p", "v7", "7x")):
        return 4
    return 1


def _choose_bn(n, ho, wo, min_steps, target_rows=4096):
    """Images per grid step: cap the row tile and honour the per-chip step target."""
    divs = [d for d in range(1, n + 1) if n % d == 0]
    ok = [d for d in divs if d * ho * wo <= target_rows] or [1]
    pref = [d for d in ok if n // d >= min_steps]
    return max(pref) if pref else min(ok)


def _phase_decompose(x_nhwc, stride, ho, wo):
    """Spatially pad x by 1 px and split into stride*stride parity phases so that the
    in-kernel tap slice for (kh, kw) is always a unit-stride window:
        phases[(kh % s)*s + (kw % s), :, kh//s : kh//s + ho, kw//s : kw//s + wo, :]
    Returns (s*s, N, ho + 2, wo + 2, C).  ~1x input bytes (vs 9x for im2col)."""
    xp = jnp.pad(x_nhwc, ((0, 0), (1, 1), (1, 1), (0, 0)))
    phases = []
    for pr in range(stride):
        for pc in range(stride):
            ph = xp[:, pr::stride, pc::stride, :]
            ph = ph[:, :ho + 2, :wo + 2, :]
            pad_h = ho + 2 - ph.shape[1]
            pad_w = wo + 2 - ph.shape[2]
            if pad_h or pad_w:
                ph = jnp.pad(ph, ((0, 0), (0, pad_h), (0, pad_w), (0, 0)))
            phases.append(ph)
    return jnp.stack(phases, axis=0)


def fold_bn(w_hwio, gamma, beta, mean, var, eps=1e-5):
    """Fold eval-mode BN into a conv weight (HWIO) -> ((k*k*Cin, Cout), (1, Cout))."""
    scale = gamma / jnp.sqrt(var + eps)
    bias = beta - mean * scale
    kh, kw, ci, co = w_hwio.shape
    w_flat = w_hwio.reshape(kh * kw * ci, co) * scale[None, :]
    return w_flat, bias.reshape(1, co)


def _padded_fold(w_hwio, gamma, beta, mean, var, cp, pad_in=False):
    """Zero-pad output channels (and optionally input channels) to cp, then fold BN."""
    w = _pad_dim(w_hwio, 3, cp)
    if pad_in:
        w = _pad_dim(w, 2, cp)
    g, b = _pad_dim(gamma, 0, cp), _pad_dim(beta, 0, cp)
    m, v = _pad_dim(mean, 0, cp), _pad_dim(var, 0, cp)
    return fold_bn(w, g, b, m, v)


# ----------------------------------------------------------------------------- kernel
def _basic_block_kernel(x_ref, w1_ref, b1_ref, w2_ref, b2_ref, s_ref, *rest,
                        ho, wo, stride, proj):
    if proj:
        sw_ref, o_ref, y1_ref = rest
    else:
        o_ref, y1_ref = rest
    bn, _, _, cp = o_ref.shape
    cin = x_ref.shape[-1]
    m = bn * ho * wo

    # ---- conv1 (3x3, stride) + BN1 + ReLU: nine MXU tap dots, fp32 accumulate ----
    acc1 = None
    for kh in range(3):
        for kw in range(3):
            p = (kh % stride) * stride + (kw % stride)
            rh, rw = kh // stride, kw // stride
            tap = x_ref[p, :, rh:rh + ho, rw:rw + wo, :].reshape(m, cin)
            d = jnp.dot(tap, w1_ref[kh * 3 + kw],
                        preferred_element_type=jnp.float32)
            acc1 = d if acc1 is None else acc1 + d
    y1 = jnp.maximum(acc1 + b1_ref[...], 0.0).astype(jnp.bfloat16)

    # ---- stash y1 in a spatially padded VMEM scratch (zero halo; never hits HBM).
    # Interior starts at sublane offset _PADW (=8) so the store is tile-aligned. ----
    y1_ref[...] = jnp.zeros_like(y1_ref)
    y1_ref[:, 1:1 + ho, _PADW:_PADW + wo, :] = y1.reshape(bn, ho, wo, cp)

    # ---- shortcut initialises the fp32 accumulator (no zero-fill pass) ----
    if proj:                                   # fused 1x1 conv + BN shortcut
        xs = s_ref[...].reshape(m, s_ref.shape[-1])
        acc = jnp.dot(xs, sw_ref[...], preferred_element_type=jnp.float32)
    else:                                      # identity shortcut (bf16 in, fp32 acc)
        acc = s_ref[...].reshape(m, cp).astype(jnp.float32)

    # ---- conv2 (3x3, stride 1) + BN2: nine MXU tap dots over the padded scratch ----
    for kh in range(3):
        for kw in range(3):
            tap = y1_ref[:, kh:kh + ho, _PADW - 1 + kw:_PADW - 1 + kw + wo, :]
            acc = acc + jnp.dot(tap.reshape(m, cp), w2_ref[kh * 3 + kw],
                                preferred_element_type=jnp.float32)

    acc = jnp.maximum(acc + b2_ref[...], 0.0)
    o_ref[...] = acc.reshape(bn, ho, wo, cp).astype(o_ref.dtype)


# ----------------------------------------------------------------------------- pallas wrapper
def _fused_block_call(xph, w1, b1, w2, b2, sc, sw, *, ho, wo, stride, bn,
                      single_buffer_consts):
    p2, n, hp, wp, cin = xph.shape
    cp = w2.shape[-1]
    proj = sw is not None
    steps = n // bn

    def const_spec(shape, index_map):
        if single_buffer_consts:
            return pl.BlockSpec(shape, index_map, pipeline_mode=pl.Buffered(1))
        return pl.BlockSpec(shape, index_map)

    in_specs = [
        pl.BlockSpec((p2, bn, hp, wp, cin), lambda i: (0, i, 0, 0, 0)),
        const_spec((9, cin, cp), lambda i: (0, 0, 0)),
        const_spec((1, cp), lambda i: (0, 0)),
        const_spec((9, cp, cp), lambda i: (0, 0, 0)),
        const_spec((1, cp), lambda i: (0, 0)),
        pl.BlockSpec((bn,) + sc.shape[1:], lambda i: (i, 0, 0, 0)),
    ]
    operands = [xph, w1, b1, w2, b2, sc]
    if proj:
        in_specs.append(const_spec(sw.shape, lambda i: (0, 0)))
        operands.append(sw)

    # VMEM accounting: batch-tiled operands are double-buffered, constants are not
    # (when single_buffer_consts), plus the y1 scratch and fp32 temporaries.
    cm = 1 if single_buffer_consts else 2
    need = (2 * (xph.size // n) * bn * 2                       # x phases (bf16)
            + cm * (w1.size + w2.size) * 2                     # weights (bf16)
            + cm * (b1.size + b2.size) * 4                     # biases (f32)
            + 2 * (sc.size // n) * bn * 2                      # shortcut (bf16)
            + 2 * bn * ho * wo * cp * 2                        # output (bf16)
            + bn * (ho + 2) * (wo + 16) * cp * 2               # y1 scratch (bf16)
            + 4 * bn * ho * wo * cp * 4)                       # fp32 acc / tap temps
    if proj:
        need += cm * sw.size * 2
    vmem_limit = max(16 << 20, min(int(need * 1.5) + (4 << 20), 56 << 20))

    flops = 2 * n * ho * wo * cp * (9 * cin + 9 * cp + (cin if proj else 0))
    bytes_accessed = (xph.size * 2 + w1.size * 2 + w2.size * 2
                      + (b1.size + b2.size) * 4 + sc.size * 2
                      + (sw.size * 2 if proj else 0) + n * ho * wo * cp * 2)

    kernel = functools.partial(_basic_block_kernel, ho=ho, wo=wo,
                               stride=stride, proj=proj)
    return pl.pallas_call(
        kernel,
        out_shape=jax.ShapeDtypeStruct((n, ho, wo, cp), jnp.bfloat16),
        grid_spec=pltpu.PrefetchScalarGridSpec(
            num_scalar_prefetch=0,
            grid=(steps,),
            in_specs=in_specs,
            out_specs=pl.BlockSpec((bn, ho, wo, cp), lambda i: (i, 0, 0, 0)),
            scratch_shapes=[pltpu.VMEM((bn, ho + 2, wo + 16, cp), jnp.bfloat16)]),
        compiler_params=pltpu.CompilerParams(
            dimension_semantics=("parallel",),
            vmem_limit_bytes=vmem_limit),
        cost_estimate=pl.CostEstimate(flops=int(flops), transcendentals=0,
                                      bytes_accessed=int(bytes_accessed)),
    )(*operands)


# ----------------------------------------------------------------------------- JAX glue
def basic_block_forward(x_nchw, params, *, in_channels, out_channels, stride):
    n, c, h, w = x_nchw.shape
    assert c == in_channels
    cp = _round_up(out_channels, _LANE)
    ho = (h + 2 - 3) // stride + 1
    wo = (w + 2 - 3) // stride + 1

    x = jnp.transpose(x_nchw, (0, 2, 3, 1)).astype(jnp.bfloat16)   # NHWC bf16
    xph = _phase_decompose(x, stride, ho, wo)          # (s*s, N, ho+2, wo+2, Cin)

    # eval-mode BN folded into the convs; output channels zero-padded to Cp (lane-dense)
    w1f, b1 = _padded_fold(params["w1"], params["bn1_gamma"], params["bn1_beta"],
                           params["bn1_mean"], params["bn1_var"], cp)
    w1t = w1f.reshape(9, in_channels, cp).astype(jnp.bfloat16)
    w2f, b2 = _padded_fold(params["w2"], params["bn2_gamma"], params["bn2_beta"],
                           params["bn2_mean"], params["bn2_var"], cp, pad_in=True)
    w2t = w2f.reshape(9, cp, cp).astype(jnp.bfloat16)

    proj = (stride != 1) or (in_channels != out_channels)
    if proj:
        wsf, bs = _padded_fold(params["ws"], params["bns_gamma"], params["bns_beta"],
                               params["bns_mean"], params["bns_var"], cp)
        bias2 = (b2 + bs).astype(jnp.float32)
        sc = x[:, ::stride, ::stride, :]               # (N, ho, wo, Cin) bf16
        sw = wsf.astype(jnp.bfloat16)                  # (Cin, Cp) bf16
    else:
        bias2 = b2.astype(jnp.float32)
        sc = _pad_dim(x, 3, cp)                        # identity, bf16 (N, ho, wo, Cp)
        sw = None

    bn = _choose_bn(n, ho, wo, _min_grid_steps())
    args = (xph, w1t, b1.astype(jnp.float32), w2t, bias2, sc, sw)
    kw = dict(ho=ho, wo=wo, stride=stride, bn=bn)
    try:
        out = _fused_block_call(*args, **kw, single_buffer_consts=True)
        out = jax.block_until_ready(out)
    except Exception:
        # TODO(synk): pl.Buffered(1) single-buffering of the constant weight operands
        # is not accepted on this jax/libtpu; fall back to default double buffering.
        out = _fused_block_call(*args, **kw, single_buffer_consts=False)

    # In a multi-block network the padded NHWC bf16 tensor would feed the next block
    # directly; slice / upcast / transpose only once at the boundary.
    out = out[..., :out_channels].astype(x_nchw.dtype)
    return jnp.transpose(out, (0, 3, 1, 2))            # NHWC -> NCHW


# ----------------------------------------------------------------------------- params & reference
def init_params(key, in_channels, out_channels, stride):
    ks = jax.random.split(key, 16)
    p = {
        "w1": jax.random.normal(ks[0], (3, 3, in_channels, out_channels), jnp.float32) * 0.1,
        "bn1_gamma": 1.0 + 0.1 * jax.random.normal(ks[1], (out_channels,), jnp.float32),
        "bn1_beta": 0.1 * jax.random.normal(ks[2], (out_channels,), jnp.float32),
        "bn1_mean": 0.1 * jax.random.normal(ks[3], (out_channels,), jnp.float32),
        "bn1_var": 1.0 + 0.5 * jax.random.uniform(ks[4], (out_channels,), jnp.float32),
        "w2": jax.random.normal(ks[5], (3, 3, out_channels, out_channels), jnp.float32) * 0.1,
        "bn2_gamma": 1.0 + 0.1 * jax.random.normal(ks[6], (out_channels,), jnp.float32),
        "bn2_beta": 0.1 * jax.random.normal(ks[7], (out_channels,), jnp.float32),
        "bn2_mean": 0.1 * jax.random.normal(ks[8], (out_channels,), jnp.float32),
        "bn2_var": 1.0 + 0.5 * jax.random.uniform(ks[9], (out_channels,), jnp.float32),
    }
    if stride != 1 or in_channels != out_channels:
        p.update({
            "ws": jax.random.normal(ks[10], (1, 1, in_channels, out_channels), jnp.float32) * 0.1,
            "bns_gamma": 1.0 + 0.1 * jax.random.normal(ks[11], (out_channels,), jnp.float32),
            "bns_beta": 0.1 * jax.random.normal(ks[12], (out_channels,), jnp.float32),
            "bns_mean": 0.1 * jax.random.normal(ks[13], (out_channels,), jnp.float32),
            "bns_var": 1.0 + 0.5 * jax.random.uniform(ks[14], (out_channels,), jnp.float32),
        })
    return p


def reference_forward(x_nchw, params, *, in_channels, out_channels, stride, eps=1e-5):
    def conv(x, w_hwio, s, pad):
        return jax.lax.conv_general_dilated(
            x, w_hwio, window_strides=(s, s), padding=((pad, pad), (pad, pad)),
            dimension_numbers=("NCHW", "HWIO", "NCHW"))

    def bn(y, g, b, m, v):
        sc = g / jnp.sqrt(v + eps)
        return y * sc[None, :, None, None] + (b - m * sc)[None, :, None, None]

    r = conv(x_nchw, params["w1"], stride, 1)
    r = jnp.maximum(bn(r, params["bn1_gamma"], params["bn1_beta"],
                       params["bn1_mean"], params["bn1_var"]), 0.0)
    r = conv(r, params["w2"], 1, 1)
    r = bn(r, params["bn2_gamma"], params["bn2_beta"],
           params["bn2_mean"], params["bn2_var"])
    if stride != 1 or in_channels != out_channels:
        s = conv(x_nchw, params["ws"], stride, 0)
        s = bn(s, params["bns_gamma"], params["bns_beta"],
               params["bns_mean"], params["bns_var"])
    else:
        s = x_nchw
    return jnp.maximum(r + s, 0.0)


# ----------------------------------------------------------------------------- main
if __name__ == "__main__":
    key = jax.random.PRNGKey(0)

    configs = [
        # (in_channels, out_channels, stride, N, H, W)
        (4, 8, 2, 2, 16, 16),   # projection shortcut (1x1 conv + BN), stride 2
        (8, 8, 1, 2, 16, 16),   # identity shortcut, stride 1
    ]
    for idx, (cin, cout, stride, n, h, w) in enumerate(configs):
        kx, kp, key = jax.random.split(key, 3)
        x = jax.random.normal(kx, (n, cin, h, w), jnp.float32)
        params = init_params(kp, cin, cout, stride)

        out = jax.block_until_ready(
            basic_block_forward(x, params, in_channels=cin,
                                out_channels=cout, stride=stride))
        ref = jax.block_until_ready(
            reference_forward(x, params, in_channels=cin,
                              out_channels=cout, stride=stride))

        assert out.shape == (n, cout, h // stride, w // stride), out.shape
        # bf16 MXU operands + bf16 output store (fp32 accumulate) vs f32 reference.
        err = float(jnp.max(jnp.abs(out - ref)))
        assert jnp.allclose(out, ref, atol=1.2e-1, rtol=6e-2), \
            f"config {idx}: max abs err {err}"
    print("KERNEL_OK")
</pallas_src>

<mosaic_0001>
module attributes {stable_mosaic.version = 11 : i64} {
  func.func @_basic_block_kernel(%arg0: i32, %arg1: memref<4x2x10x10x4xbf16, #tpu.memory_space<vmem>>, %arg2: memref<9x4x128xbf16, #tpu.memory_space<vmem>>, %arg3: memref<1x128xf32, #tpu.memory_space<vmem>>, %arg4: memref<9x128x128xbf16, #tpu.memory_space<vmem>>, %arg5: memref<1x128xf32, #tpu.memory_space<vmem>>, %arg6: memref<2x8x8x4xbf16, #tpu.memory_space<vmem>>, %arg7: memref<4x128xbf16, #tpu.memory_space<vmem>>, %arg8: memref<2x8x8x128xbf16, #tpu.memory_space<vmem>>, %arg9: memref<2x10x24x128xbf16, #tpu.memory_space<vmem>>) attributes {dimension_semantics = [#tpu.dimension_semantics<parallel>], iteration_bounds = array<i64: 1>, scalar_prefetch = 0 : i64, scratch_operands = 1 : i64, tpu.core_type = #tpu.core_type<tc>, window_params = [{transform_indices = @transform_0, window_bounds = array<i64: 4, 2, 10, 10, 4>}, {pipeline_mode = #tpu.pipeline_mode<synchronous>, transform_indices = @transform_1, window_bounds = array<i64: 9, 4, 128>}, {pipeline_mode = #tpu.pipeline_mode<synchronous>, transform_indices = @transform_2, window_bounds = array<i64: 1, 128>}, {pipeline_mode = #tpu.pipeline_mode<synchronous>, transform_indices = @transform_3, window_bounds = array<i64: 9, 128, 128>}, {pipeline_mode = #tpu.pipeline_mode<synchronous>, transform_indices = @transform_4, window_bounds = array<i64: 1, 128>}, {transform_indices = @transform_5, window_bounds = array<i64: 2, 8, 8, 4>}, {pipeline_mode = #tpu.pipeline_mode<synchronous>, transform_indices = @transform_6, window_bounds = array<i64: 4, 128>}, {transform_indices = @transform_7, window_bounds = array<i64: 2, 8, 8, 128>}]} {
    %c0 = arith.constant 0 : index
    %c0_0 = arith.constant 0 : index
    %c0_1 = arith.constant 0 : index
    %c0_2 = arith.constant 0 : index
    %c0_3 = arith.constant 0 : index
    %0 = vector.load %arg1[%c0, %c0_0, %c0_1, %c0_2, %c0_3] : memref<4x2x10x10x4xbf16, #tpu.memory_space<vmem>>, vector<1x2x8x8x4xbf16>
    %1 = vector.shape_cast %0 : vector<1x2x8x8x4xbf16> to vector<2x8x8x4xbf16>
    %2 = vector.shape_cast %1 : vector<2x8x8x4xbf16> to vector<128x4xbf16>
    %c0_4 = arith.constant 0 : index
    %c0_5 = arith.constant 0 : index
    %c0_6 = arith.constant 0 : index
    %3 = vector.load %arg2[%c0_4, %c0_5, %c0_6] : memref<9x4x128xbf16, #tpu.memory_space<vmem>>, vector<1x4x128xbf16>
    %4 = vector.shape_cast %3 : vector<1x4x128xbf16> to vector<4x128xbf16>
    %cst = arith.constant dense<0.000000e+00> : vector<128x128xf32>
    %5 = tpu.matmul %2, %4, %cst {dimension_numbers = #tpu.dot_dimension_numbers<[1], [0], [0], [1], [0, 0, 1, 1], [], []>} : vector<128x4xbf16>, vector<4x128xbf16>, vector<128x128xf32> -> vector<128x128xf32>
    %c1 = arith.constant 1 : index
    %c0_7 = arith.constant 0 : index
    %c0_8 = arith.constant 0 : index
    %c0_9 = arith.constant 0 : index
    %c0_10 = arith.constant 0 : index
    %6 = vector.load %arg1[%c1, %c0_7, %c0_8, %c0_9, %c0_10] : memref<4x2x10x10x4xbf16, #tpu.memory_space<vmem>>, vector<1x2x8x8x4xbf16>
    %7 = vector.shape_cast %6 : vector<1x2x8x8x4xbf16> to vector<2x8x8x4xbf16>
    %8 = vector.shape_cast %7 : vector<2x8x8x4xbf16> to vector<128x4xbf16>
    %c1_11 = arith.constant 1 : index
    %c0_12 = arith.constant 0 : index
    %c0_13 = arith.constant 0 : index
    %9 = vector.load %arg2[%c1_11, %c0_12, %c0_13] : memref<9x4x128xbf16, #tpu.memory_space<vmem>>, vector<1x4x128xbf16>
    %10 = vector.shape_cast %9 : vector<1x4x128xbf16> to vector<4x128xbf16>
    %cst_14 = arith.constant dense<0.000000e+00> : vector<128x128xf32>
    %11 = tpu.matmul %8, %10, %cst_14 {dimension_numbers = #tpu.dot_dimension_numbers<[1], [0], [0], [1], [0, 0, 1, 1], [], []>} : vector<128x4xbf16>, vector<4x128xbf16>, vector<128x128xf32> -> vector<128x128xf32>
    %12 = arith.addf %5, %11 : vector<128x128xf32>
    %c0_15 = arith.constant 0 : index
    %c0_16 = arith.constant 0 : index
    %c0_17 = arith.constant 0 : index
    %c1_18 = arith.constant 1 : index
    %c0_19 = arith.constant 0 : index
    %13 = vector.load %arg1[%c0_15, %c0_16, %c0_17, %c1_18, %c0_19] : memref<4x2x10x10x4xbf16, #tpu.memory_space<vmem>>, vector<1x2x8x8x4xbf16>
    %14 = vector.shape_cast %13 : vector<1x2x8x8x4xbf16> to vector<2x8x8x4xbf16>
    %15 = vector.shape_cast %14 : vector<2x8x8x4xbf16> to vector<128x4xbf16>
    %c2 = arith.constant 2 : index
    %c0_20 = arith.constant 0 : index
    %c0_21 = arith.constant 0 : index
    %16 = vector.load %arg2[%c2, %c0_20, %c0_21] : memref<9x4x128xbf16, #tpu.memory_space<vmem>>, vector<1x4x128xbf16>
    %17 = vector.shape_cast %16 : vector<1x4x128xbf16> to vector<4x128xbf16>
    %cst_22 = arith.constant dense<0.000000e+00> : vector<128x128xf32>
    %18 = tpu.matmul %15, %17, %cst_22 {dimension_numbers = #tpu.dot_dimension_numbers<[1], [0], [0], [1], [0, 0, 1, 1], [], []>} : vector<128x4xbf16>, vector<4x128xbf16>, vector<128x128xf32> -> vector<128x128xf32>
    %19 = arith.addf %12, %18 : vector<128x128xf32>
    %c2_23 = arith.constant 2 : index
    %c0_24 = arith.constant 0 : index
    %c0_25 = arith.constant 0 : index
    %c0_26 = arith.constant 0 : index
    %c0_27 = arith.constant 0 : index
    %20 = vector.load %arg1[%c2_23, %c0_24, %c0_25, %c0_26, %c0_27] : memref<4x2x10x10x4xbf16, #tpu.memory_space<vmem>>, vector<1x2x8x8x4xbf16>
    %21 = vector.shape_cast %20 : vector<1x2x8x8x4xbf16> to vector<2x8x8x4xbf16>
    %22 = vector.shape_cast %21 : vector<2x8x8x4xbf16> to vector<128x4xbf16>
    %c3 = arith.constant 3 : index
    %c0_28 = arith.constant 0 : index
    %c0_29 = arith.constant 0 : index
    %23 = vector.load %arg2[%c3, %c0_28, %c0_29] : memref<9x4x128xbf16, #tpu.memory_space<vmem>>, vector<1x4x128xbf16>
    %24 = vector.shape_cast %23 : vector<1x4x128xbf16> to vector<4x128xbf16>
    %cst_30 = arith.constant dense<0.000000e+00> : vector<128x128xf32>
    %25 = tpu.matmul %22, %24, %cst_30 {dimension_numbers = #tpu.dot_dimension_numbers<[1], [0], [0], [1], [0, 0, 1, 1], [], []>} : vector<128x4xbf16>, vector<4x128xbf16>, vector<128x128xf32> -> vector<128x128xf32>
    %26 = arith.addf %19, %25 : vector<128x128xf32>
    %c3_31 = arith.constant 3 : index
    %c0_32 = arith.constant 0 : index
    %c0_33 = arith.constant 0 : index
    %c0_34 = arith.constant 0 : index
    %c0_35 = arith.constant 0 : index
    %27 = vector.load %arg1[%c3_31, %c0_32, %c0_33, %c0_34, %c0_35] : memref<4x2x10x10x4xbf16, #tpu.memory_space<vmem>>, vector<1x2x8x8x4xbf16>
    %28 = vector.shape_cast %27 : vector<1x2x8x8x4xbf16> to vector<2x8x8x4xbf16>
    %29 = vector.shape_cast %28 : vector<2x8x8x4xbf16> to vector<128x4xbf16>
    %c4 = arith.constant 4 : index
    %c0_36 = arith.constant 0 : index
    %c0_37 = arith.constant 0 : index
    %30 = vector.load %arg2[%c4, %c0_36, %c0_37] : memref<9x4x128xbf16, #tpu.memory_space<vmem>>, vector<1x4x128xbf16>
    %31 = vector.shape_cast %30 : vector<1x4x128xbf16> to vector<4x128xbf16>
    %cst_38 = arith.constant dense<0.000000e+00> : vector<128x128xf32>
    %32 = tpu.matmul %29, %31, %cst_38 {dimension_numbers = #tpu.dot_dimension_numbers<[1], [0], [0], [1], [0, 0, 1, 1], [], []>} : vector<128x4xbf16>, vector<4x128xbf16>, vector<128x128xf32> -> vector<128x128xf32>
    %33 = arith.addf %26, %32 : vector<128x128xf32>
    %c2_39 = arith.constant 2 : index
    %c0_40 = arith.constant 0 : index
    %c0_41 = arith.constant 0 : index
    %c1_42 = arith.constant 1 : index
    %c0_43 = arith.constant 0 : index
    %34 = vector.load %arg1[%c2_39, %c0_40, %c0_41, %c1_42, %c0_43] : memref<4x2x10x10x4xbf16, #tpu.memory_space<vmem>>, vector<1x2x8x8x4xbf16>
    %35 = vector.shape_cast %34 : vector<1x2x8x8x4xbf16> to vector<2x8x8x4xbf16>
    %36 = vector.shape_cast %35 : vector<2x8x8x4xbf16> to vector<128x4xbf16>
    %c5 = arith.constant 5 : index
    %c0_44 = arith.constant 0 : index
    %c0_45 = arith.constant 0 : index
    %37 = vector.load %arg2[%c5, %c0_44, %c0_45] : memref<9x4x128xbf16, #tpu.memory_space<vmem>>, vector<1x4x128xbf16>
    %38 = vector.shape_cast %37 : vector<1x4x128xbf16> to vector<4x128xbf16>
    %cst_46 = arith.constant dense<0.000000e+00> : vector<128x128xf32>
    %39 = tpu.matmul %36, %38, %cst_46 {dimension_numbers = #tpu.dot_dimension_numbers<[1], [0], [0], [1], [0, 0, 1, 1], [], []>} : vector<128x4xbf16>, vector<4x128xbf16>, vector<128x128xf32> -> vector<128x128xf32>
    %40 = arith.addf %33, %39 : vector<128x128xf32>
    %c0_47 = arith.constant 0 : index
    %c0_48 = arith.constant 0 : index
    %c1_49 = arith.constant 1 : index
    %c0_50 = arith.constant 0 : index
    %c0_51 = arith.constant 0 : index
    %41 = vector.load %arg1[%c0_47, %c0_48, %c1_49, %c0_50, %c0_51] : memref<4x2x10x10x4xbf16, #tpu.memory_space<vmem>>, vector<1x2x8x8x4xbf16>
    %42 = vector.shape_cast %41 : vector<1x2x8x8x4xbf16> to vector<2x8x8x4xbf16>
    %43 = vector.shape_cast %42 : vector<2x8x8x4xbf16> to vector<128x4xbf16>
    %c6 = arith.constant 6 : index
    %c0_52 = arith.constant 0 : index
    %c0_53 = arith.constant 0 : index
    %44 = vector.load %arg2[%c6, %c0_52, %c0_53] : memref<9x4x128xbf16, #tpu.memory_space<vmem>>, vector<1x4x128xbf16>
    %45 = vector.shape_cast %44 : vector<1x4x128xbf16> to vector<4x128xbf16>
    %cst_54 = arith.constant dense<0.000000e+00> : vector<128x128xf32>
    %46 = tpu.matmul %43, %45, %cst_54 {dimension_numbers = #tpu.dot_dimension_numbers<[1], [0], [0], [1], [0, 0, 1, 1], [], []>} : vector<128x4xbf16>, vector<4x128xbf16>, vector<128x128xf32> -> vector<128x128xf32>
    %47 = arith.addf %40, %46 : vector<128x128xf32>
    %c1_55 = arith.constant 1 : index
    %c0_56 = arith.constant 0 : index
    %c1_57 = arith.constant 1 : index
    %c0_58 = arith.constant 0 : index
    %c0_59 = arith.constant 0 : index
    %48 = vector.load %arg1[%c1_55, %c0_56, %c1_57, %c0_58, %c0_59] : memref<4x2x10x10x4xbf16, #tpu.memory_space<vmem>>, vector<1x2x8x8x4xbf16>
    %49 = vector.shape_cast %48 : vector<1x2x8x8x4xbf16> to vector<2x8x8x4xbf16>
    %50 = vector.shape_cast %49 : vector<2x8x8x4xbf16> to vector<128x4xbf16>
    %c7 = arith.constant 7 : index
    %c0_60 = arith.constant 0 : index
    %c0_61 = arith.constant 0 : index
    %51 = vector.load %arg2[%c7, %c0_60, %c0_61] : memref<9x4x128xbf16, #tpu.memory_space<vmem>>, vector<1x4x128xbf16>
    %52 = vector.shape_cast %51 : vector<1x4x128xbf16> to vector<4x128xbf16>
    %cst_62 = arith.constant dense<0.000000e+00> : vector<128x128xf32>
    %53 = tpu.matmul %50, %52, %cst_62 {dimension_numbers = #tpu.dot_dimension_numbers<[1], [0], [0], [1], [0, 0, 1, 1], [], []>} : vector<128x4xbf16>, vector<4x128xbf16>, vector<128x128xf32> -> vector<128x128xf32>
    %54 = arith.addf %47, %53 : vector<128x128xf32>
    %c0_63 = arith.constant 0 : index
    %c0_64 = arith.constant 0 : index
    %c1_65 = arith.constant 1 : index
    %c1_66 = arith.constant 1 : index
    %c0_67 = arith.constant 0 : index
    %55 = vector.load %arg1[%c0_63, %c0_64, %c1_65, %c1_66, %c0_67] : memref<4x2x10x10x4xbf16, #tpu.memory_space<vmem>>, vector<1x2x8x8x4xbf16>
    %56 = vector.shape_cast %55 : vector<1x2x8x8x4xbf16> to vector<2x8x8x4xbf16>
    %57 = vector.shape_cast %56 : vector<2x8x8x4xbf16> to vector<128x4xbf16>
    %c8 = arith.constant 8 : index
    %c0_68 = arith.constant 0 : index
    %c0_69 = arith.constant 0 : index
    %58 = vector.load %arg2[%c8, %c0_68, %c0_69] : memref<9x4x128xbf16, #tpu.memory_space<vmem>>, vector<1x4x128xbf16>
    %59 = vector.shape_cast %58 : vector<1x4x128xbf16> to vector<4x128xbf16>
    %cst_70 = arith.constant dense<0.000000e+00> : vector<128x128xf32>
    %60 = tpu.matmul %57, %59, %cst_70 {dimension_numbers = #tpu.dot_dimension_numbers<[1], [0], [0], [1], [0, 0, 1, 1], [], []>} : vector<128x4xbf16>, vector<4x128xbf16>, vector<128x128xf32> -> vector<128x128xf32>
    %61 = arith.addf %54, %60 : vector<128x128xf32>
    %c0_71 = arith.constant 0 : index
    %c0_72 = arith.constant 0 : index
    %62 = vector.load %arg3[%c0_71, %c0_72] : memref<1x128xf32, #tpu.memory_space<vmem>>, vector<1x128xf32>
    %63 = vector.broadcast %62 : vector<1x128xf32> to vector<128x128xf32>
    %64 = arith.addf %61, %63 : vector<128x128xf32>
    %cst_73 = arith.constant 0.000000e+00 : f32
    %65 = vector.broadcast %cst_73 : f32 to vector<128x128xf32>
    %66 = arith.maximumf %64, %65 : vector<128x128xf32>
    %67 = arith.truncf %66 : vector<128x128xf32> to vector<128x128xbf16>
    %cst_74 = arith.constant 0.000000e+00 : bf16
    %68 = vector.broadcast %cst_74 : bf16 to vector<2x10x24x128xbf16>
    %c0_75 = arith.constant 0 : index
    %c0_76 = arith.constant 0 : index
    %c0_77 = arith.constant 0 : index
    %c0_78 = arith.constant 0 : index
    %69 = vector.load %arg9[%c0_75, %c0_76, %c0_77, %c0_78] : memref<2x10x24x128xbf16, #tpu.memory_space<vmem>>, vector<2x10x24x128xbf16>
    tpu.vector_store %arg9[%c0_75, %c0_76, %c0_77, %c0_78], %68 {strides = array<i32>} : memref<2x10x24x128xbf16, #tpu.memory_space<vmem>>, vector<2x10x24x128xbf16>,
    %70 = vector.shape_cast %67 : vector<128x128xbf16> to vector<2x8x8x128xbf16>
    %c0_79 = arith.constant 0 : index
    %c1_80 = arith.constant 1 : index
    %c8_81 = arith.constant 8 : index
    %c0_82 = arith.constant 0 : index
    %71 = vector.load %arg9[%c0_79, %c1_80, %c8_81, %c0_82] : memref<2x10x24x128xbf16, #tpu.memory_space<vmem>>, vector<2x8x8x128xbf16>
    tpu.vector_store %arg9[%c0_79, %c1_80, %c8_81, %c0_82], %70 {strides = array<i32>} : memref<2x10x24x128xbf16, #tpu.memory_space<vmem>>, vector<2x8x8x128xbf16>,
    %c0_83 = arith.constant 0 : index
    %c0_84 = arith.constant 0 : index
    %c0_85 = arith.constant 0 : index
    %c0_86 = arith.constant 0 : index
    %72 = vector.load %arg6[%c0_83, %c0_84, %c0_85, %c0_86] : memref<2x8x8x4xbf16, #tpu.memory_space<vmem>>, vector<2x8x8x4xbf16>
    %73 = vector.shape_cast %72 : vector<2x8x8x4xbf16> to vector<128x4xbf16>
    %c0_87 = arith.constant 0 : index
    %c0_88 = arith.constant 0 : index
    %74 = vector.load %arg7[%c0_87, %c0_88] : memref<4x128xbf16, #tpu.memory_space<vmem>>, vector<4x128xbf16>
    %cst_89 = arith.constant dense<0.000000e+00> : vector<128x128xf32>
    %75 = tpu.matmul %73, %74, %cst_89 {dimension_numbers = #tpu.dot_dimension_numbers<[1], [0], [0], [1], [0, 0, 1, 1], [], []>} : vector<128x4xbf16>, vector<4x128xbf16>, vector<128x128xf32> -> vector<128x128xf32>
    %c0_90 = arith.constant 0 : index
    %c0_91 = arith.constant 0 : index
    %c7_92 = arith.constant 7 : index
    %c0_93 = arith.constant 0 : index
    %76 = vector.load %arg9[%c0_90, %c0_91, %c7_92, %c0_93] : memref<2x10x24x128xbf16, #tpu.memory_space<vmem>>, vector<2x8x8x128xbf16>
    %77 = vector.shape_cast %76 : vector<2x8x8x128xbf16> to vector<128x128xbf16>
    %c0_94 = arith.constant 0 : index
    %c0_95 = arith.constant 0 : index
    %c0_96 = arith.constant 0 : index
    %78 = vector.load %arg4[%c0_94, %c0_95, %c0_96] : memref<9x128x128xbf16, #tpu.memory_space<vmem>>, vector<1x128x128xbf16>
    %79 = vector.shape_cast %78 : vector<1x128x128xbf16> to vector<128x128xbf16>
    %cst_97 = arith.constant dense<0.000000e+00> : vector<128x128xf32>
    %80 = tpu.matmul %77, %79, %cst_97 {dimension_numbers = #tpu.dot_dimension_numbers<[1], [0], [0], [1], [0, 0, 1, 1], [], []>} : vector<128x128xbf16>, vector<128x128xbf16>, vector<128x128xf32> -> vector<128x128xf32>
    %81 = arith.addf %75, %80 : vector<128x128xf32>
    %c0_98 = arith.constant 0 : index
    %c0_99 = arith.constant 0 : index
    %c8_100 = arith.constant 8 : index
    %c0_101 = arith.constant 0 : index
    %82 = vector.load %arg9[%c0_98, %c0_99, %c8_100, %c0_101] : memref<2x10x24x128xbf16, #tpu.memory_space<vmem>>, vector<2x8x8x128xbf16>
    %83 = vector.shape_cast %82 : vector<2x8x8x128xbf16> to vector<128x128xbf16>
    %c1_102 = arith.constant 1 : index
    %c0_103 = arith.constant 0 : index
    %c0_104 = arith.constant 0 : index
    %84 = vector.load %arg4[%c1_102, %c0_103, %c0_104] : memref<9x128x128xbf16, #tpu.memory_space<vmem>>, vector<1x128x128xbf16>
    %85 = vector.shape_cast %84 : vector<1x128x128xbf16> to vector<128x128xbf16>
    %cst_105 = arith.constant dense<0.000000e+00> : vector<128x128xf32>
    %86 = tpu.matmul %83, %85, %cst_105 {dimension_numbers = #tpu.dot_dimension_numbers<[1], [0], [0], [1], [0, 0, 1, 1], [], []>} : vector<128x128xbf16>, vector<128x128xbf16>, vector<128x128xf32> -> vector<128x128xf32>
    %87 = arith.addf %81, %86 : vector<128x128xf32>
    %c0_106 = arith.constant 0 : index
    %c0_107 = arith.constant 0 : index
    %c9 = arith.constant 9 : index
    %c0_108 = arith.constant 0 : index
    %88 = vector.load %arg9[%c0_106, %c0_107, %c9, %c0_108] : memref<2x10x24x128xbf16, #tpu.memory_space<vmem>>, vector<2x8x8x128xbf16>
    %89 = vector.shape_cast %88 : vector<2x8x8x128xbf16> to vector<128x128xbf16>
    %c2_109 = arith.constant 2 : index
    %c0_110 = arith.constant 0 : index
    %c0_111 = arith.constant 0 : index
    %90 = vector.load %arg4[%c2_109, %c0_110, %c0_111] : memref<9x128x128xbf16, #tpu.memory_space<vmem>>, vector<1x128x128xbf16>
    %91 = vector.shape_cast %90 : vector<1x128x128xbf16> to vector<128x128xbf16>
    %cst_112 = arith.constant dense<0.000000e+00> : vector<128x128xf32>
    %92 = tpu.matmul %89, %91, %cst_112 {dimension_numbers = #tpu.dot_dimension_numbers<[1], [0], [0], [1], [0, 0, 1, 1], [], []>} : vector<128x128xbf16>, vector<128x128xbf16>, vector<128x128xf32> -> vector<128x128xf32>
    %93 = arith.addf %87, %92 : vector<128x128xf32>
    %c0_113 = arith.constant 0 : index
    %c1_114 = arith.constant 1 : index
    %c7_115 = arith.constant 7 : index
    %c0_116 = arith.constant 0 : index
    %94 = vector.load %arg9[%c0_113, %c1_114, %c7_115, %c0_116] : memref<2x10x24x128xbf16, #tpu.memory_space<vmem>>, vector<2x8x8x128xbf16>
    %95 = vector.shape_cast %94 : vector<2x8x8x128xbf16> to vector<128x128xbf16>
    %c3_117 = arith.constant 3 : index
    %c0_118 = arith.constant 0 : index
    %c0_119 = arith.constant 0 : index
    %96 = vector.load %arg4[%c3_117, %c0_118, %c0_119] : memref<9x128x128xbf16, #tpu.memory_space<vmem>>, vector<1x128x128xbf16>
    %97 = vector.shape_cast %96 : vector<1x128x128xbf16> to vector<128x128xbf16>
    %cst_120 = arith.constant dense<0.000000e+00> : vector<128x128xf32>
    %98 = tpu.matmul %95, %97, %cst_120 {dimension_numbers = #tpu.dot_dimension_numbers<[1], [0], [0], [1], [0, 0, 1, 1], [], []>} : vector<128x128xbf16>, vector<128x128xbf16>, vector<128x128xf32> -> vector<128x128xf32>
    %99 = arith.addf %93, %98 : vector<128x128xf32>
    %c0_121 = arith.constant 0 : index
    %c1_122 = arith.constant 1 : index
    %c8_123 = arith.constant 8 : index
    %c0_124 = arith.constant 0 : index
    %100 = vector.load %arg9[%c0_121, %c1_122, %c8_123, %c0_124] : memref<2x10x24x128xbf16, #tpu.memory_space<vmem>>, vector<2x8x8x128xbf16>
    %101 = vector.shape_cast %100 : vector<2x8x8x128xbf16> to vector<128x128xbf16>
    %c4_125 = arith.constant 4 : index
    %c0_126 = arith.constant 0 : index
    %c0_127 = arith.constant 0 : index
    %102 = vector.load %arg4[%c4_125, %c0_126, %c0_127] : memref<9x128x128xbf16, #tpu.memory_space<vmem>>, vector<1x128x128xbf16>
    %103 = vector.shape_cast %102 : vector<1x128x128xbf16> to vector<128x128xbf16>
    %cst_128 = arith.constant dense<0.000000e+00> : vector<128x128xf32>
    %104 = tpu.matmul %101, %103, %cst_128 {dimension_numbers = #tpu.dot_dimension_numbers<[1], [0], [0], [1], [0, 0, 1, 1], [], []>} : vector<128x128xbf16>, vector<128x128xbf16>, vector<128x128xf32> -> vector<128x128xf32>
    %105 = arith.addf %99, %104 : vector<128x128xf32>
    %c0_129 = arith.constant 0 : index
    %c1_130 = arith.constant 1 : index
    %c9_131 = arith.constant 9 : index
    %c0_132 = arith.constant 0 : index
    %106 = vector.load %arg9[%c0_129, %c1_130, %c9_131, %c0_132] : memref<2x10x24x128xbf16, #tpu.memory_space<vmem>>, vector<2x8x8x128xbf16>
    %107 = vector.shape_cast %106 : vector<2x8x8x128xbf16> to vector<128x128xbf16>
    %c5_133 = arith.constant 5 : index
    %c0_134 = arith.constant 0 : index
    %c0_135 = arith.constant 0 : index
    %108 = vector.load %arg4[%c5_133, %c0_134, %c0_135] : memref<9x128x128xbf16, #tpu.memory_space<vmem>>, vector<1x128x128xbf16>
    %109 = vector.shape_cast %108 : vector<1x128x128xbf16> to vector<128x128xbf16>
    %cst_136 = arith.constant dense<0.000000e+00> : vector<128x128xf32>
    %110 = tpu.matmul %107, %109, %cst_136 {dimension_numbers = #tpu.dot_dimension_numbers<[1], [0], [0], [1], [0, 0, 1, 1], [], []>} : vector<128x128xbf16>, vector<128x128xbf16>, vector<128x128xf32> -> vector<128x128xf32>
    %111 = arith.addf %105, %110 : vector<128x128xf32>
    %c0_137 = arith.constant 0 : index
    %c2_138 = arith.constant 2 : index
    %c7_139 = arith.constant 7 : index
    %c0_140 = arith.constant 0 : index
    %112 = vector.load %arg9[%c0_137, %c2_138, %c7_139, %c0_140] : memref<2x10x24x128xbf16, #tpu.memory_space<vmem>>, vector<2x8x8x128xbf16>
    %113 = vector.shape_cast %112 : vector<2x8x8x128xbf16> to vector<128x128xbf16>
    %c6_141 = arith.constant 6 : index
    %c0_142 = arith.constant 0 : index
    %c0_143 = arith.constant 0 : index
    %114 = vector.load %arg4[%c6_141, %c0_142, %c0_143] : memref<9x128x128xbf16, #tpu.memory_space<vmem>>, vector<1x128x128xbf16>
    %115 = vector.shape_cast %114 : vector<1x128x128xbf16> to vector<128x128xbf16>
    %cst_144 = arith.constant dense<0.000000e+00> : vector<128x128xf32>
    %116 = tpu.matmul %113, %115, %cst_144 {dimension_numbers = #tpu.dot_dimension_numbers<[1], [0], [0], [1], [0, 0, 1, 1], [], []>} : vector<128x128xbf16>, vector<128x128xbf16>, vector<128x128xf32> -> vector<128x128xf32>
    %117 = arith.addf %111, %116 : vector<128x128xf32>
    %c0_145 = arith.constant 0 : index
    %c2_146 = arith.constant 2 : index
    %c8_147 = arith.constant 8 : index
    %c0_148 = arith.constant 0 : index
    %118 = vector.load %arg9[%c0_145, %c2_146, %c8_147, %c0_148] : memref<2x10x24x128xbf16, #tpu.memory_space<vmem>>, vector<2x8x8x128xbf16>
    %119 = vector.shape_cast %118 : vector<2x8x8x128xbf16> to vector<128x128xbf16>
    %c7_149 = arith.constant 7 : index
    %c0_150 = arith.constant 0 : index
    %c0_151 = arith.constant 0 : index
    %120 = vector.load %arg4[%c7_149, %c0_150, %c0_151] : memref<9x128x128xbf16, #tpu.memory_space<vmem>>, vector<1x128x128xbf16>
    %121 = vector.shape_cast %120 : vector<1x128x128xbf16> to vector<128x128xbf16>
    %cst_152 = arith.constant dense<0.000000e+00> : vector<128x128xf32>
    %122 = tpu.matmul %119, %121, %cst_152 {dimension_numbers = #tpu.dot_dimension_numbers<[1], [0], [0], [1], [0, 0, 1, 1], [], []>} : vector<128x128xbf16>, vector<128x128xbf16>, vector<128x128xf32> -> vector<128x128xf32>
    %123 = arith.addf %117, %122 : vector<128x128xf32>
    %c0_153 = arith.constant 0 : index
    %c2_154 = arith.constant 2 : index
    %c9_155 = arith.constant 9 : index
    %c0_156 = arith.constant 0 : index
    %124 = vector.load %arg9[%c0_153, %c2_154, %c9_155, %c0_156] : memref<2x10x24x128xbf16, #tpu.memory_space<vmem>>, vector<2x8x8x128xbf16>
    %125 = vector.shape_cast %124 : vector<2x8x8x128xbf16> to vector<128x128xbf16>
    %c8_157 = arith.constant 8 : index
    %c0_158 = arith.constant 0 : index
    %c0_159 = arith.constant 0 : index
    %126 = vector.load %arg4[%c8_157, %c0_158, %c0_159] : memref<9x128x128xbf16, #tpu.memory_space<vmem>>, vector<1x128x128xbf16>
    %127 = vector.shape_cast %126 : vector<1x128x128xbf16> to vector<128x128xbf16>
    %cst_160 = arith.constant dense<0.000000e+00> : vector<128x128xf32>
    %128 = tpu.matmul %125, %127, %cst_160 {dimension_numbers = #tpu.dot_dimension_numbers<[1], [0], [0], [1], [0, 0, 1, 1], [], []>} : vector<128x128xbf16>, vector<128x128xbf16>, vector<128x128xf32> -> vector<128x128xf32>
    %129 = arith.addf %123, %128 : vector<128x128xf32>
    %c0_161 = arith.constant 0 : index
    %c0_162 = arith.constant 0 : index
    %130 = vector.load %arg5[%c0_161, %c0_162] : memref<1x128xf32, #tpu.memory_space<vmem>>, vector<1x128xf32>
    %131 = vector.broadcast %130 : vector<1x128xf32> to vector<128x128xf32>
    %132 = arith.addf %129, %131 : vector<128x128xf32>
    %cst_163 = arith.constant 0.000000e+00 : f32
    %133 = vector.broadcast %cst_163 : f32 to vector<128x128xf32>
    %134 = arith.maximumf %132, %133 : vector<128x128xf32>
    %135 = vector.shape_cast %134 : vector<128x128xf32> to vector<2x8x8x128xf32>
    %136 = arith.truncf %135 : vector<2x8x8x128xf32> to vector<2x8x8x128xbf16>
    %c0_164 = arith.constant 0 : index
    %c0_165 = arith.constant 0 : index
    %c0_166 = arith.constant 0 : index
    %c0_167 = arith.constant 0 : index
    %137 = vector.load %arg8[%c0_164, %c0_165, %c0_166, %c0_167] : memref<2x8x8x128xbf16, #tpu.memory_space<vmem>>, vector<2x8x8x128xbf16>
    tpu.vector_store %arg8[%c0_164, %c0_165, %c0_166, %c0_167], %136 {strides = array<i32>} : memref<2x8x8x128xbf16, #tpu.memory_space<vmem>>, vector<2x8x8x128xbf16>,
    return
  }
  func.func @transform_0(%arg0: i32) -> (i32, i32, i32, i32, i32) {
    %c0_i32 = arith.constant 0 : i32
    %c0_i32_0 = arith.constant 0 : i32
    %c0_i32_1 = arith.constant 0 : i32
    %c0_i32_2 = arith.constant 0 : i32
    %c0_i32_3 = arith.constant 0 : i32
    return %c0_i32, %arg0, %c0_i32_0, %c0_i32_1, %c0_i32_2 : i32, i32, i32, i32, i32
  }
  func.func @transform_1(%arg0: i32) -> (i32, i32, i32) {
    %c0_i32 = arith.constant 0 : i32
    %c0_i32_0 = arith.constant 0 : i32
    %c0_i32_1 = arith.constant 0 : i32
    %c0_i32_2 = arith.constant 0 : i32
    return %c0_i32, %c0_i32_0, %c0_i32_1 : i32, i32, i32
  }
  func.func @transform_2(%arg0: i32) -> (i32, i32) {
    %c0_i32 = arith.constant 0 : i32
    %c0_i32_0 = arith.constant 0 : i32
    %c0_i32_1 = arith.constant 0 : i32
    return %c0_i32, %c0_i32_0 : i32, i32
  }
  func.func @transform_3(%arg0: i32) -> (i32, i32, i32) {
    %c0_i32 = arith.constant 0 : i32
    %c0_i32_0 = arith.constant 0 : i32
    %c0_i32_1 = arith.constant 0 : i32
    %c0_i32_2 = arith.constant 0 : i32
    return %c0_i32, %c0_i32_0, %c0_i32_1 : i32, i32, i32
  }
  func.func @transform_4(%arg0: i32) -> (i32, i32) {
    %c0_i32 = arith.constant 0 : i32
    %c0_i32_0 = arith.constant 0 : i32
    %c0_i32_1 = arith.constant 0 : i32
    return %c0_i32, %c0_i32_0 : i32, i32
  }
  func.func @transform_5(%arg0: i32) -> (i32, i32, i32, i32) {
    %c0_i32 = arith.constant 0 : i32
    %c0_i32_0 = arith.constant 0 : i32
    %c0_i32_1 = arith.constant 0 : i32
    %c0_i32_2 = arith.constant 0 : i32
    return %arg0, %c0_i32, %c0_i32_0, %c0_i32_1 : i32, i32, i32, i32
  }
  func.func @transform_6(%arg0: i32) -> (i32, i32) {
    %c0_i32 = arith.constant 0 : i32
    %c0_i32_0 = arith.constant 0 : i32
    %c0_i32_1 = arith.constant 0 : i32
    return %c0_i32, %c0_i32_0 : i32, i32
  }
  func.func @transform_7(%arg0: i32) -> (i32, i32, i32, i32) {
    %c0_i32 = arith.constant 0 : i32
    %c0_i32_0 = arith.constant 0 : i32
    %c0_i32_1 = arith.constant 0 : i32
    %c0_i32_2 = arith.constant 0 : i32
    return %arg0, %c0_i32, %c0_i32_0, %c0_i32_1 : i32, i32, i32, i32
  }
}

module attributes {stable_mosaic.version = 11 : i64} {
  func.func @_basic_block_kernel(%arg0: i32, %arg1: memref<4x2x10x10x4xbf16, #tpu.memory_space<vmem>>, %arg2: memref<9x4x128xbf16, #tpu.memory_space<vmem>>, %arg3: memref<1x128xf32, #tpu.memory_space<vmem>>, %arg4: memref<9x128x128xbf16, #tpu.memory_space<vmem>>, %arg5: memref<1x128xf32, #tpu.memory_space<vmem>>, %arg6: memref<2x8x8x4xbf16, #tpu.memory_space<vmem>>, %arg7: memref<4x128xbf16, #tpu.memory_space<vmem>>, %arg8: memref<2x8x8x128xbf16, #tpu.memory_space<vmem>>, %arg9: memref<2x10x24x128xbf16, #tpu.memory_space<vmem>>) attributes {dimension_semantics = [#tpu.dimension_semantics<parallel>], iteration_bounds = array<i64: 1>, scalar_prefetch = 0 : i64, scratch_operands = 1 : i64, tpu.core_type = #tpu.core_type<tc>, window_params = [{transform_indices = @transform_0, window_bounds = array<i64: 4, 2, 10, 10, 4>}, {pipeline_mode = #tpu.pipeline_mode<synchronous>, transform_indices = @transform_1, window_bounds = array<i64: 9, 4, 128>}, {pipeline_mode = #tpu.pipeline_mode<synchronous>, transform_indices = @transform_2, window_bounds = array<i64: 1, 128>}, {pipeline_mode = #tpu.pipeline_mode<synchronous>, transform_indices = @transform_3, window_bounds = array<i64: 9, 128, 128>}, {pipeline_mode = #tpu.pipeline_mode<synchronous>, transform_indices = @transform_4, window_bounds = array<i64: 1, 128>}, {transform_indices = @transform_5, window_bounds = array<i64: 2, 8, 8, 4>}, {pipeline_mode = #tpu.pipeline_mode<synchronous>, transform_indices = @transform_6, window_bounds = array<i64: 4, 128>}, {transform_indices = @transform_7, window_bounds = array<i64: 2, 8, 8, 128>}]} {
    %c0 = arith.constant 0 : index
    %c0_0 = arith.constant 0 : index
    %c0_1 = arith.constant 0 : index
    %c0_2 = arith.constant 0 : index
    %c0_3 = arith.constant 0 : index
    %0 = vector.load %arg1[%c0, %c0_0, %c0_1, %c0_2, %c0_3] : memref<4x2x10x10x4xbf16, #tpu.memory_space<vmem>>, vector<1x2x8x8x4xbf16>
    %1 = vector.shape_cast %0 : vector<1x2x8x8x4xbf16> to vector<2x8x8x4xbf16>
    %2 = vector.shape_cast %1 : vector<2x8x8x4xbf16> to vector<128x4xbf16>
    %c0_4 = arith.constant 0 : index
    %c0_5 = arith.constant 0 : index
    %c0_6 = arith.constant 0 : index
    %3 = vector.load %arg2[%c0_4, %c0_5, %c0_6] : memref<9x4x128xbf16, #tpu.memory_space<vmem>>, vector<1x4x128xbf16>
    %4 = vector.shape_cast %3 : vector<1x4x128xbf16> to vector<4x128xbf16>
    %cst = arith.constant dense<0.000000e+00> : vector<128x128xf32>
    %5 = tpu.matmul %2, %4, %cst {dimension_numbers = #tpu.dot_dimension_numbers<[1], [0], [0], [1], [0, 0, 1, 1], [], []>} : vector<128x4xbf16>, vector<4x128xbf16>, vector<128x128xf32> -> vector<128x128xf32>
    %c1 = arith.constant 1 : index
    %c0_7 = arith.constant 0 : index
    %c0_8 = arith.constant 0 : index
    %c0_9 = arith.constant 0 : index
    %c0_10 = arith.constant 0 : index
    %6 = vector.load %arg1[%c1, %c0_7, %c0_8, %c0_9, %c0_10] : memref<4x2x10x10x4xbf16, #tpu.memory_space<vmem>>, vector<1x2x8x8x4xbf16>
    %7 = vector.shape_cast %6 : vector<1x2x8x8x4xbf16> to vector<2x8x8x4xbf16>
    %8 = vector.shape_cast %7 : vector<2x8x8x4xbf16> to vector<128x4xbf16>
    %c1_11 = arith.constant 1 : index
    %c0_12 = arith.constant 0 : index
    %c0_13 = arith.constant 0 : index
    %9 = vector.load %arg2[%c1_11, %c0_12, %c0_13] : memref<9x4x128xbf16, #tpu.memory_space<vmem>>, vector<1x4x128xbf16>
    %10 = vector.shape_cast %9 : vector<1x4x128xbf16> to vector<4x128xbf16>
    %cst_14 = arith.constant dense<0.000000e+00> : vector<128x128xf32>
    %11 = tpu.matmul %8, %10, %cst_14 {dimension_numbers = #tpu.dot_dimension_numbers<[1], [0], [0], [1], [0, 0, 1, 1], [], []>} : vector<128x4xbf16>, vector<4x128xbf16>, vector<128x128xf32> -> vector<128x128xf32>
    %12 = arith.addf %5, %11 : vector<128x128xf32>
    %c0_15 = arith.constant 0 : index
    %c0_16 = arith.constant 0 : index
    %c0_17 = arith.constant 0 : index
    %c1_18 = arith.constant 1 : index
    %c0_19 = arith.constant 0 : index
    %13 = vector.load %arg1[%c0_15, %c0_16, %c0_17, %c1_18, %c0_19] : memref<4x2x10x10x4xbf16, #tpu.memory_space<vmem>>, vector<1x2x8x8x4xbf16>
    %14 = vector.shape_cast %13 : vector<1x2x8x8x4xbf16> to vector<2x8x8x4xbf16>
    %15 = vector.shape_cast %14 : vector<2x8x8x4xbf16> to vector<128x4xbf16>
    %c2 = arith.constant 2 : index
    %c0_20 = arith.constant 0 : index
    %c0_21 = arith.constant 0 : index
    %16 = vector.load %arg2[%c2, %c0_20, %c0_21] : memref<9x4x128xbf16, #tpu.memory_space<vmem>>, vector<1x4x128xbf16>
    %17 = vector.shape_cast %16 : vector<1x4x128xbf16> to vector<4x128xbf16>
    %cst_22 = arith.constant dense<0.000000e+00> : vector<128x128xf32>
    %18 = tpu.matmul %15, %17, %cst_22 {dimension_numbers = #tpu.dot_dimension_numbers<[1], [0], [0], [1], [0, 0, 1, 1], [], []>} : vector<128x4xbf16>, vector<4x128xbf16>, vector<128x128xf32> -> vector<128x128xf32>
    %19 = arith.addf %12, %18 : vector<128x128xf32>
    %c2_23 = arith.constant 2 : index
    %c0_24 = arith.constant 0 : index
    %c0_25 = arith.constant 0 : index
    %c0_26 = arith.constant 0 : index
    %c0_27 = arith.constant 0 : index
    %20 = vector.load %arg1[%c2_23, %c0_24, %c0_25, %c0_26, %c0_27] : memref<4x2x10x10x4xbf16, #tpu.memory_space<vmem>>, vector<1x2x8x8x4xbf16>
    %21 = vector.shape_cast %20 : vector<1x2x8x8x4xbf16> to vector<2x8x8x4xbf16>
    %22 = vector.shape_cast %21 : vector<2x8x8x4xbf16> to vector<128x4xbf16>
    %c3 = arith.constant 3 : index
    %c0_28 = arith.constant 0 : index
    %c0_29 = arith.constant 0 : index
    %23 = vector.load %arg2[%c3, %c0_28, %c0_29] : memref<9x4x128xbf16, #tpu.memory_space<vmem>>, vector<1x4x128xbf16>
    %24 = vector.shape_cast %23 : vector<1x4x128xbf16> to vector<4x128xbf16>
    %cst_30 = arith.constant dense<0.000000e+00> : vector<128x128xf32>
    %25 = tpu.matmul %22, %24, %cst_30 {dimension_numbers = #tpu.dot_dimension_numbers<[1], [0], [0], [1], [0, 0, 1, 1], [], []>} : vector<128x4xbf16>, vector<4x128xbf16>, vector<128x128xf32> -> vector<128x128xf32>
    %26 = arith.addf %19, %25 : vector<128x128xf32>
    %c3_31 = arith.constant 3 : index
    %c0_32 = arith.constant 0 : index
    %c0_33 = arith.constant 0 : index
    %c0_34 = arith.constant 0 : index
    %c0_35 = arith.constant 0 : index
    %27 = vector.load %arg1[%c3_31, %c0_32, %c0_33, %c0_34, %c0_35] : memref<4x2x10x10x4xbf16, #tpu.memory_space<vmem>>, vector<1x2x8x8x4xbf16>
    %28 = vector.shape_cast %27 : vector<1x2x8x8x4xbf16> to vector<2x8x8x4xbf16>
    %29 = vector.shape_cast %28 : vector<2x8x8x4xbf16> to vector<128x4xbf16>
    %c4 = arith.constant 4 : index
    %c0_36 = arith.constant 0 : index
    %c0_37 = arith.constant 0 : index
    %30 = vector.load %arg2[%c4, %c0_36, %c0_37] : memref<9x4x128xbf16, #tpu.memory_space<vmem>>, vector<1x4x128xbf16>
    %31 = vector.shape_cast %30 : vector<1x4x128xbf16> to vector<4x128xbf16>
    %cst_38 = arith.constant dense<0.000000e+00> : vector<128x128xf32>
    %32 = tpu.matmul %29, %31, %cst_38 {dimension_numbers = #tpu.dot_dimension_numbers<[1], [0], [0], [1], [0, 0, 1, 1], [], []>} : vector<128x4xbf16>, vector<4x128xbf16>, vector<128x128xf32> -> vector<128x128xf32>
    %33 = arith.addf %26, %32 : vector<128x128xf32>
    %c2_39 = arith.constant 2 : index
    %c0_40 = arith.constant 0 : index
    %c0_41 = arith.constant 0 : index
    %c1_42 = arith.constant 1 : index
    %c0_43 = arith.constant 0 : index
    %34 = vector.load %arg1[%c2_39, %c0_40, %c0_41, %c1_42, %c0_43] : memref<4x2x10x10x4xbf16, #tpu.memory_space<vmem>>, vector<1x2x8x8x4xbf16>
    %35 = vector.shape_cast %34 : vector<1x2x8x8x4xbf16> to vector<2x8x8x4xbf16>
    %36 = vector.shape_cast %35 : vector<2x8x8x4xbf16> to vector<128x4xbf16>
    %c5 = arith.constant 5 : index
    %c0_44 = arith.constant 0 : index
    %c0_45 = arith.constant 0 : index
    %37 = vector.load %arg2[%c5, %c0_44, %c0_45] : memref<9x4x128xbf16, #tpu.memory_space<vmem>>, vector<1x4x128xbf16>
    %38 = vector.shape_cast %37 : vector<1x4x128xbf16> to vector<4x128xbf16>
    %cst_46 = arith.constant dense<0.000000e+00> : vector<128x128xf32>
    %39 = tpu.matmul %36, %38, %cst_46 {dimension_numbers = #tpu.dot_dimension_numbers<[1], [0], [0], [1], [0, 0, 1, 1], [], []>} : vector<128x4xbf16>, vector<4x128xbf16>, vector<128x128xf32> -> vector<128x128xf32>
    %40 = arith.addf %33, %39 : vector<128x128xf32>
    %c0_47 = arith.constant 0 : index
    %c0_48 = arith.constant 0 : index
    %c1_49 = arith.constant 1 : index
    %c0_50 = arith.constant 0 : index
    %c0_51 = arith.constant 0 : index
    %41 = vector.load %arg1[%c0_47, %c0_48, %c1_49, %c0_50, %c0_51] : memref<4x2x10x10x4xbf16, #tpu.memory_space<vmem>>, vector<1x2x8x8x4xbf16>
    %42 = vector.shape_cast %41 : vector<1x2x8x8x4xbf16> to vector<2x8x8x4xbf16>
    %43 = vector.shape_cast %42 : vector<2x8x8x4xbf16> to vector<128x4xbf16>
    %c6 = arith.constant 6 : index
    %c0_52 = arith.constant 0 : index
    %c0_53 = arith.constant 0 : index
    %44 = vector.load %arg2[%c6, %c0_52, %c0_53] : memref<9x4x128xbf16, #tpu.memory_space<vmem>>, vector<1x4x128xbf16>
    %45 = vector.shape_cast %44 : vector<1x4x128xbf16> to vector<4x128xbf16>
    %cst_54 = arith.constant dense<0.000000e+00> : vector<128x128xf32>
    %46 = tpu.matmul %43, %45, %cst_54 {dimension_numbers = #tpu.dot_dimension_numbers<[1], [0], [0], [1], [0, 0, 1, 1], [], []>} : vector<128x4xbf16>, vector<4x128xbf16>, vector<128x128xf32> -> vector<128x128xf32>
    %47 = arith.addf %40, %46 : vector<128x128xf32>
    %c1_55 = arith.constant 1 : index
    %c0_56 = arith.constant 0 : index
    %c1_57 = arith.constant 1 : index
    %c0_58 = arith.constant 0 : index
    %c0_59 = arith.constant 0 : index
    %48 = vector.load %arg1[%c1_55, %c0_56, %c1_57, %c0_58, %c0_59] : memref<4x2x10x10x4xbf16, #tpu.memory_space<vmem>>, vector<1x2x8x8x4xbf16>
    %49 = vector.shape_cast %48 : vector<1x2x8x8x4xbf16> to vector<2x8x8x4xbf16>
    %50 = vector.shape_cast %49 : vector<2x8x8x4xbf16> to vector<128x4xbf16>
    %c7 = arith.constant 7 : index
    %c0_60 = arith.constant 0 : index
    %c0_61 = arith.constant 0 : index
    %51 = vector.load %arg2[%c7, %c0_60, %c0_61] : memref<9x4x128xbf16, #tpu.memory_space<vmem>>, vector<1x4x128xbf16>
    %52 = vector.shape_cast %51 : vector<1x4x128xbf16> to vector<4x128xbf16>
    %cst_62 = arith.constant dense<0.000000e+00> : vector<128x128xf32>
    %53 = tpu.matmul %50, %52, %cst_62 {dimension_numbers = #tpu.dot_dimension_numbers<[1], [0], [0], [1], [0, 0, 1, 1], [], []>} : vector<128x4xbf16>, vector<4x128xbf16>, vector<128x128xf32> -> vector<128x128xf32>
    %54 = arith.addf %47, %53 : vector<128x128xf32>
    %c0_63 = arith.constant 0 : index
    %c0_64 = arith.constant 0 : index
    %c1_65 = arith.constant 1 : index
    %c1_66 = arith.constant 1 : index
    %c0_67 = arith.constant 0 : index
    %55 = vector.load %arg1[%c0_63, %c0_64, %c1_65, %c1_66, %c0_67] : memref<4x2x10x10x4xbf16, #tpu.memory_space<vmem>>, vector<1x2x8x8x4xbf16>
    %56 = vector.shape_cast %55 : vector<1x2x8x8x4xbf16> to vector<2x8x8x4xbf16>
    %57 = vector.shape_cast %56 : vector<2x8x8x4xbf16> to vector<128x4xbf16>
    %c8 = arith.constant 8 : index
    %c0_68 = arith.constant 0 : index
    %c0_69 = arith.constant 0 : index
    %58 = vector.load %arg2[%c8, %c0_68, %c0_69] : memref<9x4x128xbf16, #tpu.memory_space<vmem>>, vector<1x4x128xbf16>
    %59 = vector.shape_cast %58 : vector<1x4x128xbf16> to vector<4x128xbf16>
    %cst_70 = arith.constant dense<0.000000e+00> : vector<128x128xf32>
    %60 = tpu.matmul %57, %59, %cst_70 {dimension_numbers = #tpu.dot_dimension_numbers<[1], [0], [0], [1], [0, 0, 1, 1], [], []>} : vector<128x4xbf16>, vector<4x128xbf16>, vector<128x128xf32> -> vector<128x128xf32>
    %61 = arith.addf %54, %60 : vector<128x128xf32>
    %c0_71 = arith.constant 0 : index
    %c0_72 = arith.constant 0 : index
    %62 = vector.load %arg3[%c0_71, %c0_72] : memref<1x128xf32, #tpu.memory_space<vmem>>, vector<1x128xf32>
    %63 = vector.broadcast %62 : vector<1x128xf32> to vector<128x128xf32>
    %64 = arith.addf %61, %63 : vector<128x128xf32>
    %cst_73 = arith.constant 0.000000e+00 : f32
    %65 = vector.broadcast %cst_73 : f32 to vector<128x128xf32>
    %66 = arith.maximumf %64, %65 : vector<128x128xf32>
    %67 = arith.truncf %66 : vector<128x128xf32> to vector<128x128xbf16>
    %cst_74 = arith.constant 0.000000e+00 : bf16
    %68 = vector.broadcast %cst_74 : bf16 to vector<2x10x24x128xbf16>
    %c0_75 = arith.constant 0 : index
    %c0_76 = arith.constant 0 : index
    %c0_77 = arith.constant 0 : index
    %c0_78 = arith.constant 0 : index
    %69 = vector.load %arg9[%c0_75, %c0_76, %c0_77, %c0_78] : memref<2x10x24x128xbf16, #tpu.memory_space<vmem>>, vector<2x10x24x128xbf16>
    tpu.vector_store %arg9[%c0_75, %c0_76, %c0_77, %c0_78], %68 {strides = array<i32>} : memref<2x10x24x128xbf16, #tpu.memory_space<vmem>>, vector<2x10x24x128xbf16>,
    %70 = vector.shape_cast %67 : vector<128x128xbf16> to vector<2x8x8x128xbf16>
    %c0_79 = arith.constant 0 : index
    %c1_80 = arith.constant 1 : index
    %c8_81 = arith.constant 8 : index
    %c0_82 = arith.constant 0 : index
    %71 = vector.load %arg9[%c0_79, %c1_80, %c8_81, %c0_82] : memref<2x10x24x128xbf16, #tpu.memory_space<vmem>>, vector<2x8x8x128xbf16>
    tpu.vector_store %arg9[%c0_79, %c1_80, %c8_81, %c0_82], %70 {strides = array<i32>} : memref<2x10x24x128xbf16, #tpu.memory_space<vmem>>, vector<2x8x8x128xbf16>,
    %c0_83 = arith.constant 0 : index
    %c0_84 = arith.constant 0 : index
    %c0_85 = arith.constant 0 : index
    %c0_86 = arith.constant 0 : index
    %72 = vector.load %arg6[%c0_83, %c0_84, %c0_85, %c0_86] : memref<2x8x8x4xbf16, #tpu.memory_space<vmem>>, vector<2x8x8x4xbf16>
    %73 = vector.shape_cast %72 : vector<2x8x8x4xbf16> to vector<128x4xbf16>
    %c0_87 = arith.constant 0 : index
    %c0_88 = arith.constant 0 : index
    %74 = vector.load %arg7[%c0_87, %c0_88] : memref<4x128xbf16, #tpu.memory_space<vmem>>, vector<4x128xbf16>
    %cst_89 = arith.constant dense<0.000000e+00> : vector<128x128xf32>
    %75 = tpu.matmul %73, %74, %cst_89 {dimension_numbers = #tpu.dot_dimension_numbers<[1], [0], [0], [1], [0, 0, 1, 1], [], []>} : vector<128x4xbf16>, vector<4x128xbf16>, vector<128x128xf32> -> vector<128x128xf32>
    %c0_90 = arith.constant 0 : index
    %c0_91 = arith.constant 0 : index
    %c7_92 = arith.constant 7 : index
    %c0_93 = arith.constant 0 : index
    %76 = vector.load %arg9[%c0_90, %c0_91, %c7_92, %c0_93] : memref<2x10x24x128xbf16, #tpu.memory_space<vmem>>, vector<2x8x8x128xbf16>
    %77 = vector.shape_cast %76 : vector<2x8x8x128xbf16> to vector<128x128xbf16>
    %c0_94 = arith.constant 0 : index
    %c0_95 = arith.constant 0 : index
    %c0_96 = arith.constant 0 : index
    %78 = vector.load %arg4[%c0_94, %c0_95, %c0_96] : memref<9x128x128xbf16, #tpu.memory_space<vmem>>, vector<1x128x128xbf16>
    %79 = vector.shape_cast %78 : vector<1x128x128xbf16> to vector<128x128xbf16>
    %cst_97 = arith.constant dense<0.000000e+00> : vector<128x128xf32>
    %80 = tpu.matmul %77, %79, %cst_97 {dimension_numbers = #tpu.dot_dimension_numbers<[1], [0], [0], [1], [0, 0, 1, 1], [], []>} : vector<128x128xbf16>, vector<128x128xbf16>, vector<128x128xf32> -> vector<128x128xf32>
    %81 = arith.addf %75, %80 : vector<128x128xf32>
    %c0_98 = arith.constant 0 : index
    %c0_99 = arith.constant 0 : index
    %c8_100 = arith.constant 8 : index
    %c0_101 = arith.constant 0 : index
    %82 = vector.load %arg9[%c0_98, %c0_99, %c8_100, %c0_101] : memref<2x10x24x128xbf16, #tpu.memory_space<vmem>>, vector<2x8x8x128xbf16>
    %83 = vector.shape_cast %82 : vector<2x8x8x128xbf16> to vector<128x128xbf16>
    %c1_102 = arith.constant 1 : index
    %c0_103 = arith.constant 0 : index
    %c0_104 = arith.constant 0 : index
    %84 = vector.load %arg4[%c1_102, %c0_103, %c0_104] : memref<9x128x128xbf16, #tpu.memory_space<vmem>>, vector<1x128x128xbf16>
    %85 = vector.shape_cast %84 : vector<1x128x128xbf16> to vector<128x128xbf16>
    %cst_105 = arith.constant dense<0.000000e+00> : vector<128x128xf32>
    %86 = tpu.matmul %83, %85, %cst_105 {dimension_numbers = #tpu.dot_dimension_numbers<[1], [0], [0], [1], [0, 0, 1, 1], [], []>} : vector<128x128xbf16>, vector<128x128xbf16>, vector<128x128xf32> -> vector<128x128xf32>
    %87 = arith.addf %81, %86 : vector<128x128xf32>
    %c0_106 = arith.constant 0 : index
    %c0_107 = arith.constant 0 : index
    %c9 = arith.constant 9 : index
    %c0_108 = arith.constant 0 : index
    %88 = vector.load %arg9[%c0_106, %c0_107, %c9, %c0_108] : memref<2x10x24x128xbf16, #tpu.memory_space<vmem>>, vector<2x8x8x128xbf16>
    %89 = vector.shape_cast %88 : vector<2x8x8x128xbf16> to vector<128x128xbf16>
    %c2_109 = arith.constant 2 : index
    %c0_110 = arith.constant 0 : index
    %c0_111 = arith.constant 0 : index
    %90 = vector.load %arg4[%c2_109, %c0_110, %c0_111] : memref<9x128x128xbf16, #tpu.memory_space<vmem>>, vector<1x128x128xbf16>
    %91 = vector.shape_cast %90 : vector<1x128x128xbf16> to vector<128x128xbf16>
    %cst_112 = arith.constant dense<0.000000e+00> : vector<128x128xf32>
    %92 = tpu.matmul %89, %91, %cst_112 {dimension_numbers = #tpu.dot_dimension_numbers<[1], [0], [0], [1], [0, 0, 1, 1], [], []>} : vector<128x128xbf16>, vector<128x128xbf16>, vector<128x128xf32> -> vector<128x128xf32>
    %93 = arith.addf %87, %92 : vector<128x128xf32>
    %c0_113 = arith.constant 0 : index
    %c1_114 = arith.constant 1 : index
    %c7_115 = arith.constant 7 : index
    %c0_116 = arith.constant 0 : index
    %94 = vector.load %arg9[%c0_113, %c1_114, %c7_115, %c0_116] : memref<2x10x24x128xbf16, #tpu.memory_space<vmem>>, vector<2x8x8x128xbf16>
    %95 = vector.shape_cast %94 : vector<2x8x8x128xbf16> to vector<128x128xbf16>
    %c3_117 = arith.constant 3 : index
    %c0_118 = arith.constant 0 : index
    %c0_119 = arith.constant 0 : index
    %96 = vector.load %arg4[%c3_117, %c0_118, %c0_119] : memref<9x128x128xbf16, #tpu.memory_space<vmem>>, vector<1x128x128xbf16>
    %97 = vector.shape_cast %96 : vector<1x128x128xbf16> to vector<128x128xbf16>
    %cst_120 = arith.constant dense<0.000000e+00> : vector<128x128xf32>
    %98 = tpu.matmul %95, %97, %cst_120 {dimension_numbers = #tpu.dot_dimension_numbers<[1], [0], [0], [1], [0, 0, 1, 1], [], []>} : vector<128x128xbf16>, vector<128x128xbf16>, vector<128x128xf32> -> vector<128x128xf32>
    %99 = arith.addf %93, %98 : vector<128x128xf32>
    %c0_121 = arith.constant 0 : index
    %c1_122 = arith.constant 1 : index
    %c8_123 = arith.constant 8 : index
    %c0_124 = arith.constant 0 : index
    %100 = vector.load %arg9[%c0_121, %c1_122, %c8_123, %c0_124] : memref<2x10x24x128xbf16, #tpu.memory_space<vmem>>, vector<2x8x8x128xbf16>
    %101 = vector.shape_cast %100 : vector<2x8x8x128xbf16> to vector<128x128xbf16>
    %c4_125 = arith.constant 4 : index
    %c0_126 = arith.constant 0 : index
    %c0_127 = arith.constant 0 : index
    %102 = vector.load %arg4[%c4_125, %c0_126, %c0_127] : memref<9x128x128xbf16, #tpu.memory_space<vmem>>, vector<1x128x128xbf16>
    %103 = vector.shape_cast %102 : vector<1x128x128xbf16> to vector<128x128xbf16>
    %cst_128 = arith.constant dense<0.000000e+00> : vector<128x128xf32>
    %104 = tpu.matmul %101, %103, %cst_128 {dimension_numbers = #tpu.dot_dimension_numbers<[1], [0], [0], [1], [0, 0, 1, 1], [], []>} : vector<128x128xbf16>, vector<128x128xbf16>, vector<128x128xf32> -> vector<128x128xf32>
    %105 = arith.addf %99, %104 : vector<128x128xf32>
    %c0_129 = arith.constant 0 : index
    %c1_130 = arith.constant 1 : index
    %c9_131 = arith.constant 9 : index
    %c0_132 = arith.constant 0 : index
    %106 = vector.load %arg9[%c0_129, %c1_130, %c9_131, %c0_132] : memref<2x10x24x128xbf16, #tpu.memory_space<vmem>>, vector<2x8x8x128xbf16>
    %107 = vector.shape_cast %106 : vector<2x8x8x128xbf16> to vector<128x128xbf16>
    %c5_133 = arith.constant 5 : index
    %c0_134 = arith.constant 0 : index
    %c0_135 = arith.constant 0 : index
    %108 = vector.load %arg4[%c5_133, %c0_134, %c0_135] : memref<9x128x128xbf16, #tpu.memory_space<vmem>>, vector<1x128x128xbf16>
    %109 = vector.shape_cast %108 : vector<1x128x128xbf16> to vector<128x128xbf16>
    %cst_136 = arith.constant dense<0.000000e+00> : vector<128x128xf32>
    %110 = tpu.matmul %107, %109, %cst_136 {dimension_numbers = #tpu.dot_dimension_numbers<[1], [0], [0], [1], [0, 0, 1, 1], [], []>} : vector<128x128xbf16>, vector<128x128xbf16>, vector<128x128xf32> -> vector<128x128xf32>
    %111 = arith.addf %105, %110 : vector<128x128xf32>
    %c0_137 = arith.constant 0 : index
    %c2_138 = arith.constant 2 : index
    %c7_139 = arith.constant 7 : index
    %c0_140 = arith.constant 0 : index
    %112 = vector.load %arg9[%c0_137, %c2_138, %c7_139, %c0_140] : memref<2x10x24x128xbf16, #tpu.memory_space<vmem>>, vector<2x8x8x128xbf16>
    %113 = vector.shape_cast %112 : vector<2x8x8x128xbf16> to vector<128x128xbf16>
    %c6_141 = arith.constant 6 : index
    %c0_142 = arith.constant 0 : index
    %c0_143 = arith.constant 0 : index
    %114 = vector.load %arg4[%c6_141, %c0_142, %c0_143] : memref<9x128x128xbf16, #tpu.memory_space<vmem>>, vector<1x128x128xbf16>
    %115 = vector.shape_cast %114 : vector<1x128x128xbf16> to vector<128x128xbf16>
    %cst_144 = arith.constant dense<0.000000e+00> : vector<128x128xf32>
    %116 = tpu.matmul %113, %115, %cst_144 {dimension_numbers = #tpu.dot_dimension_numbers<[1], [0], [0], [1], [0, 0, 1, 1], [], []>} : vector<128x128xbf16>, vector<128x128xbf16>, vector<128x128xf32> -> vector<128x128xf32>
    %117 = arith.addf %111, %116 : vector<128x128xf32>
    %c0_145 = arith.constant 0 : index
    %c2_146 = arith.constant 2 : index
    %c8_147 = arith.constant 8 : index
    %c0_148 = arith.constant 0 : index
    %118 = vector.load %arg9[%c0_145, %c2_146, %c8_147, %c0_148] : memref<2x10x24x128xbf16, #tpu.memory_space<vmem>>, vector<2x8x8x128xbf16>
    %119 = vector.shape_cast %118 : vector<2x8x8x128xbf16> to vector<128x128xbf16>
    %c7_149 = arith.constant 7 : index
    %c0_150 = arith.constant 0 : index
    %c0_151 = arith.constant 0 : index
    %120 = vector.load %arg4[%c7_149, %c0_150, %c0_151] : memref<9x128x128xbf16, #tpu.memory_space<vmem>>, vector<1x128x128xbf16>
    %121 = vector.shape_cast %120 : vector<1x128x128xbf16> to vector<128x128xbf16>
    %cst_152 = arith.constant dense<0.000000e+00> : vector<128x128xf32>
    %122 = tpu.matmul %119, %121, %cst_152 {dimension_numbers = #tpu.dot_dimension_numbers<[1], [0], [0], [1], [0, 0, 1, 1], [], []>} : vector<128x128xbf16>, vector<128x128xbf16>, vector<128x128xf32> -> vector<128x128xf32>
    %123 = arith.addf %117, %122 : vector<128x128xf32>
    %c0_153 = arith.constant 0 : index
    %c2_154 = arith.constant 2 : index
    %c9_155 = arith.constant 9 : index
    %c0_156 = arith.constant 0 : index
    %124 = vector.load %arg9[%c0_153, %c2_154, %c9_155, %c0_156] : memref<2x10x24x128xbf16, #tpu.memory_space<vmem>>, vector<2x8x8x128xbf16>
    %125 = vector.shape_cast %124 : vector<2x8x8x128xbf16> to vector<128x128xbf16>
    %c8_157 = arith.constant 8 : index
    %c0_158 = arith.constant 0 : index
    %c0_159 = arith.constant 0 : index
    %126 = vector.load %arg4[%c8_157, %c0_158, %c0_159] : memref<9x128x128xbf16, #tpu.memory_space<vmem>>, vector<1x128x128xbf16>
    %127 = vector.shape_cast %126 : vector<1x128x128xbf16> to vector<128x128xbf16>
    %cst_160 = arith.constant dense<0.000000e+00> : vector<128x128xf32>
    %128 = tpu.matmul %125, %127, %cst_160 {dimension_numbers = #tpu.dot_dimension_numbers<[1], [0], [0], [1], [0, 0, 1, 1], [], []>} : vector<128x128xbf16>, vector<128x128xbf16>, vector<128x128xf32> -> vector<128x128xf32>
    %129 = arith.addf %123, %128 : vector<128x128xf32>
    %c0_161 = arith.constant 0 : index
    %c0_162 = arith.constant 0 : index
    %130 = vector.load %arg5[%c0_161, %c0_162] : memref<1x128xf32, #tpu.memory_space<vmem>>, vector<1x128xf32>
    %131 = vector.broadcast %130 : vector<1x128xf32> to vector<128x128xf32>
    %132 = arith.addf %129, %131 : vector<128x128xf32>
    %cst_163 = arith.constant 0.000000e+00 : f32
    %133 = vector.broadcast %cst_163 : f32 to vector<128x128xf32>
    %134 = arith.maximumf %132, %133 : vector<128x128xf32>
    %135 = vector.shape_cast %134 : vector<128x128xf32> to vector<2x8x8x128xf32>
    %136 = arith.truncf %135 : vector<2x8x8x128xf32> to vector<2x8x8x128xbf16>
    %c0_164 = arith.constant 0 : index
    %c0_165 = arith.constant 0 : index
    %c0_166 = arith.constant 0 : index
    %c0_167 = arith.constant 0 : index
    %137 = vector.load %arg8[%c0_164, %c0_165, %c0_166, %c0_167] : memref<2x8x8x128xbf16, #tpu.memory_space<vmem>>, vector<2x8x8x128xbf16>
    tpu.vector_store %arg8[%c0_164, %c0_165, %c0_166, %c0_167], %136 {strides = array<i32>} : memref<2x8x8x128xbf16, #tpu.memory_space<vmem>>, vector<2x8x8x128xbf16>,
    return
  }
  func.func @transform_0(%arg0: i32) -> (i32, i32, i32, i32, i32) {
    %c0_i32 = arith.constant 0 : i32
    %c0_i32_0 = arith.constant 0 : i32
    %c0_i32_1 = arith.constant 0 : i32
    %c0_i32_2 = arith.constant 0 : i32
    %c0_i32_3 = arith.constant 0 : i32
    return %c0_i32, %arg0, %c0_i32_0, %c0_i32_1, %c0_i32_2 : i32, i32, i32, i32, i32
  }
  func.func @transform_1(%arg0: i32) -> (i32, i32, i32) {
    %c0_i32 = arith.constant 0 : i32
    %c0_i32_0 = arith.constant 0 : i32
    %c0_i32_1 = arith.constant 0 : i32
    %c0_i32_2 = arith.constant 0 : i32
    return %c0_i32, %c0_i32_0, %c0_i32_1 : i32, i32, i32
  }
  func.func @transform_2(%arg0: i32) -> (i32, i32) {
    %c0_i32 = arith.constant 0 : i32
    %c0_i32_0 = arith.constant 0 : i32
    %c0_i32_1 = arith.constant 0 : i32
    return %c0_i32, %c0_i32_0 : i32, i32
  }
  func.func @transform_3(%arg0: i32) -> (i32, i32, i32) {
    %c0_i32 = arith.constant 0 : i32
    %c0_i32_0 = arith.constant 0 : i32
    %c0_i32_1 = arith.constant 0 : i32
    %c0_i32_2 = arith.constant 0 : i32
    return %c0_i32, %c0_i32_0, %c0_i32_1 : i32, i32, i32
  }
  func.func @transform_4(%arg0: i32) -> (i32, i32) {
    %c0_i32 = arith.constant 0 : i32
    %c0_i32_0 = arith.constant 0 : i32
    %c0_i32_1 = arith.constant 0 : i32
    return %c0_i32, %c0_i32_0 : i32, i32
  }
  func.func @transform_5(%arg0: i32) -> (i32, i32, i32, i32) {
    %c0_i32 = arith.constant 0 : i32
    %c0_i32_0 = arith.constant 0 : i32
    %c0_i32_1 = arith.constant 0 : i32
    %c0_i32_2 = arith.constant 0 : i32
    return %arg0, %c0_i32, %c0_i32_0, %c0_i32_1 : i32, i32, i32, i32
  }
  func.func @transform_6(%arg0: i32) -> (i32, i32) {
    %c0_i32 = arith.constant 0 : i32
    %c0_i32_0 = arith.constant 0 : i32
    %c0_i32_1 = arith.constant 0 : i32
    return %c0_i32, %c0_i32_0 : i32, i32
  }
  func.func @transform_7(%arg0: i32) -> (i32, i32, i32, i32) {
    %c0_i32 = arith.constant 0 : i32
    %c0_i32_0 = arith.constant 0 : i32
    %c0_i32_1 = arith.constant 0 : i32
    %c0_i32_2 = arith.constant 0 : i32
    return %arg0, %c0_i32, %c0_i32_0, %c0_i32_1 : i32, i32, i32, i32
  }
}

</mosaic_0001>

<bundles_post_ra>
// kernel: tpu_custom_call.1
= control target key start
LH: loop header
LB: loop body
LE: loop exit
PB: predicated region body
PF: predicated region fallthrough
CT: control target
= control target key end

     0   :  { %vm129_vm0 = vcmask 1041408   ;;  %vm104_vm1 = vcmask 31744   ;;  %vm426_vm2 = vsmask.f32 3328  ;;  %vm427_vm3 = vsmask.f32 7440  ;;  %s9925_s0 = inlined_call_operand.vmem [shape: bf16[4,2,10,10,4], index: 0, kind: input, shape index: {}]   ;;  %s9926_s1 = inlined_call_operand.vmem [shape: bf16[9,4,128], index: 1, kind: input, shape index: {}]   ;;  %s9927_s2 = inlined_call_operand.vmem [shape: f32[1,128], index: 2, kind: input, shape index: {}]   ;;  %s9928_s3 = inlined_call_operand.vmem [shape: bf16[9,128,128], index: 3, kind: input, shape index: {}]   ;;  %s9929_s4 = inlined_call_operand.vmem [shape: f32[1,128], index: 4, kind: input, shape index: {}]   ;;  %s9930_s5 = inlined_call_operand.vmem [shape: bf16[2,8,8,4], index: 5, kind: input, shape index: {}]   ;;  %s9931_s6 = inlined_call_operand.vmem [shape: bf16[4,128], index: 6, kind: input, shape index: {}]   ;;  %s9932_s7 = inlined_call_operand.hbm [shape: bf16[2,8,8,128], index: 7, kind: output, shape index: {}]  }
   0x1   :  { %v6336_v0 = vld [vmem:[%s9926_s1 + $0x2] sm:$0x3]  ;;  %v8025_v3 = vld [vmem:[%s9925_s0 + $0xb0] ss:$8 sps:$4 sm:$0xff]   ;;  %v44_v4 = vld [vmem:[%s9926_s1] sm:$0x3] }
   0x2   :  { %8009 = vmatprep.subr.msk.bf16.mxu0 %vm129_vm0, %v6336_v0  ;;  %v131_v1 = vsel %vm129_vm0, %v6336_v0, 0  ;;  %v8024_v2 = vld [vmem:[%s9925_s0 + $0xa0] ss:$8 sps:$4 sm:$0xff]   ;;  %8010 = vmatprep.subr.msk.bf16.mxu1 %vm129_vm0, %v6336_v0  ;;  %v295_v5 = vsel %vm129_vm0, %v44_v4, 0  ;;  %v6369_v7 = vld [vmem:[%s9926_s1 + $0x4] sm:$0x3]  ;;  %vm8336_vm4 = vmor %vm426_vm2, %vm427_vm3 }
   0x3   :  { %7268 = vmatpush3.bf16.msra.mxu0 %v131_v1  ;;  %7736 = vmatpush3.bf16.msra.mxu1 %v131_v1  ;;  %v8026_v6 = vld [vmem:[%s9925_s0 + $0xc0] ss:$8 sps:$4 sm:$0xff]   ;;  %v8027_v8 = vld [vmem:[%s9925_s0 + $0xd0] ss:$8 sps:$4 sm:$0xff]   ;;  %v704_v16 = vsel %vm129_vm0, %v6369_v7, 0 }
   0x4   :  { %7269 = vmatprep.mubr.msk.bf16.mxu0 %vm104_vm1, %v8024_v2  ;;  %8011 = vmatprep.subr.msk.bf16.mxu0 %vm129_vm0, %v44_v4  ;;  %v8028_v9 = vld [vmem:[%s9925_s0] ss:$8 sps:$4 sm:$0xff]   ;;  %v8029_v11 = vld [vmem:[%s9925_s0 + $0x10] ss:$8 sps:$4 sm:$0xff]   ;;  %v6402_v21 = vld [vmem:[%s9926_s1 + $0x6] sm:$0x3] }
   0x5   :  { %v394_v10 = vld [vmem:[%s9925_s0] sm:$0xf]  ;;  %v396_v12 = vld [vmem:[%s9925_s0 + $0x8] sm:$0xf]  ;;  %v398_v17 = vld [vmem:[%s9925_s0 + $0x10] sm:$0xf] }
   0x6   :  { %7270 = vmatmul.mubr.msk.bf16.vlgmr.msra.gmra.mrb[0].mxu0 %vm104_vm1, %v8025_v3  ;;  %v8030_v13 = vld [vmem:[%s9925_s0 + $0x20] ss:$8 sps:$4 sm:$0xff]   ;;  %v430_v14 = vshrl.u32 %v394_v10, 16  ;;  %v433_v15 = vshll.u32 %v394_v10, 16  ;;  %v444_v18 = vshrl.u32 %v396_v12, 16  ;;  %v447_v19 = vshll.u32 %v396_v12, 16 }
   0x7   :  { %7286 = vmatpush3.bf16.msra.mxu0 %v295_v5  ;;  %7273 = vmatprep.mubr.msk.bf16.mxu0 %vm104_vm1, %v8026_v6  ;;  %v400_v20 = vld [vmem:[%s9925_s0 + $0x18] sm:$0xf]  ;;  %v395_v22 = vld [vmem:[%s9925_s0 + $0x4] sm:$0x1]  ;;  %v458_v25 = vshrl.u32 %v398_v17, 16  ;;  %v461_v26 = vshll.u32 %v398_v17, 16 }
   0x8   :  { %8012 = vmatprep.subr.msk.bf16.mxu0 %vm129_vm0, %v6369_v7  ;;  %v432_v23 = vrot.slane %v430_v14, 4  ;;  %v435_v24 = vrot.slane %v433_v15, 5  ;;  %v397_v27 = vld [vmem:[%s9925_s0 + $0xc] sm:$0x1]  ;;  %v472_v28 = vshrl.u32 %v400_v20, 16  ;;  %v475_v29 = vshll.u32 %v400_v20, 16 }
   0x9   :  { %v8031_v30 = vld [vmem:[%s9925_s0 + $0x30] ss:$8 sps:$4 sm:$0xff]   ;;  %v446_v31 = vrot.slane %v444_v18, 4  ;;  %v449_v32 = vrot.slane %v447_v19, 5  ;;  %v402_v33 = vld [vmem:[%s9925_s0 + $0x20] sm:$0xf] }
   0xa   :  { %v8032_v34 = vld [vmem:[%s9925_s0 + $0x50] ss:$8 sps:$4 sm:$0xff]   ;;  %v439_v35 = vshll.u32 %v395_v22, 16  ;;  %v399_v36 = vld [vmem:[%s9925_s0 + $0x14] sm:$0x1]  ;;  %v436_v37 = vor.u32 %v435_v24, %v432_v23  ;;  %v453_v38 = vshll.u32 %v397_v27, 16 }
   0xb   :  { %v460_v39 = vrot.slane %v458_v25, 4  ;;  %v463_v40 = vrot.slane %v461_v26, 5  ;;  %v404_v41 = vld [vmem:[%s9925_s0 + $0x28] sm:$0xf]  ;;  %v401_v42 = vld [vmem:[%s9925_s0 + $0x1c] sm:$0x1]  ;;  %v450_v47 = vor.u32 %v449_v32, %v446_v31 }
   0xc   :  { %v474_v43 = vrot.slane %v472_v28, 4  ;;  %v477_v44 = vrot.slane %v475_v29, 5  ;;  %v486_v45 = vshrl.u32 %v402_v33, 16  ;;  %v489_v46 = vshll.u32 %v402_v33, 16  ;;  %v403_v49 = vld [vmem:[%s9925_s0 + $0x24] sm:$0x1] }
   0xd   :  { %v467_v48 = vshll.u32 %v399_v36, 16  ;;  %v500_v50 = vshrl.u32 %v404_v41, 16  ;;  %v503_v51 = vshll.u32 %v404_v41, 16  ;;  %v437_v52 = vrot.slane %v436_v37, 4  ;;  %v8033_v56 = vld [vmem:[%s9925_s0 + $0x60] ss:$8 sps:$4 sm:$0xff]  }
   0xe   :  { %7274 = vmatmul.mubr.msk.bf16.gmra.mrb[4].mxu0 %vm104_vm1, %v8027_v8  ;;  %v441_v53 = vrot.slane %v439_v35, 5  ;;  %v455_v54 = vrot.slane %v453_v38, 5  ;;  %v481_v55 = vshll.u32 %v401_v42, 16  ;;  %v464_v58 = vor.u32 %v463_v40, %v460_v39  ;;  %v406_v62 = vld [vmem:[%s9925_s0 + $0x30] sm:$0xf] }
   0xf   :  { %7287 = vmatprep.mubr.msk.bf16.mxu0 %vm104_vm1, %v8028_v9  ;;  %v478_v59 = vor.u32 %v477_v44, %v474_v43  ;;  %v488_v60 = vrot.slane %v486_v45, 4  ;;  %v491_v61 = vrot.slane %v489_v46, 5  ;;  %v8034_v63 = vld [vmem:[%s9925_s0 + $0x70] ss:$8 sps:$4 sm:$0xff]   ;;  %v451_v0 = vrot.slane %v450_v47, 4 }
  0x10   :  { %v469_v1 = vrot.slane %v467_v48, 5  ;;  %v8347_v2 = vsel %vm129_vm0, %v6402_v21, 0  ;;  %v405_v3 = vld [vmem:[%s9925_s0 + $0x2c] sm:$0x1]  ;;  %v495_v4 = vshll.u32 %v403_v49, 16  ;;  %v502_v5 = vrot.slane %v500_v50, 4 }
  0x11   :  { %v505_v6 = vrot.slane %v503_v51, 5  ;;  %v408_v7 = vld [vmem:[%s9925_s0 + $0x38] sm:$0xf]  ;;  %v410_v8 = vld [vmem:[%s9925_s0 + $0x50] sm:$0xf]  ;;  %v442_v9 = vsel %vm8336_vm4, %v437_v52, %v441_v53  ;;  %v483_v10 = vrot.slane %v481_v55, 5  ;;  %v456_v23 = vsel %vm8336_vm4, %v451_v0, %v455_v54 }
  0x12   :  { %v514_v12 = vshrl.u32 %v406_v62, 16  ;;  %v465_v14 = vrot.slane %v464_v58, 4  ;;  %v479_v15 = vrot.slane %v478_v59, 4  ;;  %v509_v17 = vshll.u32 %v405_v3, 16  ;;  %v412_v18 = vld [vmem:[%s9925_s0 + $0x58] sm:$0xf] }
  0x13   :  { %v528_v19 = vshrl.u32 %v408_v7, 16  ;;  %v531_v20 = vshll.u32 %v408_v7, 16  ;;  %v545_v22 = vshll.u32 %v410_v8, 16  ;;  %v8369_v24 = vrot.slane %v495_v4, 5  ;;  %v409_v27 = vld [vmem:[%s9925_s0 + $0x3c] sm:$0x1] }
  0x14   :  { %v506_v25 = vor.u32 %v505_v6, %v502_v5  ;;  %v516_v28 = vrot.slane %v514_v12, 4  ;;  %v559_v31 = vshll.u32 %v412_v18, 16  ;;  %v8035_v32 = vld [vmem:[%s9925_s0 + $0x80] ss:$8 sps:$4 sm:$0xff]   ;;  %v470_v33 = vsel %vm8336_vm4, %v465_v14, %v469_v1  ;;  %v411_v37 = vld [vmem:[%s9925_s0 + $0x54] sm:$0x1] }
  0x15   :  { %v511_v36 = vrot.slane %v509_v17, 5  ;;  %v413_v38 = vld [vmem:[%s9925_s0 + $0x5c] sm:$0x1]  ;;  %v530_v39 = vrot.slane %v528_v19, 4  ;;  %v533_v40 = vrot.slane %v531_v20, 5  ;;  %v547_v42 = vrot.slane %v545_v22, 5 }
  0x16   :  { %7288 = vmatmul.mubr.msk.bf16.vlgmr.msra.gmra.mrb[0].mxu0 %vm104_vm1, %v8029_v11  ;;  %v407_v11 = vld [vmem:[%s9925_s0 + $0x34] sm:$0x1]  ;;  %v414_v43 = vld [vmem:[%s9925_s0 + $0x60] sm:$0xf]  ;;  %v6370_v44 = vcombine.low %v442_v9, %v456_v23  ;;  %v507_v45 = vrot.slane %v506_v25, 4  ;;  %v537_v46 = vshll.u32 %v409_v27, 16 }
  0x17   :  { %7304 = vmatpush3.bf16.msra.mxu0 %v704_v16  ;;  %7291 = vmatprep.mubr.msk.bf16.mxu0 %vm104_vm1, %v8030_v13  ;;  %v517_v13 = vshll.u32 %v406_v62, 16  ;;  %v492_v16 = vor.u32 %v491_v61, %v488_v60  ;;  %v523_v26 = vshll.u32 %v407_v11, 16  ;;  %v561_v50 = vrot.slane %v559_v31, 5  ;;  %v416_v51 = vld [vmem:[%s9925_s0 + $0x68] sm:$0xf] }
  0x18   :  { %8013 = vmatprep.subr.msk.bf16.mxu0 %vm129_vm0, %v6402_v21  ;;  %v542_v21 = vshrl.u32 %v410_v8, 16  ;;  %v418_v52 = vld [vmem:[%s9925_s0 + $0x70] sm:$0xf]  ;;  %v570_v55 = vshrl.u32 %v414_v43, 16  ;;  %v534_v58 = vor.u32 %v533_v40, %v530_v39  ;;  %v551_v60 = vshll.u32 %v411_v37, 16 }
  0x19   :  { %v519_v29 = vrot.slane %v517_v13, 5  ;;  %v493_v35 = vrot.slane %v492_v16, 4  ;;  %v8400_v54 = vrot.slane %v523_v26, 5  ;;  %v565_v61 = vshll.u32 %v413_v38, 16  ;;  %v420_v62 = vld [vmem:[%s9925_s0 + $0x78] sm:$0xf] }
  0x1a   :  { %v544_v41 = vrot.slane %v542_v21, 4  ;;  %v587_v0 = vshll.u32 %v416_v51, 16  ;;  %v598_v1 = vshrl.u32 %v418_v52, 16  ;;  %v601_v3 = vshll.u32 %v418_v52, 16  ;;  %v415_v8 = vld [vmem:[%s9925_s0 + $0x64] sm:$0x1] }
  0x1b   :  { %v520_v48 = vor.u32 %v519_v29, %v516_v28  ;;  %v498_v53 = vsel %vm8336_vm4, %v493_v35, %v8369_v24  ;;  %v512_v4 = vsel %vm8336_vm4, %v507_v45, %v511_v36  ;;  %v539_v6 = vrot.slane %v537_v46, 5  ;;  %v417_v9 = vld [vmem:[%s9925_s0 + $0x6c] sm:$0x1]  ;;  %v419_v12 = vld [vmem:[%s9925_s0 + $0x74] sm:$0x1] }
  0x1c   :  { %v548_v59 = vor.u32 %v547_v42, %v544_v41  ;;  %v612_v13 = vshrl.u32 %v420_v62, 16  ;;  %v615_v14 = vshll.u32 %v420_v62, 16  ;;  %v553_v17 = vrot.slane %v551_v60, 5  ;;  %v422_v19 = vld [vmem:[%s9925_s0 + $0x80] sm:$0xf] }
  0x1d   :  { %v521_v5 = vrot.slane %v520_v48, 4  ;;  %v589_v21 = vrot.slane %v587_v0, 5  ;;  %v600_v22 = vrot.slane %v598_v1, 4  ;;  %v603_v23 = vrot.slane %v601_v3, 5  ;;  %v424_v27 = vld [vmem:[%s9925_s0 + $0x88] sm:$0xf] }
  0x1e   :  { %7292 = vmatmul.mubr.msk.bf16.gmra.mrb[4].mxu0 %vm104_vm1, %v8031_v30  ;;  %v556_v30 = vshrl.u32 %v412_v18, 16  ;;  %v549_v16 = vrot.slane %v548_v59, 4  ;;  %v567_v18 = vrot.slane %v565_v61, 5  ;;  %v6372_v24 = vcombine.low %v498_v53, %v512_v4  ;;  %v6435_v36 = vld [vmem:[%s9926_s1 + $0x8] sm:$0x3] }
  0x1f   :  { %7295 = vmatprep.mubr.msk.bf16.mxu0 %vm104_vm1, %v8032_v34  ;;  %v484_v34 = vsel %vm8336_vm4, %v479_v15, %v483_v10  ;;  %v572_v10 = vrot.slane %v570_v55, 4  ;;  %v535_v15 = vrot.slane %v534_v58, 4  ;;  %v579_v26 = vshll.u32 %v415_v8, 16 }
  0x20   :  { %v6371_v47 = vcombine.low %v470_v33, %v484_v34  ;;  %v558_v49 = vrot.slane %v556_v30, 4  ;;  %v614_v29 = vrot.slane %v612_v13, 4  ;;  %v617_v30 = vrot.slane %v615_v14, 5  ;;  %v421_v34 = vld [vmem:[%s9925_s0 + $0x7c] sm:$0x1] }
  0x21   :  { %v526_v31 = vsel %vm8336_vm4, %v521_v5, %v8400_v54  ;;  %v593_v33 = vshll.u32 %v417_v9, 16  ;;  %v607_v35 = vshll.u32 %v419_v12, 16  ;;  %v604_v38 = vor.u32 %v603_v23, %v600_v22  ;;  %v425_v54 = vld [vmem:[%s9925_s0 + $0x8c] sm:$0x1]  ;;  %v8039_v22 = vld [vmem:[%s9925_s0 + $0x170] ss:$8 sps:$4 sm:$0xff]  }
  0x22   :  { %v562_v7 = vor.u32 %v561_v50, %v558_v49  ;;  %v626_v39 = vshrl.u32 %v422_v19, 16  ;;  %v629_v40 = vshll.u32 %v422_v19, 16  ;;  %v554_v41 = vsel %vm8336_vm4, %v549_v16, %v553_v17  ;;  %v8036_v17 = vld [vmem:[%s9925_s0 + $0x140] ss:$8 sps:$4 sm:$0xff]   ;;  %v8040_v23 = vld [vmem:[%s9925_s0 + $0x190] ss:$8 sps:$4 sm:$0xff]  }
  0x23   :  { %v581_v42 = vrot.slane %v579_v26, 5  ;;  %v618_v48 = vor.u32 %v617_v30, %v614_v29  ;;  %v595_v50 = vrot.slane %v593_v33, 5  ;;  %v605_v53 = vrot.slane %v604_v38, 4  ;;  %v8038_v19 = vld [vmem:[%s9925_s0 + $0x160] ss:$8 sps:$4 sm:$0xff]  }
  0x24   :  { %v563_v25 = vrot.slane %v562_v7, 4  ;;  %v628_v55 = vrot.slane %v626_v39, 4  ;;  %v649_v5 = vshll.u32 %v425_v54, 16  ;;  %v8043_v26 = vld [vmem:[%s9925_s0 + $0x1c0] ss:$8 sps:$4 sm:$0xff]  }
  0x25   :  { %v619_v61 = vrot.slane %v618_v48, 4  ;;  %v6454_v30 = vld [vmem:[%s9925_s0 + $0x148] sm:$0xf]  ;;  %v8045_v33 = vld [vmem:[%s9925_s0 + $0x1f0] ss:$8 sps:$4 sm:$0xff]  }
  0x26   :  { %7296 = vmatmul.mubr.msk.bf16.gmra.mrb[8].mxu0 %vm104_vm1, %v8033_v56  ;;  %v573_v56 = vshll.u32 %v414_v43, 16  ;;  %v640_v43 = vshrl.u32 %v424_v27, 16  ;;  %v568_v45 = vsel %vm8336_vm4, %v563_v25, %v567_v18  ;;  %v651_v13 = vrot.slane %v649_v5, 5  ;;  %v8037_v18 = vld [vmem:[%s9925_s0 + $0x150] ss:$8 sps:$4 sm:$0xff]  }
  0x27   :  { %7299 = vmatprep.mubr.msk.bf16.mxu0 %vm104_vm1, %v8034_v63  ;;  %v584_v63 = vshrl.u32 %v416_v51, 16  ;;  %v609_v51 = vrot.slane %v607_v35, 5  ;;  %v6374_v58 = vcombine.low %v554_v41, %v568_v45  ;;  %v8042_v25 = vld [vmem:[%s9925_s0 + $0x1b0] ss:$8 sps:$4 sm:$0xff]   ;;  %v8046_v35 = vld [vmem:[%s9925_s0 + $0x200] ss:$8 sps:$4 sm:$0xff]  }
  0x28   :  { %v575_v11 = vrot.slane %v573_v56, 5  ;;  %v631_v56 = vrot.slane %v629_v40, 5  ;;  %v642_v59 = vrot.slane %v640_v43, 4  ;;  %v1267_v38 = vshll.u32 %v6454_v30, 16  ;;  %v6453_v43 = vld [vmem:[%s9925_s0 + $0x144] sm:$0x1] }
  0x29   :  { %v586_v20 = vrot.slane %v584_v63, 4  ;;  %v6460_v45 = vld [vmem:[%s9925_s0 + $0x160] sm:$0xf]  ;;  %v6459_v54 = vld [vmem:[%s9925_s0 + $0x15c] sm:$0x1] }
  0x2a   :  { %v576_v28 = vor.u32 %v575_v11, %v572_v10  ;;  %v632_v3 = vor.u32 %v631_v56, %v628_v55 }
  0x2b   :  { %v590_v37 = vor.u32 %v589_v21, %v586_v20  ;;  %v1102_v20 = vsel %vm129_vm0, %v6435_v36, 0  ;;  %v6484_v21 = vld [vmem:[%s9926_s1 + $0xa] sm:$0x3] }
  0x2c   :  { %v577_v46 = vrot.slane %v576_v28, 4  ;;  %v633_v11 = vrot.slane %v632_v3, 4  ;;  %v6452_v28 = vld [vmem:[%s9925_s0 + $0x140] sm:$0xf]  ;;  %v1524_v29 = vsel %vm129_vm0, %v6484_v21, 0 }
  0x2d   :  { %v591_v52 = vrot.slane %v590_v37, 4  ;;  %v1264_v37 = vshrl.u32 %v6454_v30, 16  ;;  %v6461_v3 = vld [vmem:[%s9925_s0 + $0x164] sm:$0x1] }
  0x2e   :  { %7300 = vmatmul.mubr.msk.bf16.gmra.mrb[12].mxu0 %vm104_vm1, %v8035_v32  ;;  %v540_v32 = vsel %vm8336_vm4, %v535_v15, %v539_v6  ;;  %v582_v63 = vsel %vm8336_vm4, %v577_v46, %v581_v42  ;;  %v610_v6 = vsel %vm8336_vm4, %v605_v53, %v609_v51  ;;  %v6455_v46 = vld [vmem:[%s9925_s0 + $0x14c] sm:$0x1]  ;;  %v1269_v51 = vrot.slane %v1267_v38, 5 }
  0x2f   :  { %7305 = vmatprep.mubr.msk.bf16.mxu0 %vm104_vm1, %v6370_v44  ;;  %v643_v44 = vshll.u32 %v424_v27, 16  ;;  %v6373_v49 = vcombine.low %v526_v31, %v540_v32  ;;  %v596_v1 = vsel %vm8336_vm4, %v591_v52, %v595_v50  ;;  %v8044_v27 = vld [vmem:[%s9925_s0 + $0x1e0] ss:$8 sps:$4 sm:$0xff]   ;;  %v1250_v31 = vshrl.u32 %v6452_v28, 16 }
  0x30   :  { %v6375_v8 = vcombine.low %v582_v63, %v596_v1  ;;  %v1253_v32 = vshll.u32 %v6452_v28, 16  ;;  %v1266_v50 = vrot.slane %v1264_v37, 4  ;;  %v8047_v63 = vld [vmem:[%s9925_s0 + $0x210] ss:$8 sps:$4 sm:$0xff]   ;;  %v1273_v1 = vshll.u32 %v6455_v46, 16 }
  0x31   :  { %v645_v60 = vrot.slane %v643_v44, 5  ;;  %v6517_v44 = vld [vmem:[%s9926_s1 + $0xc] sm:$0x3]  ;;  %v1252_v48 = vrot.slane %v1250_v31, 4  ;;  %v6466_v31 = vld [vmem:[%s9925_s0 + $0x178] sm:$0xf] }
  0x32   :  { %v1270_v5 = vor.u32 %v1269_v51, %v1266_v50  ;;  %v6468_v37 = vld [vmem:[%s9925_s0 + $0x190] sm:$0xf] }
  0x33   :  { %v646_v4 = vor.u32 %v645_v60, %v642_v59  ;;  %v1309_v59 = vshll.u32 %v6460_v45, 16  ;;  %v1259_v60 = vshll.u32 %v6453_v43, 16  ;;  %v6470_v43 = vld [vmem:[%s9925_s0 + $0x198] sm:$0xf] }
  0x35   :  { %v647_v12 = vrot.slane %v646_v4, 4  ;;  %v8048_v4 = vld [vmem:[%s9925_s0 + $0x230] ss:$8 sps:$4 sm:$0xff]  }
  0x36   :  { %7306 = vmatmul.mubr.msk.bf16.vlgmr.msra.gmra.mrb[0].mxu0 %vm104_vm1, %v6371_v47  ;;  %v621_v47 = vshll.u32 %v421_v34, 16  ;;  %v6456_v34 = vld [vmem:[%s9925_s0 + $0x150] sm:$0xf] }
  0x37   :  { %7322 = vmatpush3.bf16.msra.mxu0 %v8347_v2  ;;  %7309 = vmatprep.mubr.msk.bf16.mxu0 %vm104_vm1, %v6372_v24  ;;  %v423_v2 = vld [vmem:[%s9925_s0 + $0x84] sm:$0x1]  ;;  %v652_v15 = vsel %vm8336_vm4, %v647_v12, %v651_v13  ;;  %v8041_v24 = vld [vmem:[%s9925_s0 + $0x1a0] ss:$8 sps:$4 sm:$0xff]   ;;  %v1278_v39 = vshrl.u32 %v6456_v34, 16  ;;  %v1281_v40 = vshll.u32 %v6456_v34, 16 }
  0x38   :  { %8014 = vmatprep.subr.msk.bf16.mxu0 %vm129_vm0, %v6435_v36  ;;  %v623_v62 = vrot.slane %v621_v47, 5  ;;  %v635_v0 = vshll.u32 %v423_v2, 16  ;;  %v6458_v36 = vld [vmem:[%s9925_s0 + $0x158] sm:$0xf]  ;;  %v1255_v47 = vrot.slane %v1253_v32, 5  ;;  %v1311_v12 = vrot.slane %v1309_v59, 5 }
  0x39   :  { %v1292_v41 = vshrl.u32 %v6458_v36, 16  ;;  %v1295_v42 = vshll.u32 %v6458_v36, 16  ;;  %v6457_v2 = vld [vmem:[%s9925_s0 + $0x154] sm:$0x1]  ;;  %v1280_v52 = vrot.slane %v1278_v39, 4  ;;  %v1283_v53 = vrot.slane %v1281_v40, 5 }
  0x3a   :  { %v624_v7 = vsel %vm8336_vm4, %v619_v61, %v623_v62  ;;  %v637_v9 = vrot.slane %v635_v0, 5  ;;  %v1256_v0 = vor.u32 %v1255_v47, %v1252_v48  ;;  %v8562_v13 = vrot.slane %v1259_v60, 5  ;;  %v6467_v32 = vld [vmem:[%s9925_s0 + $0x17c] sm:$0x1]  ;;  %v8068_v40 = vld [vmem:[%s9925_s0 + $0xf0] ss:$8 sps:$4 sm:$0xff]  }
  0x3b   :  { %v6376_v10 = vcombine.low %v610_v6, %v624_v7  ;;  %v1294_v55 = vrot.slane %v1292_v41, 4  ;;  %v1297_v56 = vrot.slane %v1295_v42, 5  ;;  %v1287_v6 = vshll.u32 %v6457_v2, 16  ;;  %v6472_v47 = vld [vmem:[%s9925_s0 + $0x1a0] sm:$0xf]  ;;  %7277 = vmatprep.mubr.msk.bf16.mxu1 %vm104_vm1, %v8068_v40 }
  0x3c   :  { %v638_v14 = vsel %vm8336_vm4, %v633_v11, %v637_v9  ;;  %v1301_v7 = vshll.u32 %v6459_v54, 16  ;;  %v1284_v9 = vor.u32 %v1283_v53, %v1280_v52  ;;  %v1348_v41 = vshrl.u32 %v6466_v31, 16  ;;  %v8069_v52 = vld [vmem:[%s9925_s0 + $0x100] ss:$8 sps:$4 sm:$0xff]  }
  0x3d   :  { %v6377_v16 = vcombine.low %v638_v14, %v652_v15  ;;  %v1315_v14 = vshll.u32 %v6461_v3, 16  ;;  %v1351_v42 = vshll.u32 %v6466_v31, 16  ;;  %v1357_v51 = vshll.u32 %v6467_v32, 16  ;;  %7278 = vmatmul.mubr.msk.bf16.vlgmr.msra.gmra.mrb[0].mxu1 %vm104_vm1, %v8069_v52  ;;  %v6477_v31 = vld [vmem:[%s9925_s0 + $0x1b4] sm:$0x1]  ;;  %v8072_v40 = vld [vmem:[%s9930_s5] sm:$0xff]  }
  0x3e   :  { %7310 = vmatmul.mubr.msk.bf16.gmra.mrb[4].mxu0 %vm104_vm1, %v6373_v49  ;;  %v6462_v49 = vld [vmem:[%s9925_s0 + $0x168] sm:$0xf]  ;;  %v8586_v28 = vrot.slane %v1284_v9, 4  ;;  %v1362_v2 = vshrl.u32 %v6468_v37, 16  ;;  %v1350_v59 = vrot.slane %v1348_v41, 4 }
  0x3f   :  { %7313 = vmatprep.mubr.msk.bf16.mxu0 %vm104_vm1, %v6374_v58  ;;  %v1306_v58 = vshrl.u32 %v6460_v45, 16  ;;  %v1320_v61 = vshrl.u32 %v6462_v49, 16  ;;  %v1323_v62 = vshll.u32 %v6462_v49, 16  ;;  %v1317_v34 = vrot.slane %v1315_v14, 5  ;;  %v6479_v32 = vld [vmem:[%s9925_s0 + $0x1bc] sm:$0x1] }
  0x40   :  { %v1353_v60 = vrot.slane %v1351_v42, 5 }
  0x41   :  { %v1308_v11 = vrot.slane %v1306_v58, 4  ;;  %v1322_v15 = vrot.slane %v1320_v61, 4  ;;  %v1365_v58 = vshll.u32 %v6468_v37, 16  ;;  %v1376_v61 = vshrl.u32 %v6470_v43, 16 }
  0x43   :  { %v1312_v30 = vor.u32 %v1311_v12, %v1308_v11  ;;  %v1367_v12 = vrot.slane %v1365_v58, 5  ;;  %v1441_v58 = vshll.u32 %v6479_v32, 16  ;;  %v8073_v32 = vld [vmem:[%s9930_s5 + $0x8] sm:$0xff]  }
  0x45   :  { %v1313_v46 = vrot.slane %v1312_v30, 4  ;;  %v6475_v30 = vld [vmem:[%s9925_s0 + $0x1ac] sm:$0x1] }
  0x46   :  { %7314 = vmatmul.mubr.msk.bf16.gmra.mrb[8].mxu0 %vm104_vm1, %v6375_v8  ;;  %v6464_v8 = vld [vmem:[%s9925_s0 + $0x170] sm:$0xf] }
  0x47   :  { %7317 = vmatprep.mubr.msk.bf16.mxu0 %vm104_vm1, %v6376_v10  ;;  %v1298_v10 = vor.u32 %v1297_v56, %v1294_v55  ;;  %v6469_v56 = vld [vmem:[%s9925_s0 + $0x194] sm:$0x1] }
  0x48   :  { %v1371_v9 = vshll.u32 %v6469_v56, 16  ;;  %v1427_v56 = vshll.u32 %v6477_v31, 16 }
  0x4a   :  { %v8684_v37 = vrot.slane %v1371_v9, 5 }
  0x4e   :  { %7318 = vmatmul.mubr.msk.bf16.gmra.mrb[12].mxu0 %vm104_vm1, %v6377_v16  ;;  %v1325_v16 = vrot.slane %v1323_v62, 5  ;;  %v1379_v62 = vshll.u32 %v6470_v43, 16 }
  0x4f   :  { %7323 = vmatprep.mubr.msk.bf16.mxu0 %vm104_vm1, %v8036_v17  ;;  %v8565_v17 = vrot.slane %v1256_v0, 4  ;;  %v8051_v0 = vld [vmem:[%s9925_s0 + $0x260] ss:$8 sps:$4 sm:$0xff]  }
  0x56   :  { %7324 = vmatmul.mubr.msk.bf16.vlgmr.msra.gmra.mrb[0].mxu0 %vm104_vm1, %v8037_v18  ;;  %v8567_v18 = vrot.slane %v1273_v1, 5  ;;  %v1318_v1 = vsel %vm8336_vm4, %v1313_v46, %v1317_v34 }
  0x57   :  { %7340 = vmatpush3.bf16.msra.mxu0 %v1102_v20  ;;  %7327 = vmatprep.mubr.msk.bf16.mxu0 %vm104_vm1, %v8038_v19  ;;  %v6463_v19 = vld [vmem:[%s9925_s0 + $0x16c] sm:$0x1]  ;;  %v1334_v20 = vshrl.u32 %v6464_v8, 16 }
  0x58   :  { %8015 = vmatprep.subr.msk.bf16.mxu0 %vm129_vm0, %v6484_v21  ;;  %v1337_v21 = vshll.u32 %v6464_v8, 16  ;;  %v1329_v36 = vshll.u32 %v6463_v19, 16  ;;  %v1364_v8 = vrot.slane %v1362_v2, 4  ;;  %v1378_v19 = vrot.slane %v1376_v61, 4 }
  0x59   :  { %v1336_v38 = vrot.slane %v1334_v20, 4  ;;  %v1381_v20 = vrot.slane %v1379_v62, 5 }
  0x5a   :  { %v1339_v39 = vrot.slane %v1337_v21, 5  ;;  %v1331_v50 = vrot.slane %v1329_v36, 5  ;;  %v6473_v21 = vld [vmem:[%s9925_s0 + $0x1a4] sm:$0x1]  ;;  %v1368_v42 = vor.u32 %v1367_v12, %v1364_v8 }
  0x5b   :  { %v1382_v46 = vor.u32 %v1381_v20, %v1378_v19 }
  0x5c   :  { %v1340_v55 = vor.u32 %v1339_v39, %v1336_v38 }
  0x5e   :  { %7328 = vmatmul.mubr.msk.bf16.gmra.mrb[4].mxu0 %vm104_vm1, %v8039_v22  ;;  %v1271_v22 = vrot.slane %v1270_v5, 4  ;;  %v1393_v5 = vshll.u32 %v6472_v47, 16  ;;  %v8653_v11 = vrot.slane %v1340_v55, 4  ;;  %v1413_v55 = vshll.u32 %v6475_v30, 16 }
  0x5f   :  { %7331 = vmatprep.mubr.msk.bf16.mxu0 %vm104_vm1, %v8040_v23  ;;  %v8573_v23 = vrot.slane %v1287_v6, 5 }
  0x60   :  { %v1276_v45 = vsel %vm8336_vm4, %v1271_v22, %v8567_v18  ;;  %v6471_v18 = vld [vmem:[%s9925_s0 + $0x19c] sm:$0x1]  ;;  %v6480_v22 = vld [vmem:[%s9925_s0 + $0x1c0] sm:$0xf] }
  0x61   :  { %v1290_v53 = vsel %vm8336_vm4, %v8586_v28, %v8573_v23  ;;  %v1446_v43 = vshrl.u32 %v6480_v22, 16 }
  0x66   :  { %7332 = vmatmul.mubr.msk.bf16.gmra.mrb[8].mxu0 %vm104_vm1, %v8041_v24  ;;  %v8575_v24 = vrot.slane %v1301_v7, 5  ;;  %v8648_v7 = vrot.slane %v1357_v51, 5 }
  0x67   :  { %7335 = vmatprep.mubr.msk.bf16.mxu0 %vm104_vm1, %v8042_v25  ;;  %v8578_v25 = vsel %vm129_vm0, %v6517_v44, 0 }
  0x6e   :  { %7336 = vmatmul.mubr.msk.bf16.gmra.mrb[12].mxu0 %vm104_vm1, %v8043_v26  ;;  %v6465_v26 = vld [vmem:[%s9925_s0 + $0x174] sm:$0x1] }
  0x6f   :  { %7341 = vmatprep.mubr.msk.bf16.mxu0 %vm104_vm1, %v8044_v27  ;;  %v8049_v27 = vld [vmem:[%s9925_s0 + $0x240] ss:$8 sps:$4 sm:$0xff]   ;;  %v1343_v48 = vshll.u32 %v6465_v26, 16 }
  0x71   :  { %v8644_v3 = vrot.slane %v1343_v48, 5  ;;  %v1385_v48 = vshll.u32 %v6471_v18, 16  ;;  %v1443_v18 = vrot.slane %v1441_v58, 5  ;;  %v8060_v58 = vld [vmem:[%s9925_s0 + $0xa8] ss:$8 sps:$4 sm:$0xff]  }
  0x73   :  { %v1346_v36 = vsel %vm8336_vm4, %v8653_v11, %v8644_v3  ;;  %v8077_v3 = vld [vmem:[%s9930_s5 + $0x10] sm:$0xff]  }
  0x76   :  { %7342 = vmatmul.mubr.msk.bf16.vlgmr.msra.gmra.mrb[0].mxu0 %vm104_vm1, %v8045_v33  ;;  %v8050_v33 = vld [vmem:[%s9925_s0 + $0x250] ss:$8 sps:$4 sm:$0xff]  }
  0x77   :  { %7358 = vmatpush3.bf16.msra.mxu0 %v1524_v29  ;;  %7345 = vmatprep.mubr.msk.bf16.mxu0 %vm104_vm1, %v8046_v35  ;;  %v8588_v29 = vrot.slane %v1298_v10, 4  ;;  %v1326_v35 = vor.u32 %v1325_v16, %v1322_v15  ;;  %v6476_v10 = vld [vmem:[%s9925_s0 + $0x1b0] sm:$0xf]  ;;  %v6478_v15 = vld [vmem:[%s9925_s0 + $0x1b8] sm:$0xf] }
  0x78   :  { %8016 = vmatprep.subr.msk.bf16.mxu0 %vm129_vm0, %v6517_v44  ;;  %v1262_v44 = vsel %vm8336_vm4, %v8565_v17, %v8562_v13  ;;  %v1354_v17 = vor.u32 %v1353_v60, %v1350_v59  ;;  %v1418_v26 = vshrl.u32 %v6476_v10, 16  ;;  %v1435_v34 = vshll.u32 %v6478_v15, 16  ;;  %v6481_v59 = vld [vmem:[%s9925_s0 + $0x1c4] sm:$0x1] }
  0x79   :  { %v1327_v49 = vrot.slane %v1326_v35, 4  ;;  %v1304_v54 = vsel %vm8336_vm4, %v8588_v29, %v8575_v24  ;;  %v6485_v16 = vcombine.low %v1262_v44, %v1276_v45  ;;  %v1395_v24 = vrot.slane %v1393_v5, 5  ;;  %v8070_v35 = vld [vmem:[%s9925_s0 + $0x110] ss:$8 sps:$4 sm:$0xff]   ;;  %v8071_v45 = vld [vmem:[%s9925_s0 + $0x120] ss:$8 sps:$4 sm:$0xff]  }
  0x7a   :  { %v6486_v28 = vcombine.low %v1290_v53, %v1304_v54  ;;  %v1355_v41 = vrot.slane %v1354_v17, 4  ;;  %v1449_v44 = vshll.u32 %v6480_v22, 16  ;;  %7281 = vmatprep.mubr.msk.bf16.mxu1 %vm104_vm1, %v8070_v35  ;;  %v1420_v51 = vrot.slane %v1418_v26, 4  ;;  %v2655_v17 = vld [vmem:[%s9931_s6] sm:$0x3] }
  0x7b   :  { %v1332_v6 = vsel %vm8336_vm4, %v1327_v49, %v1331_v50  ;;  %v1399_v49 = vshll.u32 %v6473_v21, 16  ;;  %v6482_v50 = vld [vmem:[%s9925_s0 + $0x1c8] sm:$0xf]  ;;  %v1437_v53 = vrot.slane %v1435_v34, 5  ;;  %7282 = vmatmul.mubr.msk.bf16.gmra.mrb[4].mxu1 %vm104_vm1, %v8071_v45  ;;  %v1448_v60 = vrot.slane %v1446_v43, 4  ;;  %8019 = vmatprep.subr.msk.bf16.mxu1 %vm129_vm0, %v2655_v17  ;;  %v8078_v43 = vld [vmem:[%s9930_s5 + $0x18] sm:$0xff]  }
  0x7c   :  { %v6487_v29 = vcombine.low %v1318_v1, %v1332_v6  ;;  %7463 = vmatprep.mubr.msk.bf16.mxu1 %vm104_vm1, %v8072_v40  ;;  %v1451_v61 = vrot.slane %v1449_v44, 5  ;;  %v1460_v62 = vshrl.u32 %v6482_v50, 16  ;;  %v1369_v1 = vrot.slane %v1368_v42, 4  ;;  %v8079_v40 = vld [vmem:[%s9928_s3 + $0x50] sm:$0xff]  }
  0x7d   :  { %v1387_v5 = vrot.slane %v1385_v48, 5  ;;  %v1401_v6 = vrot.slane %v1399_v49, 5  ;;  %v1455_v12 = vshll.u32 %v6481_v59, 16  ;;  %v3157_v31 = vsel %vm129_vm0, %v2655_v17, 0 }
  0x7e   :  { %7346 = vmatmul.mubr.msk.bf16.gmra.mrb[4].mxu0 %vm104_vm1, %v8047_v63  ;;  %v6474_v63 = vld [vmem:[%s9925_s0 + $0x1a8] sm:$0xf]  ;;  %v1452_v19 = vor.u32 %v1451_v61, %v1448_v60  ;;  %v1462_v20 = vrot.slane %v1460_v62, 4  ;;  %v1374_v22 = vsel %vm8336_vm4, %v1369_v1, %v8684_v37  ;;  %7462 = vmatpush3.bf16.msra.mxu1 %v3157_v31 }
  0x7f   :  { %7349 = vmatprep.mubr.msk.bf16.mxu0 %vm104_vm1, %v8048_v4  ;;  %v1390_v4 = vshrl.u32 %v6472_v47, 16  ;;  %v1404_v13 = vshrl.u32 %v6474_v63, 16  ;;  %v1407_v14 = vshll.u32 %v6474_v63, 16  ;;  %v1463_v63 = vshll.u32 %v6482_v50, 16  ;;  %v8075_v37 = vld [vmem:[%s9928_s3 + $0x48] sm:$0xff]  }
  0x80   :  { %v1453_v34 = vrot.slane %v1452_v19, 4  ;;  %v8053_v50 = vld [vmem:[%s9925_s0 + $0x18] ss:$8 sps:$4 sm:$0xff]  }
  0x81   :  { %v1392_v23 = vrot.slane %v1390_v4, 4  ;;  %v1406_v38 = vrot.slane %v1404_v13, 4  ;;  %v1409_v39 = vrot.slane %v1407_v14, 5  ;;  %v1383_v4 = vrot.slane %v1382_v46, 4  ;;  %v6550_v13 = vld [vmem:[%s9926_s1 + $0xe] sm:$0x3] }
  0x82   :  { %v1465_v21 = vrot.slane %v1463_v63, 5 }
  0x83   :  { %v1396_v47 = vor.u32 %v1395_v24, %v1392_v23  ;;  %v1410_v54 = vor.u32 %v1409_v39, %v1406_v38  ;;  %v1388_v23 = vsel %vm8336_vm4, %v1383_v4, %v1387_v5  ;;  %7464 = vmatmul.mubr.msk.bf16.vlgmr.msra.gmra.mrb[8].mxu1 %vm104_vm1, %v8073_v32 }
  0x84   :  { %v1466_v35 = vor.u32 %v1465_v21, %v1462_v20  ;;  %7467 = vmatprep.mubr.msk.bf16.mxu1 %vm104_vm1, %v8077_v3 }
  0x85   :  { %v1397_v14 = vrot.slane %v1396_v47, 4  ;;  %v8052_v47 = vld [vmem:[%s9925_s0 + $0x8] ss:$8 sps:$4 sm:$0xff]  }
  0x86   :  { %7350 = vmatmul.mubr.msk.bf16.gmra.mrb[8].mxu0 %vm104_vm1, %v8049_v27  ;;  %v1421_v27 = vshll.u32 %v6476_v10, 16  ;;  %v6483_v10 = vld [vmem:[%s9925_s0 + $0x1cc] sm:$0x1]  ;;  %v1467_v39 = vrot.slane %v1466_v35, 4 }
  0x87   :  { %7353 = vmatprep.mubr.msk.bf16.mxu0 %vm104_vm1, %v8050_v33  ;;  %v1432_v33 = vshrl.u32 %v6478_v15, 16  ;;  %v1411_v15 = vrot.slane %v1410_v54, 4  ;;  %v1469_v24 = vshll.u32 %v6483_v10, 16  ;;  %v1402_v11 = vsel %vm8336_vm4, %v1397_v14, %v1401_v6  ;;  %v8057_v54 = vld [vmem:[%s9925_s0 + $0x68] ss:$8 sps:$4 sm:$0xff]  }
  0x88   :  { %v1423_v2 = vrot.slane %v1421_v27, 5 }
  0x89   :  { %v1434_v52 = vrot.slane %v1432_v33, 4  ;;  %v6489_v33 = vcombine.low %v1374_v22, %v1388_v23  ;;  %v1471_v38 = vrot.slane %v1469_v24, 5 }
  0x8a   :  { %v1424_v8 = vor.u32 %v1423_v2, %v1420_v51  ;;  %v8054_v51 = vld [vmem:[%s9925_s0 + $0x28] ss:$8 sps:$4 sm:$0xff]  }
  0x8b   :  { %v1438_v9 = vor.u32 %v1437_v53, %v1434_v52  ;;  %7468 = vmatmul.mubr.msk.bf16.gmra.mrb[12].mxu1 %vm104_vm1, %v8078_v43  ;;  %v1472_v48 = vsel %vm8336_vm4, %v1467_v39, %v1471_v38  ;;  %v6599_v2 = vld [vmem:[%s9926_s1 + $0x10] sm:$0x3]  ;;  %v8055_v52 = vld [vmem:[%s9925_s0 + $0x38] ss:$8 sps:$4 sm:$0xff]  }
  0x8c   :  { %v1425_v26 = vrot.slane %v1424_v8, 4  ;;  %v8056_v53 = vld [vmem:[%s9925_s0 + $0x58] ss:$8 sps:$4 sm:$0xff]  }
  0x8d   :  { %v1439_v27 = vrot.slane %v1438_v9, 4 }
  0x8e   :  { %7354 = vmatmul.mubr.msk.bf16.gmra.mrb[12].mxu0 %vm104_vm1, %v8051_v0  ;;  %v1360_v0 = vsel %vm8336_vm4, %v1355_v41, %v8648_v7  ;;  %v1415_v7 = vrot.slane %v1413_v55, 5  ;;  %v8058_v55 = vld [vmem:[%s9925_s0 + $0x78] ss:$8 sps:$4 sm:$0xff]  }
  0x8f   :  { %7359 = vmatprep.mubr.msk.bf16.mxu0 %vm104_vm1, %v6485_v16  ;;  %v1429_v16 = vrot.slane %v1427_v56, 5  ;;  %v6488_v30 = vcombine.low %v1346_v36, %v1360_v0  ;;  %v1444_v42 = vsel %vm8336_vm4, %v1439_v27, %v1443_v18  ;;  %v8059_v56 = vld [vmem:[%s9925_s0 + $0x88] ss:$8 sps:$4 sm:$0xff]  }
  0x90   :  { %v1416_v36 = vsel %vm8336_vm4, %v1411_v15, %v1415_v7 }
  0x91   :  { %v1430_v41 = vsel %vm8336_vm4, %v1425_v26, %v1429_v16  ;;  %v6490_v44 = vcombine.low %v1402_v11, %v1416_v36 }
  0x92   :  { %v6491_v45 = vcombine.low %v1430_v41, %v1444_v42 }
  0x96   :  { %7360 = vmatmul.mubr.msk.bf16.vlgmr.msra.gmra.mrb[0].mxu0 %vm104_vm1, %v6486_v28  ;;  %v1457_v28 = vrot.slane %v1455_v12, 5 }
  0x97   :  { %7376 = vmatpush3.bf16.msra.mxu0 %v8578_v25  ;;  %7363 = vmatprep.mubr.msk.bf16.mxu0 %vm104_vm1, %v6487_v29  ;;  %v8074_v25 = vld [vmem:[%s9928_s3 + $0x40] sm:$0xff]   ;;  %v1922_v29 = vsel %vm129_vm0, %v6550_v13, 0 }
  0x98   :  { %8017 = vmatprep.subr.msk.bf16.mxu0 %vm129_vm0, %v6550_v13  ;;  %7479 = vmatprep.subr.bf16.mxu1 %v8074_v25  ;;  %v1458_v46 = vsel %vm8336_vm4, %v1453_v34, %v1457_v28 }
  0x99   :  { %7480 = vmatpush3.bf16.msra.mxu1 %v8074_v25  ;;  %v6492_v49 = vcombine.low %v1458_v46, %v1472_v48 }
  0x9a   :  { %7481 = vmatprep.subr.bf16.mxu1 %v8075_v37 }
  0x9d   :  { %7482 = vmatpush3.bf16.msra.mxu1 %v8075_v37 }
  0x9e   :  { %7364 = vmatmul.mubr.msk.bf16.gmra.mrb[4].mxu0 %vm104_vm1, %v6488_v30  ;;  %7483 = vmatprep.subr.bf16.mxu1 %v8079_v40 }
  0x9f   :  { %7367 = vmatprep.mubr.msk.bf16.mxu0 %vm104_vm1, %v6489_v33 }
  0xa1   :  { %7484 = vmatpush3.bf16.msra.mxu1 %v8079_v40 }
  0xa6   :  { %7368 = vmatmul.mubr.msk.bf16.gmra.mrb[8].mxu0 %vm104_vm1, %v6490_v44 }
  0xa7   :  { %7371 = vmatprep.mubr.msk.bf16.mxu0 %vm104_vm1, %v6491_v45 }
  0xae   :  { %7372 = vmatmul.mubr.msk.bf16.gmra.mrb[12].mxu0 %vm104_vm1, %v6492_v49 }
  0xaf   :  { %7377 = vmatprep.mubr.msk.bf16.mxu0 %vm104_vm1, %v8052_v47 }
  0xb6   :  { %7378 = vmatmul.mubr.msk.bf16.vlgmr.msra.gmra.mrb[0].mxu0 %vm104_vm1, %v8053_v50 }
  0xb7   :  { %7394 = vmatpush3.bf16.msra.mxu0 %v1922_v29  ;;  %7381 = vmatprep.mubr.msk.bf16.mxu0 %vm104_vm1, %v8054_v51 }
  0xb8   :  { %8018 = vmatprep.subr.msk.bf16.mxu0 %vm129_vm0, %v6599_v2 }
  0xbe   :  { %7382 = vmatmul.mubr.msk.bf16.gmra.mrb[4].mxu0 %vm104_vm1, %v8055_v52 }
  0xbf   :  { %7385 = vmatprep.mubr.msk.bf16.mxu0 %vm104_vm1, %v8056_v53 }
  0xc6   :  { %7386 = vmatmul.mubr.msk.bf16.gmra.mrb[8].mxu0 %vm104_vm1, %v8057_v54 }
  0xc7   :  { %7389 = vmatprep.mubr.msk.bf16.mxu0 %vm104_vm1, %v8058_v55 }
  0xce   :  { %7390 = vmatmul.mubr.msk.bf16.gmra.mrb[12].mxu0 %vm104_vm1, %v8059_v56 }
  0xcf   :  { %7395 = vmatprep.mubr.msk.bf16.mxu0 %vm104_vm1, %v8060_v58 }
  0xd0   :  { %12 = vsyncpa [#allocation4], 0  ;;  %v6567_v59 = vld [vmem:[%s9925_s0 + $0x8] sm:$0xf]  ;;  %v8061_v60 = vld [vmem:[%s9925_s0 + $0xb8] ss:$8 sps:$4 sm:$0xff]  }
  0xd1   :  { %v6569_v61 = vld [vmem:[%s9925_s0 + $0x10] sm:$0xf]  ;;  %v2070_v63 = vshrl.u32 %v6567_v59, 16  ;;  %v2073_v0 = vshll.u32 %v6567_v59, 16  ;;  %v2344_v1 = vsel %vm129_vm0, %v6599_v2, 0  ;;  %v8828_v5 = vld [vmem:[%s9928_s3] sm:$0xff]  }
  0xd2   :  { %v8062_v62 = vld [vmem:[%s9925_s0 + $0xc8] ss:$8 sps:$4 sm:$0xff]   ;;  %v6571_v4 = vld [vmem:[%s9925_s0 + $0x18] sm:$0xf]  ;;  %v2084_v6 = vshrl.u32 %v6569_v61, 16  ;;  %v2087_v8 = vshll.u32 %v6569_v61, 16 }
  0xd3   :  { %v6573_v9 = vld [vmem:[%s9925_s0 + $0x20] sm:$0xf]  ;;  %v2072_v10 = vrot.slane %v2070_v63, 4  ;;  %v2075_v12 = vrot.slane %v2073_v0, 5  ;;  %v2098_v13 = vshrl.u32 %v6571_v4, 16  ;;  %v2101_v14 = vshll.u32 %v6571_v4, 16 }
  0xd4   :  { %v6568_v15 = vld [vmem:[%s9925_s0 + $0xc] sm:$0x1]  ;;  %v2112_v7 = vshrl.u32 %v6573_v9, 16  ;;  %v2115_v16 = vshll.u32 %v6573_v9, 16  ;;  %v8063_v17 = vld [vmem:[%s9925_s0 + $0xd8] ss:$8 sps:$4 sm:$0xff]  }
  0xd5   :  { %v2086_v18 = vrot.slane %v2084_v6, 4  ;;  %v2089_v19 = vrot.slane %v2087_v8, 5  ;;  %v6575_v20 = vld [vmem:[%s9925_s0 + $0x28] sm:$0xf]  ;;  %v8064_v21 = vld [vmem:[%s9925_s0 + $0xf8] ss:$8 sps:$4 sm:$0xff]   ;;  %v2076_v24 = vor.u32 %v2075_v12, %v2072_v10 }
  0xd6   :  { %7396 = vmatmul.mubr.msk.bf16.vlgmr.msra.gmra.mrb[0].mxu0 %vm104_vm1, %v8061_v60  ;;  %v6570_v22 = vld [vmem:[%s9925_s0 + $0x14] sm:$0x1]  ;;  %v6572_v23 = vld [vmem:[%s9925_s0 + $0x1c] sm:$0x1]  ;;  %v2079_v25 = vshll.u32 %v6568_v15, 16  ;;  %v2100_v27 = vrot.slane %v2098_v13, 4 }
  0xd7   :  { %7412 = vmatpush3.bf16.msra.mxu0 %v2344_v1  ;;  %7399 = vmatprep.mubr.msk.bf16.mxu0 %vm104_vm1, %v8062_v62  ;;  %v6574_v26 = vld [vmem:[%s9925_s0 + $0x24] sm:$0x1]  ;;  %v2103_v28 = vrot.slane %v2101_v14, 5  ;;  %v2114_v29 = vrot.slane %v2112_v7, 4  ;;  %v2117_v30 = vrot.slane %v2115_v16, 5  ;;  %v2126_v32 = vshrl.u32 %v6575_v20, 16 }
  0xd8   :  { %7429 = vmatprep.subr.bf16.mxu0 %v8828_v5  ;;  %v6577_v31 = vld [vmem:[%s9925_s0 + $0x30] sm:$0xf]  ;;  %v2129_v33 = vshll.u32 %v6575_v20, 16  ;;  %v2090_v34 = vor.u32 %v2089_v19, %v2086_v18  ;;  %v2093_v35 = vshll.u32 %v6570_v22, 16  ;;  %v2107_v37 = vshll.u32 %v6572_v23, 16 }
  0xd9   :  { %v2121_v38 = vshll.u32 %v6574_v26, 16  ;;  %v2077_v3 = vrot.slane %v2076_v24, 4  ;;  %v2081_v11 = vrot.slane %v2079_v25, 5  ;;  %v6576_v36 = vld [vmem:[%s9925_s0 + $0x2c] sm:$0x1]  ;;  %v2140_v39 = vshrl.u32 %v6577_v31, 16 }
  0xda   :  { %v2143_v40 = vshll.u32 %v6577_v31, 16  ;;  %v8065_v41 = vld [vmem:[%s9925_s0 + $0x108] ss:$8 sps:$4 sm:$0xff]   ;;  %v2104_v42 = vor.u32 %v2103_v28, %v2100_v27  ;;  %v2118_v43 = vor.u32 %v2117_v30, %v2114_v29  ;;  %v2128_v44 = vrot.slane %v2126_v32, 4  ;;  %v6579_v46 = vld [vmem:[%s9925_s0 + $0x38] sm:$0xf] }
  0xdb   :  { %v2131_v45 = vrot.slane %v2129_v33, 5  ;;  %v8066_v48 = vld [vmem:[%s9925_s0 + $0x118] ss:$8 sps:$4 sm:$0xff]   ;;  %v2091_v47 = vrot.slane %v2090_v34, 4  ;;  %v2095_v49 = vrot.slane %v2093_v35, 5  ;;  %v2109_v50 = vrot.slane %v2107_v37, 5 }
  0xdc   :  { %v2123_v51 = vrot.slane %v2121_v38, 5  ;;  %v2135_v2 = vshll.u32 %v6576_v36, 16  ;;  %v6581_v52 = vld [vmem:[%s9925_s0 + $0x40] sm:$0xf]  ;;  %v6583_v53 = vld [vmem:[%s9925_s0 + $0x58] sm:$0xf]  ;;  %v2082_v60 = vsel %vm8336_vm4, %v2077_v3, %v2081_v11 }
  0xdd   :  { %v2142_v54 = vrot.slane %v2140_v39, 4  ;;  %v2145_v55 = vrot.slane %v2143_v40, 5  ;;  %v2154_v56 = vshrl.u32 %v6579_v46, 16  ;;  %v2157_v58 = vshll.u32 %v6579_v46, 16  ;;  %v6585_v59 = vld [vmem:[%s9925_s0 + $0x60] sm:$0xf] }
  0xde   :  { %7400 = vmatmul.mubr.msk.bf16.gmra.mrb[4].mxu0 %vm104_vm1, %v8063_v17  ;;  %v2105_v61 = vrot.slane %v2104_v42, 4  ;;  %v2119_v62 = vrot.slane %v2118_v43, 4  ;;  %v6578_v63 = vld [vmem:[%s9925_s0 + $0x34] sm:$0x1]  ;;  %v2132_v0 = vor.u32 %v2131_v45, %v2128_v44  ;;  %v6580_v1 = vld [vmem:[%s9925_s0 + $0x3c] sm:$0x1]  ;;  %v2096_v10 = vsel %vm8336_vm4, %v2091_v47, %v2095_v49 }
  0xdf   :  { %7403 = vmatprep.mubr.msk.bf16.mxu0 %vm104_vm1, %v8064_v21  ;;  %v2168_v4 = vshrl.u32 %v6581_v52, 16  ;;  %v2171_v6 = vshll.u32 %v6581_v52, 16  ;;  %v2182_v8 = vshrl.u32 %v6583_v53, 16  ;;  %v2185_v9 = vshll.u32 %v6583_v53, 16  ;;  %v8067_v18 = vld [vmem:[%s9925_s0 + $0x128] ss:$8 sps:$4 sm:$0xff]  }
  0xe0   :  { %v8894_v12 = vrot.slane %v2135_v2, 5  ;;  %v2196_v13 = vshrl.u32 %v6585_v59, 16  ;;  %v2199_v14 = vshll.u32 %v6585_v59, 16  ;;  %v2146_v15 = vor.u32 %v2145_v55, %v2142_v54  ;;  %v6582_v22 = vld [vmem:[%s9925_s0 + $0x44] sm:$0x1] }
  0xe1   :  { %v2149_v7 = vshll.u32 %v6578_v63, 16  ;;  %v2156_v16 = vrot.slane %v2154_v56, 4  ;;  %v2159_v17 = vrot.slane %v2157_v58, 5  ;;  %v2110_v19 = vsel %vm8336_vm4, %v2105_v61, %v2109_v50  ;;  %v6584_v26 = vld [vmem:[%s9925_s0 + $0x5c] sm:$0x1] }
  0xe2   :  { %v2124_v20 = vsel %vm8336_vm4, %v2119_v62, %v2123_v51  ;;  %v2133_v21 = vrot.slane %v2132_v0, 4  ;;  %v2163_v23 = vshll.u32 %v6580_v1, 16  ;;  %v2170_v24 = vrot.slane %v2168_v4, 4  ;;  %v6586_v30 = vld [vmem:[%s9925_s0 + $0x64] sm:$0x1] }
  0xe3   :  { %v2173_v25 = vrot.slane %v2171_v6, 5  ;;  %v2184_v27 = vrot.slane %v2182_v8, 4  ;;  %v2187_v28 = vrot.slane %v2185_v9, 5  ;;  %v6600_v29 = vcombine.low %v2082_v60, %v2096_v10  ;;  %v6587_v33 = vld [vmem:[%s9925_s0 + $0x68] sm:$0xf] }
  0xe4   :  { %v2198_v31 = vrot.slane %v2196_v13, 4  ;;  %v2201_v32 = vrot.slane %v2199_v14, 5  ;;  %v2147_v34 = vrot.slane %v2146_v15, 4  ;;  %v2151_v35 = vrot.slane %v2149_v7, 5  ;;  %v6589_v3 = vld [vmem:[%s9925_s0 + $0x70] sm:$0xf] }
  0xe5   :  { %v2160_v37 = vor.u32 %v2159_v17, %v2156_v16  ;;  %v2177_v38 = vshll.u32 %v6582_v22, 16  ;;  %v6601_v11 = vcombine.low %v2110_v19, %v2124_v20  ;;  %v2138_v36 = vsel %vm8336_vm4, %v2133_v21, %v8894_v12  ;;  %v6593_v46 = vld [vmem:[%s9925_s0 + $0x80] sm:$0xf]  ;;  %v6588_v0 = vld [vmem:[%s9925_s0 + $0x6c] sm:$0x1] }
  0xe6   :  { %7404 = vmatmul.mubr.msk.bf16.gmra.mrb[8].mxu0 %vm104_vm1, %v8065_v41  ;;  %v8922_v39 = vrot.slane %v2163_v23, 5  ;;  %v2191_v40 = vshll.u32 %v6584_v26, 16  ;;  %v6591_v41 = vld [vmem:[%s9925_s0 + $0x78] sm:$0xf]  ;;  %v2174_v42 = vor.u32 %v2173_v25, %v2170_v24  ;;  %v2188_v43 = vor.u32 %v2187_v28, %v2184_v27  ;;  %v6590_v9 = vld [vmem:[%s9925_s0 + $0x74] sm:$0x1] }
  0xe7   :  { %7407 = vmatprep.mubr.msk.bf16.mxu0 %vm104_vm1, %v8066_v48  ;;  %v2205_v44 = vshll.u32 %v6586_v30, 16  ;;  %v2210_v45 = vshrl.u32 %v6587_v33, 16  ;;  %v2202_v48 = vor.u32 %v2201_v32, %v2198_v31  ;;  %v2213_v47 = vshll.u32 %v6587_v33, 16  ;;  %v6595_v12 = vld [vmem:[%s9925_s0 + $0x88] sm:$0xf] }
  0xe8   :  { %v2224_v49 = vshrl.u32 %v6589_v3, 16  ;;  %v2227_v50 = vshll.u32 %v6589_v3, 16  ;;  %v2152_v51 = vsel %vm8336_vm4, %v2147_v34, %v2151_v35  ;;  %v2161_v2 = vrot.slane %v2160_v37, 4  ;;  %v6597_v7 = vld [vmem:[%s9925_s0 + $0x90] sm:$0xf]  ;;  %v8080_v16 = vld [vmem:[%s9928_s3 + $0x8] sm:$0xff]  }
  0xe9   :  { %v2179_v52 = vrot.slane %v2177_v38, 5  ;;  %v2238_v53 = vshrl.u32 %v6591_v41, 16  ;;  %v2193_v54 = vrot.slane %v2191_v40, 5  ;;  %v2241_v55 = vshll.u32 %v6591_v41, 16  ;;  %v6592_v21 = vld [vmem:[%s9925_s0 + $0x7c] sm:$0x1] }
  0xea   :  { %v2252_v56 = vshrl.u32 %v6593_v46, 16  ;;  %v2255_v58 = vshll.u32 %v6593_v46, 16  ;;  %v2175_v59 = vrot.slane %v2174_v42, 4  ;;  %v2189_v60 = vrot.slane %v2188_v43, 4  ;;  %v6594_v22 = vld [vmem:[%s9925_s0 + $0x84] sm:$0x1] }
  0xeb   :  { %v2207_v61 = vrot.slane %v2205_v44, 5  ;;  %v2212_v62 = vrot.slane %v2210_v45, 4  ;;  %v2203_v63 = vrot.slane %v2202_v48, 4  ;;  %v2215_v1 = vrot.slane %v2213_v47, 5  ;;  %v6598_v48 = vld [vmem:[%s9925_s0 + $0x94] sm:$0x1] }
  0xec   :  { %v2226_v4 = vrot.slane %v2224_v49, 4  ;;  %v2229_v6 = vrot.slane %v2227_v50, 5  ;;  %v6602_v8 = vcombine.low %v2138_v36, %v2152_v51  ;;  %v2240_v10 = vrot.slane %v2238_v53, 4 }
  0xed   :  { %v2243_v13 = vrot.slane %v2241_v55, 5  ;;  %v2254_v14 = vrot.slane %v2252_v56, 4  ;;  %v2257_v15 = vrot.slane %v2255_v58, 5  ;;  %v2166_v17 = vsel %vm8336_vm4, %v2161_v2, %v8922_v39  ;;  %v6596_v39 = vld [vmem:[%s9925_s0 + $0x8c] sm:$0x1] }
  0xee   :  { %7408 = vmatmul.mubr.msk.bf16.gmra.mrb[12].mxu0 %vm104_vm1, %v8067_v18  ;;  %v2180_v18 = vsel %vm8336_vm4, %v2175_v59, %v2179_v52  ;;  %v2194_v19 = vsel %vm8336_vm4, %v2189_v60, %v2193_v54  ;;  %v2219_v20 = vshll.u32 %v6588_v0, 16  ;;  %v2208_v23 = vsel %vm8336_vm4, %v2203_v63, %v2207_v61 }
  0xef   :  { %7413 = vmatprep.mubr.msk.bf16.mxu0 %vm104_vm1, %v6600_v29  ;;  %v2216_v24 = vor.u32 %v2215_v1, %v2212_v62  ;;  %v2230_v25 = vor.u32 %v2229_v6, %v2226_v4  ;;  %v2233_v26 = vshll.u32 %v6590_v9, 16  ;;  %v2266_v27 = vshrl.u32 %v6595_v12, 16  ;;  %v8081_v1 = vld [vmem:[%s9928_s3 + $0x58] sm:$0xff]   ;;  %v8996_v4 = vld [vmem:[%s9928_s3 + $0x10] sm:$0xff]   ;;  %v8083_v6 = vld [vmem:[%s9930_s5 + $0x20] sm:$0xff]  }
  0xf0   :  { %v2269_v28 = vshll.u32 %v6595_v12, 16  ;;  %v2280_v29 = vshrl.u32 %v6597_v7, 16  ;;  %v2283_v30 = vshll.u32 %v6597_v7, 16  ;;  %v2244_v31 = vor.u32 %v2243_v13, %v2240_v10  ;;  %7485 = vmatprep.subr.bf16.mxu1 %v8081_v1  ;;  %v9009_v9 = vld [vmem:[%s9928_s3 + $0x60] sm:$0xff]   ;;  %7471 = vmatprep.mubr.msk.bf16.mxu1 %vm104_vm1, %v8083_v6  ;;  %v8086_v12 = vld [vmem:[%s9928_s3 + $0x18] sm:$0xff]   ;;  %v8087_v13 = vld [vmem:[%s9928_s3 + $0x68] sm:$0xff]  }
  0xf1   :  { %v2247_v32 = vshll.u32 %v6592_v21, 16  ;;  %v2258_v33 = vor.u32 %v2257_v15, %v2254_v14  ;;  %v2261_v34 = vshll.u32 %v6594_v22, 16  ;;  %v6603_v35 = vcombine.low %v2166_v17, %v2180_v18  ;;  %7486 = vmatpush3.bf16.msra.mxu1 %v8081_v1  ;;  %v8088_v14 = vld [vmem:[%s9928_s3 + $0x20] sm:$0xff]   ;;  %v8089_v15 = vld [vmem:[%s9930_s5 + $0x30] sm:$0xff]   ;;  %v8090_v7 = vld [vmem:[%s9930_s5 + $0x38] sm:$0xff]  }
  0xf2   :  { %v2221_v37 = vrot.slane %v2219_v20, 5  ;;  %v6604_v38 = vcombine.low %v2194_v19, %v2208_v23  ;;  %v2217_v3 = vrot.slane %v2216_v24, 4  ;;  %v2235_v36 = vrot.slane %v2233_v26, 5  ;;  %7487 = vmatprep.subr.bf16.mxu1 %v9009_v9  ;;  %v8092_v17 = vld [vmem:[%s9928_s3 + $0x28] sm:$0xff]   ;;  %v8093_v18 = vld [vmem:[%s9928_s3 + $0x78] sm:$0xff]   ;;  %v8095_v20 = vld [vmem:[%s9928_s3 + $0x30] sm:$0xff]  }
  0xf3   :  { %v2268_v40 = vrot.slane %v2266_v27, 4  ;;  %v2271_v41 = vrot.slane %v2269_v28, 5  ;;  %v2282_v42 = vrot.slane %v2280_v29, 4  ;;  %v2285_v43 = vrot.slane %v2283_v30, 5  ;;  %v9058_v24 = vld [vmem:[%s9928_s3 + $0x80] sm:$0xff]  }
  0xf4   :  { %v2249_v44 = vrot.slane %v2247_v32, 5  ;;  %v2259_v45 = vrot.slane %v2258_v33, 4  ;;  %v2263_v46 = vrot.slane %v2261_v34, 5  ;;  %v2222_v47 = vsel %vm8336_vm4, %v2217_v3, %v2221_v37 }
  0xf5   :  { %v2275_v49 = vshll.u32 %v6596_v39, 16  ;;  %v2272_v51 = vor.u32 %v2271_v41, %v2268_v40  ;;  %v2286_v2 = vor.u32 %v2285_v43, %v2282_v42  ;;  %v2289_v52 = vshll.u32 %v6598_v48, 16  ;;  %7488 = vmatpush3.bf16.msra.mxu1 %v9009_v9 }
  0xf6   :  { %7414 = vmatmul.mubr.msk.bf16.vlgmr.msra.gmra.mrb[0].mxu0 %vm104_vm1, %v6601_v11  ;;  %v2231_v11 = vrot.slane %v2230_v25, 4  ;;  %v2264_v54 = vsel %vm8336_vm4, %v2259_v45, %v2263_v46  ;;  %v8200_v10 = vmov 0   ;;  %7489 = vmatprep.subr.bf16.mxu1 %v8087_v13  ;;  %v8098_v25 = vld [vmem:[%s9928_s3 + $0x38] sm:$0xff]   ;;  %vm2688_vm5 = vsmask.f32 256 }
  0xf7   :  { %7417 = vmatprep.mubr.msk.bf16.mxu0 %vm104_vm1, %v6602_v8  ;;  %7430 = vmatpush3.bf16.msra.mxu0 %v8828_v5  ;;  %v2245_v5 = vrot.slane %v2244_v31, 4  ;;  %v2277_v56 = vrot.slane %v2275_v49, 5  ;;  %v2273_v59 = vrot.slane %v2272_v51, 4  ;;  %v2287_v60 = vrot.slane %v2286_v2, 4  ;;  %v9004_v8 = vld [vmem:[%s9930_s5 + $0x28] sm:$0xff]  }
  0xf8   :  { %7431 = vmatprep.subr.bf16.mxu0 %v8080_v16  ;;  %v2236_v50 = vsel %vm8336_vm4, %v2231_v11, %v2235_v36  ;;  %v2291_v61 = vrot.slane %v2289_v52, 5  ;;  %2516 = vst [vmem:[#allocation2 + $0x28] sm:$0xf] %v8200_v10  ;;  %2506 = vst [vmem:[#allocation2] sm:$0xf] %v8200_v10  ;;  %7472 = vmatmul.mubr.msk.bf16.gmra.mrb[16].mxu1 %vm104_vm1, %v9004_v8 }
  0xf9   :  { %v2250_v53 = vsel %vm8336_vm4, %v2245_v5, %v2249_v44  ;;  %v6605_v55 = vcombine.low %v2222_v47, %v2236_v50  ;;  %v2278_v62 = vsel %vm8336_vm4, %v2273_v59, %v2277_v56  ;;  %2507 = vst [vmem:[#allocation2 + $0x4] sm:$0xf] %v8200_v10  ;;  %2508 = vst [vmem:[#allocation2 + $0x8] sm:$0xf] %v8200_v10  ;;  %7490 = vmatpush3.bf16.msra.mxu1 %v8087_v13  ;;  %vm2689_vm6 = vsmask.f32 4368 }
  0xfa   :  { %v6606_v58 = vcombine.low %v2250_v53, %v2264_v54  ;;  %v2292_v63 = vsel %vm8336_vm4, %v2287_v60, %v2291_v61  ;;  %2509 = vst [vmem:[#allocation2 + $0xc] sm:$0xf] %v8200_v10  ;;  %2510 = vst [vmem:[#allocation2 + $0x10] sm:$0xf] %v8200_v10  ;;  %7475 = vmatprep.mubr.msk.bf16.mxu1 %vm104_vm1, %v8089_v15 }
  0xfb   :  { %7432 = vmatpush3.bf16.msra.mxu0 %v8080_v16  ;;  %v6607_v0 = vcombine.low %v2278_v62, %v2292_v63  ;;  %2511 = vst [vmem:[#allocation2 + $0x14] sm:$0xf] %v8200_v10  ;;  %2512 = vst [vmem:[#allocation2 + $0x18] sm:$0xf] %v8200_v10  ;;  %v8091_v16 = vld [vmem:[%s9928_s3 + $0x70] sm:$0xff]  }
  0xfc   :  { %7433 = vmatprep.subr.bf16.mxu0 %v8996_v4  ;;  %2513 = vst [vmem:[#allocation2 + $0x1c] sm:$0xf] %v8200_v10  ;;  %2514 = vst [vmem:[#allocation2 + $0x20] sm:$0xf] %v8200_v10  ;;  %7491 = vmatprep.subr.bf16.mxu1 %v8091_v16 }
  0xfd   :  { %2515 = vst [vmem:[#allocation2 + $0x24] sm:$0xf] %v8200_v10  ;;  %2517 = vst [vmem:[#allocation2 + $0x2c] sm:$0xf] %v8200_v10  ;;  %7492 = vmatpush3.bf16.msra.mxu1 %v8091_v16 }
  0xfe   :  { %7418 = vmatmul.mubr.msk.bf16.gmra.mrb[4].mxu0 %vm104_vm1, %v6603_v35  ;;  %2518 = vst [vmem:[#allocation2 + $0x30] sm:$0xf] %v8200_v10  ;;  %2519 = vst [vmem:[#allocation2 + $0x34] sm:$0xf] %v8200_v10  ;;  %7493 = vmatprep.subr.bf16.mxu1 %v8093_v18 }
  0xff   :  { %7421 = vmatprep.mubr.msk.bf16.mxu0 %vm104_vm1, %v6604_v38  ;;  %2520 = vst [vmem:[#allocation2 + $0x38] sm:$0xf] %v8200_v10  ;;  %2521 = vst [vmem:[#allocation2 + $0x3c] sm:$0xf] %v8200_v10  ;;  %7434 = vmatpush3.bf16.msra.mxu0 %v8996_v4  ;;  %v2656_v34 = vld [vmem:[#allocation2] sm:$0x8] }
 0x100   :  { %2522 = vst [vmem:[#allocation2 + $0x40] sm:$0xf] %v8200_v10  ;;  %2523 = vst [vmem:[#allocation2 + $0x44] sm:$0xf] %v8200_v10  ;;  %7435 = vmatprep.subr.bf16.mxu0 %v8086_v12  ;;  %7476 = vmatmul.mubr.msk.bf16.gmra.mrb[20].mxu1 %vm104_vm1, %v8090_v7  ;;  %v3482_v30 = vld [vmem:[#allocation2 + $0x4] sm:$0xf] }
 0x101   :  { %2524 = vst [vmem:[#allocation2 + $0x48] sm:$0xf] %v8200_v10  ;;  %2525 = vst [vmem:[#allocation2 + $0x4c] sm:$0xf] %v8200_v10  ;;  %7494 = vmatpush3.bf16.msra.mxu1 %v8093_v18  ;;  %v3515_v31 = vshrl.u32 %v3482_v30, 16  ;;  %v3518_v32 = vshll.u32 %v3482_v30, 16 }
 0x102   :  { %2526 = vst [vmem:[#allocation2 + $0x50] sm:$0xf] %v8200_v10  ;;  %2527 = vst [vmem:[#allocation2 + $0x54] sm:$0xf] %v8200_v10  ;;  %7511 = vmatprep.subr.bf16.mxu1 %v9058_v24  ;;  %v9072_v33 = vld [vmem:[#allocation2 + $0x4] sm:$0xf] }
 0x103   :  { %2528 = vst [vmem:[#allocation2 + $0x58] sm:$0xf] %v8200_v10  ;;  %2529 = vst [vmem:[#allocation2 + $0x5c] sm:$0xf] %v8200_v10  ;;  %7436 = vmatpush3.bf16.msra.mxu0 %v8086_v12  ;;  %v2658_v37 = vld [vmem:[#allocation2 + $0xc] sm:$0x8] }
 0x104   :  { %2530 = vst [vmem:[#allocation2 + $0x60] sm:$0xf] %v8200_v10  ;;  %2531 = vst [vmem:[#allocation2 + $0x64] sm:$0xf] %v8200_v10  ;;  %7437 = vmatprep.subr.bf16.mxu0 %v8088_v14  ;;  %v2662_v35 = vld [vmem:[#allocation2 + $0x24] sm:$0x8] }
 0x105   :  { %2532 = vst [vmem:[#allocation2 + $0x68] sm:$0xf] %v8200_v10  ;;  %2533 = vst [vmem:[#allocation2 + $0x6c] sm:$0xf] %v8200_v10  ;;  %v2660_v38 = vld [vmem:[#allocation2 + $0x18] sm:$0x8] }
 0x106   :  { %7422 = vmatmul.mubr.msk.bf16.gmra.mrb[8].mxu0 %vm104_vm1, %v6605_v55  ;;  %2534 = vst [vmem:[#allocation2 + $0x70] sm:$0xf] %v8200_v10  ;;  %2535 = vst [vmem:[#allocation2 + $0x74] sm:$0xf] %v8200_v10  ;;  %v2664_v3 = vld [vmem:[#allocation2 + $0x30] sm:$0x8] }
 0x107   :  { %7425 = vmatprep.mubr.msk.bf16.mxu0 %vm104_vm1, %v6606_v58  ;;  %2536 = vst [vmem:[#allocation2 + $0x78] sm:$0xf] %v8200_v10  ;;  %2537 = vst [vmem:[#allocation2 + $0x7c] sm:$0xf] %v8200_v10  ;;  %7438 = vmatpush3.bf16.msra.mxu0 %v8088_v14  ;;  %v3517_v11 = vrot.slane %v3515_v31, 4  ;;  %v3520_v36 = vrot.slane %v3518_v32, 5 }
 0x108   :  { %2538 = vst [vmem:[#allocation2 + $0x80] sm:$0xf] %v8200_v10  ;;  %2539 = vst [vmem:[#allocation2 + $0x84] sm:$0xf] %v8200_v10  ;;  %7439 = vmatprep.subr.bf16.mxu0 %v8092_v17  ;;  %v2697_v39 = vshrl.u32 %v9072_v33, 16  ;;  %v2692_v40 = vshrl.u32 %v2656_v34, 16 }
 0x109   :  { %2540 = vst [vmem:[#allocation2 + $0x88] sm:$0xf] %v8200_v10  ;;  %2541 = vst [vmem:[#allocation2 + $0x8c] sm:$0xf] %v8200_v10  ;;  %v2731_v41 = vshrl.u32 %v2662_v35, 16  ;;  %v2705_v43 = vshrl.u32 %v2658_v37, 16  ;;  %v3521_v46 = vor.u32 %v3520_v36, %v3517_v11 }
 0x10a   :  { %2542 = vst [vmem:[#allocation2 + $0x90] sm:$0xf] %v8200_v10  ;;  %2543 = vst [vmem:[#allocation2 + $0x94] sm:$0xf] %v8200_v10  ;;  %v3483_v42 = vld [vmem:[#allocation2 + $0x8] sm:$0x1] }
 0x10b   :  { %2544 = vst [vmem:[#allocation2 + $0x98] sm:$0xf] %v8200_v10  ;;  %2545 = vst [vmem:[#allocation2 + $0x9c] sm:$0xf] %v8200_v10  ;;  %7440 = vmatpush3.bf16.msra.mxu0 %v8092_v17  ;;  %v2718_v5 = vshrl.u32 %v2660_v38, 16  ;;  %v2744_v44 = vshrl.u32 %v2664_v3, 16 }
 0x10c   :  { %2546 = vst [vmem:[#allocation2 + $0xa0] sm:$0xf] %v8200_v10  ;;  %2547 = vst [vmem:[#allocation2 + $0xa4] sm:$0xf] %v8200_v10  ;;  %7441 = vmatprep.subr.bf16.mxu0 %v8095_v20  ;;  %v3524_v48 = vshll.u32 %v3483_v42, 16  ;;  %v2699_v47 = vrot.slane %v2697_v39, 7 }
 0x10d   :  { %2548 = vst [vmem:[#allocation2 + $0xa8] sm:$0xf] %v8200_v10  ;;  %2549 = vst [vmem:[#allocation2 + $0xac] sm:$0xf] %v8200_v10  ;;  %v2700_v49 = vshll.u32 %v9072_v33, 16  ;;  %v9078_v50 = vrot.slane %v2692_v40, 11 }
 0x10e   :  { %7426 = vmatmul.mubr.msk.bf16.gmra.mrb[12].mxu0 %vm104_vm1, %v6607_v0  ;;  %2550 = vst [vmem:[#allocation2 + $0xb0] sm:$0xf] %v8200_v10  ;;  %2551 = vst [vmem:[#allocation2 + $0xb4] sm:$0xf] %v8200_v10  ;;  %v9075_v45 = vld [vmem:[#allocation2 + $0x7c] sm:$0xf] }
 0x10f   :  { %2552 = vst [vmem:[#allocation2 + $0xb8] sm:$0xf] %v8200_v10  ;;  %2553 = vst [vmem:[#allocation2 + $0xbc] sm:$0xf] %v8200_v10  ;;  %7442 = vmatpush3.bf16.msra.mxu0 %v8095_v20  ;;  %v9080_v51 = vrot.slane %v2731_v41, 11  ;;  %v9082_v52 = vrot.slane %v2705_v43, 11  ;;  %v9094_v18 = vor.u32 %v2700_v49, %v2699_v47 }
 0x110   :  { %2554 = vst [vmem:[#allocation2 + $0xc0] sm:$0xf] %v8200_v10  ;;  %2555 = vst [vmem:[#allocation2 + $0xc4] sm:$0xf] %v8200_v10  ;;  %v9044_v19 = vpop.f32.mrb[0].mxu1  ;;  %7443 = vmatprep.subr.bf16.mxu0 %v8098_v25  ;;  %v2801_v55 = vshrl.u32 %v9075_v45, 16 }
 0x111   :  { %2556 = vst [vmem:[#allocation2 + $0xc8] sm:$0xf] %v8200_v10  ;;  %2557 = vst [vmem:[#allocation2 + $0xcc] sm:$0xf] %v8200_v10  ;;  %v9049_v21 = vpop.f32.mrb[1].mxu1  ;;  %v9085_v56 = vrot.slane %v2718_v5, 11 }
 0x112   :  { %2558 = vst [vmem:[#allocation2 + $0xd0] sm:$0xf] %v8200_v10  ;;  %2559 = vst [vmem:[#allocation2 + $0xd4] sm:$0xf] %v8200_v10  ;;  %v9051_v22 = vpop.f32.mrb[2].mxu1  ;;  %v9087_v58 = vrot.slane %v2744_v44, 11 }
 0x113   :  { %2560 = vst [vmem:[#allocation2 + $0xd8] sm:$0xf] %v8200_v10  ;;  %2561 = vst [vmem:[#allocation2 + $0xdc] sm:$0xf] %v8200_v10  ;;  %v9053_v23 = vpop.f32.mrb[3].mxu1  ;;  %7444 = vmatpush3.bf16.msra.mxu0 %v8098_v25  ;;  %v9089_v63 = vrot.slane %v3521_v46, 4 }
 0x114   :  { %2562 = vst [vmem:[#allocation2 + $0xe0] sm:$0xf] %v8200_v10  ;;  %2563 = vst [vmem:[#allocation2 + $0xe4] sm:$0xf] %v8200_v10  ;;  %v2666_v2 = vld [vmem:[#allocation2 + $0x3c] sm:$0x8] }
 0x115   :  { %2564 = vst [vmem:[#allocation2 + $0xe8] sm:$0xf] %v8200_v10  ;;  %2565 = vst [vmem:[#allocation2 + $0xec] sm:$0xf] %v8200_v10  ;;  %v2668_v53 = vld [vmem:[#allocation2 + $0x48] sm:$0x8] }
 0x116   :  { %v2670_v54 = vld [vmem:[#allocation2 + $0x54] sm:$0x8]  ;;  %v2672_v59 = vld [vmem:[#allocation2 + $0x78] sm:$0x8]  ;;  %v3485_v60 = vld [vmem:[#allocation2 + $0x14] sm:$0x1] }
 0x117   :  { %v2674_v61 = vld [vmem:[#allocation2 + $0x84] sm:$0x8]  ;;  %v2678_v62 = vld [vmem:[#allocation2 + $0x9c] sm:$0x8]  ;;  %v9091_v0 = vrot.slane %v3524_v48, 5  ;;  %v2757_v1 = vshrl.u32 %v2666_v2, 16  ;;  %vm9123_vm7 = vmor %vm2688_vm5, %vm2689_vm6 }
 0x118   :  { %v2770_v4 = vshrl.u32 %v2668_v53, 16  ;;  %v2783_v6 = vshrl.u32 %v2670_v54, 16  ;;  %v2804_v8 = vshll.u32 %v9075_v45, 16  ;;  %v2676_v9 = vld [vmem:[#allocation2 + $0x90] sm:$0x8]  ;;  %v2803_v10 = vrot.slane %v2801_v55, 7 }
 0x119   :  { %v2796_v12 = vshrl.u32 %v2672_v59, 16  ;;  %v3487_v13 = vld [vmem:[#allocation2 + $0x20] sm:$0x1]  ;;  %v3489_v14 = vld [vmem:[#allocation2 + $0x2c] sm:$0x1]  ;;  %v2809_v15 = vshrl.u32 %v2674_v61, 16 }
 0x11a   :  { %v2835_v7 = vshrl.u32 %v2678_v62, 16  ;;  %v2680_v16 = vld [vmem:[#allocation2 + $0xa8] sm:$0x8]  ;;  %v3498_v17 = vld [vmem:[#allocation2 + $0x7c] sm:$0xf]  ;;  %v2822_v20 = vshrl.u32 %v2676_v9, 16  ;;  %v9111_v43 = vor.u32 %v2804_v8, %v2803_v10 }
 0x11b   :  { %v3538_v25 = vshll.u32 %v3485_v60, 16  ;;  %v2682_v30 = vld [vmem:[#allocation2 + $0xb4] sm:$0x8]  ;;  %v2684_v31 = vld [vmem:[#allocation2 + $0xc0] sm:$0x8]  ;;  %v9096_v32 = vrot.slane %v2757_v1, 11 }
 0x11c   :  { %v9098_v34 = vrot.slane %v2783_v6, 11  ;;  %v3552_v35 = vshll.u32 %v3487_v13, 16  ;;  %v3566_v37 = vshll.u32 %v3489_v14, 16  ;;  %v9100_v38 = vld [vmem:[#allocation2 + $0xc] sm:$0x8]  ;;  %v9102_v3 = vrot.slane %v2770_v4, 11 }
 0x11d   :  { %9940 = vst [vmem:[#allocation6_spill] sm:$0xff] %v9100_v38  ;;  %v2848_v11 = vshrl.u32 %v2680_v16, 16  ;;  %v2686_v36 = vld [vmem:[#allocation2 + $0xcc] sm:$0x8]  ;;  %v3627_v39 = vshrl.u32 %v3498_v17, 16  ;;  %v3630_v40 = vshll.u32 %v3498_v17, 16 }
 0x11e   :  { %v9107_v41 = vld [vmem:[%s9927_s2] ss:$0 sm:$0xff]  ;;  %v9109_v42 = vrot.slane %v2796_v12, 11  ;;  %v2861_v5 = vshrl.u32 %v2682_v30, 16  ;;  %v2874_v44 = vshrl.u32 %v2684_v31, 16  ;;  %v9113_v46 = vrot.slane %v2809_v15, 11 }
 0x11f   :  { %v9115_v48 = vrot.slane %v2822_v20, 11  ;;  %v9117_v47 = vrot.slane %v2835_v7, 11  ;;  %v9119_v49 = vrot.slane %v3538_v25, 5  ;;  %v3491_v2 = vld [vmem:[#allocation2 + $0x38] sm:$0x1]  ;;  %v2887_v55 = vshrl.u32 %v2686_v36, 16 }
 0x120   :  { %v9127_v59 = vrot.slane %v3552_v35, 5  ;;  %v9129_v60 = vrot.slane %v3566_v37, 5  ;;  %v9133_v4 = vrot.slane %v2848_v11, 11  ;;  %v3493_v6 = vld [vmem:[#allocation2 + $0x44] sm:$0x1]  ;;  %v3629_v8 = vrot.slane %v3627_v39, 4 }
 0x121   :  { %v3632_v9 = vrot.slane %v3630_v40, 5  ;;  %v9136_v13 = vrot.slane %v2861_v5, 11  ;;  %v9138_v14 = vrot.slane %v2874_v44, 11  ;;  %v3580_v15 = vshll.u32 %v3491_v2, 16  ;;  %v3499_v7 = vld [vmem:[#allocation2 + $0x80] sm:$0x1] }
 0x122   :  { %9943 = vst [vmem:[#allocation7_spill] sm:$0xff] %v9127_v59  ;;  %9944 = vst [vmem:[#allocation8_spill] sm:$0xff] %v9129_v60  ;;  %v3495_v31 = vld [vmem:[#allocation2 + $0x50] sm:$0x1]  ;;  %v3497_v35 = vld [vmem:[#allocation2 + $0x5c] sm:$0x1] }
 0x123   :  { %9945 = vst [vmem:[#allocation9_spill] sm:$0xff] %v9138_v14  ;;  %v3594_v39 = vshll.u32 %v3493_v6, 16  ;;  %v3501_v40 = vld [vmem:[#allocation2 + $0x8c] sm:$0x1]  ;;  %v3505_v5 = vld [vmem:[#allocation2 + $0xa4] sm:$0x1] }
 0x124   :  { %v3608_v30 = vshll.u32 %v3495_v31, 16  ;;  %v3622_v25 = vshll.u32 %v3497_v35, 16  ;;  %v9154_v38 = vrot.slane %v2887_v55, 11  ;;  %v3650_v60 = vshll.u32 %v3501_v40, 16  ;;  %v3509_v36 = vld [vmem:[#allocation2 + $0xbc] sm:$0x1] }
 0x125   :  { %v3678_v59 = vshll.u32 %v3505_v5, 16  ;;  %v3706_v40 = vshll.u32 %v3509_v36, 16 }
 0x14e   :  { %v9064_v26 = vpop.f32.mrb[4].mxu1 }
 0x14f   :  { %v9066_v27 = vpop.f32.mrb[5].mxu1 }
 0x150   :  { %v9068_v28 = vpop.f32.mrb[6].mxu1 }
 0x151   :  { %v9070_v29 = vpop.f32.mrb[7].mxu1 }
 0x1c9   :  { %v7415_v53 = vpop.f32.mrb[0].mxu0 }
 0x1ca   :  { %v2468_v62 = vadd.f32 %v7415_v53, %v9107_v41  ;;  %v2380_v1 = vpop.f32.mrb[1].mxu0  ;;  %v3633_v53 = vor.u32 %v3632_v9, %v3629_v8  ;;  %v9158_v8 = vrot.slane %v3594_v39, 5  ;;  %v9170_v39 = vrot.slane %v3622_v25, 5 }
 0x1cb   :  { %v2466_v10 = vadd.f32 %v9107_v41, %v2380_v1  ;;  %v7416_v12 = vpop.f32.mrb[2].mxu0  ;;  %v3503_v1 = vld [vmem:[#allocation2 + $0x98] sm:$0x1] }
 0x1cc   :  { %v2484_v16 = vmax.f32 %v2468_v62, 0.0  ;;  %v2469_v17 = vadd.f32 %v7416_v12, %v9107_v41  ;;  %v2383_v20 = vpop.f32.mrb[3].mxu0  ;;  %v3636_v62 = vshll.u32 %v3499_v7, 16  ;;  %v3664_v9 = vshll.u32 %v3503_v1, 16 }
 0x1cd   :  { %v2482_v37 = vmax.f32 %v2466_v10, 0.0  ;;  %v2467_v11 = vadd.f32 %v9107_v41, %v2383_v20  ;;  %v3507_v10 = vld [vmem:[#allocation2 + $0xb0] sm:$0x1]  ;;  %v9161_v31 = vrot.slane %v3633_v53, 4  ;;  %v9175_v53 = vrot.slane %v3678_v59, 5 }
 0x1ce   :  { %v6972_v44 = vpack.c.bf16 %v2484_v16, %v2484_v16  ;;  %v2485_v2 = vmax.f32 %v2469_v17, 0.0  ;;  %v9156_v16 = vrot.slane %v3580_v15, 5  ;;  %v9163_v35 = vrot.slane %v3636_v62, 5  ;;  %v9177_v62 = vld [vmem:[#allocation2 + $0xd4] sm:$0x1] }
 0x1cf   :  { %v6970_v12 = vpack.c.bf16 %v2482_v37, %v2482_v37  ;;  %v2483_v61 = vmax.f32 %v2467_v11, 0.0  ;;  %v3692_v55 = vshll.u32 %v3507_v10, 16  ;;  %v9165_v37 = vld [vmem:[#allocation2 + $0x18] sm:$0x8]  ;;  %v9168_v15 = vrot.slane %v3608_v30, 5  ;;  %9948 = vst [vmem:[#allocation12_spill] sm:$0xff] %v9175_v53 }
 0x1d0   :  { %2625 = vst [vmem:[#allocation2 + $0x28] sm:$0xf] %v6972_v44  ;;  %v6973_v20 = vpack.c.bf16 %v2485_v2, %v2485_v2  ;;  %9946 = vst [vmem:[#allocation10_spill] sm:$0xff] %v9163_v35  ;;  %v9173_v2 = vrot.slane %v3650_v60, 5  ;;  %v9180_v10 = vrot.slane %v3664_v9, 5 }
 0x1d1   :  { %2623 = vst [vmem:[#allocation2 + $0x10] sm:$0xf] %v6970_v12  ;;  %v6971_v6 = vpack.c.bf16 %v2483_v61, %v2483_v61  ;;  %v7419_v14 = vpop.f32.mrb[4].mxu0  ;;  %9947 = vst [vmem:[#allocation11_spill] sm:$0xff] %v9165_v37  ;;  %v9182_v30 = vld [vmem:[#allocation2 + $0xc8] sm:$0x1] }
 0x1d2   :  { %2626 = vst [vmem:[#allocation2 + $0x34] sm:$0xf] %v6973_v20  ;;  %v2472_v7 = vadd.f32 %v7419_v14, %v9107_v41  ;;  %v2396_v17 = vpop.f32.mrb[5].mxu0  ;;  %9949 = vst [vmem:[#allocation13_spill] sm:$0xff] %v9177_v62  ;;  %v9189_v59 = vrot.slane %v3692_v55, 5 }
 0x1d3   :  { %2624 = vst [vmem:[#allocation2 + $0x1c] sm:$0xf] %v6971_v6  ;;  %v2470_v61 = vadd.f32 %v9107_v41, %v2396_v17  ;;  %v7420_v11 = vpop.f32.mrb[6].mxu0  ;;  %9950 = vst [vmem:[#allocation14_spill] sm:$0xff] %v9180_v10 }
 0x1d4   :  { %v2488_v5 = vmax.f32 %v2472_v7, 0.0  ;;  %v2473_v14 = vadd.f32 %v7420_v11, %v9107_v41  ;;  %v2399_v44 = vpop.f32.mrb[7].mxu0  ;;  %9951 = vst [vmem:[#allocation15_spill] sm:$0xff] %v9182_v30  ;;  %9952 = vst [vmem:[#allocation16_spill] sm:$0xff] %v9189_v59 }
 0x1d5   :  { %v2486_v1 = vmax.f32 %v2470_v61, 0.0  ;;  %v2471_v12 = vadd.f32 %v9107_v41, %v2399_v44  ;;  %v9191_v61 = vrot.slane %v3706_v40, 5 }
 0x1d6   :  { %v6976_v36 = vpack.c.bf16 %v2488_v5, %v2488_v5  ;;  %v2489_v20 = vmax.f32 %v2473_v14, 0.0 }
 0x1d7   :  { %v6974_v6 = vpack.c.bf16 %v2486_v1, %v2486_v1  ;;  %v2487_v7 = vmax.f32 %v2471_v12, 0.0  ;;  %v2663_v17 = vld [vmem:[#allocation2 + $0x28] sm:$0xf]  ;;  %9953 = vst [vmem:[#allocation17_spill] sm:$0xff] %v9191_v61 }
 0x1d8   :  { %2629 = vst [vmem:[#allocation2 + $0x58] sm:$0xf] %v6976_v36  ;;  %v6977_v11 = vpack.c.bf16 %v2489_v20, %v2489_v20  ;;  %v2659_v44 = vld [vmem:[#allocation2 + $0x10] sm:$0xf]  ;;  %v2736_v25 = vshrl.u32 %v2663_v17, 16  ;;  %v2739_v5 = vshll.u32 %v2663_v17, 16 }
 0x1d9   :  { %2627 = vst [vmem:[#allocation2 + $0x40] sm:$0xf] %v6974_v6  ;;  %v6975_v53 = vpack.c.bf16 %v2487_v7, %v2487_v7  ;;  %v7423_v37 = vpop.f32.mrb[8].mxu0  ;;  %v2710_v60 = vshrl.u32 %v2659_v44, 16  ;;  %v2713_v55 = vshll.u32 %v2659_v44, 16  ;;  %v6697_v1 = vcombine.low %v9072_v33, %v2659_v44 }
 0x1da   :  { %v9196_v12 = vld [vmem:[#allocation2 + $0x34] sm:$0xf]  ;;  %2630 = vst [vmem:[#allocation2 + $0x64] sm:$0xf] %v6977_v11  ;;  %v7737_v40 = vadd.f32 %v7423_v37, %v9044_v19  ;;  %v2412_v9 = vpop.f32.mrb[9].mxu0  ;;  %v2738_v20 = vrot.slane %v2736_v25, 7 }
 0x1db   :  { %v2661_v36 = vld [vmem:[#allocation2 + $0x1c] sm:$0xf]  ;;  %v2749_v61 = vshrl.u32 %v9196_v12, 16  ;;  %v2752_v59 = vshll.u32 %v9196_v12, 16  ;;  %2628 = vst [vmem:[#allocation2 + $0x4c] sm:$0xf] %v6975_v53  ;;  %v7738_v6 = vadd.f32 %v2412_v9, %v9049_v21  ;;  %7495 = vmatprep.mubr.bf16.mxu1 %v6697_v1 }
 0x1dc   :  { %v7424_v7 = vpop.f32.mrb[10].mxu0  ;;  %v2712_v14 = vrot.slane %v2710_v60, 7  ;;  %v2723_v30 = vshrl.u32 %v2661_v36, 16  ;;  %v2726_v33 = vshll.u32 %v2661_v36, 16  ;;  %v2476_v44 = vadd.f32 %v7737_v40, %v9107_v41  ;;  %v8100_v25 = vld [vmem:[%s9928_s3 + $0x88] sm:$0xff]  }
 0x1dd   :  { %v7739_v11 = vadd.f32 %v7424_v7, %v9051_v22  ;;  %v2415_v19 = vpop.f32.mrb[11].mxu0  ;;  %v6698_v37 = vcombine.low %v2661_v36, %v2663_v17  ;;  %v2751_v62 = vrot.slane %v2749_v61, 7  ;;  %v2474_v53 = vadd.f32 %v7738_v6, %v9107_v41  ;;  %v5767_v54 = vld [vmem:[#allocation2 + $0x1c] sm:$0xf] }
 0x1de   :  { %v7740_v21 = vadd.f32 %v2415_v19, %v9053_v23  ;;  %v2725_v9 = vrot.slane %v2723_v30, 7  ;;  %v2715_v60 = vor.u32 %v2713_v55, %v2712_v14  ;;  %v2492_v1 = vmax.f32 %v2476_v44, 0.0 }
 0x1df   :  { %v2477_v10 = vadd.f32 %v7739_v11, %v9107_v41  ;;  %7496 = vmatmul.mubr.bf16.vlgmr.msra.gmra.mrb[8].mxu1 %v6698_v37  ;;  %v2741_v40 = vor.u32 %v2739_v5, %v2738_v20  ;;  %v9210_v35 = vor.u32 %v2752_v59, %v2751_v62  ;;  %v2490_v22 = vmax.f32 %v2474_v53, 0.0  ;;  %v2671_v11 = vld [vmem:[#allocation2 + $0x58] sm:$0xf] }
 0x1e0   :  { %v2475_v17 = vadd.f32 %v7740_v21, %v9107_v41  ;;  %7512 = vmatpush3.bf16.msra.mxu1 %v9058_v24  ;;  %v2716_v61 = vsel %vm9123_vm7, %v9082_v52, %v2715_v60  ;;  %v2728_v36 = vor.u32 %v2726_v33, %v2725_v9  ;;  %v6980_v23 = vpack.c.bf16 %v2492_v1, %v2492_v1  ;;  %v2667_v62 = vld [vmem:[#allocation2 + $0x40] sm:$0xf]  ;;  %v8102_v24 = vld [vmem:[%s9928_s3 + $0x90] sm:$0xff]  }
 0x1e1   :  { %v2493_v30 = vmax.f32 %v2477_v10, 0.0  ;;  %v9954_v14 = vsel %vm9123_vm7, %v9078_v50, %v9094_v18  ;;  %7513 = vmatprep.subr.bf16.mxu1 %v8100_v25  ;;  %v2742_v59 = vsel %vm9123_vm7, %v9080_v51, %v2741_v40  ;;  %v6978_v52 = vpack.c.bf16 %v2490_v22, %v2490_v22  ;;  %v7427_v20 = vpop.f32.mrb[12].mxu0 }
 0x1e2   :  { %v6649_v5 = vcombine.low %v9954_v14, %v2716_v61  ;;  %v2491_v55 = vmax.f32 %v2475_v17, 0.0  ;;  %v2762_v10 = vshrl.u32 %v2667_v62, 16  ;;  %v2765_v6 = vshll.u32 %v2667_v62, 16  ;;  %2633 = vst [vmem:[#allocation2 + $0xa0] sm:$0xf] %v6980_v23  ;;  %v2428_v18 = vpop.f32.mrb[13].mxu0 }
 0x1e3   :  { %v6981_v7 = vpack.c.bf16 %v2493_v30, %v2493_v30  ;;  %v7741_v50 = vadd.f32 %v7427_v20, %v9064_v26  ;;  %v6699_v33 = vcombine.low %v9196_v12, %v2667_v62  ;;  %v2729_v51 = vsel %vm9123_vm7, %v9085_v56, %v2728_v36  ;;  %v2669_v44 = vld [vmem:[#allocation2 + $0x4c] sm:$0xf]  ;;  %2631 = vst [vmem:[#allocation2 + $0x88] sm:$0xf] %v6978_v52  ;;  %v7428_v53 = vpop.f32.mrb[14].mxu0  ;;  %v8103_v56 = vld [vmem:[%s9928_s3 + $0x98] sm:$0xff]  }
 0x1e4   :  { %7445 = vmatprep.mubr.bf16.mxu0 %v6649_v5  ;;  %v6979_v19 = vpack.c.bf16 %v2491_v55, %v2491_v55  ;;  %v7742_v37 = vadd.f32 %v2428_v18, %v9066_v27  ;;  %v2764_v21 = vrot.slane %v2762_v10, 7  ;;  %v6650_v9 = vcombine.low %v2729_v51, %v2742_v59  ;;  %7514 = vmatpush3.bf16.msra.mxu1 %v8100_v25  ;;  %v2431_v12 = vpop.f32.mrb[15].mxu0  ;;  %v9242_v30 = vld [vmem:[#allocation2 + $0x10] sm:$0xf]  ;;  %v8106_v10 = vld [vmem:[%s9928_s3 + $0xa0] sm:$0xff]  }
 0x1e5   :  { %2634 = vst [vmem:[#allocation2 + $0xac] sm:$0xf] %v6981_v7  ;;  %v2480_v26 = vadd.f32 %v7741_v50, %v9107_v41  ;;  %v7743_v60 = vadd.f32 %v7428_v53, %v9068_v28  ;;  %7499 = vmatprep.mubr.bf16.mxu1 %v6699_v33  ;;  %v2775_v1 = vshrl.u32 %v2669_v44, 16  ;;  %v2778_v40 = vshll.u32 %v2669_v44, 16  ;;  %7515 = vmatprep.subr.bf16.mxu1 %v8102_v24  ;;  %v8107_v53 = vld [vmem:[%s9928_s3 + $0xa8] sm:$0xff]  }
 0x1e6   :  { %2632 = vst [vmem:[#allocation2 + $0x94] sm:$0xf] %v6979_v19  ;;  %v2478_v27 = vadd.f32 %v7742_v37, %v9107_v41  ;;  %v7744_v22 = vadd.f32 %v2431_v12, %v9070_v29  ;;  %7446 = vmatmul.mubr.bf16.vlgmr.msra.gmra.mrb[16].mxu0 %v6650_v9  ;;  %v2788_v25 = vshrl.u32 %v2671_v11, 16  ;;  %v2791_v17 = vshll.u32 %v2671_v11, 16  ;;  %v9266_v12 = vld [vmem:[#allocation2 + $0x28] sm:$0xf] }
 0x1e7   :  { %v2496_v61 = vmax.f32 %v2480_v26, 0.0  ;;  %v2481_v28 = vadd.f32 %v7743_v60, %v9107_v41  ;;  %v2777_v36 = vrot.slane %v2775_v1, 7  ;;  %v6700_v23 = vcombine.low %v2669_v44, %v2671_v11 }
 0x1e8   :  { %v2494_v14 = vmax.f32 %v2478_v27, 0.0  ;;  %v2479_v5 = vadd.f32 %v7744_v22, %v9107_v41  ;;  %v2790_v62 = vrot.slane %v2788_v25, 7  ;;  %7516 = vmatpush3.bf16.msra.mxu1 %v8102_v24  ;;  %v2755_v29 = vsel %vm9123_vm7, %v9087_v58, %v9210_v35  ;;  %v3486_v27 = vld [vmem:[#allocation2 + $0x1c] sm:$0xf] }
 0x1e9   :  { %v6984_v59 = vpack.c.bf16 %v2496_v61, %v2496_v61  ;;  %v2497_v52 = vmax.f32 %v2481_v28, 0.0  ;;  %7500 = vmatmul.mubr.bf16.gmra.mrb[12].mxu1 %v6700_v23  ;;  %v2767_v55 = vor.u32 %v2765_v6, %v2764_v21  ;;  %7517 = vmatprep.subr.bf16.mxu1 %v8103_v56  ;;  %v2780_v20 = vor.u32 %v2778_v40, %v2777_v36  ;;  %v2679_v18 = vld [vmem:[#allocation2 + $0xa0] sm:$0xf] }
 0x1ea   :  { %v6982_v7 = vpack.c.bf16 %v2494_v14, %v2494_v14  ;;  %v2495_v50 = vmax.f32 %v2479_v5, 0.0  ;;  %v2793_v41 = vor.u32 %v2791_v17, %v2790_v62  ;;  %v3529_v24 = vshrl.u32 %v9242_v30, 16  ;;  %v2675_v6 = vld [vmem:[#allocation2 + $0x88] sm:$0xf]  ;;  %v8110_v5 = vld [vmem:[%s9928_s3 + $0xb0] sm:$0xff]  }
 0x1eb   :  { %2637 = vst [vmem:[#allocation2 + $0xd0] sm:$0xf] %v6984_v59  ;;  %v6985_v33 = vpack.c.bf16 %v2497_v52, %v2497_v52  ;;  %v2768_v58 = vsel %vm9123_vm7, %v9096_v32, %v2767_v55  ;;  %v2781_v35 = vsel %vm9123_vm7, %v9102_v3, %v2780_v20  ;;  %v2840_v51 = vshrl.u32 %v2679_v18, 16 }
 0x1ec   :  { %2635 = vst [vmem:[#allocation2 + $0xb8] sm:$0xf] %v6982_v7  ;;  %v6983_v44 = vpack.c.bf16 %v2495_v50, %v2495_v50  ;;  %v6651_v11 = vcombine.low %v2755_v29, %v2768_v58  ;;  %v2794_v19 = vsel %vm9123_vm7, %v9098_v34, %v2793_v41  ;;  %7518 = vmatpush3.bf16.msra.mxu1 %v8103_v56  ;;  %v2814_v37 = vshrl.u32 %v2675_v6, 16  ;;  %v2681_v32 = vld [vmem:[#allocation2 + $0xac] sm:$0xf] }
 0x1ed   :  { %2638 = vst [vmem:[#allocation2 + $0xdc] sm:$0xf] %v6985_v33  ;;  %v6652_v21 = vcombine.low %v2781_v35, %v2794_v19  ;;  %v2817_v9 = vshll.u32 %v2675_v6, 16  ;;  %v6701_v3 = vcombine.low %v9075_v45, %v2675_v6  ;;  %v2677_v26 = vld [vmem:[#allocation2 + $0x94] sm:$0xf]  ;;  %v2842_v60 = vrot.slane %v2840_v51, 7  ;;  %7519 = vmatprep.subr.bf16.mxu1 %v8106_v10 }
 0x1ee   :  { %2636 = vst [vmem:[#allocation2 + $0xc4] sm:$0xf] %v6983_v44  ;;  %7449 = vmatprep.mubr.bf16.mxu0 %v6651_v11  ;;  %v2816_v34 = vrot.slane %v2814_v37, 7  ;;  %v2827_v1 = vshrl.u32 %v2677_v26, 16  ;;  %v2830_v40 = vshll.u32 %v2677_v26, 16  ;;  %v2843_v56 = vshll.u32 %v2679_v18, 16 }
 0x1ef   :  { %7450 = vmatmul.mubr.bf16.gmra.mrb[20].mxu0 %v6652_v21  ;;  %7503 = vmatprep.mubr.bf16.mxu1 %v6701_v3  ;;  %v6702_v22 = vcombine.low %v2677_v26, %v2679_v18  ;;  %v2853_v25 = vshrl.u32 %v2681_v32, 16  ;;  %v2856_v17 = vshll.u32 %v2681_v32, 16  ;;  %v3531_v61 = vrot.slane %v3529_v24, 4 }
 0x1f0   :  { %v2829_v28 = vrot.slane %v2827_v1, 7  ;;  %7520 = vmatpush3.bf16.msra.mxu1 %v8106_v10  ;;  %v2819_v45 = vor.u32 %v2817_v9, %v2816_v34  ;;  %v2845_v36 = vor.u32 %v2843_v56, %v2842_v60  ;;  %v3532_v23 = vshll.u32 %v9242_v30, 16 }
 0x1f1   :  { %7504 = vmatmul.mubr.bf16.gmra.mrb[16].mxu1 %v6702_v22  ;;  %7521 = vmatprep.subr.bf16.mxu1 %v8107_v53  ;;  %v2855_v14 = vrot.slane %v2853_v25, 7  ;;  %v3543_v62 = vshrl.u32 %v3486_v27, 16  ;;  %v3546_v29 = vshll.u32 %v3486_v27, 16  ;;  %v3557_v59 = vshrl.u32 %v9266_v12, 16  ;;  %v8112_v22 = vld [vmem:[%s9928_s3 + $0xc0] sm:$0xff]  }
 0x1f2   :  { %v2820_v52 = vsel %vm9123_vm7, %v9113_v46, %v2819_v45  ;;  %v2832_v55 = vor.u32 %v2830_v40, %v2829_v28  ;;  %v2846_v30 = vsel %vm9123_vm7, %v9117_v47, %v2845_v36  ;;  %v2687_v20 = vld [vmem:[#allocation2 + $0xd0] sm:$0xf]  ;;  %v3534_v10 = vrot.slane %v3532_v23, 5  ;;  %v3492_v25 = vld [vmem:[#allocation2 + $0x40] sm:$0xf] }
 0x1f3   :  { %v9955_v7 = vsel %vm9123_vm7, %v9109_v42, %v9111_v43  ;;  %v2683_v41 = vld [vmem:[#allocation2 + $0xb8] sm:$0xf]  ;;  %v2892_v18 = vshrl.u32 %v2687_v20, 16  ;;  %v2895_v24 = vshll.u32 %v2687_v20, 16  ;;  %v2858_v33 = vor.u32 %v2856_v17, %v2855_v14 }
 0x1f4   :  { %v6653_v50 = vcombine.low %v9955_v7, %v2820_v52  ;;  %7522 = vmatpush3.bf16.msra.mxu1 %v8107_v53  ;;  %v2866_v58 = vshrl.u32 %v2683_v41, 16  ;;  %v2869_v46 = vshll.u32 %v2683_v41, 16  ;;  %v6703_v35 = vcombine.low %v2681_v32, %v2683_v41  ;;  %v8111_v42 = vld [vmem:[%s9928_s3 + $0xb8] sm:$0xff]   ;;  %v3500_v7 = vld [vmem:[#allocation2 + $0x88] sm:$0xf] }
 0x1f5   :  { %v2833_v47 = vsel %vm9123_vm7, %v9115_v48, %v2832_v55  ;;  %v2685_v51 = vld [vmem:[#allocation2 + $0xc4] sm:$0xf]  ;;  %v2894_v44 = vrot.slane %v2892_v18, 7  ;;  %7523 = vmatprep.subr.bf16.mxu1 %v8110_v5  ;;  %v3535_v11 = vor.u32 %v3534_v10, %v3531_v61  ;;  %v2859_v43 = vsel %vm9123_vm7, %v9133_v4, %v2858_v33  ;;  %v3490_v48 = vld [vmem:[#allocation2 + $0x34] sm:$0xf] }
 0x1f6   :  { %7453 = vmatprep.mubr.bf16.mxu0 %v6653_v50  ;;  %v6654_v6 = vcombine.low %v2833_v47, %v2846_v30  ;;  %v2868_v19 = vrot.slane %v2866_v58, 7  ;;  %7507 = vmatprep.mubr.bf16.mxu1 %v6703_v35  ;;  %v2879_v37 = vshrl.u32 %v2685_v51, 16  ;;  %v2882_v53 = vshll.u32 %v2685_v51, 16  ;;  %v3496_v52 = vld [vmem:[#allocation2 + $0x58] sm:$0xf]  ;;  %v9959_v47 = vld [vmem:[#allocation8_spill] sm:$0xff] }
 0x1f7   :  { %v6704_v32 = vcombine.low %v2685_v51, %v2687_v20  ;;  %v3536_v21 = vrot.slane %v3535_v11, 4  ;;  %v2897_v9 = vor.u32 %v2895_v24, %v2894_v44  ;;  %v3545_v3 = vrot.slane %v3543_v62, 4  ;;  %v9957_v62 = vld [vmem:[#allocation9_spill] sm:$0xff] }
 0x1f8   :  { %7454 = vmatmul.mubr.bf16.gmra.mrb[24].mxu0 %v6654_v6  ;;  %v3548_v26 = vrot.slane %v3546_v29, 5  ;;  %v2881_v60 = vrot.slane %v2879_v37, 7  ;;  %7524 = vmatpush3.bf16.msra.mxu1 %v8110_v5  ;;  %v2871_v34 = vor.u32 %v2869_v46, %v2868_v19  ;;  %v3559_v1 = vrot.slane %v3557_v59, 4  ;;  %v8113_v37 = vld [vmem:[%s9928_s3 + $0xc8] sm:$0xff]  }
 0x1f9   :  { %v3560_v40 = vshll.u32 %v9266_v12, 16  ;;  %7508 = vmatmul.mubr.bf16.gmra.mrb[20].mxu1 %v6704_v32  ;;  %v3541_v4 = vsel %vm8336_vm4, %v3536_v21, %v9119_v49  ;;  %7525 = vmatprep.subr.bf16.mxu1 %v8111_v42  ;;  %v2898_v56 = vsel %vm9123_vm7, %v9154_v38, %v2897_v9  ;;  %v3571_v17 = vshrl.u32 %v3490_v48, 16  ;;  %v3494_v38 = vld [vmem:[#allocation2 + $0x4c] sm:$0xf] }
 0x1fa   :  { %v3549_v27 = vor.u32 %v3548_v26, %v3545_v3  ;;  %v9956_v12 = vsel %vm8336_vm4, %v9089_v63, %v9091_v0  ;;  %v2872_v49 = vsel %vm9123_vm7, %v9136_v13, %v2871_v34  ;;  %v2884_v28 = vor.u32 %v2882_v53, %v2881_v60  ;;  %v9958_v13 = vld [vmem:[#allocation7_spill] sm:$0xff] }
 0x1fb   :  { %v6729_v61 = vcombine.low %v9956_v12, %v3541_v4  ;;  %v3562_v45 = vrot.slane %v3560_v40, 5  ;;  %v6655_v36 = vcombine.low %v2859_v43, %v2872_v49  ;;  %v3573_v14 = vrot.slane %v3571_v17, 4  ;;  %v3506_v17 = vld [vmem:[#allocation2 + $0xac] sm:$0xf]  ;;  %v8114_v49 = vld [vmem:[%s9928_s3 + $0xd0] sm:$0xff]  }
 0x1fc   :  { %v3550_v23 = vrot.slane %v3549_v27, 4  ;;  %v3574_v5 = vshll.u32 %v3490_v48, 16  ;;  %7526 = vmatpush3.bf16.msra.mxu1 %v8111_v42  ;;  %v2885_v29 = vsel %vm9123_vm7, %v9957_v62, %v2884_v28  ;;  %v3585_v63 = vshrl.u32 %v3492_v25, 16  ;;  %v3502_v42 = vld [vmem:[#allocation2 + $0x94] sm:$0xf] }
 0x1fd   :  { %7527 = vmatprep.mubr.bf16.mxu1 %v6729_v61  ;;  %v3563_v59 = vor.u32 %v3562_v45, %v3559_v1  ;;  %v3588_v0 = vshll.u32 %v3492_v25, 16  ;;  %7457 = vmatprep.mubr.bf16.mxu0 %v6655_v36  ;;  %v6656_v55 = vcombine.low %v2885_v29, %v2898_v56  ;;  %v3599_v10 = vshrl.u32 %v3494_v38, 16  ;;  %v3504_v48 = vld [vmem:[#allocation2 + $0xa0] sm:$0xf]  ;;  %v3508_v45 = vld [vmem:[#allocation2 + $0xb8] sm:$0xf] }
 0x1fe   :  { %v3555_v30 = vsel %vm8336_vm4, %v3550_v23, %v9958_v13  ;;  %7543 = vmatprep.subr.bf16.mxu1 %v8112_v22  ;;  %v3576_v20 = vrot.slane %v3574_v5, 5  ;;  %v3587_v41 = vrot.slane %v3585_v63, 4  ;;  %v3602_v24 = vshll.u32 %v3494_v38, 16  ;;  %v3510_v29 = vld [vmem:[#allocation2 + $0xc4] sm:$0xf] }
 0x1ff   :  { %v3564_v50 = vrot.slane %v3563_v59, 4  ;;  %v3590_v18 = vrot.slane %v3588_v0, 5  ;;  %v3601_v58 = vrot.slane %v3599_v10, 4  ;;  %v3613_v46 = vshrl.u32 %v3496_v52, 16  ;;  %v8115_v0 = vld [vmem:[%s9928_s3 + $0xd8] sm:$0xff]  }
 0x200   :  { %7458 = vmatmul.mubr.bf16.gmra.mrb[28].mxu0 %v6656_v55  ;;  %v3577_v33 = vor.u32 %v3576_v20, %v3573_v14  ;;  %v3616_v35 = vshll.u32 %v3496_v52, 16  ;;  %v3604_v44 = vrot.slane %v3602_v24, 5  ;;  %v3641_v11 = vshrl.u32 %v3500_v7, 16  ;;  %v3512_v10 = vld [vmem:[#allocation2 + $0xd0] sm:$0xf] }
 0x201   :  { %v3569_v6 = vsel %vm8336_vm4, %v3564_v50, %v9959_v47  ;;  %v3591_v51 = vor.u32 %v3590_v18, %v3587_v41  ;;  %v3615_v53 = vrot.slane %v3613_v46, 4  ;;  %v3644_v26 = vshll.u32 %v3500_v7, 16  ;;  %v9344_v18 = vld [vmem:[#allocation2 + $0x10] sm:$0xf] }
 0x202   :  { %v6730_v43 = vcombine.low %v3555_v30, %v3569_v6  ;;  %v3578_v19 = vrot.slane %v3577_v33, 4  ;;  %v3618_v32 = vrot.slane %v3616_v35, 5  ;;  %v3605_v9 = vor.u32 %v3604_v44, %v3601_v58  ;;  %v9960_v24 = vld [vmem:[#allocation10_spill] sm:$0xff] }
 0x203   :  { %v3592_v21 = vrot.slane %v3591_v51, 4  ;;  %v3643_v3 = vrot.slane %v3641_v11, 4  ;;  %v3655_v1 = vshrl.u32 %v3502_v42, 16  ;;  %v3658_v40 = vshll.u32 %v3502_v42, 16  ;;  %v9962_v46 = vld [vmem:[#allocation14_spill] sm:$0xff] }
 0x204   :  { %7528 = vmatmul.mubr.bf16.vlgmr.msra.gmra.mrb[8].mxu1 %v6730_v43  ;;  %v3583_v60 = vsel %vm8336_vm4, %v3578_v19, %v9156_v16  ;;  %v3619_v34 = vor.u32 %v3618_v32, %v3615_v53  ;;  %v3606_v56 = vrot.slane %v3605_v9, 4  ;;  %v3646_v27 = vrot.slane %v3644_v26, 5  ;;  %v3954_v51 = vld [vmem:[#allocation2 + $0x30] sm:$0x8]  ;;  %v8116_v43 = vld [vmem:[%s9928_s3 + $0xe0] sm:$0xff]   ;;  %v9963_v9 = vld [vmem:[#allocation11_spill] sm:$0xff] }
 0x205   :  { %v3597_v4 = vsel %vm8336_vm4, %v3592_v21, %v9158_v8  ;;  %7544 = vmatpush3.bf16.msra.mxu1 %v8112_v22  ;;  %v3669_v25 = vshrl.u32 %v3504_v48, 16  ;;  %v3657_v16 = vrot.slane %v3655_v1, 4  ;;  %v3660_v28 = vrot.slane %v3658_v40, 5  ;;  %v9357_v53 = vld [vmem:[#allocation2 + $0x1c] sm:$0xf] }
 0x206   :  { %v6731_v12 = vcombine.low %v3583_v60, %v3597_v4  ;;  %7545 = vmatprep.subr.bf16.mxu1 %v8113_v37  ;;  %v3620_v61 = vrot.slane %v3619_v34, 4  ;;  %v3611_v38 = vsel %vm8336_vm4, %v3606_v56, %v9168_v15  ;;  %v3647_v8 = vor.u32 %v3646_v27, %v3643_v3  ;;  %v9965_v34 = vld [vmem:[#allocation12_spill] sm:$0xff]  ;;  %v9966_v56 = vld [vmem:[#allocation13_spill] sm:$0xff] }
 0x207   :  { %v3671_v22 = vrot.slane %v3669_v25, 4  ;;  %v3672_v36 = vshll.u32 %v3504_v48, 16  ;;  %v3661_v14 = vor.u32 %v3660_v28, %v3657_v16  ;;  %v3683_v5 = vshrl.u32 %v3506_v17, 16 }
 0x208   :  { %7531 = vmatprep.mubr.bf16.mxu1 %v6731_v12  ;;  %v3625_v23 = vsel %vm8336_vm4, %v3620_v61, %v9170_v39  ;;  %v3686_v62 = vshll.u32 %v3506_v17, 16  ;;  %v3648_v63 = vrot.slane %v3647_v8, 4  ;;  %v3697_v52 = vshrl.u32 %v3508_v45, 16  ;;  %v9968_v61 = vld [vmem:[#allocation15_spill] sm:$0xff] }
 0x209   :  { %7546 = vmatpush3.bf16.msra.mxu1 %v8113_v37  ;;  %v6732_v59 = vcombine.low %v3611_v38, %v3625_v23  ;;  %v3674_v15 = vrot.slane %v3672_v36, 5  ;;  %v3662_v55 = vrot.slane %v3661_v14, 4  ;;  %v3685_v13 = vrot.slane %v3683_v5, 4  ;;  %v9970_v38 = vld [vmem:[#allocation16_spill] sm:$0xff]  ;;  %v8117_v23 = vld [vmem:[%s9928_s3 + $0xe8] sm:$0xff]  }
 0x20a   :  { %7547 = vmatprep.subr.bf16.mxu1 %v8114_v49  ;;  %v3688_v30 = vrot.slane %v3686_v62, 5  ;;  %v3700_v20 = vshll.u32 %v3508_v45, 16  ;;  %v3653_v39 = vsel %vm8336_vm4, %v3648_v63, %v9173_v2  ;;  %v3699_v50 = vrot.slane %v3697_v52, 4  ;;  %v9372_v45 = vld [vmem:[#allocation2 + $0x34] sm:$0xf] }
 0x20b   :  { %v3675_v7 = vor.u32 %v3674_v15, %v3671_v22  ;;  %v3711_v41 = vshrl.u32 %v3510_v29, 16  ;;  %v9961_v33 = vsel %vm8336_vm4, %v9161_v31, %v9960_v24  ;;  %v3667_v35 = vsel %vm8336_vm4, %v3662_v55, %v9962_v46  ;;  %v9971_v22 = vld [vmem:[#allocation17_spill] sm:$0xff]  ;;  %v3952_v62 = vld [vmem:[#allocation2 + $0x24] sm:$0x8]  ;;  %v9386_v52 = vld [vmem:[#allocation2 + $0x40] sm:$0xf] }
 0x20c   :  { %7532 = vmatmul.mubr.bf16.gmra.mrb[12].mxu1 %v6732_v59  ;;  %v6733_v58 = vcombine.low %v9961_v33, %v3653_v39  ;;  %v3689_v47 = vor.u32 %v3688_v30, %v3685_v13  ;;  %v3702_v6 = vrot.slane %v3700_v20, 5  ;;  %v3714_v11 = vshll.u32 %v3510_v29, 16  ;;  %v9383_v29 = vld [vmem:[#allocation2 + $0x28] sm:$0xf]  ;;  %v3956_v30 = vld [vmem:[#allocation2 + $0x3c] sm:$0x8] }
 0x20d   :  { %7548 = vmatpush3.bf16.msra.mxu1 %v8114_v49  ;;  %v3676_v2 = vrot.slane %v3675_v7, 4  ;;  %v3713_v44 = vrot.slane %v3711_v41, 4  ;;  %v3725_v42 = vshrl.u32 %v3512_v10, 16  ;;  %v3728_v37 = vshll.u32 %v3512_v10, 16  ;;  %v9390_v20 = vld [vmem:[#allocation2 + $0x4c] sm:$0xf] }
 0x20e   :  { %7535 = vmatprep.mubr.bf16.mxu1 %v6733_v58  ;;  %7549 = vmatprep.subr.bf16.mxu1 %v8115_v0  ;;  %v3690_v31 = vrot.slane %v3689_v47, 4  ;;  %v3703_v19 = vor.u32 %v3702_v6, %v3699_v50  ;;  %v3986_v32 = vshrl.u32 %v9344_v18, 16  ;;  %v3716_v48 = vrot.slane %v3714_v11, 5  ;;  %v3958_v50 = vld [vmem:[#allocation2 + $0x48] sm:$0x8]  ;;  %v8118_v24 = vld [vmem:[%s9928_s3 + $0xf0] sm:$0xff]  }
 0x20f   :  { %v3727_v21 = vrot.slane %v3725_v42, 4  ;;  %v9964_v3 = vshrl.u32 %v9963_v9, 16  ;;  %v4020_v60 = vshrl.u32 %v3954_v51, 16  ;;  %v3681_v1 = vsel %vm8336_vm4, %v3676_v2, %v9965_v34  ;;  %v3962_v41 = vld [vmem:[#allocation2 + $0x60] sm:$0x8]  ;;  %v9972_v33 = vld [vmem:[#allocation6_spill] sm:$0xff] }
 0x210   :  { %v3704_v40 = vrot.slane %v3703_v19, 4  ;;  %v3730_v4 = vrot.slane %v3728_v37, 5  ;;  %v9967_v27 = vshll.u32 %v9966_v56, 16  ;;  %v6734_v17 = vcombine.low %v3667_v35, %v3681_v1  ;;  %v9405_v19 = vld [vmem:[#allocation2 + $0x64] sm:$0xf]  ;;  %v8119_v34 = vld [vmem:[%s9928_s3 + $0xf8] sm:$0xff]  }
 0x211   :  { %v9362_v26 = vrot.slane %v9964_v3, 11  ;;  %7550 = vmatpush3.bf16.msra.mxu1 %v8115_v0  ;;  %v3717_v12 = vor.u32 %v3716_v48, %v3713_v44  ;;  %v9969_v49 = vshll.u32 %v9968_v61, 16  ;;  %v3999_v28 = vshrl.u32 %v9357_v53, 16  ;;  %v9410_v3 = vld [vmem:[#allocation2 + $0x94] sm:$0xf] }
 0x212   :  { %v3736_v25 = vrot.slane %v9967_v27, 5  ;;  %7551 = vmatprep.subr.bf16.mxu1 %v8116_v43  ;;  %v3695_v8 = vsel %vm8336_vm4, %v3690_v31, %v9970_v38  ;;  %v3709_v36 = vsel %vm8336_vm4, %v3704_v40, %v9971_v22  ;;  %v3731_v14 = vor.u32 %v3730_v4, %v3727_v21  ;;  %v9418_v4 = vld [vmem:[#allocation2 + $0x58] sm:$0xf] }
 0x213   :  { %v3722_v16 = vrot.slane %v9969_v49, 5  ;;  %v3988_v5 = vrot.slane %v3986_v32, 7  ;;  %v6735_v59 = vcombine.low %v3695_v8, %v3709_v36  ;;  %v3718_v63 = vrot.slane %v3717_v12, 4  ;;  %v9422_v12 = vld [vmem:[#allocation2 + $0x88] sm:$0xf] }
 0x214   :  { %v4001_v0 = vrot.slane %v3999_v28, 7  ;;  %v4002_v15 = vshll.u32 %v9357_v53, 16  ;;  %7536 = vmatmul.mubr.bf16.gmra.mrb[16].mxu1 %v6734_v17  ;;  %v3989_v55 = vshll.u32 %v9344_v18, 16  ;;  %v4025_v13 = vshrl.u32 %v9372_v45, 16  ;;  %v3960_v28 = vld [vmem:[#allocation2 + $0x54] sm:$0x8] }
 0x215   :  { %7539 = vmatprep.mubr.bf16.mxu1 %v6735_v59  ;;  %7552 = vmatpush3.bf16.msra.mxu1 %v8116_v43  ;;  %v3732_v10 = vrot.slane %v3731_v14, 4  ;;  %v4012_v7 = vshrl.u32 %v9383_v29, 16  ;;  %v9973_v58 = vshrl.u32 %v9972_v33, 16  ;;  %v4007_v47 = vshrl.u32 %v3952_v62, 16  ;;  %v3966_v14 = vld [vmem:[#allocation2 + $0x90] sm:$0x8] }
 0x216   :  { %v4004_v39 = vor.u32 %v4002_v15, %v4001_v0  ;;  %7553 = vmatprep.subr.bf16.mxu1 %v8117_v23  ;;  %v3991_v35 = vor.u32 %v3989_v55, %v3988_v5  ;;  %v4038_v6 = vshrl.u32 %v9386_v52, 16  ;;  %v3723_v51 = vsel %vm8336_vm4, %v3718_v63, %v3722_v16  ;;  %v8120_v5 = vld [vmem:[%s9928_s3 + $0x100] sm:$0xff]   ;;  %v3970_v0 = vld [vmem:[#allocation2 + $0xa8] sm:$0x8] }
 0x217   :  { %v6745_v46 = vrot.slane %v9973_v58, 11  ;;  %v6748_v2 = vrot.slane %v4020_v60, 11  ;;  %v4027_v44 = vrot.slane %v4025_v13, 7  ;;  %v4051_v11 = vshrl.u32 %v9390_v20, 16 }
 0x218   :  { %v4005_v42 = vsel %vm9123_vm7, %v9362_v26, %v4004_v39  ;;  %v4033_v43 = vshrl.u32 %v3956_v30, 16  ;;  %v4046_v31 = vshrl.u32 %v3958_v50, 16  ;;  %v4072_v37 = vshrl.u32 %v3962_v41, 16  ;;  %v9435_v41 = vld [vmem:[#allocation2 + $0xac] sm:$0xf] }
 0x219   :  { %7554 = vmatpush3.bf16.msra.mxu1 %v8117_v23  ;;  %v3737_v32 = vsel %vm8336_vm4, %v3732_v10, %v3736_v25  ;;  %v4014_v48 = vrot.slane %v4012_v7, 7  ;;  %v4028_v21 = vshll.u32 %v9372_v45, 16  ;;  %v4053_v9 = vrot.slane %v4051_v11, 7  ;;  %v3964_v23 = vld [vmem:[#allocation2 + $0x84] sm:$0x8] }
 0x21a   :  { %v6736_v60 = vcombine.low %v3723_v51, %v3737_v32  ;;  %7555 = vmatprep.subr.bf16.mxu1 %v8118_v24  ;;  %v3992_v26 = vsel %vm9123_vm7, %v6745_v46, %v3991_v35  ;;  %v4040_v1 = vrot.slane %v4038_v6, 7  ;;  %v4054_v40 = vshll.u32 %v9390_v20, 16  ;;  %v9440_v35 = vld [vmem:[#allocation2 + $0xc4] sm:$0xf]  ;;  %v8121_v51 = vld [vmem:[%s9928_s3 + $0x108] sm:$0xff]  }
 0x21b   :  { %v6777_v56 = vcombine.low %v3992_v26, %v4005_v42  ;;  %v4015_v27 = vshll.u32 %v9383_v29, 16  ;;  %v4030_v25 = vor.u32 %v4028_v21, %v4027_v44  ;;  %v4077_v17 = vshrl.u32 %v9405_v19, 16  ;;  %v9448_v11 = vld [vmem:[#allocation2 + $0xa0] sm:$0xf]  ;;  %v9452_v32 = vld [vmem:[#allocation2 + $0xb8] sm:$0xf] }
 0x21c   :  { %7540 = vmatmul.mubr.bf16.gmra.mrb[20].mxu1 %v6736_v60  ;;  %v4041_v61 = vshll.u32 %v9386_v52, 16  ;;  %v6750_v49 = vrot.slane %v4046_v31, 11  ;;  %v4056_v16 = vor.u32 %v4054_v40, %v4053_v9  ;;  %v4103_v38 = vshrl.u32 %v9410_v3, 16  ;;  %v3968_v60 = vld [vmem:[#allocation2 + $0x9c] sm:$0x8] }
 0x21d   :  { %7556 = vmatpush3.bf16.msra.mxu1 %v8118_v24  ;;  %7559 = vmatprep.mubr.bf16.mxu1 %v6777_v56  ;;  %v6747_v8 = vrot.slane %v4007_v47, 11  ;;  %v4017_v22 = vor.u32 %v4015_v27, %v4014_v48  ;;  %v4064_v36 = vshrl.u32 %v9418_v4, 16  ;;  %v6749_v62 = vrot.slane %v4033_v43, 11  ;;  %v3974_v56 = vld [vmem:[#allocation2 + $0xc0] sm:$0x8]  ;;  %v8122_v27 = vld [vmem:[%s9928_s3 + $0x110] sm:$0xff]  }
 0x21e   :  { %7557 = vmatprep.subr.bf16.mxu1 %v8119_v34  ;;  %v4043_v59 = vor.u32 %v4041_v61, %v4040_v1  ;;  %v4090_v63 = vshrl.u32 %v9422_v12, 16  ;;  %v4031_v15 = vsel %vm9123_vm7, %v6748_v2, %v4030_v25  ;;  %v4059_v55 = vshrl.u32 %v3960_v28, 16  ;;  %v3972_v61 = vld [vmem:[#allocation2 + $0xb4] sm:$0x8] }
 0x21f   :  { %v6752_v13 = vrot.slane %v4072_v37, 11  ;;  %v4079_v30 = vrot.slane %v4077_v17, 7  ;;  %v4057_v10 = vsel %vm9123_vm7, %v6750_v49, %v4056_v16  ;;  %v4085_v39 = vshrl.u32 %v3964_v23, 16 }
 0x220   :  { %v4098_v7 = vshrl.u32 %v3966_v14, 16  ;;  %v4105_v50 = vrot.slane %v4103_v38, 7  ;;  %v4018_v24 = vsel %vm9123_vm7, %v6747_v8, %v4017_v22  ;;  %v4066_v33 = vrot.slane %v4064_v36, 7  ;;  %v9465_v14 = vld [vmem:[#allocation2 + $0xdc] sm:$0xf] }
 0x221   :  { %7558 = vmatpush3.bf16.msra.mxu1 %v8119_v34  ;;  %v4080_v58 = vshll.u32 %v9405_v19, 16  ;;  %v4124_v46 = vshrl.u32 %v3970_v0, 16  ;;  %v6778_v47 = vcombine.low %v4018_v24, %v4031_v15  ;;  %v4044_v6 = vsel %vm9123_vm7, %v6749_v62, %v4043_v59 }
 0x222   :  { %7575 = vmatprep.subr.bf16.mxu1 %v8120_v5  ;;  %v4092_v2 = vrot.slane %v4090_v63, 7  ;;  %v4106_v44 = vshll.u32 %v9410_v3, 16  ;;  %v6779_v42 = vcombine.low %v4044_v6, %v4057_v10  ;;  %v4067_v43 = vshll.u32 %v9418_v4, 16  ;;  %v9476_v10 = vld [vmem:[#allocation2 + $0xd0] sm:$0xf] }
 0x223   :  { %v4082_v31 = vor.u32 %v4080_v58, %v4079_v30  ;;  %v4129_v37 = vshrl.u32 %v9435_v41, 16  ;;  %v4093_v48 = vshll.u32 %v9422_v12, 16  ;;  %v6754_v21 = vrot.slane %v4098_v7, 11 }
 0x224   :  { %7560 = vmatmul.mubr.bf16.vlgmr.msra.gmra.mrb[8].mxu1 %v6778_v47  ;;  %v4108_v9 = vor.u32 %v4106_v44, %v4105_v50  ;;  %v4155_v26 = vshrl.u32 %v9440_v35, 16  ;;  %v6751_v34 = vrot.slane %v4059_v55, 11  ;;  %v4069_v1 = vor.u32 %v4067_v43, %v4066_v33  ;;  %v8123_v55 = vld [vmem:[%s9928_s3 + $0x118] sm:$0xff]   ;;  %v8124_v44 = vld [vmem:[%s9928_s3 + $0x120] sm:$0xff]  }
 0x225   :  { %7563 = vmatprep.mubr.bf16.mxu1 %v6779_v42  ;;  %7576 = vmatpush3.bf16.msra.mxu1 %v8120_v5  ;;  %v4116_v40 = vshrl.u32 %v9448_v11, 16  ;;  %v6753_v25 = vrot.slane %v4085_v39, 11  ;;  %v4095_v17 = vor.u32 %v4093_v48, %v4092_v2  ;;  %v4142_v49 = vshrl.u32 %v9452_v32, 16  ;;  %v3978_v47 = vld [vmem:[#allocation2 + $0xd8] sm:$0x8] }
 0x226   :  { %7577 = vmatprep.subr.bf16.mxu1 %v8121_v51  ;;  %v4083_v16 = vsel %vm9123_vm7, %v6752_v13, %v4082_v31  ;;  %v4111_v28 = vshrl.u32 %v3968_v60, 16  ;;  %v4131_v38 = vrot.slane %v4129_v37, 7  ;;  %v4109_v8 = vsel %vm9123_vm7, %v6754_v21, %v4108_v9  ;;  %v3976_v31 = vld [vmem:[#allocation2 + $0xcc] sm:$0x8] }
 0x227   :  { %v6756_v22 = vrot.slane %v4124_v46, 11  ;;  %v4150_v36 = vshrl.u32 %v3974_v56, 16  ;;  %v4157_v23 = vrot.slane %v4155_v26, 7  ;;  %v4070_v5 = vsel %vm9123_vm7, %v6751_v34, %v4069_v1 }
 0x228   :  { %v4118_v62 = vrot.slane %v4116_v40, 7  ;;  %v4132_v59 = vshll.u32 %v9435_v41, 16  ;;  %v4137_v63 = vshrl.u32 %v3972_v61, 16  ;;  %v6780_v0 = vcombine.low %v4070_v5, %v4083_v16 }
 0x229   :  { %7578 = vmatpush3.bf16.msra.mxu1 %v8121_v51  ;;  %v4096_v15 = vsel %vm9123_vm7, %v6753_v25, %v4095_v17  ;;  %v4144_v13 = vrot.slane %v4142_v49, 7  ;;  %v4158_v30 = vshll.u32 %v9440_v35, 16  ;;  %v4119_v7 = vshll.u32 %v9448_v11, 16 }
 0x22a   :  { %7579 = vmatprep.subr.bf16.mxu1 %v8122_v27  ;;  %v6781_v39 = vcombine.low %v4096_v15, %v4109_v8  ;;  %v4134_v50 = vor.u32 %v4132_v59, %v4131_v38  ;;  %v4181_v24 = vshrl.u32 %v9465_v14, 16  ;;  %v4145_v33 = vshll.u32 %v9452_v32, 16  ;;  %v8126_v38 = vld [vmem:[%s9928_s3 + $0x130] sm:$0xff]   ;;  %v4626_v15 = vld [vmem:[#allocation2 + $0x1c] sm:$0xf] }
 0x22b   :  { %v6758_v58 = vrot.slane %v4150_v36, 11  ;;  %v4160_v46 = vor.u32 %v4158_v30, %v4157_v23  ;;  %v6755_v6 = vrot.slane %v4111_v28, 11  ;;  %v4121_v51 = vor.u32 %v4119_v7, %v4118_v62  ;;  %v8128_v23 = vld [vmem:[%s9928_s3 + $0x138] sm:$0xff]   ;;  %v8130_v62 = vld [vmem:[%s9928_s3 + $0x140] sm:$0xff]   ;;  %v4629_v30 = vld [vmem:[#allocation2 + $0x2c] sm:$0x1] }
 0x22c   :  { %7564 = vmatmul.mubr.bf16.gmra.mrb[12].mxu1 %v6780_v0  ;;  %v4168_v2 = vshrl.u32 %v9476_v10, 16  ;;  %v6757_v42 = vrot.slane %v4137_v63, 11  ;;  %v4147_v43 = vor.u32 %v4145_v33, %v4144_v13  ;;  %v4135_v37 = vsel %vm9123_vm7, %v6756_v22, %v4134_v50  ;;  %v8132_v63 = vld [vmem:[%s9928_s3 + $0x148] sm:$0xff]   ;;  %v4625_v0 = vld [vmem:[#allocation2 + $0x14] sm:$0x1] }
 0x22d   :  { %7567 = vmatprep.mubr.bf16.mxu1 %v6781_v39  ;;  %7580 = vmatpush3.bf16.msra.mxu1 %v8122_v27  ;;  %v4176_v48 = vshrl.u32 %v3978_v47, 16  ;;  %v4183_v21 = vrot.slane %v4181_v24, 7  ;;  %v4161_v9 = vsel %vm9123_vm7, %v6758_v58, %v4160_v46  ;;  %v4122_v60 = vsel %vm9123_vm7, %v6755_v6, %v4121_v51  ;;  %v8125_v27 = vld [vmem:[%s9928_s3 + $0x128] sm:$0xff]   ;;  %v4631_v50 = vld [vmem:[#allocation2 + $0x38] sm:$0x1] }
 0x22e   :  { %7581 = vmatprep.subr.bf16.mxu1 %v8123_v55  ;;  %v4163_v26 = vshrl.u32 %v3976_v31, 16  ;;  %v4170_v34 = vrot.slane %v4168_v2, 7  ;;  %v4184_v1 = vshll.u32 %v9465_v14, 16  ;;  %v6782_v40 = vcombine.low %v4122_v60, %v4135_v37  ;;  %v8136_v58 = vld [vmem:[%s9928_s3 + $0x158] sm:$0xff]   ;;  %v4630_v46 = vld [vmem:[#allocation2 + $0x34] sm:$0xf] }
 0x22f   :  { %v4148_v56 = vsel %vm9123_vm7, %v6757_v42, %v4147_v43  ;;  %v4171_v17 = vshll.u32 %v9476_v10, 16  ;;  %v6760_v61 = vrot.slane %v4176_v48, 11  ;;  %v6809_v5 = vcombine.low %v9344_v18, %v9357_v53  ;;  %v4627_v53 = vld [vmem:[#allocation2 + $0x20] sm:$0x1]  ;;  %v9530_v6 = vld [vmem:[#allocation2 + $0x18] sm:$0x8] }
 0x230   :  { %v6783_v25 = vcombine.low %v4148_v56, %v4161_v9  ;;  %v4186_v49 = vor.u32 %v4184_v1, %v4183_v21  ;;  %v6759_v16 = vrot.slane %v4163_v26, 11  ;;  %v6810_v59 = vcombine.low %v9383_v29, %v9372_v45  ;;  %v8134_v45 = vld [vmem:[%s9928_s3 + $0x150] sm:$0xff]   ;;  %v4633_v42 = vld [vmem:[#allocation2 + $0x44] sm:$0x1]  ;;  %v4637_v43 = vld [vmem:[#allocation2 + $0x5c] sm:$0x1] }
 0x231   :  { %7582 = vmatpush3.bf16.msra.mxu1 %v8123_v55  ;;  %v4173_v28 = vor.u32 %v4171_v17, %v4170_v34  ;;  %v6811_v18 = vcombine.low %v9386_v52, %v9390_v20  ;;  %v4666_v55 = vshll.u32 %v4625_v0, 16  ;;  %v4624_v29 = vld [vmem:[#allocation2 + $0x10] sm:$0xf]  ;;  %v4680_v13 = vshll.u32 %v4627_v53, 16  ;;  %v4639_v37 = vld [vmem:[#allocation2 + $0x68] sm:$0x1] }
 0x232   :  { %7583 = vmatprep.subr.bf16.mxu1 %v8124_v44  ;;  %v4187_v8 = vsel %vm9123_vm7, %v6760_v61, %v4186_v49  ;;  %v4671_v39 = vshrl.u32 %v4626_v15, 16  ;;  %v4674_v7 = vshll.u32 %v4626_v15, 16  ;;  %v4657_v24 = vshrl.u32 %v4624_v29, 16  ;;  %v4634_v26 = vld [vmem:[#allocation2 + $0x4c] sm:$0xf] }
 0x233   :  { %v4174_v22 = vsel %vm9123_vm7, %v6759_v16, %v4173_v28  ;;  %v4660_v52 = vshll.u32 %v4624_v29, 16  ;;  %v9523_v20 = vrot.slane %v4666_v55, 5  ;;  %v6812_v33 = vcombine.low %v9418_v4, %v9405_v19  ;;  %v4628_v4 = vld [vmem:[#allocation2 + $0x28] sm:$0xf]  ;;  %v4635_v34 = vld [vmem:[#allocation2 + $0x50] sm:$0x1] }
 0x234   :  { %7568 = vmatmul.mubr.bf16.gmra.mrb[16].mxu1 %v6782_v40  ;;  %v6784_v36 = vcombine.low %v4174_v22, %v4187_v8  ;;  %v4694_v47 = vshll.u32 %v4629_v30, 16  ;;  %v6813_v51 = vcombine.low %v9422_v12, %v9410_v3  ;;  %v9534_v2 = vrot.slane %v4680_v13, 5  ;;  %v8138_v3 = vld [vmem:[%s9928_s3 + $0x160] sm:$0xff]   ;;  %v4636_v30 = vld [vmem:[#allocation2 + $0x58] sm:$0xf] }
 0x235   :  { %7571 = vmatprep.mubr.bf16.mxu1 %v6783_v25  ;;  %7584 = vmatpush3.bf16.msra.mxu1 %v8124_v44  ;;  %v4708_v44 = vshll.u32 %v4631_v50, 16  ;;  %v4673_v31 = vrot.slane %v4671_v39, 4  ;;  %v4676_v19 = vrot.slane %v4674_v7, 5  ;;  %v4659_v48 = vrot.slane %v4657_v24, 4  ;;  %v4632_v17 = vld [vmem:[#allocation2 + $0x40] sm:$0xf] }
 0x236   :  { %7585 = vmatprep.subr.bf16.mxu1 %v8125_v27  ;;  %v4662_v21 = vrot.slane %v4660_v52, 5  ;;  %v4699_v9 = vshrl.u32 %v4630_v46, 16  ;;  %v4702_v60 = vshll.u32 %v4630_v46, 16  ;;  %v9539_v12 = vrot.slane %v4694_v47, 5  ;;  %v4638_v55 = vld [vmem:[#allocation2 + $0x64] sm:$0xf] }
 0x237   :  { %v4750_v1 = vshll.u32 %v4637_v43, 16  ;;  %v5124_v40 = vshrl.u32 %v9530_v6, 16  ;;  %v4685_v56 = vshrl.u32 %v4628_v4, 16  ;;  %v9542_v25 = vrot.slane %v4708_v44, 5  ;;  %v8142_v39 = vld [vmem:[%s9928_s3 + $0x170] sm:$0xff]  }
 0x238   :  { %v4722_v61 = vshll.u32 %v4633_v42, 16  ;;  %v4677_v49 = vor.u32 %v4676_v19, %v4673_v31  ;;  %v4727_v16 = vshrl.u32 %v4634_v26, 16  ;;  %v4730_v28 = vshll.u32 %v4634_v26, 16  ;;  %v4642_v24 = vld [vmem:[#allocation2 + $0x94] sm:$0xf] }
 0x239   :  { %7586 = vmatpush3.bf16.msra.mxu1 %v8125_v27  ;;  %v4688_v27 = vshll.u32 %v4628_v4, 16  ;;  %v4663_v8 = vor.u32 %v4662_v21, %v4659_v48  ;;  %v4701_v22 = vrot.slane %v4699_v9, 4  ;;  %v9549_v0 = vrot.slane %v4750_v1, 5  ;;  %v4640_v47 = vld [vmem:[#allocation2 + $0x88] sm:$0xf] }
 0x23a   :  { %7587 = vmatprep.subr.bf16.mxu1 %v8126_v38  ;;  %v4687_v53 = vrot.slane %v4685_v56, 4  ;;  %v4678_v29 = vrot.slane %v4677_v49, 4  ;;  %v4732_v13 = vrot.slane %v4730_v28, 5  ;;  %v4758_v46 = vshll.u32 %v4638_v55, 16  ;;  %v9570_v26 = vld [vmem:[#allocation2 + $0xb0] sm:$0x1] }
 0x23b   :  { %v4690_v15 = vrot.slane %v4688_v27, 5  ;;  %v4664_v7 = vrot.slane %v4663_v8, 4  ;;  %v4741_v44 = vshrl.u32 %v4636_v30, 16  ;;  %v4744_v42 = vshll.u32 %v4636_v30, 16  ;;  %v4643_v27 = vld [vmem:[#allocation2 + $0x98] sm:$0x1] }
 0x23c   :  { %7572 = vmatmul.mubr.bf16.gmra.mrb[20].mxu1 %v6784_v36  ;;  %v4704_v36 = vrot.slane %v4702_v60, 5  ;;  %v4683_v31 = vsel %vm8336_vm4, %v4678_v29, %v9534_v2  ;;  %v4783_v4 = vshrl.u32 %v4642_v24, 16  ;;  %v6816_v48 = vcombine.low %v9476_v10, %v9465_v14  ;;  %v8143_v2 = vld [vmem:[%s9928_s3 + $0x178] sm:$0xff]   ;;  %v4646_v49 = vld [vmem:[#allocation2 + $0xac] sm:$0xf] }
 0x23d   :  { %7588 = vmatpush3.bf16.msra.mxu1 %v8126_v38  ;;  %7591 = vmatprep.mubr.bf16.mxu1 %v6809_v5  ;;  %v4764_v38 = vshll.u32 %v4639_v37, 16  ;;  %v6814_v5 = vcombine.low %v9448_v11, %v9435_v41  ;;  %v9555_v41 = vrot.slane %v4722_v61, 5  ;;  %v4729_v11 = vrot.slane %v4727_v16, 4  ;;  %v4644_v8 = vld [vmem:[#allocation2 + $0xa0] sm:$0xf] }
 0x23e   :  { %7589 = vmatprep.subr.bf16.mxu1 %v8128_v23  ;;  %v4786_v37 = vshll.u32 %v4642_v24, 16  ;;  %v4769_v9 = vshrl.u32 %v4640_v47, 16  ;;  %v4772_v60 = vshll.u32 %v4640_v47, 16  ;;  %v4760_v56 = vrot.slane %v4758_v46, 5  ;;  %v8145_v46 = vld [vmem:[%s9928_s3 + $0x188] sm:$0xff]  }
 0x23f   :  { %v9562_v50 = vrot.slane %v4764_v38, 5  ;;  %v4733_v19 = vor.u32 %v4732_v13, %v4729_v11  ;;  %v4743_v10 = vrot.slane %v4741_v44, 4  ;;  %v4746_v61 = vrot.slane %v4744_v42, 5 }
 0x240   :  { %v4785_v28 = vrot.slane %v4783_v4, 4  ;;  %v4788_v38 = vrot.slane %v4786_v37, 5  ;;  %v4800_v13 = vshll.u32 %v4644_v8, 16  ;;  %v4654_v37 = vld [vmem:[#allocation2 + $0xdc] sm:$0xf] }
 0x241   :  { %7590 = vmatpush3.bf16.msra.mxu1 %v8128_v23  ;;  %v4736_v23 = vshll.u32 %v4635_v34, 16  ;;  %v4734_v16 = vrot.slane %v4733_v19, 4  ;;  %v4747_v11 = vor.u32 %v4746_v61, %v4743_v10  ;;  %v4649_v10 = vld [vmem:[#allocation2 + $0xbc] sm:$0x1]  ;;  %v4867_v61 = vshrl.u32 %v4654_v37, 16 }
 0x242   :  { %7607 = vmatprep.subr.bf16.mxu1 %v8130_v62  ;;  %v4802_v4 = vrot.slane %v4800_v13, 5  ;;  %v9619_v13 = vld [vmem:[#allocation2 + $0x28] sm:$0xf] }
 0x244   :  { %7592 = vmatmul.mubr.bf16.vlgmr.msra.gmra.mrb[8].mxu1 %v6810_v59  ;;  %v4713_v59 = vshrl.u32 %v4632_v17, 16 }
 0x245   :  { %7595 = vmatprep.mubr.bf16.mxu1 %v6811_v18  ;;  %7608 = vmatpush3.bf16.msra.mxu1 %v8130_v62  ;;  %v8140_v62 = vld [vmem:[%s9928_s3 + $0x168] sm:$0xff]   ;;  %v6815_v18 = vcombine.low %v9452_v32, %v9440_v35  ;;  %v4705_v35 = vor.u32 %v4704_v36, %v4701_v22  ;;  %v9560_v32 = vrot.slane %v4736_v23, 5  ;;  %v4771_v36 = vrot.slane %v4769_v9, 4 }
 0x246   :  { %7609 = vmatprep.subr.bf16.mxu1 %v8132_v63  ;;  %v4715_v52 = vrot.slane %v4713_v59, 4  ;;  %v4774_v23 = vrot.slane %v4772_v60, 5  ;;  %v8144_v59 = vld [vmem:[%s9928_s3 + $0x180] sm:$0xff]   ;;  %v4651_v9 = vld [vmem:[#allocation2 + $0xc8] sm:$0x1] }
 0x247   :  { %v4706_v21 = vrot.slane %v4705_v35, 4  ;;  %v4739_v30 = vsel %vm8336_vm4, %v4734_v16, %v9560_v32 }
 0x249   :  { %7610 = vmatpush3.bf16.msra.mxu1 %v8132_v63  ;;  %v4716_v63 = vshll.u32 %v4632_v17, 16  ;;  %v4711_v22 = vsel %vm8336_vm4, %v4706_v21, %v9542_v25  ;;  %v4797_v25 = vshrl.u32 %v4644_v8, 16 }
 0x24a   :  { %7611 = vmatprep.subr.bf16.mxu1 %v8134_v45 }
 0x24b   :  { %v4799_v19 = vrot.slane %v4797_v25, 4 }
 0x24c   :  { %7596 = vmatmul.mubr.bf16.gmra.mrb[12].mxu1 %v6812_v33  ;;  %v4718_v33 = vrot.slane %v4716_v63, 5 }
 0x24d   :  { %7599 = vmatprep.mubr.bf16.mxu1 %v6813_v51  ;;  %7612 = vmatpush3.bf16.msra.mxu1 %v8134_v45  ;;  %v9553_v45 = vld [vmem:[#allocation2 + $0x8c] sm:$0x1]  ;;  %v4691_v51 = vor.u32 %v4690_v15, %v4687_v53  ;;  %v4811_v53 = vshrl.u32 %v4646_v49, 16  ;;  %v4814_v15 = vshll.u32 %v4646_v49, 16  ;;  %v4870_v49 = vshll.u32 %v4654_v37, 16 }
 0x24e   :  { %7613 = vmatprep.subr.bf16.mxu1 %v8136_v58  ;;  %v4778_v43 = vshll.u32 %v9553_v45, 16  ;;  %v4719_v34 = vor.u32 %v4718_v33, %v4715_v52  ;;  %v4775_v52 = vor.u32 %v4774_v23, %v4771_v36 }
 0x24f   :  { %v4692_v14 = vrot.slane %v4691_v51, 4  ;;  %v4645_v51 = vld [vmem:[#allocation2 + $0xa4] sm:$0x1]  ;;  %v4813_v32 = vrot.slane %v4811_v53, 4  ;;  %v4816_v44 = vrot.slane %v4814_v15, 5  ;;  %v4869_v15 = vrot.slane %v4867_v61, 4 }
 0x250   :  { %v4720_v63 = vrot.slane %v4719_v34, 4  ;;  %v4806_v16 = vshll.u32 %v4645_v51, 16  ;;  %v4655_v53 = vld [vmem:[#allocation2 + $0xe0] sm:$0x1]  ;;  %v5142_v51 = vshrl.u32 %v9619_v13, 16 }
 0x251   :  { %7614 = vmatpush3.bf16.msra.mxu1 %v8136_v58  ;;  %v4755_v58 = vshrl.u32 %v4638_v55, 16  ;;  %v4648_v55 = vld [vmem:[#allocation2 + $0xb8] sm:$0xf]  ;;  %v4697_v29 = vsel %vm8336_vm4, %v4692_v14, %v9539_v12  ;;  %v4817_v14 = vor.u32 %v4816_v44, %v4813_v32  ;;  %v5095_v32 = vld [vmem:[#allocation2 + $0x30] sm:$0x8] }
 0x252   :  { %7615 = vmatprep.subr.bf16.mxu1 %v8138_v3  ;;  %v6842_v24 = vcombine.low %v4697_v29, %v4711_v22  ;;  %v4825_v33 = vshrl.u32 %v4648_v55, 16  ;;  %v4725_v12 = vsel %vm8336_vm4, %v4720_v63, %v9555_v41  ;;  %v4776_v41 = vrot.slane %v4775_v52, 4  ;;  %v8147_v63 = vld [vmem:[%s9928_s3 + $0x198] sm:$0xff]   ;;  %v5093_v29 = vld [vmem:[#allocation2 + $0x24] sm:$0x8] }
 0x253   :  { %v4757_v1 = vrot.slane %v4755_v58, 4  ;;  %v4828_v58 = vshll.u32 %v4648_v55, 16  ;;  %v6843_v42 = vcombine.low %v4725_v12, %v4739_v30  ;;  %v4872_v55 = vrot.slane %v4870_v49, 5 }
 0x254   :  { %7600 = vmatmul.mubr.bf16.gmra.mrb[16].mxu1 %v6814_v5  ;;  %v4792_v5 = vshll.u32 %v4643_v27, 16  ;;  %v4827_v34 = vrot.slane %v4825_v33, 4 }
 0x255   :  { %7603 = vmatprep.mubr.bf16.mxu1 %v6815_v18  ;;  %7616 = vmatpush3.bf16.msra.mxu1 %v8138_v3  ;;  %v4669_v3 = vsel %vm8336_vm4, %v4664_v7, %v9523_v20  ;;  %v4820_v20 = vshll.u32 %v9570_v26, 16  ;;  %v4761_v18 = vor.u32 %v4760_v56, %v4757_v1  ;;  %v4830_v1 = vrot.slane %v4828_v58, 5  ;;  %v4652_v56 = vld [vmem:[#allocation2 + $0xd0] sm:$0xf] }
 0x256   :  { %7617 = vmatprep.subr.bf16.mxu1 %v8140_v62  ;;  %v6841_v17 = vcombine.low %v4669_v3, %v4683_v31  ;;  %v4748_v31 = vrot.slane %v4747_v11, 4  ;;  %v4794_v21 = vrot.slane %v4792_v5, 5  ;;  %v4856_v22 = vshll.u32 %v4652_v56, 16 }
 0x257   :  { %v4762_v47 = vrot.slane %v4761_v18, 4  ;;  %v4822_v23 = vrot.slane %v4820_v20, 5  ;;  %v4831_v5 = vor.u32 %v4830_v1, %v4827_v34  ;;  %v4818_v18 = vrot.slane %v4817_v14, 4  ;;  %v8149_v34 = vld [vmem:[%s9928_s3 + $0x1a8] sm:$0xff]   ;;  %v5101_v14 = vld [vmem:[#allocation2 + $0x54] sm:$0x8] }
 0x258   :  { %v4753_v45 = vsel %vm8336_vm4, %v4748_v31, %v9549_v0  ;;  %v4808_v20 = vrot.slane %v4806_v16, 5  ;;  %v4876_v58 = vshll.u32 %v4655_v53, 16  ;;  %v5137_v31 = vshrl.u32 %v5093_v29, 16  ;;  %v9664_v29 = vld [vmem:[#allocation2 + $0x64] sm:$0xf] }
 0x259   :  { %7618 = vmatpush3.bf16.msra.mxu1 %v8140_v62  ;;  %v4650_v62 = vld [vmem:[#allocation2 + $0xc4] sm:$0xf]  ;;  %v4767_v27 = vsel %vm8336_vm4, %v4762_v47, %v9562_v50  ;;  %v4853_v50 = vshrl.u32 %v4652_v56, 16  ;;  %v4832_v52 = vrot.slane %v4831_v5, 4  ;;  %v4823_v12 = vsel %vm8336_vm4, %v4818_v18, %v4822_v23 }
 0x25a   :  { %7619 = vmatprep.subr.bf16.mxu1 %v8142_v39  ;;  %v4839_v7 = vshrl.u32 %v4650_v62, 16  ;;  %v4842_v35 = vshll.u32 %v4650_v62, 16  ;;  %v6844_v36 = vcombine.low %v4753_v45, %v4767_v27  ;;  %v4834_v62 = vshll.u32 %v4649_v10, 16  ;;  %v9650_v45 = vld [vmem:[#allocation2 + $0x58] sm:$0xf] }
 0x25b   :  { %v4873_v47 = vor.u32 %v4872_v55, %v4869_v15  ;;  %v5144_v27 = vrot.slane %v5142_v51, 7  ;;  %v5194_v18 = vshrl.u32 %v9650_v45, 16  ;;  %v5189_v55 = vshrl.u32 %v5101_v14, 16  ;;  %v5109_v14 = vld [vmem:[#allocation2 + $0x9c] sm:$0x8] }
 0x25c   :  { %7604 = vmatmul.mubr.bf16.gmra.mrb[20].mxu1 %v6816_v48  ;;  %v4841_v60 = vrot.slane %v4839_v7, 4  ;;  %v4844_v3 = vrot.slane %v4842_v35, 5  ;;  %v4855_v7 = vrot.slane %v4853_v50, 4  ;;  %v4858_v35 = vrot.slane %v4856_v22, 5 }
 0x25d   :  { %7620 = vmatpush3.bf16.msra.mxu1 %v8142_v39  ;;  %7623 = vmatprep.mubr.bf16.mxu1 %v6841_v17  ;;  %v4789_v39 = vor.u32 %v4788_v38, %v4785_v28  ;;  %v8146_v17 = vld [vmem:[%s9928_s3 + $0x190] sm:$0xff]   ;;  %v4848_v28 = vshll.u32 %v4651_v9, 16  ;;  %v4836_v33 = vrot.slane %v4834_v62, 5  ;;  %v4874_v1 = vrot.slane %v4873_v47, 4 }
 0x25e   :  { %7621 = vmatprep.subr.bf16.mxu1 %v8143_v2  ;;  %v4845_v8 = vor.u32 %v4844_v3, %v4841_v60  ;;  %v9638_v9 = vld [vmem:[#allocation2 + $0x34] sm:$0xf]  ;;  %v5097_v3 = vld [vmem:[#allocation2 + $0x3c] sm:$0x8]  ;;  %v6858_v22 = vrot.slane %v5137_v31, 11  ;;  %v5196_v51 = vrot.slane %v5194_v18, 7 }
 0x25f   :  { %v4790_v48 = vrot.slane %v4789_v39, 4  ;;  %v4850_v25 = vrot.slane %v4848_v28, 5  ;;  %v4653_v39 = vld [vmem:[#allocation2 + $0xd4] sm:$0x1]  ;;  %v4837_v6 = vsel %vm8336_vm4, %v4832_v52, %v4836_v33  ;;  %v5155_v49 = vshrl.u32 %v9638_v9, 16 }
 0x260   :  { %v4846_v30 = vrot.slane %v4845_v8, 4  ;;  %v4862_v44 = vshll.u32 %v4653_v39, 16  ;;  %v5099_v8 = vld [vmem:[#allocation2 + $0x48] sm:$0x8]  ;;  %v5163_v23 = vshrl.u32 %v5097_v3, 16  ;;  %v8150_v62 = vld [vmem:[%s9928_s3 + $0x1b0] sm:$0xff]  }
 0x261   :  { %7622 = vmatpush3.bf16.msra.mxu1 %v8143_v2  ;;  %v4780_v2 = vrot.slane %v4778_v43, 5  ;;  %v4803_v43 = vor.u32 %v4802_v4, %v4799_v19  ;;  %v4795_v38 = vsel %vm8336_vm4, %v4790_v48, %v4794_v21  ;;  %v9632_v19 = vld [vmem:[#allocation2 + $0x40] sm:$0xf]  ;;  %v4859_v48 = vor.u32 %v4858_v35, %v4855_v7  ;;  %v5105_v7 = vld [vmem:[#allocation2 + $0x6c] sm:$0x8] }
 0x262   :  { %7639 = vmatprep.subr.bf16.mxu1 %v8144_v59  ;;  %v4851_v37 = vsel %vm8336_vm4, %v4846_v30, %v4850_v25  ;;  %v4864_v61 = vrot.slane %v4862_v44, 5  ;;  %v5157_v53 = vrot.slane %v5155_v49, 7  ;;  %v5176_v15 = vshrl.u32 %v5099_v8, 16  ;;  %v5103_v39 = vld [vmem:[#allocation2 + $0x60] sm:$0x8] }
 0x263   :  { %v4781_v0 = vsel %vm8336_vm4, %v4776_v41, %v4780_v2  ;;  %v4804_v26 = vrot.slane %v4803_v43, 4  ;;  %v5150_v41 = vshrl.u32 %v5095_v32, 16  ;;  %v9642_v2 = vld [vmem:[#allocation2 + $0x4c] sm:$0xf]  ;;  %v6847_v10 = vcombine.low %v4837_v6, %v4851_v37  ;;  %v9652_v43 = vld [vmem:[#allocation2 + $0x70] sm:$0xf] }
 0x264   :  { %7624 = vmatmul.mubr.bf16.vlgmr.msra.gmra.mrb[8].mxu1 %v6842_v24  ;;  %v6845_v11 = vcombine.low %v4781_v0, %v4795_v38  ;;  %v4860_v16 = vrot.slane %v4859_v48, 4  ;;  %v5145_v38 = vshll.u32 %v9619_v13, 16  ;;  %v5181_v50 = vshrl.u32 %v9642_v2, 16  ;;  %v9683_v37 = vld [vmem:[#allocation2 + $0xa0] sm:$0xf] }
 0x265   :  { %7627 = vmatprep.mubr.bf16.mxu1 %v6843_v42  ;;  %7640 = vmatpush3.bf16.msra.mxu1 %v8144_v59  ;;  %v9612_v59 = vld [vmem:[#allocation2 + $0x1c] sm:$0xf]  ;;  %v9630_v42 = vrot.slane %v5124_v40, 11  ;;  %v4809_v4 = vsel %vm8336_vm4, %v4804_v26, %v4808_v20  ;;  %v4878_v40 = vrot.slane %v4876_v58, 5  ;;  %v5171_v25 = vshll.u32 %v9632_v19, 16 }
 0x266   :  { %7641 = vmatprep.subr.bf16.mxu1 %v8145_v46  ;;  %v5129_v24 = vshrl.u32 %v9612_v59, 16  ;;  %v6846_v60 = vcombine.low %v4809_v4, %v4823_v12  ;;  %v5132_v56 = vshll.u32 %v9612_v59, 16  ;;  %v5147_v0 = vor.u32 %v5145_v38, %v5144_v27  ;;  %v9675_v58 = vld [vmem:[#allocation2 + $0x94] sm:$0xf] }
 0x267   :  { %v4879_v5 = vsel %vm8336_vm4, %v4874_v1, %v4878_v40  ;;  %v4865_v26 = vsel %vm8336_vm4, %v4860_v16, %v4864_v61  ;;  %v5183_v30 = vrot.slane %v5181_v50, 7  ;;  %v6860_v52 = vrot.slane %v5163_v23, 11 }
 0x268   :  { %v5131_v21 = vrot.slane %v5129_v24, 7  ;;  %v6848_v35 = vcombine.low %v4865_v26, %v4879_v5  ;;  %v5158_v24 = vshll.u32 %v9638_v9, 16  ;;  %v5184_v33 = vshll.u32 %v9642_v2, 16  ;;  %v8153_v5 = vld [vmem:[%s9928_s3 + $0x1c8] sm:$0xff]  }
 0x269   :  { %7642 = vmatpush3.bf16.msra.mxu1 %v8145_v46  ;;  %v8148_v46 = vld [vmem:[%s9928_s3 + $0x1a0] sm:$0xff]   ;;  %v5148_v12 = vsel %vm9123_vm7, %v6858_v22, %v5147_v0  ;;  %v5207_v32 = vshrl.u32 %v9664_v29, 16  ;;  %v5202_v31 = vshrl.u32 %v5103_v39, 16  ;;  %v5215_v4 = vshrl.u32 %v5105_v7, 16 }
 0x26a   :  { %7643 = vmatprep.subr.bf16.mxu1 %v8146_v17  ;;  %v5134_v28 = vor.u32 %v5132_v56, %v5131_v21  ;;  %v6861_v48 = vrot.slane %v5176_v15, 11  ;;  %v5186_v21 = vor.u32 %v5184_v33, %v5183_v30  ;;  %v5233_v6 = vshrl.u32 %v9675_v58, 16  ;;  %v8152_v56 = vld [vmem:[%s9928_s3 + $0x1c0] sm:$0xff]  }
 0x26b   :  { %v6862_v40 = vrot.slane %v5189_v55, 11  ;;  %v6863_v49 = vrot.slane %v5202_v31, 11  ;;  %v6864_v16 = vrot.slane %v5215_v4, 11  ;;  %v5210_v8 = vshll.u32 %v9664_v29, 16  ;;  %v9710_v55 = vld [vmem:[#allocation2 + $0xac] sm:$0xf] }
 0x26c   :  { %7628 = vmatmul.mubr.bf16.gmra.mrb[12].mxu1 %v6844_v36  ;;  %v9656_v36 = vrot.slane %v5150_v41, 11  ;;  %v5135_v20 = vsel %vm9123_vm7, %v9630_v42, %v5134_v28  ;;  %v5160_v42 = vor.u32 %v5158_v24, %v5157_v53  ;;  %v5223_v41 = vshll.u32 %v9652_v43, 16  ;;  %v9697_v28 = vld [vmem:[#allocation2 + $0xb8] sm:$0xf] }
 0x26d   :  { %7631 = vmatprep.mubr.bf16.mxu1 %v6845_v11  ;;  %7644 = vmatpush3.bf16.msra.mxu1 %v8146_v17  ;;  %v5168_v17 = vshrl.u32 %v9632_v19, 16  ;;  %v5220_v11 = vshrl.u32 %v9652_v43, 16  ;;  %v6889_v44 = vcombine.low %v5135_v20, %v5148_v12  ;;  %v5187_v38 = vsel %vm9123_vm7, %v6861_v48, %v5186_v21  ;;  %v5117_v48 = vld [vmem:[#allocation2 + $0xcc] sm:$0x8]  ;;  %v9726_v21 = vld [vmem:[#allocation2 + $0xdc] sm:$0xf] }
 0x26e   :  { %7645 = vmatprep.subr.bf16.mxu1 %v8147_v63  ;;  %v5161_v61 = vsel %vm9123_vm7, %v9656_v36, %v5160_v42  ;;  %v5235_v22 = vrot.slane %v5233_v6, 7  ;;  %v5236_v36 = vshll.u32 %v9675_v58, 16  ;;  %v5241_v0 = vshrl.u32 %v5109_v14, 16  ;;  %v8155_v14 = vld [vmem:[%s9928_s3 + $0x1d8] sm:$0xff]  }
 0x26f   :  { %v5222_v3 = vrot.slane %v5220_v11, 7  ;;  %v5113_v11 = vld [vmem:[#allocation2 + $0xb4] sm:$0x8]  ;;  %v5272_v26 = vshrl.u32 %v9697_v28, 16  ;;  %v5249_v7 = vshll.u32 %v9683_v37, 16  ;;  %v5259_v12 = vshrl.u32 %v9710_v55, 16 }
 0x270   :  { %v5238_v39 = vor.u32 %v5236_v36, %v5235_v22  ;;  %v6866_v33 = vrot.slane %v5241_v0, 11  ;;  %v5275_v6 = vshll.u32 %v9697_v28, 16  ;;  %v5121_v36 = vld [vmem:[#allocation2 + $0xe4] sm:$0x8] }
 0x271   :  { %7646 = vmatpush3.bf16.msra.mxu1 %v8147_v63  ;;  %v5170_v63 = vrot.slane %v5168_v17, 7  ;;  %v5209_v17 = vrot.slane %v5207_v32, 7  ;;  %v8154_v32 = vld [vmem:[%s9928_s3 + $0x1d0] sm:$0xff]   ;;  %v5274_v42 = vrot.slane %v5272_v26, 7 }
 0x272   :  { %7647 = vmatprep.subr.bf16.mxu1 %v8148_v46 }
 0x273   :  { %v5173_v47 = vor.u32 %v5171_v25, %v5170_v63  ;;  %v9706_v63 = vld [vmem:[#allocation2 + $0xc4] sm:$0xf]  ;;  %v5212_v53 = vor.u32 %v5210_v8, %v5209_v17  ;;  %v9713_v25 = vld [vmem:[#allocation2 + $0xd0] sm:$0xf]  ;;  %v5119_v8 = vld [vmem:[#allocation2 + $0xd8] sm:$0x8] }
 0x274   :  { %7632 = vmatmul.mubr.bf16.gmra.mrb[16].mxu1 %v6846_v60  ;;  %v5197_v60 = vshll.u32 %v9650_v45, 16  ;;  %v5285_v24 = vshrl.u32 %v9706_v63, 16  ;;  %v5298_v31 = vshrl.u32 %v9713_v25, 16 }
 0x275   :  { %7635 = vmatprep.mubr.bf16.mxu1 %v6847_v10  ;;  %7648 = vmatpush3.bf16.msra.mxu1 %v8148_v46  ;;  %v8151_v46 = vld [vmem:[%s9928_s3 + $0x1b8] sm:$0xff]   ;;  %v5174_v1 = vsel %vm9123_vm7, %v6860_v52, %v5173_v47  ;;  %v5246_v10 = vshrl.u32 %v9683_v37, 16  ;;  %v5115_v47 = vld [vmem:[#allocation2 + $0xc0] sm:$0x8] }
 0x276   :  { %7649 = vmatprep.subr.bf16.mxu1 %v8149_v34  ;;  %v5199_v27 = vor.u32 %v5197_v60, %v5196_v51  ;;  %v6890_v23 = vcombine.low %v5161_v61, %v5174_v1  ;;  %v5213_v51 = vsel %vm9123_vm7, %v6863_v49, %v5212_v53  ;;  %v5261_v1 = vrot.slane %v5259_v12, 7 }
 0x277   :  { %v5248_v15 = vrot.slane %v5246_v10, 7  ;;  %v5277_v10 = vor.u32 %v5275_v6, %v5274_v42  ;;  %v5293_v61 = vshrl.u32 %v5117_v48, 16  ;;  %v5300_v49 = vrot.slane %v5298_v31, 7 }
 0x278   :  { %v5200_v18 = vsel %vm9123_vm7, %v6862_v40, %v5199_v27  ;;  %v5280_v40 = vshrl.u32 %v5115_v47, 16  ;;  %v5288_v27 = vshll.u32 %v9706_v63, 16  ;;  %v8157_v47 = vld [vmem:[%s9928_s3 + $0x1e8] sm:$0xff]  }
 0x279   :  { %7650 = vmatpush3.bf16.msra.mxu1 %v8149_v34  ;;  %v5107_v34 = vld [vmem:[#allocation2 + $0x90] sm:$0x8]  ;;  %v6891_v20 = vcombine.low %v5187_v38, %v5200_v18  ;;  %v5262_v38 = vshll.u32 %v9710_v55, 16 }
 0x27a   :  { %7651 = vmatprep.subr.bf16.mxu1 %v8150_v62  ;;  %v5228_v50 = vshrl.u32 %v5107_v34, 16 }
 0x27b   :  { %v5264_v18 = vor.u32 %v5262_v38, %v5261_v1  ;;  %v6922_v1 = vcombine.low %v9638_v9, %v9632_v19  ;;  %v8166_v19 = vld [vmem:[%s9928_s3 + $0x210] sm:$0xff]  }
 0x27c   :  { %7636 = vmatmul.mubr.bf16.gmra.mrb[20].mxu1 %v6848_v35  ;;  %v6865_v30 = vrot.slane %v5228_v50, 11  ;;  %v5111_v35 = vld [vmem:[#allocation2 + $0xa8] sm:$0x8]  ;;  %v5311_v50 = vshrl.u32 %v9726_v21, 16  ;;  %v5771_v9 = vld [vmem:[#allocation2 + $0x34] sm:$0xf] }
 0x27d   :  { %7652 = vmatpush3.bf16.msra.mxu1 %v8150_v62  ;;  %7655 = vmatprep.mubr.bf16.mxu1 %v6889_v44  ;;  %v5225_v62 = vor.u32 %v5223_v41, %v5222_v3  ;;  %v5251_v44 = vor.u32 %v5249_v7, %v5248_v15  ;;  %v5254_v4 = vshrl.u32 %v5111_v35, 16  ;;  %v5287_v3 = vrot.slane %v5285_v24, 7  ;;  %v9731_v41 = vld [vmem:[#allocation2 + $0xe8] sm:$0xf]  ;;  %v8156_v15 = vld [vmem:[%s9928_s3 + $0x1e0] sm:$0xff]  }
 0x27e   :  { %7653 = vmatprep.subr.bf16.mxu1 %v8151_v46  ;;  %v5239_v60 = vsel %vm9123_vm7, %v6865_v30, %v5238_v39  ;;  %v5324_v22 = vshrl.u32 %v9731_v41, 16  ;;  %v5313_v30 = vrot.slane %v5311_v50, 7  ;;  %v5319_v39 = vshrl.u32 %v5121_v36, 16 }
 0x27f   :  { %v5226_v52 = vsel %vm9123_vm7, %v6864_v16, %v5225_v62  ;;  %v5252_v17 = vsel %vm9123_vm7, %v6866_v33, %v5251_v44  ;;  %v5301_v62 = vshll.u32 %v9713_v25, 16  ;;  %v6867_v0 = vrot.slane %v5254_v4, 11  ;;  %v8158_v4 = vld [vmem:[%s9928_s3 + $0x1f0] sm:$0xff]  }
 0x280   :  { %v6892_v34 = vcombine.low %v5213_v51, %v5226_v52  ;;  %v6893_v16 = vcombine.low %v5239_v60, %v5252_v17  ;;  %v5326_v7 = vrot.slane %v5324_v22, 7  ;;  %v5327_v35 = vshll.u32 %v9731_v41, 16 }
 0x281   :  { %7654 = vmatpush3.bf16.msra.mxu1 %v8151_v46  ;;  %v5267_v46 = vshrl.u32 %v5113_v11, 16  ;;  %v6870_v11 = vrot.slane %v5293_v61, 11  ;;  %v5303_v26 = vor.u32 %v5301_v62, %v5300_v49  ;;  %v5265_v52 = vsel %vm9123_vm7, %v6867_v0, %v5264_v18  ;;  %v5773_v61 = vld [vmem:[#allocation2 + $0x40] sm:$0xf]  ;;  %v5775_v18 = vld [vmem:[#allocation2 + $0x4c] sm:$0xf] }
 0x282   :  { %7671 = vmatprep.subr.bf16.mxu1 %v8152_v56  ;;  %v5314_v33 = vshll.u32 %v9726_v21, 16  ;;  %v6872_v42 = vrot.slane %v5319_v39, 11  ;;  %v5329_v31 = vor.u32 %v5327_v35, %v5326_v7  ;;  %v5803_v17 = vshll.u32 %v5767_v54, 16  ;;  %v5768_v49 = vld [vmem:[#allocation2 + $0x20] sm:$0x1] }
 0x283   :  { %v5828_v50 = vshrl.u32 %v5771_v9, 16  ;;  %v5831_v22 = vshll.u32 %v5771_v9, 16  ;;  %v5842_v62 = vshrl.u32 %v5773_v61, 16  ;;  %v5845_v36 = vshll.u32 %v5773_v61, 16  ;;  %v8170_v7 = vld [vmem:[%s9928_s3 + $0x220] sm:$0xff]  }
 0x284   :  { %7656 = vmatmul.mubr.bf16.vlgmr.msra.gmra.mrb[8].mxu1 %v6890_v23  ;;  %v6869_v23 = vrot.slane %v5280_v40, 11  ;;  %v5316_v44 = vor.u32 %v5314_v33, %v5313_v30  ;;  %v5330_v60 = vsel %vm9123_vm7, %v6872_v42, %v5329_v31  ;;  %v8160_v40 = vld [vmem:[%s9928_s3 + $0x1f8] sm:$0xff]   ;;  %v5805_v38 = vrot.slane %v5803_v17, 5  ;;  %v5779_v42 = vld [vmem:[#allocation2 + $0x64] sm:$0xf] }
 0x285   :  { %7659 = vmatprep.mubr.bf16.mxu1 %v6891_v20  ;;  %7672 = vmatpush3.bf16.msra.mxu1 %v8152_v56  ;;  %v6868_v56 = vrot.slane %v5267_v46, 11  ;;  %v5306_v20 = vshrl.u32 %v5119_v8, 16  ;;  %v5304_v46 = vsel %vm9123_vm7, %v6870_v11, %v5303_v26  ;;  %v5770_v8 = vld [vmem:[#allocation2 + $0x2c] sm:$0x1]  ;;  %v6925_v0 = vcombine.low %v9675_v58, %v9683_v37  ;;  %v5777_v11 = vld [vmem:[#allocation2 + $0x58] sm:$0xf] }
 0x286   :  { %7673 = vmatprep.subr.bf16.mxu1 %v8153_v5  ;;  %v5830_v30 = vrot.slane %v5828_v50, 4  ;;  %v5833_v39 = vrot.slane %v5831_v22, 5  ;;  %v5844_v35 = vrot.slane %v5842_v62, 4  ;;  %v5847_v58 = vrot.slane %v5845_v36, 5  ;;  %v5780_v9 = vld [vmem:[#allocation2 + $0x68] sm:$0x1] }
 0x287   :  { %v5278_v53 = vsel %vm9123_vm7, %v6868_v56, %v5277_v10  ;;  %v6871_v51 = vrot.slane %v5306_v20, 11  ;;  %v8164_v56 = vld [vmem:[%s9928_s3 + $0x208] sm:$0xff]   ;;  %v5856_v37 = vshrl.u32 %v5775_v18, 16  ;;  %v5870_v33 = vshrl.u32 %v5777_v11, 16  ;;  %v5785_v50 = vld [vmem:[#allocation2 + $0xa0] sm:$0xf] }
 0x288   :  { %v6894_v12 = vcombine.low %v5265_v52, %v5278_v53  ;;  %v5809_v53 = vshll.u32 %v5768_v49, 16  ;;  %v6926_v52 = vcombine.low %v9710_v55, %v9697_v28  ;;  %v8172_v28 = vld [vmem:[%s9928_s3 + $0x228] sm:$0xff]   ;;  %v5834_v55 = vor.u32 %v5833_v39, %v5830_v30  ;;  %v8175_v39 = vld [vmem:[%s9928_s3 + $0x238] sm:$0xff]  }
 0x289   :  { %7674 = vmatpush3.bf16.msra.mxu1 %v8153_v5  ;;  %v5290_v5 = vor.u32 %v5288_v27, %v5287_v3  ;;  %v5317_v48 = vsel %vm9123_vm7, %v6871_v51, %v5316_v44  ;;  %v6921_v3 = vcombine.low %v9612_v59, %v9619_v13  ;;  %v5769_v27 = vld [vmem:[#allocation2 + $0x28] sm:$0xf]  ;;  %v6923_v59 = vcombine.low %v9642_v2, %v9650_v45  ;;  %v5776_v44 = vld [vmem:[#allocation2 + $0x50] sm:$0x1] }
 0x28a   :  { %7675 = vmatprep.subr.bf16.mxu1 %v8154_v32  ;;  %v6896_v6 = vcombine.low %v5317_v48, %v5330_v60  ;;  %v5800_v13 = vshrl.u32 %v5767_v54, 16  ;;  %v5817_v10 = vshll.u32 %v5769_v27, 16  ;;  %v5811_v51 = vrot.slane %v5809_v53, 5 }
 0x28b   :  { %v5291_v24 = vsel %vm9123_vm7, %v6869_v23, %v5290_v5  ;;  %v6924_v23 = vcombine.low %v9664_v29, %v9652_v43  ;;  %v8168_v5 = vld [vmem:[%s9928_s3 + $0x218] sm:$0xff]   ;;  %v5774_v29 = vld [vmem:[#allocation2 + $0x44] sm:$0x1]  ;;  %v5872_v54 = vrot.slane %v5870_v33, 4  ;;  %v5835_v22 = vrot.slane %v5834_v55, 4 }
 0x28c   :  { %7660 = vmatmul.mubr.bf16.gmra.mrb[12].mxu1 %v6892_v34  ;;  %v8162_v34 = vld [vmem:[%s9928_s3 + $0x200] sm:$0xff]   ;;  %v5819_v45 = vrot.slane %v5817_v10, 5  ;;  %v5772_v43 = vld [vmem:[#allocation2 + $0x38] sm:$0x1]  ;;  %v5851_v60 = vshll.u32 %v5774_v29, 16  ;;  %v5929_v29 = vshll.u32 %v5785_v50, 16 }
 0x28d   :  { %7663 = vmatprep.mubr.bf16.mxu1 %v6893_v16  ;;  %7676 = vmatpush3.bf16.msra.mxu1 %v8154_v32  ;;  %v6895_v32 = vcombine.low %v5291_v24, %v5304_v46  ;;  %v5802_v16 = vrot.slane %v5800_v13, 4  ;;  %v5859_v24 = vshll.u32 %v5775_v18, 16  ;;  %v6927_v46 = vcombine.low %v9706_v63, %v9713_v25  ;;  %v5791_v55 = vld [vmem:[#allocation2 + $0xc4] sm:$0xf] }
 0x28e   :  { %7677 = vmatprep.subr.bf16.mxu1 %v8155_v14  ;;  %v5848_v63 = vor.u32 %v5847_v58, %v5844_v35  ;;  %v5858_v25 = vrot.slane %v5856_v37, 4  ;;  %v5865_v13 = vshll.u32 %v5776_v44, 16  ;;  %v5893_v37 = vshll.u32 %v5780_v9, 16  ;;  %v5790_v9 = vld [vmem:[#allocation2 + $0xbc] sm:$0x1] }
 0x28f   :  { %v5806_v26 = vor.u32 %v5805_v38, %v5802_v16  ;;  %v8174_v16 = vld [vmem:[%s9928_s3 + $0x230] sm:$0xff]  }
 0x290   :  { %v5867_v18 = vrot.slane %v5865_v13, 5  ;;  %v5971_v13 = vshll.u32 %v5791_v55, 16 }
 0x291   :  { %7678 = vmatpush3.bf16.msra.mxu1 %v8155_v14  ;;  %v5814_v14 = vshrl.u32 %v5769_v27, 16  ;;  %v5807_v31 = vrot.slane %v5806_v26, 4  ;;  %v5887_v27 = vshll.u32 %v5779_v42, 16 }
 0x292   :  { %7679 = vmatprep.subr.bf16.mxu1 %v8156_v15 }
 0x293   :  { %v5816_v2 = vrot.slane %v5814_v14, 4  ;;  %v5812_v10 = vsel %vm8336_vm4, %v5807_v31, %v5811_v51  ;;  %v5889_v36 = vrot.slane %v5887_v27, 5  ;;  %v5789_v51 = vld [vmem:[#allocation2 + $0xb8] sm:$0xf]  ;;  %v5786_v31 = vld [vmem:[#allocation2 + $0xa4] sm:$0x1] }
 0x294   :  { %7664 = vmatmul.mubr.bf16.gmra.mrb[16].mxu1 %v6894_v12  ;;  %v5873_v12 = vshll.u32 %v5777_v11, 16  ;;  %v5784_v11 = vld [vmem:[#allocation2 + $0x98] sm:$0x1]  ;;  %v5935_v27 = vshll.u32 %v5786_v31, 16 }
 0x295   :  { %7667 = vmatprep.mubr.bf16.mxu1 %v6895_v32  ;;  %7680 = vmatpush3.bf16.msra.mxu1 %v8156_v15  ;;  %v5823_v15 = vshll.u32 %v5770_v8, 16  ;;  %v5820_v20 = vor.u32 %v5819_v45, %v5816_v2  ;;  %v5837_v32 = vshll.u32 %v5772_v43, 16  ;;  %v5849_v8 = vrot.slane %v5848_v63, 4 }
 0x296   :  { %7681 = vmatprep.subr.bf16.mxu1 %v8157_v47  ;;  %v5926_v43 = vshrl.u32 %v5785_v50, 16  ;;  %v5954_v63 = vshrl.u32 %v5789_v51, 16  ;;  %v5788_v50 = vld [vmem:[#allocation2 + $0xb0] sm:$0x1] }
 0x297   :  { %v5825_v48 = vrot.slane %v5823_v15, 5 }
 0x299   :  { %7682 = vmatpush3.bf16.msra.mxu1 %v8157_v47  ;;  %v6928_v47 = vcombine.low %v9726_v21, %v9731_v41  ;;  %v5895_v41 = vrot.slane %v5893_v37, 5  ;;  %v5794_v37 = vld [vmem:[#allocation2 + $0xd4] sm:$0x1] }
 0x29a   :  { %7683 = vmatprep.subr.bf16.mxu1 %v8158_v4 }
 0x29c   :  { %7668 = vmatmul.mubr.bf16.gmra.mrb[20].mxu1 %v6896_v6  ;;  %v5781_v6 = vld [vmem:[#allocation2 + $0x70] sm:$0xf] }
 0x29d   :  { %7684 = vmatpush3.bf16.msra.mxu1 %v8158_v4  ;;  %7687 = vmatprep.mubr.bf16.mxu1 %v6921_v3  ;;  %v5821_v4 = vrot.slane %v5820_v20, 4  ;;  %v5783_v3 = vld [vmem:[#allocation2 + $0x94] sm:$0xf]  ;;  %v5898_v17 = vshrl.u32 %v5781_v6, 16  ;;  %v5901_v14 = vshll.u32 %v5781_v6, 16  ;;  %v5928_v6 = vrot.slane %v5926_v43, 4 }
 0x29e   :  { %7685 = vmatprep.subr.bf16.mxu1 %v8160_v40  ;;  %v5912_v61 = vshrl.u32 %v5783_v3, 16  ;;  %v5915_v49 = vshll.u32 %v5783_v3, 16  ;;  %v5963_v43 = vshll.u32 %v5790_v9, 16 }
 0x29f   :  { %v5826_v38 = vsel %vm8336_vm4, %v5821_v4, %v5825_v48  ;;  %v5900_v53 = vrot.slane %v5898_v17, 4  ;;  %v5903_v15 = vrot.slane %v5901_v14, 5 }
 0x2a0   :  { %v5914_v26 = vrot.slane %v5912_v61, 4  ;;  %v5917_v20 = vrot.slane %v5915_v49, 5  ;;  %v5956_v61 = vrot.slane %v5954_v63, 4 }
 0x2a1   :  { %7686 = vmatpush3.bf16.msra.mxu1 %v8160_v40  ;;  %v5861_v40 = vrot.slane %v5859_v24, 5 }
 0x2a2   :  { %7703 = vmatprep.subr.bf16.mxu1 %v8162_v34 }
 0x2a3   :  { %v5862_v2 = vor.u32 %v5861_v40, %v5858_v25  ;;  %v5957_v25 = vshll.u32 %v5789_v51, 16  ;;  %v5949_v51 = vshll.u32 %v5788_v50, 16 }
 0x2a4   :  { %7688 = vmatmul.mubr.bf16.vlgmr.msra.gmra.mrb[8].mxu1 %v6922_v1  ;;  %v5875_v1 = vrot.slane %v5873_v12, 5 }
 0x2a5   :  { %7691 = vmatprep.mubr.bf16.mxu1 %v6923_v59  ;;  %7704 = vmatpush3.bf16.msra.mxu1 %v8162_v34  ;;  %v5778_v34 = vld [vmem:[#allocation2 + $0x5c] sm:$0x1]  ;;  %v5839_v59 = vrot.slane %v5837_v32, 5  ;;  %v5863_v35 = vrot.slane %v5862_v2, 4  ;;  %v5959_v49 = vrot.slane %v5957_v25, 5 }
 0x2a6   :  { %7705 = vmatprep.subr.bf16.mxu1 %v8164_v56  ;;  %v5879_v45 = vshll.u32 %v5778_v34, 16 }
 0x2a7   :  { %v5840_v44 = vsel %vm8336_vm4, %v5835_v22, %v5839_v59  ;;  %v5868_v21 = vsel %vm8336_vm4, %v5863_v35, %v5867_v18  ;;  %v5968_v59 = vshrl.u32 %v5791_v55, 16  ;;  %v5792_v22 = vld [vmem:[#allocation2 + $0xc8] sm:$0x1]  ;;  %v5973_v18 = vrot.slane %v5971_v13, 5 }
 0x2a8   :  { %v5881_v58 = vrot.slane %v5879_v45, 5 }
 0x2a9   :  { %7706 = vmatpush3.bf16.msra.mxu1 %v8164_v56  ;;  %v5884_v56 = vshrl.u32 %v5779_v42, 16  ;;  %v5904_v42 = vor.u32 %v5903_v15, %v5900_v53  ;;  %v5797_v53 = vld [vmem:[#allocation2 + $0xe8] sm:$0xf] }
 0x2aa   :  { %7707 = vmatprep.subr.bf16.mxu1 %v8166_v19 }
 0x2ab   :  { %v5886_v62 = vrot.slane %v5884_v56, 4  ;;  %v5905_v56 = vrot.slane %v5904_v42, 4  ;;  %v5977_v42 = vshll.u32 %v5792_v22, 16 }
 0x2ac   :  { %7692 = vmatmul.mubr.bf16.gmra.mrb[12].mxu1 %v6924_v23  ;;  %v5876_v23 = vor.u32 %v5875_v1, %v5872_v54  ;;  %v5793_v1 = vld [vmem:[#allocation2 + $0xd0] sm:$0xf] }
 0x2ad   :  { %7695 = vmatprep.mubr.bf16.mxu1 %v6925_v0  ;;  %7708 = vmatpush3.bf16.msra.mxu1 %v8166_v19  ;;  %v5853_v19 = vrot.slane %v5851_v60, 5  ;;  %v6953_v0 = vcombine.low %v5812_v10, %v5826_v38  ;;  %v5890_v33 = vor.u32 %v5889_v36, %v5886_v62  ;;  %v5918_v60 = vor.u32 %v5917_v20, %v5914_v26 }
 0x2ae   :  { %7709 = vmatprep.subr.bf16.mxu1 %v8168_v5  ;;  %v5985_v38 = vshll.u32 %v5793_v1, 16  ;;  %v5937_v36 = vrot.slane %v5935_v27, 5  ;;  %v5798_v27 = vld [vmem:[#allocation2 + $0xec] sm:$0x1] }
 0x2af   :  { %v5891_v3 = vrot.slane %v5890_v33, 4  ;;  %v5919_v17 = vrot.slane %v5918_v60, 4 }
 0x2b1   :  { %7710 = vmatpush3.bf16.msra.mxu1 %v8168_v5  ;;  %v5782_v5 = vld [vmem:[#allocation2 + $0x74] sm:$0x1]  ;;  %v5896_v45 = vsel %vm8336_vm4, %v5891_v3, %v5895_v41  ;;  %v5991_v41 = vshll.u32 %v5794_v37, 16 }
 0x2b2   :  { %7711 = vmatprep.subr.bf16.mxu1 %v8170_v7  ;;  %v5907_v12 = vshll.u32 %v5782_v5, 16 }
 0x2b4   :  { %7696 = vmatmul.mubr.bf16.gmra.mrb[16].mxu1 %v6926_v52  ;;  %v5877_v52 = vrot.slane %v5876_v23, 4  ;;  %v5909_v34 = vrot.slane %v5907_v12, 5  ;;  %v5795_v23 = vld [vmem:[#allocation2 + $0xdc] sm:$0xf]  ;;  %v6010_v12 = vshrl.u32 %v5797_v53, 16 }
 0x2b5   :  { %7699 = vmatprep.mubr.bf16.mxu1 %v6927_v46  ;;  %7712 = vmatpush3.bf16.msra.mxu1 %v8170_v7  ;;  %v5854_v7 = vsel %vm8336_vm4, %v5849_v8, %v5853_v19  ;;  %v5921_v46 = vshll.u32 %v5784_v11, 16  ;;  %v5999_v33 = vshll.u32 %v5795_v23, 16 }
 0x2b6   :  { %7713 = vmatprep.subr.bf16.mxu1 %v8172_v28  ;;  %v6954_v48 = vcombine.low %v5840_v44, %v5854_v7  ;;  %v5882_v40 = vsel %vm8336_vm4, %v5877_v52, %v5881_v58  ;;  %v5910_v62 = vsel %vm8336_vm4, %v5905_v56, %v5909_v34  ;;  %v5960_v7 = vor.u32 %v5959_v49, %v5956_v61 }
 0x2b7   :  { %v5923_v54 = vrot.slane %v5921_v46, 5  ;;  %v6955_v2 = vcombine.low %v5868_v21, %v5882_v40  ;;  %v5987_v58 = vrot.slane %v5985_v38, 5  ;;  %v5996_v52 = vshrl.u32 %v5795_v23, 16 }
 0x2b8   :  { %v6013_v46 = vshll.u32 %v5797_v53, 16  ;;  %v6956_v31 = vcombine.low %v5896_v45, %v5910_v62  ;;  %v5961_v55 = vrot.slane %v5960_v7, 4  ;;  %v6001_v40 = vrot.slane %v5999_v33, 5 }
 0x2b9   :  { %7714 = vmatpush3.bf16.msra.mxu1 %v8172_v28  ;;  %v9810_v30 = vpop.f32.mrb[16].mxu0  ;;  %v5931_v28 = vrot.slane %v5929_v29, 5  ;;  %v5998_v25 = vrot.slane %v5996_v52, 4  ;;  %v6012_v3 = vrot.slane %v6010_v12, 4  ;;  %v5979_v56 = vrot.slane %v5977_v42, 5 }
 0x2ba   :  { %7715 = vmatprep.subr.bf16.mxu1 %v8174_v16  ;;  %v9817_v24 = vpop.f32.mrb[17].mxu0  ;;  %v6015_v34 = vrot.slane %v6013_v46, 5  ;;  %v6019_v38 = vshll.u32 %v5798_v27, 16 }
 0x2bb   :  { %v9822_v32 = vpop.f32.mrb[18].mxu0  ;;  %v5932_v14 = vor.u32 %v5931_v28, %v5928_v6  ;;  %v5965_v6 = vrot.slane %v5963_v43, 5  ;;  %v6002_v49 = vor.u32 %v6001_v40, %v5998_v25 }
 0x2bc   :  { %7700 = vmatmul.mubr.bf16.gmra.mrb[20].mxu1 %v6928_v47  ;;  %v9826_v4 = vpop.f32.mrb[19].mxu0  ;;  %v5787_v47 = vld [vmem:[#allocation2 + $0xac] sm:$0xf]  ;;  %v6021_v53 = vrot.slane %v6019_v38, 5 }
 0x2bd   :  { %7716 = vmatpush3.bf16.msra.mxu1 %v8174_v16  ;;  %7719 = vmatprep.mubr.bf16.mxu1 %v6953_v0  ;;  %v5940_v10 = vshrl.u32 %v5787_v47, 16  ;;  %v5943_v19 = vshll.u32 %v5787_v47, 16  ;;  %v5982_v16 = vshrl.u32 %v5793_v1, 16  ;;  %v5970_v0 = vrot.slane %v5968_v59, 4  ;;  %v5796_v47 = vld [vmem:[#allocation2 + $0xe0] sm:$0x1] }
 0x2be   :  { %7717 = vmatprep.subr.bf16.mxu1 %v8175_v39  ;;  %v5933_v11 = vrot.slane %v5932_v14, 4  ;;  %v6005_v9 = vshll.u32 %v5796_v47, 16  ;;  %v5966_v61 = vsel %vm8336_vm4, %v5961_v55, %v5965_v6 }
 0x2bf   :  { %v5942_v26 = vrot.slane %v5940_v10, 4  ;;  %v5945_v20 = vrot.slane %v5943_v19, 5  ;;  %v5984_v35 = vrot.slane %v5982_v16, 4  ;;  %v5974_v44 = vor.u32 %v5973_v18, %v5970_v0 }
 0x2c0   :  { %v5993_v19 = vrot.slane %v5991_v41, 5  ;;  %v6016_v16 = vor.u32 %v6015_v34, %v6012_v3  ;;  %v6007_v23 = vrot.slane %v6005_v9, 5  ;;  %v6003_v0 = vrot.slane %v6002_v49, 4 }
 0x2c1   :  { %7718 = vmatpush3.bf16.msra.mxu1 %v8175_v39  ;;  %v5924_v39 = vsel %vm8336_vm4, %v5919_v17, %v5923_v54  ;;  %v5946_v60 = vor.u32 %v5945_v20, %v5942_v26  ;;  %v5988_v21 = vor.u32 %v5987_v58, %v5984_v35  ;;  %v5975_v1 = vrot.slane %v5974_v44, 4  ;;  %v9879_v58 = vld [vmem:[%s9929_s4] ss:$0 sm:$0xff]  ;;  %s8201_s4 = smov [#allocation3]  }
 0x2c2   :  { %v9832_v8 = vpop.f32.mrb[20].mxu0  ;;  %v5951_v17 = vrot.slane %v5949_v51, 5  ;;  %v6017_v18 = vrot.slane %v6016_v16, 4  ;;  %v6008_v43 = vsel %vm8336_vm4, %v6003_v0, %v6007_v23  ;;  %s6309_s24 = sshll.u32 %s8201_s4, 4  ;;  %s6310_s24 = int_to_ptr.vmem [resolvable:$true] %s6309_s24 }
 0x2c3   :  { %v9836_v5 = vpop.f32.mrb[21].mxu0  ;;  %v5947_v13 = vrot.slane %v5946_v60, 4  ;;  %v5989_v10 = vrot.slane %v5988_v21, 4  ;;  %s8176_s2 = scalar_lea.vmem %s6310_s24, 1024  ;;  %p8181_p1 = scmp.lt.s32.totalorder %s6310_s24, %s6310_s24 }
 0x2c4   :  { %7720 = vmatmul.mubr.bf16.vlgmr.msra.gmra.mrb[8].mxu1 %v6954_v48  ;;  %v9840_v15 = vpop.f32.mrb[22].mxu0  ;;  %v5938_v48 = vsel %vm8336_vm4, %v5933_v11, %v5937_v36  ;;  %p8177_p0 = scmp.ne.s32.totalorder %s6310_s24, %s8176_s2  ;;  %p8182_p2 = scmp.lt.s32.totalorder %s8176_s2, %s8176_s2 }
 0x2c5   :  { %7723 = vmatprep.mubr.bf16.mxu1 %v6955_v2  ;;  %v9842_v29 = vpop.f32.mrb[23].mxu0  ;;  %v6957_v28 = vcombine.low %v5924_v39, %v5938_v48  ;;  %v5980_v2 = vsel %vm8336_vm4, %v5975_v1, %v5979_v56  ;;  %v5952_v45 = vsel %vm8336_vm4, %v5947_v13, %v5951_v17  ;;  %v5994_v22 = vsel %vm8336_vm4, %v5989_v10, %v5993_v19 }
 0x2c6   :  { %v6958_v50 = vcombine.low %v5952_v45, %v5966_v61  ;;  %v6959_v62 = vcombine.low %v5980_v2, %v5994_v22  ;;  %v6022_v39 = vsel %vm8336_vm4, %v6017_v18, %v6021_v53  ;;  %p8183_p3 = por %p8182_p2, %p8181_p1 }
 0x2c7   :  { %v6960_v7 = vcombine.low %v6008_v43, %v6022_v39 }
 0x2c8   :  { %p8184_p4 = pnand %p8183_p3, %p8177_p0 }
 0x2cb   :  { %v9848_v63 = vpop.f32.mrb[24].mxu0 }
 0x2cc   :  { %7724 = vmatmul.mubr.bf16.gmra.mrb[12].mxu1 %v6956_v31  ;;  %v9850_v54 = vpop.f32.mrb[25].mxu0 }
 0x2cd   :  { %7727 = vmatprep.mubr.bf16.mxu1 %v6957_v28  ;;  %v9852_v59 = vpop.f32.mrb[26].mxu0 }
 0x2ce   :  { %v9854_v14 = vpop.f32.mrb[27].mxu0 }
 0x2d3   :  { %v9864_v36 = vpop.f32.mrb[28].mxu0 }
 0x2d4   :  { %7728 = vmatmul.mubr.bf16.gmra.mrb[16].mxu1 %v6958_v50  ;;  %v9866_v11 = vpop.f32.mrb[29].mxu0 }
 0x2d5   :  { %7731 = vmatprep.mubr.bf16.mxu1 %v6959_v62  ;;  %v9868_v26 = vpop.f32.mrb[30].mxu0 }
 0x2d6   :  { %v9870_v20 = vpop.f32.mrb[31].mxu0 }
 0x2dc   :  { %7732 = vmatmul.mubr.bf16.gmra.mrb[20].mxu1 %v6960_v7 }
 0x397   :  { %v7721_v35 = vpop.f32.mrb[8].mxu1 }
 0x398   :  { %v7745_v37 = vadd.f32 %v7721_v35, %v9810_v30  ;;  %v6154_v52 = vpop.f32.mrb[9].mxu1 }
 0x399   :  { %v7746_v33 = vadd.f32 %v6154_v52, %v9817_v24  ;;  %v7722_v12 = vpop.f32.mrb[10].mxu1 }
 0x39a   :  { %v6242_v46 = vadd.f32 %v7745_v37, %v9879_v58  ;;  %v7747_v51 = vadd.f32 %v7722_v12, %v9822_v32  ;;  %v6157_v57 = vpop.f32.mrb[11].mxu1 }
 0x39b   :  { %v6240_v44 = vadd.f32 %v7746_v33, %v9879_v58  ;;  %v7748_v42 = vadd.f32 %v6157_v57, %v9826_v4 }
 0x39c   :  { %v6243_v31 = vadd.f32 %v7747_v51, %v9879_v58  ;;  %v6258_v60 = vmax.f32 %v6242_v46, 0.0 }
 0x39d   :  { %v6241_v48 = vadd.f32 %v7748_v42, %v9879_v58  ;;  %v6256_v30 = vmax.f32 %v6240_v44, 0.0 }
 0x39e   :  { %v6259_v6 = vmax.f32 %v6243_v31, 0.0 }
 0x39f   :  { %v6257_v28 = vmax.f32 %v6241_v48, 0.0  ;;  %v7725_v55 = vpop.f32.mrb[12].mxu1 }
 0x3a0   :  { %v6994_v24 = vpack.c.bf16 %v6259_v6, %v6258_v60  ;;  %v7749_v21 = vadd.f32 %v7725_v55, %v9832_v8  ;;  %v6170_v41 = vpop.f32.mrb[13].mxu1 }
 0x3a1   :  { %v6989_v47 = vpack.c.bf16 %v6257_v28, %v6256_v30  ;;  %v7750_v32 = vadd.f32 %v6170_v41, %v9836_v5  ;;  %v7726_v25 = vpop.f32.mrb[14].mxu1 }
 0x3a2   :  { %7026 = vst [vmem:[#allocation3 + $0x8] sm:$0xff] %v6994_v24   ;;  %v6246_v4 = vadd.f32 %v7749_v21, %v9879_v58  ;;  %v7751_v40 = vadd.f32 %v7726_v25, %v9840_v15  ;;  %v6173_v3 = vpop.f32.mrb[15].mxu1 }
 0x3a3   :  { %6990 = vst [vmem:[#allocation3] sm:$0xff] %v6989_v47   ;;  %v6244_v34 = vadd.f32 %v7750_v32, %v9879_v58  ;;  %v7752_v1 = vadd.f32 %v6173_v3, %v9842_v29 }
 0x3a4   :  { %v6247_v56 = vadd.f32 %v7751_v40, %v9879_v58  ;;  %v6262_v27 = vmax.f32 %v6246_v4, 0.0 }
 0x3a5   :  { %v6245_v8 = vadd.f32 %v7752_v1, %v9879_v58  ;;  %v6260_v17 = vmax.f32 %v6244_v34, 0.0 }
 0x3a6   :  { %v6263_v13 = vmax.f32 %v6247_v56, 0.0 }
 0x3a7   :  { %v6261_v5 = vmax.f32 %v6245_v8, 0.0  ;;  %v7729_v10 = vpop.f32.mrb[16].mxu1 }
 0x3a8   :  { %v7004_v19 = vpack.c.bf16 %v6263_v13, %v6262_v27  ;;  %v7753_v9 = vadd.f32 %v7729_v10, %v9848_v63  ;;  %v6186_v61 = vpop.f32.mrb[17].mxu1 }
 0x3a9   :  { %v6999_v15 = vpack.c.bf16 %v6261_v5, %v6260_v17  ;;  %v7754_v49 = vadd.f32 %v6186_v61, %v9850_v54  ;;  %v7730_v16 = vpop.f32.mrb[18].mxu1 }
 0x3aa   :  { %7028 = vst [vmem:[#allocation3 + $0x18] sm:$0xff] %v7004_v19   ;;  %v6250_v29 = vadd.f32 %v7753_v9, %v9879_v58  ;;  %v7755_v38 = vadd.f32 %v7730_v16, %v9852_v59  ;;  %v6189_v2 = vpop.f32.mrb[19].mxu1 }
 0x3ab   :  { %7027 = vst [vmem:[#allocation3 + $0x10] sm:$0xff] %v6999_v15   ;;  %v6248_v45 = vadd.f32 %v7754_v49, %v9879_v58  ;;  %v7756_v50 = vadd.f32 %v6189_v2, %v9854_v14 }
 0x3ac   :  { %v6251_v22 = vadd.f32 %v7755_v38, %v9879_v58  ;;  %v6266_v23 = vmax.f32 %v6250_v29, 0.0 }
 0x3ad   :  { %v6249_v63 = vadd.f32 %v7756_v50, %v9879_v58  ;;  %v6264_v0 = vmax.f32 %v6248_v45, 0.0 }
 0x3ae   :  { %v6267_v62 = vmax.f32 %v6251_v22, 0.0 }
 0x3af   :  { %v6265_v54 = vmax.f32 %v6249_v63, 0.0  ;;  %v7733_v18 = vpop.f32.mrb[20].mxu1 }
 0x3b0   :  { %v7014_v53 = vpack.c.bf16 %v6267_v62, %v6266_v23  ;;  %v7757_v43 = vadd.f32 %v7733_v18, %v9864_v36  ;;  %v6202_v39 = vpop.f32.mrb[21].mxu1 }
 0x3b1   :  { %v7009_v59 = vpack.c.bf16 %v6265_v54, %v6264_v0  ;;  %v7758_v7 = vadd.f32 %v6202_v39, %v9866_v11  ;;  %v7734_v35 = vpop.f32.mrb[22].mxu1 }
 0x3b2   :  { %7030 = vst [vmem:[#allocation3 + $0x28] sm:$0xff] %v7014_v53   ;;  %v6254_v14 = vadd.f32 %v7757_v43, %v9879_v58  ;;  %v7759_v37 = vadd.f32 %v7734_v35, %v9868_v26  ;;  %v6205_v52 = vpop.f32.mrb[23].mxu1 }
 0x3b3   :  { %7029 = vst [vmem:[#allocation3 + $0x20] sm:$0xff] %v7009_v59   ;;  %v6252_v33 = vadd.f32 %v7758_v7, %v9879_v58  ;;  %v7760_v12 = vadd.f32 %v6205_v52, %v9870_v20 }
 0x3b4   :  { %v6255_v46 = vadd.f32 %v7759_v37, %v9879_v58  ;;  %v6270_v51 = vmax.f32 %v6254_v14, 0.0 }
 0x3b5   :  { %v6253_v36 = vadd.f32 %v7760_v12, %v9879_v58  ;;  %v6268_v11 = vmax.f32 %v6252_v33, 0.0 }
 0x3b6   :  { %v6271_v57 = vmax.f32 %v6255_v46, 0.0 }
 0x3b7   :  { %v6269_v44 = vmax.f32 %v6253_v36, 0.0 }
 0x3b8   :  { %v7024_v42 = vpack.c.bf16 %v6271_v57, %v6270_v51 }
 0x3b9   :  { %v7019_v31 = vpack.c.bf16 %v6269_v44, %v6268_v11 }
 0x3ba   :  { %7032 = vst [vmem:[#allocation3 + $0x38] sm:$0xff] %v7024_v42  }
 0x3bb   :  { %7031 = vst [vmem:[#allocation3 + $0x30] sm:$0xff] %v7019_v31  }
 0x3bc   :  { %8187 = shalt.err (!%p8184_p4)
}
 0x3bd   :  { %s8188_s27 = scalar_lea.hbm %s9932_s7, 1024 }
 0x3be   :  { %p8189_p5 = scmp.ne.s32.totalorder %s9932_s7, %s8188_s27  ;;  %p8192_p6 = scmp.lt.u32.totalorder %s8188_s27, %s9932_s7 }
 0x3c0   :  { %p8194_p7 = pnand %p8192_p6, %p8189_p5 }
 0x3c2   :  { %8197 = shalt.err (!%p8194_p7)
}
 0x3c3   :  { %s8202_s30 = smov 64   ;;  %s8203_s8 = smov 4  }
 0x3c4   :  { %6315 = dma.vmem_to_hbm [thread:$0]  %s6310_s24, 1024, %s9932_s7, [#allocation4], %s8202_s30, %s8202_s30, %s8203_s8  }
 0x3c5   :  { %8198 = dma.done.wait [#allocation4], 1024  }
 0x3c6   :  { %8199 = vsyncadd [#allocation4], 4294966272 }
 0x3c7   :  { %6319 = vsyncpa [#allocation4], 1 }

// kernel: tpu_custom_call.1
= control target key start
LH: loop header
LB: loop body
LE: loop exit
PB: predicated region body
PF: predicated region fallthrough
CT: control target
= control target key end

     0   :  { %vm129_vm0 = vcmask 1041408   ;;  %vm104_vm1 = vcmask 31744   ;;  %vm426_vm2 = vsmask.f32 3328  ;;  %vm427_vm3 = vsmask.f32 7440  ;;  %s9925_s0 = inlined_call_operand.vmem [shape: bf16[4,2,10,10,4], index: 0, kind: input, shape index: {}]   ;;  %s9926_s1 = inlined_call_operand.vmem [shape: bf16[9,4,128], index: 1, kind: input, shape index: {}]   ;;  %s9927_s2 = inlined_call_operand.vmem [shape: f32[1,128], index: 2, kind: input, shape index: {}]   ;;  %s9928_s3 = inlined_call_operand.vmem [shape: bf16[9,128,128], index: 3, kind: input, shape index: {}]   ;;  %s9929_s4 = inlined_call_operand.vmem [shape: f32[1,128], index: 4, kind: input, shape index: {}]   ;;  %s9930_s5 = inlined_call_operand.vmem [shape: bf16[2,8,8,4], index: 5, kind: input, shape index: {}]   ;;  %s9931_s6 = inlined_call_operand.vmem [shape: bf16[4,128], index: 6, kind: input, shape index: {}]   ;;  %s9932_s7 = inlined_call_operand.hbm [shape: bf16[2,8,8,128], index: 7, kind: output, shape index: {}]  }
   0x1   :  { %v6336_v0 = vld [vmem:[%s9926_s1 + $0x2] sm:$0x3]  ;;  %v8025_v3 = vld [vmem:[%s9925_s0 + $0xb0] ss:$8 sps:$4 sm:$0xff]   ;;  %v44_v4 = vld [vmem:[%s9926_s1] sm:$0x3] }
   0x2   :  { %8009 = vmatprep.subr.msk.bf16.mxu0 %vm129_vm0, %v6336_v0  ;;  %v131_v1 = vsel %vm129_vm0, %v6336_v0, 0  ;;  %v8024_v2 = vld [vmem:[%s9925_s0 + $0xa0] ss:$8 sps:$4 sm:$0xff]   ;;  %8010 = vmatprep.subr.msk.bf16.mxu1 %vm129_vm0, %v6336_v0  ;;  %v295_v5 = vsel %vm129_vm0, %v44_v4, 0  ;;  %v6369_v7 = vld [vmem:[%s9926_s1 + $0x4] sm:$0x3]  ;;  %vm8336_vm4 = vmor %vm426_vm2, %vm427_vm3 }
   0x3   :  { %7268 = vmatpush3.bf16.msra.mxu0 %v131_v1  ;;  %7736 = vmatpush3.bf16.msra.mxu1 %v131_v1  ;;  %v8026_v6 = vld [vmem:[%s9925_s0 + $0xc0] ss:$8 sps:$4 sm:$0xff]   ;;  %v8027_v8 = vld [vmem:[%s9925_s0 + $0xd0] ss:$8 sps:$4 sm:$0xff]   ;;  %v704_v16 = vsel %vm129_vm0, %v6369_v7, 0 }
   0x4   :  { %7269 = vmatprep.mubr.msk.bf16.mxu0 %vm104_vm1, %v8024_v2  ;;  %8011 = vmatprep.subr.msk.bf16.mxu0 %vm129_vm0, %v44_v4  ;;  %v8028_v9 = vld [vmem:[%s9925_s0] ss:$8 sps:$4 sm:$0xff]   ;;  %v8029_v11 = vld [vmem:[%s9925_s0 + $0x10] ss:$8 sps:$4 sm:$0xff]   ;;  %v6402_v21 = vld [vmem:[%s9926_s1 + $0x6] sm:$0x3] }
   0x5   :  { %v394_v10 = vld [vmem:[%s9925_s0] sm:$0xf]  ;;  %v396_v12 = vld [vmem:[%s9925_s0 + $0x8] sm:$0xf]  ;;  %v398_v17 = vld [vmem:[%s9925_s0 + $0x10] sm:$0xf] }
   0x6   :  { %7270 = vmatmul.mubr.msk.bf16.vlgmr.msra.gmra.mrb[0].mxu0 %vm104_vm1, %v8025_v3  ;;  %v8030_v13 = vld [vmem:[%s9925_s0 + $0x20] ss:$8 sps:$4 sm:$0xff]   ;;  %v430_v14 = vshrl.u32 %v394_v10, 16  ;;  %v433_v15 = vshll.u32 %v394_v10, 16  ;;  %v444_v18 = vshrl.u32 %v396_v12, 16  ;;  %v447_v19 = vshll.u32 %v396_v12, 16 }
   0x7   :  { %7286 = vmatpush3.bf16.msra.mxu0 %v295_v5  ;;  %7273 = vmatprep.mubr.msk.bf16.mxu0 %vm104_vm1, %v8026_v6  ;;  %v400_v20 = vld [vmem:[%s9925_s0 + $0x18] sm:$0xf]  ;;  %v395_v22 = vld [vmem:[%s9925_s0 + $0x4] sm:$0x1]  ;;  %v458_v25 = vshrl.u32 %v398_v17, 16  ;;  %v461_v26 = vshll.u32 %v398_v17, 16 }
   0x8   :  { %8012 = vmatprep.subr.msk.bf16.mxu0 %vm129_vm0, %v6369_v7  ;;  %v432_v23 = vrot.slane %v430_v14, 4  ;;  %v435_v24 = vrot.slane %v433_v15, 5  ;;  %v397_v27 = vld [vmem:[%s9925_s0 + $0xc] sm:$0x1]  ;;  %v472_v28 = vshrl.u32 %v400_v20, 16  ;;  %v475_v29 = vshll.u32 %v400_v20, 16 }
   0x9   :  { %v8031_v30 = vld [vmem:[%s9925_s0 + $0x30] ss:$8 sps:$4 sm:$0xff]   ;;  %v446_v31 = vrot.slane %v444_v18, 4  ;;  %v449_v32 = vrot.slane %v447_v19, 5  ;;  %v402_v33 = vld [vmem:[%s9925_s0 + $0x20] sm:$0xf] }
   0xa   :  { %v8032_v34 = vld [vmem:[%s9925_s0 + $0x50] ss:$8 sps:$4 sm:$0xff]   ;;  %v439_v35 = vshll.u32 %v395_v22, 16  ;;  %v399_v36 = vld [vmem:[%s9925_s0 + $0x14] sm:$0x1]  ;;  %v436_v37 = vor.u32 %v435_v24, %v432_v23  ;;  %v453_v38 = vshll.u32 %v397_v27, 16 }
   0xb   :  { %v460_v39 = vrot.slane %v458_v25, 4  ;;  %v463_v40 = vrot.slane %v461_v26, 5  ;;  %v404_v41 = vld [vmem:[%s9925_s0 + $0x28] sm:$0xf]  ;;  %v401_v42 = vld [vmem:[%s9925_s0 + $0x1c] sm:$0x1]  ;;  %v450_v47 = vor.u32 %v449_v32, %v446_v31 }
   0xc   :  { %v474_v43 = vrot.slane %v472_v28, 4  ;;  %v477_v44 = vrot.slane %v475_v29, 5  ;;  %v486_v45 = vshrl.u32 %v402_v33, 16  ;;  %v489_v46 = vshll.u32 %v402_v33, 16  ;;  %v403_v49 = vld [vmem:[%s9925_s0 + $0x24] sm:$0x1] }
   0xd   :  { %v467_v48 = vshll.u32 %v399_v36, 16  ;;  %v500_v50 = vshrl.u32 %v404_v41, 16  ;;  %v503_v51 = vshll.u32 %v404_v41, 16  ;;  %v437_v52 = vrot.slane %v436_v37, 4  ;;  %v8033_v56 = vld [vmem:[%s9925_s0 + $0x60] ss:$8 sps:$4 sm:$0xff]  }
   0xe   :  { %7274 = vmatmul.mubr.msk.bf16.gmra.mrb[4].mxu0 %vm104_vm1, %v8027_v8  ;;  %v441_v53 = vrot.slane %v439_v35, 5  ;;  %v455_v54 = vrot.slane %v453_v38, 5  ;;  %v481_v55 = vshll.u32 %v401_v42, 16  ;;  %v464_v58 = vor.u32 %v463_v40, %v460_v39  ;;  %v406_v62 = vld [vmem:[%s9925_s0 + $0x30] sm:$0xf] }
   0xf   :  { %7287 = vmatprep.mubr.msk.bf16.mxu0 %vm104_vm1, %v8028_v9  ;;  %v478_v59 = vor.u32 %v477_v44, %v474_v43  ;;  %v488_v60 = vrot.slane %v486_v45, 4  ;;  %v491_v61 = vrot.slane %v489_v46, 5  ;;  %v8034_v63 = vld [vmem:[%s9925_s0 + $0x70] ss:$8 sps:$4 sm:$0xff]   ;;  %v451_v0 = vrot.slane %v450_v47, 4 }
  0x10   :  { %v469_v1 = vrot.slane %v467_v48, 5  ;;  %v8347_v2 = vsel %vm129_vm0, %v6402_v21, 0  ;;  %v405_v3 = vld [vmem:[%s9925_s0 + $0x2c] sm:$0x1]  ;;  %v495_v4 = vshll.u32 %v403_v49, 16  ;;  %v502_v5 = vrot.slane %v500_v50, 4 }
  0x11   :  { %v505_v6 = vrot.slane %v503_v51, 5  ;;  %v408_v7 = vld [vmem:[%s9925_s0 + $0x38] sm:$0xf]  ;;  %v410_v8 = vld [vmem:[%s9925_s0 + $0x50] sm:$0xf]  ;;  %v442_v9 = vsel %vm8336_vm4, %v437_v52, %v441_v53  ;;  %v483_v10 = vrot.slane %v481_v55, 5  ;;  %v456_v23 = vsel %vm8336_vm4, %v451_v0, %v455_v54 }
  0x12   :  { %v514_v12 = vshrl.u32 %v406_v62, 16  ;;  %v465_v14 = vrot.slane %v464_v58, 4  ;;  %v479_v15 = vrot.slane %v478_v59, 4  ;;  %v509_v17 = vshll.u32 %v405_v3, 16  ;;  %v412_v18 = vld [vmem:[%s9925_s0 + $0x58] sm:$0xf] }
  0x13   :  { %v528_v19 = vshrl.u32 %v408_v7, 16  ;;  %v531_v20 = vshll.u32 %v408_v7, 16  ;;  %v545_v22 = vshll.u32 %v410_v8, 16  ;;  %v8369_v24 = vrot.slane %v495_v4, 5  ;;  %v409_v27 = vld [vmem:[%s9925_s0 + $0x3c] sm:$0x1] }
  0x14   :  { %v506_v25 = vor.u32 %v505_v6, %v502_v5  ;;  %v516_v28 = vrot.slane %v514_v12, 4  ;;  %v559_v31 = vshll.u32 %v412_v18, 16  ;;  %v8035_v32 = vld [vmem:[%s9925_s0 + $0x80] ss:$8 sps:$4 sm:$0xff]   ;;  %v470_v33 = vsel %vm8336_vm4, %v465_v14, %v469_v1  ;;  %v411_v37 = vld [vmem:[%s9925_s0 + $0x54] sm:$0x1] }
  0x15   :  { %v511_v36 = vrot.slane %v509_v17, 5  ;;  %v413_v38 = vld [vmem:[%s9925_s0 + $0x5c] sm:$0x1]  ;;  %v530_v39 = vrot.slane %v528_v19, 4  ;;  %v533_v40 = vrot.slane %v531_v20, 5  ;;  %v547_v42 = vrot.slane %v545_v22, 5 }
  0x16   :  { %7288 = vmatmul.mubr.msk.bf16.vlgmr.msra.gmra.mrb[0].mxu0 %vm104_vm1, %v8029_v11  ;;  %v407_v11 = vld [vmem:[%s9925_s0 + $0x34] sm:$0x1]  ;;  %v414_v43 = vld [vmem:[%s9925_s0 + $0x60] sm:$0xf]  ;;  %v6370_v44 = vcombine.low %v442_v9, %v456_v23  ;;  %v507_v45 = vrot.slane %v506_v25, 4  ;;  %v537_v46 = vshll.u32 %v409_v27, 16 }
  0x17   :  { %7304 = vmatpush3.bf16.msra.mxu0 %v704_v16  ;;  %7291 = vmatprep.mubr.msk.bf16.mxu0 %vm104_vm1, %v8030_v13  ;;  %v517_v13 = vshll.u32 %v406_v62, 16  ;;  %v492_v16 = vor.u32 %v491_v61, %v488_v60  ;;  %v523_v26 = vshll.u32 %v407_v11, 16  ;;  %v561_v50 = vrot.slane %v559_v31, 5  ;;  %v416_v51 = vld [vmem:[%s9925_s0 + $0x68] sm:$0xf] }
  0x18   :  { %8013 = vmatprep.subr.msk.bf16.mxu0 %vm129_vm0, %v6402_v21  ;;  %v542_v21 = vshrl.u32 %v410_v8, 16  ;;  %v418_v52 = vld [vmem:[%s9925_s0 + $0x70] sm:$0xf]  ;;  %v570_v55 = vshrl.u32 %v414_v43, 16  ;;  %v534_v58 = vor.u32 %v533_v40, %v530_v39  ;;  %v551_v60 = vshll.u32 %v411_v37, 16 }
  0x19   :  { %v519_v29 = vrot.slane %v517_v13, 5  ;;  %v493_v35 = vrot.slane %v492_v16, 4  ;;  %v8400_v54 = vrot.slane %v523_v26, 5  ;;  %v565_v61 = vshll.u32 %v413_v38, 16  ;;  %v420_v62 = vld [vmem:[%s9925_s0 + $0x78] sm:$0xf] }
  0x1a   :  { %v544_v41 = vrot.slane %v542_v21, 4  ;;  %v587_v0 = vshll.u32 %v416_v51, 16  ;;  %v598_v1 = vshrl.u32 %v418_v52, 16  ;;  %v601_v3 = vshll.u32 %v418_v52, 16  ;;  %v415_v8 = vld [vmem:[%s9925_s0 + $0x64] sm:$0x1] }
  0x1b   :  { %v520_v48 = vor.u32 %v519_v29, %v516_v28  ;;  %v498_v53 = vsel %vm8336_vm4, %v493_v35, %v8369_v24  ;;  %v512_v4 = vsel %vm8336_vm4, %v507_v45, %v511_v36  ;;  %v539_v6 = vrot.slane %v537_v46, 5  ;;  %v417_v9 = vld [vmem:[%s9925_s0 + $0x6c] sm:$0x1]  ;;  %v419_v12 = vld [vmem:[%s9925_s0 + $0x74] sm:$0x1] }
  0x1c   :  { %v548_v59 = vor.u32 %v547_v42, %v544_v41  ;;  %v612_v13 = vshrl.u32 %v420_v62, 16  ;;  %v615_v14 = vshll.u32 %v420_v62, 16  ;;  %v553_v17 = vrot.slane %v551_v60, 5  ;;  %v422_v19 = vld [vmem:[%s9925_s0 + $0x80] sm:$0xf] }
  0x1d   :  { %v521_v5 = vrot.slane %v520_v48, 4  ;;  %v589_v21 = vrot.slane %v587_v0, 5  ;;  %v600_v22 = vrot.slane %v598_v1, 4  ;;  %v603_v23 = vrot.slane %v601_v3, 5  ;;  %v424_v27 = vld [vmem:[%s9925_s0 + $0x88] sm:$0xf] }
  0x1e   :  { %7292 = vmatmul.mubr.msk.bf16.gmra.mrb[4].mxu0 %vm104_vm1, %v8031_v30  ;;  %v556_v30 = vshrl.u32 %v412_v18, 16  ;;  %v549_v16 = vrot.slane %v548_v59, 4  ;;  %v567_v18 = vrot.slane %v565_v61, 5  ;;  %v6372_v24 = vcombine.low %v498_v53, %v512_v4  ;;  %v6435_v36 = vld [vmem:[%s9926_s1 + $0x8] sm:$0x3] }
  0x1f   :  { %7295 = vmatprep.mubr.msk.bf16.mxu0 %vm104_vm1, %v8032_v34  ;;  %v484_v34 = vsel %vm8336_vm4, %v479_v15, %v483_v10  ;;  %v572_v10 = vrot.slane %v570_v55, 4  ;;  %v535_v15 = vrot.slane %v534_v58, 4  ;;  %v579_v26 = vshll.u32 %v415_v8, 16 }
  0x20   :  { %v6371_v47 = vcombine.low %v470_v33, %v484_v34  ;;  %v558_v49 = vrot.slane %v556_v30, 4  ;;  %v614_v29 = vrot.slane %v612_v13, 4  ;;  %v617_v30 = vrot.slane %v615_v14, 5  ;;  %v421_v34 = vld [vmem:[%s9925_s0 + $0x7c] sm:$0x1] }
  0x21   :  { %v526_v31 = vsel %vm8336_vm4, %v521_v5, %v8400_v54  ;;  %v593_v33 = vshll.u32 %v417_v9, 16  ;;  %v607_v35 = vshll.u32 %v419_v12, 16  ;;  %v604_v38 = vor.u32 %v603_v23, %v600_v22  ;;  %v425_v54 = vld [vmem:[%s9925_s0 + $0x8c] sm:$0x1]  ;;  %v8039_v22 = vld [vmem:[%s9925_s0 + $0x170] ss:$8 sps:$4 sm:$0xff]  }
  0x22   :  { %v562_v7 = vor.u32 %v561_v50, %v558_v49  ;;  %v626_v39 = vshrl.u32 %v422_v19, 16  ;;  %v629_v40 = vshll.u32 %v422_v19, 16  ;;  %v554_v41 = vsel %vm8336_vm4, %v549_v16, %v553_v17  ;;  %v8036_v17 = vld [vmem:[%s9925_s0 + $0x140] ss:$8 sps:$4 sm:$0xff]   ;;  %v8040_v23 = vld [vmem:[%s9925_s0 + $0x190] ss:$8 sps:$4 sm:$0xff]  }
  0x23   :  { %v581_v42 = vrot.slane %v579_v26, 5  ;;  %v618_v48 = vor.u32 %v617_v30, %v614_v29  ;;  %v595_v50 = vrot.slane %v593_v33, 5  ;;  %v605_v53 = vrot.slane %v604_v38, 4  ;;  %v8038_v19 = vld [vmem:[%s9925_s0 + $0x160] ss:$8 sps:$4 sm:$0xff]  }
  0x24   :  { %v563_v25 = vrot.slane %v562_v7, 4  ;;  %v628_v55 = vrot.slane %v626_v39, 4  ;;  %v649_v5 = vshll.u32 %v425_v54, 16  ;;  %v8043_v26 = vld [vmem:[%s9925_s0 + $0x1c0] ss:$8 sps:$4 sm:$0xff]  }
  0x25   :  { %v619_v61 = vrot.slane %v618_v48, 4  ;;  %v6454_v30 = vld [vmem:[%s9925_s0 + $0x148] sm:$0xf]  ;;  %v8045_v33 = vld [vmem:[%s9925_s0 + $0x1f0] ss:$8 sps:$4 sm:$0xff]  }
  0x26   :  { %7296 = vmatmul.mubr.msk.bf16.gmra.mrb[8].mxu0 %vm104_vm1, %v8033_v56  ;;  %v573_v56 = vshll.u32 %v414_v43, 16  ;;  %v640_v43 = vshrl.u32 %v424_v27, 16  ;;  %v568_v45 = vsel %vm8336_vm4, %v563_v25, %v567_v18  ;;  %v651_v13 = vrot.slane %v649_v5, 5  ;;  %v8037_v18 = vld [vmem:[%s9925_s0 + $0x150] ss:$8 sps:$4 sm:$0xff]  }
  0x27   :  { %7299 = vmatprep.mubr.msk.bf16.mxu0 %vm104_vm1, %v8034_v63  ;;  %v584_v63 = vshrl.u32 %v416_v51, 16  ;;  %v609_v51 = vrot.slane %v607_v35, 5  ;;  %v6374_v58 = vcombine.low %v554_v41, %v568_v45  ;;  %v8042_v25 = vld [vmem:[%s9925_s0 + $0x1b0] ss:$8 sps:$4 sm:$0xff]   ;;  %v8046_v35 = vld [vmem:[%s9925_s0 + $0x200] ss:$8 sps:$4 sm:$0xff]  }
  0x28   :  { %v575_v11 = vrot.slane %v573_v56, 5  ;;  %v631_v56 = vrot.slane %v629_v40, 5  ;;  %v642_v59 = vrot.slane %v640_v43, 4  ;;  %v1267_v38 = vshll.u32 %v6454_v30, 16  ;;  %v6453_v43 = vld [vmem:[%s9925_s0 + $0x144] sm:$0x1] }
  0x29   :  { %v586_v20 = vrot.slane %v584_v63, 4  ;;  %v6460_v45 = vld [vmem:[%s9925_s0 + $0x160] sm:$0xf]  ;;  %v6459_v54 = vld [vmem:[%s9925_s0 + $0x15c] sm:$0x1] }
  0x2a   :  { %v576_v28 = vor.u32 %v575_v11, %v572_v10  ;;  %v632_v3 = vor.u32 %v631_v56, %v628_v55 }
  0x2b   :  { %v590_v37 = vor.u32 %v589_v21, %v586_v20  ;;  %v1102_v20 = vsel %vm129_vm0, %v6435_v36, 0  ;;  %v6484_v21 = vld [vmem:[%s9926_s1 + $0xa] sm:$0x3] }
  0x2c   :  { %v577_v46 = vrot.slane %v576_v28, 4  ;;  %v633_v11 = vrot.slane %v632_v3, 4  ;;  %v6452_v28 = vld [vmem:[%s9925_s0 + $0x140] sm:$0xf]  ;;  %v1524_v29 = vsel %vm129_vm0, %v6484_v21, 0 }
  0x2d   :  { %v591_v52 = vrot.slane %v590_v37, 4  ;;  %v1264_v37 = vshrl.u32 %v6454_v30, 16  ;;  %v6461_v3 = vld [vmem:[%s9925_s0 + $0x164] sm:$0x1] }
  0x2e   :  { %7300 = vmatmul.mubr.msk.bf16.gmra.mrb[12].mxu0 %vm104_vm1, %v8035_v32  ;;  %v540_v32 = vsel %vm8336_vm4, %v535_v15, %v539_v6  ;;  %v582_v63 = vsel %vm8336_vm4, %v577_v46, %v581_v42  ;;  %v610_v6 = vsel %vm8336_vm4, %v605_v53, %v609_v51  ;;  %v6455_v46 = vld [vmem:[%s9925_s0 + $0x14c] sm:$0x1]  ;;  %v1269_v51 = vrot.slane %v1267_v38, 5 }
  0x2f   :  { %7305 = vmatprep.mubr.msk.bf16.mxu0 %vm104_vm1, %v6370_v44  ;;  %v643_v44 = vshll.u32 %v424_v27, 16  ;;  %v6373_v49 = vcombine.low %v526_v31, %v540_v32  ;;  %v596_v1 = vsel %vm8336_vm4, %v591_v52, %v595_v50  ;;  %v8044_v27 = vld [vmem:[%s9925_s0 + $0x1e0] ss:$8 sps:$4 sm:$0xff]   ;;  %v1250_v31 = vshrl.u32 %v6452_v28, 16 }
  0x30   :  { %v6375_v8 = vcombine.low %v582_v63, %v596_v1  ;;  %v1253_v32 = vshll.u32 %v6452_v28, 16  ;;  %v1266_v50 = vrot.slane %v1264_v37, 4  ;;  %v8047_v63 = vld [vmem:[%s9925_s0 + $0x210] ss:$8 sps:$4 sm:$0xff]   ;;  %v1273_v1 = vshll.u32 %v6455_v46, 16 }
  0x31   :  { %v645_v60 = vrot.slane %v643_v44, 5  ;;  %v6517_v44 = vld [vmem:[%s9926_s1 + $0xc] sm:$0x3]  ;;  %v1252_v48 = vrot.slane %v1250_v31, 4  ;;  %v6466_v31 = vld [vmem:[%s9925_s0 + $0x178] sm:$0xf] }
  0x32   :  { %v1270_v5 = vor.u32 %v1269_v51, %v1266_v50  ;;  %v6468_v37 = vld [vmem:[%s9925_s0 + $0x190] sm:$0xf] }
  0x33   :  { %v646_v4 = vor.u32 %v645_v60, %v642_v59  ;;  %v1309_v59 = vshll.u32 %v6460_v45, 16  ;;  %v1259_v60 = vshll.u32 %v6453_v43, 16  ;;  %v6470_v43 = vld [vmem:[%s9925_s0 + $0x198] sm:$0xf] }
  0x35   :  { %v647_v12 = vrot.slane %v646_v4, 4  ;;  %v8048_v4 = vld [vmem:[%s9925_s0 + $0x230] ss:$8 sps:$4 sm:$0xff]  }
  0x36   :  { %7306 = vmatmul.mubr.msk.bf16.vlgmr.msra.gmra.mrb[0].mxu0 %vm104_vm1, %v6371_v47  ;;  %v621_v47 = vshll.u32 %v421_v34, 16  ;;  %v6456_v34 = vld [vmem:[%s9925_s0 + $0x150] sm:$0xf] }
  0x37   :  { %7322 = vmatpush3.bf16.msra.mxu0 %v8347_v2  ;;  %7309 = vmatprep.mubr.msk.bf16.mxu0 %vm104_vm1, %v6372_v24  ;;  %v423_v2 = vld [vmem:[%s9925_s0 + $0x84] sm:$0x1]  ;;  %v652_v15 = vsel %vm8336_vm4, %v647_v12, %v651_v13  ;;  %v8041_v24 = vld [vmem:[%s9925_s0 + $0x1a0] ss:$8 sps:$4 sm:$0xff]   ;;  %v1278_v39 = vshrl.u32 %v6456_v34, 16  ;;  %v1281_v40 = vshll.u32 %v6456_v34, 16 }
  0x38   :  { %8014 = vmatprep.subr.msk.bf16.mxu0 %vm129_vm0, %v6435_v36  ;;  %v623_v62 = vrot.slane %v621_v47, 5  ;;  %v635_v0 = vshll.u32 %v423_v2, 16  ;;  %v6458_v36 = vld [vmem:[%s9925_s0 + $0x158] sm:$0xf]  ;;  %v1255_v47 = vrot.slane %v1253_v32, 5  ;;  %v1311_v12 = vrot.slane %v1309_v59, 5 }
  0x39   :  { %v1292_v41 = vshrl.u32 %v6458_v36, 16  ;;  %v1295_v42 = vshll.u32 %v6458_v36, 16  ;;  %v6457_v2 = vld [vmem:[%s9925_s0 + $0x154] sm:$0x1]  ;;  %v1280_v52 = vrot.slane %v1278_v39, 4  ;;  %v1283_v53 = vrot.slane %v1281_v40, 5 }
  0x3a   :  { %v624_v7 = vsel %vm8336_vm4, %v619_v61, %v623_v62  ;;  %v637_v9 = vrot.slane %v635_v0, 5  ;;  %v1256_v0 = vor.u32 %v1255_v47, %v1252_v48  ;;  %v8562_v13 = vrot.slane %v1259_v60, 5  ;;  %v6467_v32 = vld [vmem:[%s9925_s0 + $0x17c] sm:$0x1]  ;;  %v8068_v40 = vld [vmem:[%s9925_s0 + $0xf0] ss:$8 sps:$4 sm:$0xff]  }
  0x3b   :  { %v6376_v10 = vcombine.low %v610_v6, %v624_v7  ;;  %v1294_v55 = vrot.slane %v1292_v41, 4  ;;  %v1297_v56 = vrot.slane %v1295_v42, 5  ;;  %v1287_v6 = vshll.u32 %v6457_v2, 16  ;;  %v6472_v47 = vld [vmem:[%s9925_s0 + $0x1a0] sm:$0xf]  ;;  %7277 = vmatprep.mubr.msk.bf16.mxu1 %vm104_vm1, %v8068_v40 }
  0x3c   :  { %v638_v14 = vsel %vm8336_vm4, %v633_v11, %v637_v9  ;;  %v1301_v7 = vshll.u32 %v6459_v54, 16  ;;  %v1284_v9 = vor.u32 %v1283_v53, %v1280_v52  ;;  %v1348_v41 = vshrl.u32 %v6466_v31, 16  ;;  %v8069_v52 = vld [vmem:[%s9925_s0 + $0x100] ss:$8 sps:$4 sm:$0xff]  }
  0x3d   :  { %v6377_v16 = vcombine.low %v638_v14, %v652_v15  ;;  %v1315_v14 = vshll.u32 %v6461_v3, 16  ;;  %v1351_v42 = vshll.u32 %v6466_v31, 16  ;;  %v1357_v51 = vshll.u32 %v6467_v32, 16  ;;  %7278 = vmatmul.mubr.msk.bf16.vlgmr.msra.gmra.mrb[0].mxu1 %vm104_vm1, %v8069_v52  ;;  %v6477_v31 = vld [vmem:[%s9925_s0 + $0x1b4] sm:$0x1]  ;;  %v8072_v40 = vld [vmem:[%s9930_s5] sm:$0xff]  }
  0x3e   :  { %7310 = vmatmul.mubr.msk.bf16.gmra.mrb[4].mxu0 %vm104_vm1, %v6373_v49  ;;  %v6462_v49 = vld [vmem:[%s9925_s0 + $0x168] sm:$0xf]  ;;  %v8586_v28 = vrot.slane %v1284_v9, 4  ;;  %v1362_v2 = vshrl.u32 %v6468_v37, 16  ;;  %v1350_v59 = vrot.slane %v1348_v41, 4 }
  0x3f   :  { %7313 = vmatprep.mubr.msk.bf16.mxu0 %vm104_vm1, %v6374_v58  ;;  %v1306_v58 = vshrl.u32 %v6460_v45, 16  ;;  %v1320_v61 = vshrl.u32 %v6462_v49, 16  ;;  %v1323_v62 = vshll.u32 %v6462_v49, 16  ;;  %v1317_v34 = vrot.slane %v1315_v14, 5  ;;  %v6479_v32 = vld [vmem:[%s9925_s0 + $0x1bc] sm:$0x1] }
  0x40   :  { %v1353_v60 = vrot.slane %v1351_v42, 5 }
  0x41   :  { %v1308_v11 = vrot.slane %v1306_v58, 4  ;;  %v1322_v15 = vrot.slane %v1320_v61, 4  ;;  %v1365_v58 = vshll.u32 %v6468_v37, 16  ;;  %v1376_v61 = vshrl.u32 %v6470_v43, 16 }
  0x43   :  { %v1312_v30 = vor.u32 %v1311_v12, %v1308_v11  ;;  %v1367_v12 = vrot.slane %v1365_v58, 5  ;;  %v1441_v58 = vshll.u32 %v6479_v32, 16  ;;  %v8073_v32 = vld [vmem:[%s9930_s5 + $0x8] sm:$0xff]  }
  0x45   :  { %v1313_v46 = vrot.slane %v1312_v30, 4  ;;  %v6475_v30 = vld [vmem:[%s9925_s0 + $0x1ac] sm:$0x1] }
  0x46   :  { %7314 = vmatmul.mubr.msk.bf16.gmra.mrb[8].mxu0 %vm104_vm1, %v6375_v8  ;;  %v6464_v8 = vld [vmem:[%s9925_s0 + $0x170] sm:$0xf] }
  0x47   :  { %7317 = vmatprep.mubr.msk.bf16.mxu0 %vm104_vm1, %v6376_v10  ;;  %v1298_v10 = vor.u32 %v1297_v56, %v1294_v55  ;;  %v6469_v56 = vld [vmem:[%s9925_s0 + $0x194] sm:$0x1] }
  0x48   :  { %v1371_v9 = vshll.u32 %v6469_v56, 16  ;;  %v1427_v56 = vshll.u32 %v6477_v31, 16 }
  0x4a   :  { %v8684_v37 = vrot.slane %v1371_v9, 5 }
  0x4e   :  { %7318 = vmatmul.mubr.msk.bf16.gmra.mrb[12].mxu0 %vm104_vm1, %v6377_v16  ;;  %v1325_v16 = vrot.slane %v1323_v62, 5  ;;  %v1379_v62 = vshll.u32 %v6470_v43, 16 }
  0x4f   :  { %7323 = vmatprep.mubr.msk.bf16.mxu0 %vm104_vm1, %v8036_v17  ;;  %v8565_v17 = vrot.slane %v1256_v0, 4  ;;  %v8051_v0 = vld [vmem:[%s9925_s0 + $0x260] ss:$8 sps:$4 sm:$0xff]  }
  0x56   :  { %7324 = vmatmul.mubr.msk.bf16.vlgmr.msra.gmra.mrb[0].mxu0 %vm104_vm1, %v8037_v18  ;;  %v8567_v18 = vrot.slane %v1273_v1, 5  ;;  %v1318_v1 = vsel %vm8336_vm4, %v1313_v46, %v1317_v34 }
  0x57   :  { %7340 = vmatpush3.bf16.msra.mxu0 %v1102_v20  ;;  %7327 = vmatprep.mubr.msk.bf16.mxu0 %vm104_vm1, %v8038_v19  ;;  %v6463_v19 = vld [vmem:[%s9925_s0 + $0x16c] sm:$0x1]  ;;  %v1334_v20 = vshrl.u32 %v6464_v8, 16 }
  0x58   :  { %8015 = vmatprep.subr.msk.bf16.mxu0 %vm129_vm0, %v6484_v21  ;;  %v1337_v21 = vshll.u32 %v6464_v8, 16  ;;  %v1329_v36 = vshll.u32 %v6463_v19, 16  ;;  %v1364_v8 = vrot.slane %v1362_v2, 4  ;;  %v1378_v19 = vrot.slane %v1376_v61, 4 }
  0x59   :  { %v1336_v38 = vrot.slane %v1334_v20, 4  ;;  %v1381_v20 = vrot.slane %v1379_v62, 5 }
  0x5a   :  { %v1339_v39 = vrot.slane %v1337_v21, 5  ;;  %v1331_v50 = vrot.slane %v1329_v36, 5  ;;  %v6473_v21 = vld [vmem:[%s9925_s0 + $0x1a4] sm:$0x1]  ;;  %v1368_v42 = vor.u32 %v1367_v12, %v1364_v8 }
  0x5b   :  { %v1382_v46 = vor.u32 %v1381_v20, %v1378_v19 }
  0x5c   :  { %v1340_v55 = vor.u32 %v1339_v39, %v1336_v38 }
  0x5e   :  { %7328 = vmatmul.mubr.msk.bf16.gmra.mrb[4].mxu0 %vm104_vm1, %v8039_v22  ;;  %v1271_v22 = vrot.slane %v1270_v5, 4  ;;  %v1393_v5 = vshll.u32 %v6472_v47, 16  ;;  %v8653_v11 = vrot.slane %v1340_v55, 4  ;;  %v1413_v55 = vshll.u32 %v6475_v30, 16 }
  0x5f   :  { %7331 = vmatprep.mubr.msk.bf16.mxu0 %vm104_vm1, %v8040_v23  ;;  %v8573_v23 = vrot.slane %v1287_v6, 5 }
  0x60   :  { %v1276_v45 = vsel %vm8336_vm4, %v1271_v22, %v8567_v18  ;;  %v6471_v18 = vld [vmem:[%s9925_s0 + $0x19c] sm:$0x1]  ;;  %v6480_v22 = vld [vmem:[%s9925_s0 + $0x1c0] sm:$0xf] }
  0x61   :  { %v1290_v53 = vsel %vm8336_vm4, %v8586_v28, %v8573_v23  ;;  %v1446_v43 = vshrl.u32 %v6480_v22, 16 }
  0x66   :  { %7332 = vmatmul.mubr.msk.bf16.gmra.mrb[8].mxu0 %vm104_vm1, %v8041_v24  ;;  %v8575_v24 = vrot.slane %v1301_v7, 5  ;;  %v8648_v7 = vrot.slane %v1357_v51, 5 }
  0x67   :  { %7335 = vmatprep.mubr.msk.bf16.mxu0 %vm104_vm1, %v8042_v25  ;;  %v8578_v25 = vsel %vm129_vm0, %v6517_v44, 0 }
  0x6e   :  { %7336 = vmatmul.mubr.msk.bf16.gmra.mrb[12].mxu0 %vm104_vm1, %v8043_v26  ;;  %v6465_v26 = vld [vmem:[%s9925_s0 + $0x174] sm:$0x1] }
  0x6f   :  { %7341 = vmatprep.mubr.msk.bf16.mxu0 %vm104_vm1, %v8044_v27  ;;  %v8049_v27 = vld [vmem:[%s9925_s0 + $0x240] ss:$8 sps:$4 sm:$0xff]   ;;  %v1343_v48 = vshll.u32 %v6465_v26, 16 }
  0x71   :  { %v8644_v3 = vrot.slane %v1343_v48, 5  ;;  %v1385_v48 = vshll.u32 %v6471_v18, 16  ;;  %v1443_v18 = vrot.slane %v1441_v58, 5  ;;  %v8060_v58 = vld [vmem:[%s9925_s0 + $0xa8] ss:$8 sps:$4 sm:$0xff]  }
  0x73   :  { %v1346_v36 = vsel %vm8336_vm4, %v8653_v11, %v8644_v3  ;;  %v8077_v3 = vld [vmem:[%s9930_s5 + $0x10] sm:$0xff]  }
  0x76   :  { %7342 = vmatmul.mubr.msk.bf16.vlgmr.msra.gmra.mrb[0].mxu0 %vm104_vm1, %v8045_v33  ;;  %v8050_v33 = vld [vmem:[%s9925_s0 + $0x250] ss:$8 sps:$4 sm:$0xff]  }
  0x77   :  { %7358 = vmatpush3.bf16.msra.mxu0 %v1524_v29  ;;  %7345 = vmatprep.mubr.msk.bf16.mxu0 %vm104_vm1, %v8046_v35  ;;  %v8588_v29 = vrot.slane %v1298_v10, 4  ;;  %v1326_v35 = vor.u32 %v1325_v16, %v1322_v15  ;;  %v6476_v10 = vld [vmem:[%s9925_s0 + $0x1b0] sm:$0xf]  ;;  %v6478_v15 = vld [vmem:[%s9925_s0 + $0x1b8] sm:$0xf] }
  0x78   :  { %8016 = vmatprep.subr.msk.bf16.mxu0 %vm129_vm0, %v6517_v44  ;;  %v1262_v44 = vsel %vm8336_vm4, %v8565_v17, %v8562_v13  ;;  %v1354_v17 = vor.u32 %v1353_v60, %v1350_v59  ;;  %v1418_v26 = vshrl.u32 %v6476_v10, 16  ;;  %v1435_v34 = vshll.u32 %v6478_v15, 16  ;;  %v6481_v59 = vld [vmem:[%s9925_s0 + $0x1c4] sm:$0x1] }
  0x79   :  { %v1327_v49 = vrot.slane %v1326_v35, 4  ;;  %v1304_v54 = vsel %vm8336_vm4, %v8588_v29, %v8575_v24  ;;  %v6485_v16 = vcombine.low %v1262_v44, %v1276_v45  ;;  %v1395_v24 = vrot.slane %v1393_v5, 5  ;;  %v8070_v35 = vld [vmem:[%s9925_s0 + $0x110] ss:$8 sps:$4 sm:$0xff]   ;;  %v8071_v45 = vld [vmem:[%s9925_s0 + $0x120] ss:$8 sps:$4 sm:$0xff]  }
  0x7a   :  { %v6486_v28 = vcombine.low %v1290_v53, %v1304_v54  ;;  %v1355_v41 = vrot.slane %v1354_v17, 4  ;;  %v1449_v44 = vshll.u32 %v6480_v22, 16  ;;  %7281 = vmatprep.mubr.msk.bf16.mxu1 %vm104_vm1, %v8070_v35  ;;  %v1420_v51 = vrot.slane %v1418_v26, 4  ;;  %v2655_v17 = vld [vmem:[%s9931_s6] sm:$0x3] }
  0x7b   :  { %v1332_v6 = vsel %vm8336_vm4, %v1327_v49, %v1331_v50  ;;  %v1399_v49 = vshll.u32 %v6473_v21, 16  ;;  %v6482_v50 = vld [vmem:[%s9925_s0 + $0x1c8] sm:$0xf]  ;;  %v1437_v53 = vrot.slane %v1435_v34, 5  ;;  %7282 = vmatmul.mubr.msk.bf16.gmra.mrb[4].mxu1 %vm104_vm1, %v8071_v45  ;;  %v1448_v60 = vrot.slane %v1446_v43, 4  ;;  %8019 = vmatprep.subr.msk.bf16.mxu1 %vm129_vm0, %v2655_v17  ;;  %v8078_v43 = vld [vmem:[%s9930_s5 + $0x18] sm:$0xff]  }
  0x7c   :  { %v6487_v29 = vcombine.low %v1318_v1, %v1332_v6  ;;  %7463 = vmatprep.mubr.msk.bf16.mxu1 %vm104_vm1, %v8072_v40  ;;  %v1451_v61 = vrot.slane %v1449_v44, 5  ;;  %v1460_v62 = vshrl.u32 %v6482_v50, 16  ;;  %v1369_v1 = vrot.slane %v1368_v42, 4  ;;  %v8079_v40 = vld [vmem:[%s9928_s3 + $0x50] sm:$0xff]  }
  0x7d   :  { %v1387_v5 = vrot.slane %v1385_v48, 5  ;;  %v1401_v6 = vrot.slane %v1399_v49, 5  ;;  %v1455_v12 = vshll.u32 %v6481_v59, 16  ;;  %v3157_v31 = vsel %vm129_vm0, %v2655_v17, 0 }
  0x7e   :  { %7346 = vmatmul.mubr.msk.bf16.gmra.mrb[4].mxu0 %vm104_vm1, %v8047_v63  ;;  %v6474_v63 = vld [vmem:[%s9925_s0 + $0x1a8] sm:$0xf]  ;;  %v1452_v19 = vor.u32 %v1451_v61, %v1448_v60  ;;  %v1462_v20 = vrot.slane %v1460_v62, 4  ;;  %v1374_v22 = vsel %vm8336_vm4, %v1369_v1, %v8684_v37  ;;  %7462 = vmatpush3.bf16.msra.mxu1 %v3157_v31 }
  0x7f   :  { %7349 = vmatprep.mubr.msk.bf16.mxu0 %vm104_vm1, %v8048_v4  ;;  %v1390_v4 = vshrl.u32 %v6472_v47, 16  ;;  %v1404_v13 = vshrl.u32 %v6474_v63, 16  ;;  %v1407_v14 = vshll.u32 %v6474_v63, 16  ;;  %v1463_v63 = vshll.u32 %v6482_v50, 16  ;;  %v8075_v37 = vld [vmem:[%s9928_s3 + $0x48] sm:$0xff]  }
  0x80   :  { %v1453_v34 = vrot.slane %v1452_v19, 4  ;;  %v8053_v50 = vld [vmem:[%s9925_s0 + $0x18] ss:$8 sps:$4 sm:$0xff]  }
  0x81   :  { %v1392_v23 = vrot.slane %v1390_v4, 4  ;;  %v1406_v38 = vrot.slane %v1404_v13, 4  ;;  %v1409_v39 = vrot.slane %v1407_v14, 5  ;;  %v1383_v4 = vrot.slane %v1382_v46, 4  ;;  %v6550_v13 = vld [vmem:[%s9926_s1 + $0xe] sm:$0x3] }
  0x82   :  { %v1465_v21 = vrot.slane %v1463_v63, 5 }
  0x83   :  { %v1396_v47 = vor.u32 %v1395_v24, %v1392_v23  ;;  %v1410_v54 = vor.u32 %v1409_v39, %v1406_v38  ;;  %v1388_v23 = vsel %vm8336_vm4, %v1383_v4, %v1387_v5  ;;  %7464 = vmatmul.mubr.msk.bf16.vlgmr.msra.gmra.mrb[8].mxu1 %vm104_vm1, %v8073_v32 }
  0x84   :  { %v1466_v35 = vor.u32 %v1465_v21, %v1462_v20  ;;  %7467 = vmatprep.mubr.msk.bf16.mxu1 %vm104_vm1, %v8077_v3 }
  0x85   :  { %v1397_v14 = vrot.slane %v1396_v47, 4  ;;  %v8052_v47 = vld [vmem:[%s9925_s0 + $0x8] ss:$8 sps:$4 sm:$0xff]  }
  0x86   :  { %7350 = vmatmul.mubr.msk.bf16.gmra.mrb[8].mxu0 %vm104_vm1, %v8049_v27  ;;  %v1421_v27 = vshll.u32 %v6476_v10, 16  ;;  %v6483_v10 = vld [vmem:[%s9925_s0 + $0x1cc] sm:$0x1]  ;;  %v1467_v39 = vrot.slane %v1466_v35, 4 }
  0x87   :  { %7353 = vmatprep.mubr.msk.bf16.mxu0 %vm104_vm1, %v8050_v33  ;;  %v1432_v33 = vshrl.u32 %v6478_v15, 16  ;;  %v1411_v15 = vrot.slane %v1410_v54, 4  ;;  %v1469_v24 = vshll.u32 %v6483_v10, 16  ;;  %v1402_v11 = vsel %vm8336_vm4, %v1397_v14, %v1401_v6  ;;  %v8057_v54 = vld [vmem:[%s9925_s0 + $0x68] ss:$8 sps:$4 sm:$0xff]  }
  0x88   :  { %v1423_v2 = vrot.slane %v1421_v27, 5 }
  0x89   :  { %v1434_v52 = vrot.slane %v1432_v33, 4  ;;  %v6489_v33 = vcombine.low %v1374_v22, %v1388_v23  ;;  %v1471_v38 = vrot.slane %v1469_v24, 5 }
  0x8a   :  { %v1424_v8 = vor.u32 %v1423_v2, %v1420_v51  ;;  %v8054_v51 = vld [vmem:[%s9925_s0 + $0x28] ss:$8 sps:$4 sm:$0xff]  }
  0x8b   :  { %v1438_v9 = vor.u32 %v1437_v53, %v1434_v52  ;;  %7468 = vmatmul.mubr.msk.bf16.gmra.mrb[12].mxu1 %vm104_vm1, %v8078_v43  ;;  %v1472_v48 = vsel %vm8336_vm4, %v1467_v39, %v1471_v38  ;;  %v6599_v2 = vld [vmem:[%s9926_s1 + $0x10] sm:$0x3]  ;;  %v8055_v52 = vld [vmem:[%s9925_s0 + $0x38] ss:$8 sps:$4 sm:$0xff]  }
  0x8c   :  { %v1425_v26 = vrot.slane %v1424_v8, 4  ;;  %v8056_v53 = vld [vmem:[%s9925_s0 + $0x58] ss:$8 sps:$4 sm:$0xff]  }
  0x8d   :  { %v1439_v27 = vrot.slane %v1438_v9, 4 }
  0x8e   :  { %7354 = vmatmul.mubr.msk.bf16.gmra.mrb[12].mxu0 %vm104_vm1, %v8051_v0  ;;  %v1360_v0 = vsel %vm8336_vm4, %v1355_v41, %v8648_v7  ;;  %v1415_v7 = vrot.slane %v1413_v55, 5  ;;  %v8058_v55 = vld [vmem:[%s9925_s0 + $0x78] ss:$8 sps:$4 sm:$0xff]  }
  0x8f   :  { %7359 = vmatprep.mubr.msk.bf16.mxu0 %vm104_vm1, %v6485_v16  ;;  %v1429_v16 = vrot.slane %v1427_v56, 5  ;;  %v6488_v30 = vcombine.low %v1346_v36, %v1360_v0  ;;  %v1444_v42 = vsel %vm8336_vm4, %v1439_v27, %v1443_v18  ;;  %v8059_v56 = vld [vmem:[%s9925_s0 + $0x88] ss:$8 sps:$4 sm:$0xff]  }
  0x90   :  { %v1416_v36 = vsel %vm8336_vm4, %v1411_v15, %v1415_v7 }
  0x91   :  { %v1430_v41 = vsel %vm8336_vm4, %v1425_v26, %v1429_v16  ;;  %v6490_v44 = vcombine.low %v1402_v11, %v1416_v36 }
  0x92   :  { %v6491_v45 = vcombine.low %v1430_v41, %v1444_v42 }
  0x96   :  { %7360 = vmatmul.mubr.msk.bf16.vlgmr.msra.gmra.mrb[0].mxu0 %vm104_vm1, %v6486_v28  ;;  %v1457_v28 = vrot.slane %v1455_v12, 5 }
  0x97   :  { %7376 = vmatpush3.bf16.msra.mxu0 %v8578_v25  ;;  %7363 = vmatprep.mubr.msk.bf16.mxu0 %vm104_vm1, %v6487_v29  ;;  %v8074_v25 = vld [vmem:[%s9928_s3 + $0x40] sm:$0xff]   ;;  %v1922_v29 = vsel %vm129_vm0, %v6550_v13, 0 }
  0x98   :  { %8017 = vmatprep.subr.msk.bf16.mxu0 %vm129_vm0, %v6550_v13  ;;  %7479 = vmatprep.subr.bf16.mxu1 %v8074_v25  ;;  %v1458_v46 = vsel %vm8336_vm4, %v1453_v34, %v1457_v28 }
  0x99   :  { %7480 = vmatpush3.bf16.msra.mxu1 %v8074_v25  ;;  %v6492_v49 = vcombine.low %v1458_v46, %v1472_v48 }
  0x9a   :  { %7481 = vmatprep.subr.bf16.mxu1 %v8075_v37 }
  0x9d   :  { %7482 = vmatpush3.bf16.msra.mxu1 %v8075_v37 }
  0x9e   :  { %7364 = vmatmul.mubr.msk.bf16.gmra.mrb[4].mxu0 %vm104_vm1, %v6488_v30  ;;  %7483 = vmatprep.subr.bf16.mxu1 %v8079_v40 }
  0x9f   :  { %7367 = vmatprep.mubr.msk.bf16.mxu0 %vm104_vm1, %v6489_v33 }
  0xa1   :  { %7484 = vmatpush3.bf16.msra.mxu1 %v8079_v40 }
  0xa6   :  { %7368 = vmatmul.mubr.msk.bf16.gmra.mrb[8].mxu0 %vm104_vm1, %v6490_v44 }
  0xa7   :  { %7371 = vmatprep.mubr.msk.bf16.mxu0 %vm104_vm1, %v6491_v45 }
  0xae   :  { %7372 = vmatmul.mubr.msk.bf16.gmra.mrb[12].mxu0 %vm104_vm1, %v6492_v49 }
  0xaf   :  { %7377 = vmatprep.mubr.msk.bf16.mxu0 %vm104_vm1, %v8052_v47 }
  0xb6   :  { %7378 = vmatmul.mubr.msk.bf16.vlgmr.msra.gmra.mrb[0].mxu0 %vm104_vm1, %v8053_v50 }
  0xb7   :  { %7394 = vmatpush3.bf16.msra.mxu0 %v1922_v29  ;;  %7381 = vmatprep.mubr.msk.bf16.mxu0 %vm104_vm1, %v8054_v51 }
  0xb8   :  { %8018 = vmatprep.subr.msk.bf16.mxu0 %vm129_vm0, %v6599_v2 }
  0xbe   :  { %7382 = vmatmul.mubr.msk.bf16.gmra.mrb[4].mxu0 %vm104_vm1, %v8055_v52 }
  0xbf   :  { %7385 = vmatprep.mubr.msk.bf16.mxu0 %vm104_vm1, %v8056_v53 }
  0xc6   :  { %7386 = vmatmul.mubr.msk.bf16.gmra.mrb[8].mxu0 %vm104_vm1, %v8057_v54 }
  0xc7   :  { %7389 = vmatprep.mubr.msk.bf16.mxu0 %vm104_vm1, %v8058_v55 }
  0xce   :  { %7390 = vmatmul.mubr.msk.bf16.gmra.mrb[12].mxu0 %vm104_vm1, %v8059_v56 }
  0xcf   :  { %7395 = vmatprep.mubr.msk.bf16.mxu0 %vm104_vm1, %v8060_v58 }
  0xd0   :  { %12 = vsyncpa [#allocation4], 0  ;;  %v6567_v59 = vld [vmem:[%s9925_s0 + $0x8] sm:$0xf]  ;;  %v8061_v60 = vld [vmem:[%s9925_s0 + $0xb8] ss:$8 sps:$4 sm:$0xff]  }
  0xd1   :  { %v6569_v61 = vld [vmem:[%s9925_s0 + $0x10] sm:$0xf]  ;;  %v2070_v63 = vshrl.u32 %v6567_v59, 16  ;;  %v2073_v0 = vshll.u32 %v6567_v59, 16  ;;  %v2344_v1 = vsel %vm129_vm0, %v6599_v2, 0  ;;  %v8828_v5 = vld [vmem:[%s9928_s3] sm:$0xff]  }
  0xd2   :  { %v8062_v62 = vld [vmem:[%s9925_s0 + $0xc8] ss:$8 sps:$4 sm:$0xff]   ;;  %v6571_v4 = vld [vmem:[%s9925_s0 + $0x18] sm:$0xf]  ;;  %v2084_v6 = vshrl.u32 %v6569_v61, 16  ;;  %v2087_v8 = vshll.u32 %v6569_v61, 16 }
  0xd3   :  { %v6573_v9 = vld [vmem:[%s9925_s0 + $0x20] sm:$0xf]  ;;  %v2072_v10 = vrot.slane %v2070_v63, 4  ;;  %v2075_v12 = vrot.slane %v2073_v0, 5  ;;  %v2098_v13 = vshrl.u32 %v6571_v4, 16  ;;  %v2101_v14 = vshll.u32 %v6571_v4, 16 }
  0xd4   :  { %v6568_v15 = vld [vmem:[%s9925_s0 + $0xc] sm:$0x1]  ;;  %v2112_v7 = vshrl.u32 %v6573_v9, 16  ;;  %v2115_v16 = vshll.u32 %v6573_v9, 16  ;;  %v8063_v17 = vld [vmem:[%s9925_s0 + $0xd8] ss:$8 sps:$4 sm:$0xff]  }
  0xd5   :  { %v2086_v18 = vrot.slane %v2084_v6, 4  ;;  %v2089_v19 = vrot.slane %v2087_v8, 5  ;;  %v6575_v20 = vld [vmem:[%s9925_s0 + $0x28] sm:$0xf]  ;;  %v8064_v21 = vld [vmem:[%s9925_s0 + $0xf8] ss:$8 sps:$4 sm:$0xff]   ;;  %v2076_v24 = vor.u32 %v2075_v12, %v2072_v10 }
  0xd6   :  { %7396 = vmatmul.mubr.msk.bf16.vlgmr.msra.gmra.mrb[0].mxu0 %vm104_vm1, %v8061_v60  ;;  %v6570_v22 = vld [vmem:[%s9925_s0 + $0x14] sm:$0x1]  ;;  %v6572_v23 = vld [vmem:[%s9925_s0 + $0x1c] sm:$0x1]  ;;  %v2079_v25 = vshll.u32 %v6568_v15, 16  ;;  %v2100_v27 = vrot.slane %v2098_v13, 4 }
  0xd7   :  { %7412 = vmatpush3.bf16.msra.mxu0 %v2344_v1  ;;  %7399 = vmatprep.mubr.msk.bf16.mxu0 %vm104_vm1, %v8062_v62  ;;  %v6574_v26 = vld [vmem:[%s9925_s0 + $0x24] sm:$0x1]  ;;  %v2103_v28 = vrot.slane %v2101_v14, 5  ;;  %v2114_v29 = vrot.slane %v2112_v7, 4  ;;  %v2117_v30 = vrot.slane %v2115_v16, 5  ;;  %v2126_v32 = vshrl.u32 %v6575_v20, 16 }
  0xd8   :  { %7429 = vmatprep.subr.bf16.mxu0 %v8828_v5  ;;  %v6577_v31 = vld [vmem:[%s9925_s0 + $0x30] sm:$0xf]  ;;  %v2129_v33 = vshll.u32 %v6575_v20, 16  ;;  %v2090_v34 = vor.u32 %v2089_v19, %v2086_v18  ;;  %v2093_v35 = vshll.u32 %v6570_v22, 16  ;;  %v2107_v37 = vshll.u32 %v6572_v23, 16 }
  0xd9   :  { %v2121_v38 = vshll.u32 %v6574_v26, 16  ;;  %v2077_v3 = vrot.slane %v2076_v24, 4  ;;  %v2081_v11 = vrot.slane %v2079_v25, 5  ;;  %v6576_v36 = vld [vmem:[%s9925_s0 + $0x2c] sm:$0x1]  ;;  %v2140_v39 = vshrl.u32 %v6577_v31, 16 }
  0xda   :  { %v2143_v40 = vshll.u32 %v6577_v31, 16  ;;  %v8065_v41 = vld [vmem:[%s9925_s0 + $0x108] ss:$8 sps:$4 sm:$0xff]   ;;  %v2104_v42 = vor.u32 %v2103_v28, %v2100_v27  ;;  %v2118_v43 = vor.u32 %v2117_v30, %v2114_v29  ;;  %v2128_v44 = vrot.slane %v2126_v32, 4  ;;  %v6579_v46 = vld [vmem:[%s9925_s0 + $0x38] sm:$0xf] }
  0xdb   :  { %v2131_v45 = vrot.slane %v2129_v33, 5  ;;  %v8066_v48 = vld [vmem:[%s9925_s0 + $0x118] ss:$8 sps:$4 sm:$0xff]   ;;  %v2091_v47 = vrot.slane %v2090_v34, 4  ;;  %v2095_v49 = vrot.slane %v2093_v35, 5  ;;  %v2109_v50 = vrot.slane %v2107_v37, 5 }
  0xdc   :  { %v2123_v51 = vrot.slane %v2121_v38, 5  ;;  %v2135_v2 = vshll.u32 %v6576_v36, 16  ;;  %v6581_v52 = vld [vmem:[%s9925_s0 + $0x40] sm:$0xf]  ;;  %v6583_v53 = vld [vmem:[%s9925_s0 + $0x58] sm:$0xf]  ;;  %v2082_v60 = vsel %vm8336_vm4, %v2077_v3, %v2081_v11 }
  0xdd   :  { %v2142_v54 = vrot.slane %v2140_v39, 4  ;;  %v2145_v55 = vrot.slane %v2143_v40, 5  ;;  %v2154_v56 = vshrl.u32 %v6579_v46, 16  ;;  %v2157_v58 = vshll.u32 %v6579_v46, 16  ;;  %v6585_v59 = vld [vmem:[%s9925_s0 + $0x60] sm:$0xf] }
  0xde   :  { %7400 = vmatmul.mubr.msk.bf16.gmra.mrb[4].mxu0 %vm104_vm1, %v8063_v17  ;;  %v2105_v61 = vrot.slane %v2104_v42, 4  ;;  %v2119_v62 = vrot.slane %v2118_v43, 4  ;;  %v6578_v63 = vld [vmem:[%s9925_s0 + $0x34] sm:$0x1]  ;;  %v2132_v0 = vor.u32 %v2131_v45, %v2128_v44  ;;  %v6580_v1 = vld [vmem:[%s9925_s0 + $0x3c] sm:$0x1]  ;;  %v2096_v10 = vsel %vm8336_vm4, %v2091_v47, %v2095_v49 }
  0xdf   :  { %7403 = vmatprep.mubr.msk.bf16.mxu0 %vm104_vm1, %v8064_v21  ;;  %v2168_v4 = vshrl.u32 %v6581_v52, 16  ;;  %v2171_v6 = vshll.u32 %v6581_v52, 16  ;;  %v2182_v8 = vshrl.u32 %v6583_v53, 16  ;;  %v2185_v9 = vshll.u32 %v6583_v53, 16  ;;  %v8067_v18 = vld [vmem:[%s9925_s0 + $0x128] ss:$8 sps:$4 sm:$0xff]  }
  0xe0   :  { %v8894_v12 = vrot.slane %v2135_v2, 5  ;;  %v2196_v13 = vshrl.u32 %v6585_v59, 16  ;;  %v2199_v14 = vshll.u32 %v6585_v59, 16  ;;  %v2146_v15 = vor.u32 %v2145_v55, %v2142_v54  ;;  %v6582_v22 = vld [vmem:[%s9925_s0 + $0x44] sm:$0x1] }
  0xe1   :  { %v2149_v7 = vshll.u32 %v6578_v63, 16  ;;  %v2156_v16 = vrot.slane %v2154_v56, 4  ;;  %v2159_v17 = vrot.slane %v2157_v58, 5  ;;  %v2110_v19 = vsel %vm8336_vm4, %v2105_v61, %v2109_v50  ;;  %v6584_v26 = vld [vmem:[%s9925_s0 + $0x5c] sm:$0x1] }
  0xe2   :  { %v2124_v20 = vsel %vm8336_vm4, %v2119_v62, %v2123_v51  ;;  %v2133_v21 = vrot.slane %v2132_v0, 4  ;;  %v2163_v23 = vshll.u32 %v6580_v1, 16  ;;  %v2170_v24 = vrot.slane %v2168_v4, 4  ;;  %v6586_v30 = vld [vmem:[%s9925_s0 + $0x64] sm:$0x1] }
  0xe3   :  { %v2173_v25 = vrot.slane %v2171_v6, 5  ;;  %v2184_v27 = vrot.slane %v2182_v8, 4  ;;  %v2187_v28 = vrot.slane %v2185_v9, 5  ;;  %v6600_v29 = vcombine.low %v2082_v60, %v2096_v10  ;;  %v6587_v33 = vld [vmem:[%s9925_s0 + $0x68] sm:$0xf] }
  0xe4   :  { %v2198_v31 = vrot.slane %v2196_v13, 4  ;;  %v2201_v32 = vrot.slane %v2199_v14, 5  ;;  %v2147_v34 = vrot.slane %v2146_v15, 4  ;;  %v2151_v35 = vrot.slane %v2149_v7, 5  ;;  %v6589_v3 = vld [vmem:[%s9925_s0 + $0x70] sm:$0xf] }
  0xe5   :  { %v2160_v37 = vor.u32 %v2159_v17, %v2156_v16  ;;  %v2177_v38 = vshll.u32 %v6582_v22, 16  ;;  %v6601_v11 = vcombine.low %v2110_v19, %v2124_v20  ;;  %v2138_v36 = vsel %vm8336_vm4, %v2133_v21, %v8894_v12  ;;  %v6593_v46 = vld [vmem:[%s9925_s0 + $0x80] sm:$0xf]  ;;  %v6588_v0 = vld [vmem:[%s9925_s0 + $0x6c] sm:$0x1] }
  0xe6   :  { %7404 = vmatmul.mubr.msk.bf16.gmra.mrb[8].mxu0 %vm104_vm1, %v8065_v41  ;;  %v8922_v39 = vrot.slane %v2163_v23, 5  ;;  %v2191_v40 = vshll.u32 %v6584_v26, 16  ;;  %v6591_v41 = vld [vmem:[%s9925_s0 + $0x78] sm:$0xf]  ;;  %v2174_v42 = vor.u32 %v2173_v25, %v2170_v24  ;;  %v2188_v43 = vor.u32 %v2187_v28, %v2184_v27  ;;  %v6590_v9 = vld [vmem:[%s9925_s0 + $0x74] sm:$0x1] }
  0xe7   :  { %7407 = vmatprep.mubr.msk.bf16.mxu0 %vm104_vm1, %v8066_v48  ;;  %v2205_v44 = vshll.u32 %v6586_v30, 16  ;;  %v2210_v45 = vshrl.u32 %v6587_v33, 16  ;;  %v2202_v48 = vor.u32 %v2201_v32, %v2198_v31  ;;  %v2213_v47 = vshll.u32 %v6587_v33, 16  ;;  %v6595_v12 = vld [vmem:[%s9925_s0 + $0x88] sm:$0xf] }
  0xe8   :  { %v2224_v49 = vshrl.u32 %v6589_v3, 16  ;;  %v2227_v50 = vshll.u32 %v6589_v3, 16  ;;  %v2152_v51 = vsel %vm8336_vm4, %v2147_v34, %v2151_v35  ;;  %v2161_v2 = vrot.slane %v2160_v37, 4  ;;  %v6597_v7 = vld [vmem:[%s9925_s0 + $0x90] sm:$0xf]  ;;  %v8080_v16 = vld [vmem:[%s9928_s3 + $0x8] sm:$0xff]  }
  0xe9   :  { %v2179_v52 = vrot.slane %v2177_v38, 5  ;;  %v2238_v53 = vshrl.u32 %v6591_v41, 16  ;;  %v2193_v54 = vrot.slane %v2191_v40, 5  ;;  %v2241_v55 = vshll.u32 %v6591_v41, 16  ;;  %v6592_v21 = vld [vmem:[%s9925_s0 + $0x7c] sm:$0x1] }
  0xea   :  { %v2252_v56 = vshrl.u32 %v6593_v46, 16  ;;  %v2255_v58 = vshll.u32 %v6593_v46, 16  ;;  %v2175_v59 = vrot.slane %v2174_v42, 4  ;;  %v2189_v60 = vrot.slane %v2188_v43, 4  ;;  %v6594_v22 = vld [vmem:[%s9925_s0 + $0x84] sm:$0x1] }
  0xeb   :  { %v2207_v61 = vrot.slane %v2205_v44, 5  ;;  %v2212_v62 = vrot.slane %v2210_v45, 4  ;;  %v2203_v63 = vrot.slane %v2202_v48, 4  ;;  %v2215_v1 = vrot.slane %v2213_v47, 5  ;;  %v6598_v48 = vld [vmem:[%s9925_s0 + $0x94] sm:$0x1] }
  0xec   :  { %v2226_v4 = vrot.slane %v2224_v49, 4  ;;  %v2229_v6 = vrot.slane %v2227_v50, 5  ;;  %v6602_v8 = vcombine.low %v2138_v36, %v2152_v51  ;;  %v2240_v10 = vrot.slane %v2238_v53, 4 }
  0xed   :  { %v2243_v13 = vrot.slane %v2241_v55, 5  ;;  %v2254_v14 = vrot.slane %v2252_v56, 4  ;;  %v2257_v15 = vrot.slane %v2255_v58, 5  ;;  %v2166_v17 = vsel %vm8336_vm4, %v2161_v2, %v8922_v39  ;;  %v6596_v39 = vld [vmem:[%s9925_s0 + $0x8c] sm:$0x1] }
  0xee   :  { %7408 = vmatmul.mubr.msk.bf16.gmra.mrb[12].mxu0 %vm104_vm1, %v8067_v18  ;;  %v2180_v18 = vsel %vm8336_vm4, %v2175_v59, %v2179_v52  ;;  %v2194_v19 = vsel %vm8336_vm4, %v2189_v60, %v2193_v54  ;;  %v2219_v20 = vshll.u32 %v6588_v0, 16  ;;  %v2208_v23 = vsel %vm8336_vm4, %v2203_v63, %v2207_v61 }
  0xef   :  { %7413 = vmatprep.mubr.msk.bf16.mxu0 %vm104_vm1, %v6600_v29  ;;  %v2216_v24 = vor.u32 %v2215_v1, %v2212_v62  ;;  %v2230_v25 = vor.u32 %v2229_v6, %v2226_v4  ;;  %v2233_v26 = vshll.u32 %v6590_v9, 16  ;;  %v2266_v27 = vshrl.u32 %v6595_v12, 16  ;;  %v8081_v1 = vld [vmem:[%s9928_s3 + $0x58] sm:$0xff]   ;;  %v8996_v4 = vld [vmem:[%s9928_s3 + $0x10] sm:$0xff]   ;;  %v8083_v6 = vld [vmem:[%s9930_s5 + $0x20] sm:$0xff]  }
  0xf0   :  { %v2269_v28 = vshll.u32 %v6595_v12, 16  ;;  %v2280_v29 = vshrl.u32 %v6597_v7, 16  ;;  %v2283_v30 = vshll.u32 %v6597_v7, 16  ;;  %v2244_v31 = vor.u32 %v2243_v13, %v2240_v10  ;;  %7485 = vmatprep.subr.bf16.mxu1 %v8081_v1  ;;  %v9009_v9 = vld [vmem:[%s9928_s3 + $0x60] sm:$0xff]   ;;  %7471 = vmatprep.mubr.msk.bf16.mxu1 %vm104_vm1, %v8083_v6  ;;  %v8086_v12 = vld [vmem:[%s9928_s3 + $0x18] sm:$0xff]   ;;  %v8087_v13 = vld [vmem:[%s9928_s3 + $0x68] sm:$0xff]  }
  0xf1   :  { %v2247_v32 = vshll.u32 %v6592_v21, 16  ;;  %v2258_v33 = vor.u32 %v2257_v15, %v2254_v14  ;;  %v2261_v34 = vshll.u32 %v6594_v22, 16  ;;  %v6603_v35 = vcombine.low %v2166_v17, %v2180_v18  ;;  %7486 = vmatpush3.bf16.msra.mxu1 %v8081_v1  ;;  %v8088_v14 = vld [vmem:[%s9928_s3 + $0x20] sm:$0xff]   ;;  %v8089_v15 = vld [vmem:[%s9930_s5 + $0x30] sm:$0xff]   ;;  %v8090_v7 = vld [vmem:[%s9930_s5 + $0x38] sm:$0xff]  }
  0xf2   :  { %v2221_v37 = vrot.slane %v2219_v20, 5  ;;  %v6604_v38 = vcombine.low %v2194_v19, %v2208_v23  ;;  %v2217_v3 = vrot.slane %v2216_v24, 4  ;;  %v2235_v36 = vrot.slane %v2233_v26, 5  ;;  %7487 = vmatprep.subr.bf16.mxu1 %v9009_v9  ;;  %v8092_v17 = vld [vmem:[%s9928_s3 + $0x28] sm:$0xff]   ;;  %v8093_v18 = vld [vmem:[%s9928_s3 + $0x78] sm:$0xff]   ;;  %v8095_v20 = vld [vmem:[%s9928_s3 + $0x30] sm:$0xff]  }
  0xf3   :  { %v2268_v40 = vrot.slane %v2266_v27, 4  ;;  %v2271_v41 = vrot.slane %v2269_v28, 5  ;;  %v2282_v42 = vrot.slane %v2280_v29, 4  ;;  %v2285_v43 = vrot.slane %v2283_v30, 5  ;;  %v9058_v24 = vld [vmem:[%s9928_s3 + $0x80] sm:$0xff]  }
  0xf4   :  { %v2249_v44 = vrot.slane %v2247_v32, 5  ;;  %v2259_v45 = vrot.slane %v2258_v33, 4  ;;  %v2263_v46 = vrot.slane %v2261_v34, 5  ;;  %v2222_v47 = vsel %vm8336_vm4, %v2217_v3, %v2221_v37 }
  0xf5   :  { %v2275_v49 = vshll.u32 %v6596_v39, 16  ;;  %v2272_v51 = vor.u32 %v2271_v41, %v2268_v40  ;;  %v2286_v2 = vor.u32 %v2285_v43, %v2282_v42  ;;  %v2289_v52 = vshll.u32 %v6598_v48, 16  ;;  %7488 = vmatpush3.bf16.msra.mxu1 %v9009_v9 }
  0xf6   :  { %7414 = vmatmul.mubr.msk.bf16.vlgmr.msra.gmra.mrb[0].mxu0 %vm104_vm1, %v6601_v11  ;;  %v2231_v11 = vrot.slane %v2230_v25, 4  ;;  %v2264_v54 = vsel %vm8336_vm4, %v2259_v45, %v2263_v46  ;;  %v8200_v10 = vmov 0   ;;  %7489 = vmatprep.subr.bf16.mxu1 %v8087_v13  ;;  %v8098_v25 = vld [vmem:[%s9928_s3 + $0x38] sm:$0xff]   ;;  %vm2688_vm5 = vsmask.f32 256 }
  0xf7   :  { %7417 = vmatprep.mubr.msk.bf16.mxu0 %vm104_vm1, %v6602_v8  ;;  %7430 = vmatpush3.bf16.msra.mxu0 %v8828_v5  ;;  %v2245_v5 = vrot.slane %v2244_v31, 4  ;;  %v2277_v56 = vrot.slane %v2275_v49, 5  ;;  %v2273_v59 = vrot.slane %v2272_v51, 4  ;;  %v2287_v60 = vrot.slane %v2286_v2, 4  ;;  %v9004_v8 = vld [vmem:[%s9930_s5 + $0x28] sm:$0xff]  }
  0xf8   :  { %7431 = vmatprep.subr.bf16.mxu0 %v8080_v16  ;;  %v2236_v50 = vsel %vm8336_vm4, %v2231_v11, %v2235_v36  ;;  %v2291_v61 = vrot.slane %v2289_v52, 5  ;;  %2516 = vst [vmem:[#allocation2 + $0x28] sm:$0xf] %v8200_v10  ;;  %2506 = vst [vmem:[#allocation2] sm:$0xf] %v8200_v10  ;;  %7472 = vmatmul.mubr.msk.bf16.gmra.mrb[16].mxu1 %vm104_vm1, %v9004_v8 }
  0xf9   :  { %v2250_v53 = vsel %vm8336_vm4, %v2245_v5, %v2249_v44  ;;  %v6605_v55 = vcombine.low %v2222_v47, %v2236_v50  ;;  %v2278_v62 = vsel %vm8336_vm4, %v2273_v59, %v2277_v56  ;;  %2507 = vst [vmem:[#allocation2 + $0x4] sm:$0xf] %v8200_v10  ;;  %2508 = vst [vmem:[#allocation2 + $0x8] sm:$0xf] %v8200_v10  ;;  %7490 = vmatpush3.bf16.msra.mxu1 %v8087_v13  ;;  %vm2689_vm6 = vsmask.f32 4368 }
  0xfa   :  { %v6606_v58 = vcombine.low %v2250_v53, %v2264_v54  ;;  %v2292_v63 = vsel %vm8336_vm4, %v2287_v60, %v2291_v61  ;;  %2509 = vst [vmem:[#allocation2 + $0xc] sm:$0xf] %v8200_v10  ;;  %2510 = vst [vmem:[#allocation2 + $0x10] sm:$0xf] %v8200_v10  ;;  %7475 = vmatprep.mubr.msk.bf16.mxu1 %vm104_vm1, %v8089_v15 }
  0xfb   :  { %7432 = vmatpush3.bf16.msra.mxu0 %v8080_v16  ;;  %v6607_v0 = vcombine.low %v2278_v62, %v2292_v63  ;;  %2511 = vst [vmem:[#allocation2 + $0x14] sm:$0xf] %v8200_v10  ;;  %2512 = vst [vmem:[#allocation2 + $0x18] sm:$0xf] %v8200_v10  ;;  %v8091_v16 = vld [vmem:[%s9928_s3 + $0x70] sm:$0xff]  }
  0xfc   :  { %7433 = vmatprep.subr.bf16.mxu0 %v8996_v4  ;;  %2513 = vst [vmem:[#allocation2 + $0x1c] sm:$0xf] %v8200_v10  ;;  %2514 = vst [vmem:[#allocation2 + $0x20] sm:$0xf] %v8200_v10  ;;  %7491 = vmatprep.subr.bf16.mxu1 %v8091_v16 }
  0xfd   :  { %2515 = vst [vmem:[#allocation2 + $0x24] sm:$0xf] %v8200_v10  ;;  %2517 = vst [vmem:[#allocation2 + $0x2c] sm:$0xf] %v8200_v10  ;;  %7492 = vmatpush3.bf16.msra.mxu1 %v8091_v16 }
  0xfe   :  { %7418 = vmatmul.mubr.msk.bf16.gmra.mrb[4].mxu0 %vm104_vm1, %v6603_v35  ;;  %2518 = vst [vmem:[#allocation2 + $0x30] sm:$0xf] %v8200_v10  ;;  %2519 = vst [vmem:[#allocation2 + $0x34] sm:$0xf] %v8200_v10  ;;  %7493 = vmatprep.subr.bf16.mxu1 %v8093_v18 }
  0xff   :  { %7421 = vmatprep.mubr.msk.bf16.mxu0 %vm104_vm1, %v6604_v38  ;;  %2520 = vst [vmem:[#allocation2 + $0x38] sm:$0xf] %v8200_v10  ;;  %2521 = vst [vmem:[#allocation2 + $0x3c] sm:$0xf] %v8200_v10  ;;  %7434 = vmatpush3.bf16.msra.mxu0 %v8996_v4  ;;  %v2656_v34 = vld [vmem:[#allocation2] sm:$0x8] }
 0x100   :  { %2522 = vst [vmem:[#allocation2 + $0x40] sm:$0xf] %v8200_v10  ;;  %2523 = vst [vmem:[#allocation2 + $0x44] sm:$0xf] %v8200_v10  ;;  %7435 = vmatprep.subr.bf16.mxu0 %v8086_v12  ;;  %7476 = vmatmul.mubr.msk.bf16.gmra.mrb[20].mxu1 %vm104_vm1, %v8090_v7  ;;  %v3482_v30 = vld [vmem:[#allocation2 + $0x4] sm:$0xf] }
 0x101   :  { %2524 = vst [vmem:[#allocation2 + $0x48] sm:$0xf] %v8200_v10  ;;  %2525 = vst [vmem:[#allocation2 + $0x4c] sm:$0xf] %v8200_v10  ;;  %7494 = vmatpush3.bf16.msra.mxu1 %v8093_v18  ;;  %v3515_v31 = vshrl.u32 %v3482_v30, 16  ;;  %v3518_v32 = vshll.u32 %v3482_v30, 16 }
 0x102   :  { %2526 = vst [vmem:[#allocation2 + $0x50] sm:$0xf] %v8200_v10  ;;  %2527 = vst [vmem:[#allocation2 + $0x54] sm:$0xf] %v8200_v10  ;;  %7511 = vmatprep.subr.bf16.mxu1 %v9058_v24  ;;  %v9072_v33 = vld [vmem:[#allocation2 + $0x4] sm:$0xf] }
 0x103   :  { %2528 = vst [vmem:[#allocation2 + $0x58] sm:$0xf] %v8200_v10  ;;  %2529 = vst [vmem:[#allocation2 + $0x5c] sm:$0xf] %v8200_v10  ;;  %7436 = vmatpush3.bf16.msra.mxu0 %v8086_v12  ;;  %v2658_v37 = vld [vmem:[#allocation2 + $0xc] sm:$0x8] }
 0x104   :  { %2530 = vst [vmem:[#allocation2 + $0x60] sm:$0xf] %v8200_v10  ;;  %2531 = vst [vmem:[#allocation2 + $0x64] sm:$0xf] %v8200_v10  ;;  %7437 = vmatprep.subr.bf16.mxu0 %v8088_v14  ;;  %v2662_v35 = vld [vmem:[#allocation2 + $0x24] sm:$0x8] }
 0x105   :  { %2532 = vst [vmem:[#allocation2 + $0x68] sm:$0xf] %v8200_v10  ;;  %2533 = vst [vmem:[#allocation2 + $0x6c] sm:$0xf] %v8200_v10  ;;  %v2660_v38 = vld [vmem:[#allocation2 + $0x18] sm:$0x8] }
 0x106   :  { %7422 = vmatmul.mubr.msk.bf16.gmra.mrb[8].mxu0 %vm104_vm1, %v6605_v55  ;;  %2534 = vst [vmem:[#allocation2 + $0x70] sm:$0xf] %v8200_v10  ;;  %2535 = vst [vmem:[#allocation2 + $0x74] sm:$0xf] %v8200_v10  ;;  %v2664_v3 = vld [vmem:[#allocation2 + $0x30] sm:$0x8] }
 0x107   :  { %7425 = vmatprep.mubr.msk.bf16.mxu0 %vm104_vm1, %v6606_v58  ;;  %2536 = vst [vmem:[#allocation2 + $0x78] sm:$0xf] %v8200_v10  ;;  %2537 = vst [vmem:[#allocation2 + $0x7c] sm:$0xf] %v8200_v10  ;;  %7438 = vmatpush3.bf16.msra.mxu0 %v8088_v14  ;;  %v3517_v11 = vrot.slane %v3515_v31, 4  ;;  %v3520_v36 = vrot.slane %v3518_v32, 5 }
 0x108   :  { %2538 = vst [vmem:[#allocation2 + $0x80] sm:$0xf] %v8200_v10  ;;  %2539 = vst [vmem:[#allocation2 + $0x84] sm:$0xf] %v8200_v10  ;;  %7439 = vmatprep.subr.bf16.mxu0 %v8092_v17  ;;  %v2697_v39 = vshrl.u32 %v9072_v33, 16  ;;  %v2692_v40 = vshrl.u32 %v2656_v34, 16 }
 0x109   :  { %2540 = vst [vmem:[#allocation2 + $0x88] sm:$0xf] %v8200_v10  ;;  %2541 = vst [vmem:[#allocation2 + $0x8c] sm:$0xf] %v8200_v10  ;;  %v2731_v41 = vshrl.u32 %v2662_v35, 16  ;;  %v2705_v43 = vshrl.u32 %v2658_v37, 16  ;;  %v3521_v46 = vor.u32 %v3520_v36, %v3517_v11 }
 0x10a   :  { %2542 = vst [vmem:[#allocation2 + $0x90] sm:$0xf] %v8200_v10  ;;  %2543 = vst [vmem:[#allocation2 + $0x94] sm:$0xf] %v8200_v10  ;;  %v3483_v42 = vld [vmem:[#allocation2 + $0x8] sm:$0x1] }
 0x10b   :  { %2544 = vst [vmem:[#allocation2 + $0x98] sm:$0xf] %v8200_v10  ;;  %2545 = vst [vmem:[#allocation2 + $0x9c] sm:$0xf] %v8200_v10  ;;  %7440 = vmatpush3.bf16.msra.mxu0 %v8092_v17  ;;  %v2718_v5 = vshrl.u32 %v2660_v38, 16  ;;  %v2744_v44 = vshrl.u32 %v2664_v3, 16 }
 0x10c   :  { %2546 = vst [vmem:[#allocation2 + $0xa0] sm:$0xf] %v8200_v10  ;;  %2547 = vst [vmem:[#allocation2 + $0xa4] sm:$0xf] %v8200_v10  ;;  %7441 = vmatprep.subr.bf16.mxu0 %v8095_v20  ;;  %v3524_v48 = vshll.u32 %v3483_v42, 16  ;;  %v2699_v47 = vrot.slane %v2697_v39, 7 }
 0x10d   :  { %2548 = vst [vmem:[#allocation2 + $0xa8] sm:$0xf] %v8200_v10  ;;  %2549 = vst [vmem:[#allocation2 + $0xac] sm:$0xf] %v8200_v10  ;;  %v2700_v49 = vshll.u32 %v9072_v33, 16  ;;  %v9078_v50 = vrot.slane %v2692_v40, 11 }
 0x10e   :  { %7426 = vmatmul.mubr.msk.bf16.gmra.mrb[12].mxu0 %vm104_vm1, %v6607_v0  ;;  %2550 = vst [vmem:[#allocation2 + $0xb0] sm:$0xf] %v8200_v10  ;;  %2551 = vst [vmem:[#allocation2 + $0xb4] sm:$0xf] %v8200_v10  ;;  %v9075_v45 = vld [vmem:[#allocation2 + $0x7c] sm:$0xf] }
 0x10f   :  { %2552 = vst [vmem:[#allocation2 + $0xb8] sm:$0xf] %v8200_v10  ;;  %2553 = vst [vmem:[#allocation2 + $0xbc] sm:$0xf] %v8200_v10  ;;  %7442 = vmatpush3.bf16.msra.mxu0 %v8095_v20  ;;  %v9080_v51 = vrot.slane %v2731_v41, 11  ;;  %v9082_v52 = vrot.slane %v2705_v43, 11  ;;  %v9094_v18 = vor.u32 %v2700_v49, %v2699_v47 }
 0x110   :  { %2554 = vst [vmem:[#allocation2 + $0xc0] sm:$0xf] %v8200_v10  ;;  %2555 = vst [vmem:[#allocation2 + $0xc4] sm:$0xf] %v8200_v10  ;;  %v9044_v19 = vpop.f32.mrb[0].mxu1  ;;  %7443 = vmatprep.subr.bf16.mxu0 %v8098_v25  ;;  %v2801_v55 = vshrl.u32 %v9075_v45, 16 }
 0x111   :  { %2556 = vst [vmem:[#allocation2 + $0xc8] sm:$0xf] %v8200_v10  ;;  %2557 = vst [vmem:[#allocation2 + $0xcc] sm:$0xf] %v8200_v10  ;;  %v9049_v21 = vpop.f32.mrb[1].mxu1  ;;  %v9085_v56 = vrot.slane %v2718_v5, 11 }
 0x112   :  { %2558 = vst [vmem:[#allocation2 + $0xd0] sm:$0xf] %v8200_v10  ;;  %2559 = vst [vmem:[#allocation2 + $0xd4] sm:$0xf] %v8200_v10  ;;  %v9051_v22 = vpop.f32.mrb[2].mxu1  ;;  %v9087_v58 = vrot.slane %v2744_v44, 11 }
 0x113   :  { %2560 = vst [vmem:[#allocation2 + $0xd8] sm:$0xf] %v8200_v10  ;;  %2561 = vst [vmem:[#allocation2 + $0xdc] sm:$0xf] %v8200_v10  ;;  %v9053_v23 = vpop.f32.mrb[3].mxu1  ;;  %7444 = vmatpush3.bf16.msra.mxu0 %v8098_v25  ;;  %v9089_v63 = vrot.slane %v3521_v46, 4 }
 0x114   :  { %2562 = vst [vmem:[#allocation2 + $0xe0] sm:$0xf] %v8200_v10  ;;  %2563 = vst [vmem:[#allocation2 + $0xe4] sm:$0xf] %v8200_v10  ;;  %v2666_v2 = vld [vmem:[#allocation2 + $0x3c] sm:$0x8] }
 0x115   :  { %2564 = vst [vmem:[#allocation2 + $0xe8] sm:$0xf] %v8200_v10  ;;  %2565 = vst [vmem:[#allocation2 + $0xec] sm:$0xf] %v8200_v10  ;;  %v2668_v53 = vld [vmem:[#allocation2 + $0x48] sm:$0x8] }
 0x116   :  { %v2670_v54 = vld [vmem:[#allocation2 + $0x54] sm:$0x8]  ;;  %v2672_v59 = vld [vmem:[#allocation2 + $0x78] sm:$0x8]  ;;  %v3485_v60 = vld [vmem:[#allocation2 + $0x14] sm:$0x1] }
 0x117   :  { %v2674_v61 = vld [vmem:[#allocation2 + $0x84] sm:$0x8]  ;;  %v2678_v62 = vld [vmem:[#allocation2 + $0x9c] sm:$0x8]  ;;  %v9091_v0 = vrot.slane %v3524_v48, 5  ;;  %v2757_v1 = vshrl.u32 %v2666_v2, 16  ;;  %vm9123_vm7 = vmor %vm2688_vm5, %vm2689_vm6 }
 0x118   :  { %v2770_v4 = vshrl.u32 %v2668_v53, 16  ;;  %v2783_v6 = vshrl.u32 %v2670_v54, 16  ;;  %v2804_v8 = vshll.u32 %v9075_v45, 16  ;;  %v2676_v9 = vld [vmem:[#allocation2 + $0x90] sm:$0x8]  ;;  %v2803_v10 = vrot.slane %v2801_v55, 7 }
 0x119   :  { %v2796_v12 = vshrl.u32 %v2672_v59, 16  ;;  %v3487_v13 = vld [vmem:[#allocation2 + $0x20] sm:$0x1]  ;;  %v3489_v14 = vld [vmem:[#allocation2 + $0x2c] sm:$0x1]  ;;  %v2809_v15 = vshrl.u32 %v2674_v61, 16 }
 0x11a   :  { %v2835_v7 = vshrl.u32 %v2678_v62, 16  ;;  %v2680_v16 = vld [vmem:[#allocation2 + $0xa8] sm:$0x8]  ;;  %v3498_v17 = vld [vmem:[#allocation2 + $0x7c] sm:$0xf]  ;;  %v2822_v20 = vshrl.u32 %v2676_v9, 16  ;;  %v9111_v43 = vor.u32 %v2804_v8, %v2803_v10 }
 0x11b   :  { %v3538_v25 = vshll.u32 %v3485_v60, 16  ;;  %v2682_v30 = vld [vmem:[#allocation2 + $0xb4] sm:$0x8]  ;;  %v2684_v31 = vld [vmem:[#allocation2 + $0xc0] sm:$0x8]  ;;  %v9096_v32 = vrot.slane %v2757_v1, 11 }
 0x11c   :  { %v9098_v34 = vrot.slane %v2783_v6, 11  ;;  %v3552_v35 = vshll.u32 %v3487_v13, 16  ;;  %v3566_v37 = vshll.u32 %v3489_v14, 16  ;;  %v9100_v38 = vld [vmem:[#allocation2 + $0xc] sm:$0x8]  ;;  %v9102_v3 = vrot.slane %v2770_v4, 11 }
 0x11d   :  { %9940 = vst [vmem:[#allocation6_spill] sm:$0xff] %v9100_v38  ;;  %v2848_v11 = vshrl.u32 %v2680_v16, 16  ;;  %v2686_v36 = vld [vmem:[#allocation2 + $0xcc] sm:$0x8]  ;;  %v3627_v39 = vshrl.u32 %v3498_v17, 16  ;;  %v3630_v40 = vshll.u32 %v3498_v17, 16 }
 0x11e   :  { %v9107_v41 = vld [vmem:[%s9927_s2] ss:$0 sm:$0xff]  ;;  %v9109_v42 = vrot.slane %v2796_v12, 11  ;;  %v2861_v5 = vshrl.u32 %v2682_v30, 16  ;;  %v2874_v44 = vshrl.u32 %v2684_v31, 16  ;;  %v9113_v46 = vrot.slane %v2809_v15, 11 }
 0x11f   :  { %v9115_v48 = vrot.slane %v2822_v20, 11  ;;  %v9117_v47 = vrot.slane %v2835_v7, 11  ;;  %v9119_v49 = vrot.slane %v3538_v25, 5  ;;  %v3491_v2 = vld [vmem:[#allocation2 + $0x38] sm:$0x1]  ;;  %v2887_v55 = vshrl.u32 %v2686_v36, 16 }
 0x120   :  { %v9127_v59 = vrot.slane %v3552_v35, 5  ;;  %v9129_v60 = vrot.slane %v3566_v37, 5  ;;  %v9133_v4 = vrot.slane %v2848_v11, 11  ;;  %v3493_v6 = vld [vmem:[#allocation2 + $0x44] sm:$0x1]  ;;  %v3629_v8 = vrot.slane %v3627_v39, 4 }
 0x121   :  { %v3632_v9 = vrot.slane %v3630_v40, 5  ;;  %v9136_v13 = vrot.slane %v2861_v5, 11  ;;  %v9138_v14 = vrot.slane %v2874_v44, 11  ;;  %v3580_v15 = vshll.u32 %v3491_v2, 16  ;;  %v3499_v7 = vld [vmem:[#allocation2 + $0x80] sm:$0x1] }
 0x122   :  { %9943 = vst [vmem:[#allocation7_spill] sm:$0xff] %v9127_v59  ;;  %9944 = vst [vmem:[#allocation8_spill] sm:$0xff] %v9129_v60  ;;  %v3495_v31 = vld [vmem:[#allocation2 + $0x50] sm:$0x1]  ;;  %v3497_v35 = vld [vmem:[#allocation2 + $0x5c] sm:$0x1] }
 0x123   :  { %9945 = vst [vmem:[#allocation9_spill] sm:$0xff] %v9138_v14  ;;  %v3594_v39 = vshll.u32 %v3493_v6, 16  ;;  %v3501_v40 = vld [vmem:[#allocation2 + $0x8c] sm:$0x1]  ;;  %v3505_v5 = vld [vmem:[#allocation2 + $0xa4] sm:$0x1] }
 0x124   :  { %v3608_v30 = vshll.u32 %v3495_v31, 16  ;;  %v3622_v25 = vshll.u32 %v3497_v35, 16  ;;  %v9154_v38 = vrot.slane %v2887_v55, 11  ;;  %v3650_v60 = vshll.u32 %v3501_v40, 16  ;;  %v3509_v36 = vld [vmem:[#allocation2 + $0xbc] sm:$0x1] }
 0x125   :  { %v3678_v59 = vshll.u32 %v3505_v5, 16  ;;  %v3706_v40 = vshll.u32 %v3509_v36, 16 }
 0x14e   :  { %v9064_v26 = vpop.f32.mrb[4].mxu1 }
 0x14f   :  { %v9066_v27 = vpop.f32.mrb[5].mxu1 }
 0x150   :  { %v9068_v28 = vpop.f32.mrb[6].mxu1 }
 0x151   :  { %v9070_v29 = vpop.f32.mrb[7].mxu1 }
 0x1c9   :  { %v7415_v53 = vpop.f32.mrb[0].mxu0 }
 0x1ca   :  { %v2468_v62 = vadd.f32 %v7415_v53, %v9107_v41  ;;  %v2380_v1 = vpop.f32.mrb[1].mxu0  ;;  %v3633_v53 = vor.u32 %v3632_v9, %v3629_v8  ;;  %v9158_v8 = vrot.slane %v3594_v39, 5  ;;  %v9170_v39 = vrot.slane %v3622_v25, 5 }
 0x1cb   :  { %v2466_v10 = vadd.f32 %v9107_v41, %v2380_v1  ;;  %v7416_v12 = vpop.f32.mrb[2].mxu0  ;;  %v3503_v1 = vld [vmem:[#allocation2 + $0x98] sm:$0x1] }
 0x1cc   :  { %v2484_v16 = vmax.f32 %v2468_v62, 0.0  ;;  %v2469_v17 = vadd.f32 %v7416_v12, %v9107_v41  ;;  %v2383_v20 = vpop.f32.mrb[3].mxu0  ;;  %v3636_v62 = vshll.u32 %v3499_v7, 16  ;;  %v3664_v9 = vshll.u32 %v3503_v1, 16 }
 0x1cd   :  { %v2482_v37 = vmax.f32 %v2466_v10, 0.0  ;;  %v2467_v11 = vadd.f32 %v9107_v41, %v2383_v20  ;;  %v3507_v10 = vld [vmem:[#allocation2 + $0xb0] sm:$0x1]  ;;  %v9161_v31 = vrot.slane %v3633_v53, 4  ;;  %v9175_v53 = vrot.slane %v3678_v59, 5 }
 0x1ce   :  { %v6972_v44 = vpack.c.bf16 %v2484_v16, %v2484_v16  ;;  %v2485_v2 = vmax.f32 %v2469_v17, 0.0  ;;  %v9156_v16 = vrot.slane %v3580_v15, 5  ;;  %v9163_v35 = vrot.slane %v3636_v62, 5  ;;  %v9177_v62 = vld [vmem:[#allocation2 + $0xd4] sm:$0x1] }
 0x1cf   :  { %v6970_v12 = vpack.c.bf16 %v2482_v37, %v2482_v37  ;;  %v2483_v61 = vmax.f32 %v2467_v11, 0.0  ;;  %v3692_v55 = vshll.u32 %v3507_v10, 16  ;;  %v9165_v37 = vld [vmem:[#allocation2 + $0x18] sm:$0x8]  ;;  %v9168_v15 = vrot.slane %v3608_v30, 5  ;;  %9948 = vst [vmem:[#allocation12_spill] sm:$0xff] %v9175_v53 }
 0x1d0   :  { %2625 = vst [vmem:[#allocation2 + $0x28] sm:$0xf] %v6972_v44  ;;  %v6973_v20 = vpack.c.bf16 %v2485_v2, %v2485_v2  ;;  %9946 = vst [vmem:[#allocation10_spill] sm:$0xff] %v9163_v35  ;;  %v9173_v2 = vrot.slane %v3650_v60, 5  ;;  %v9180_v10 = vrot.slane %v3664_v9, 5 }
 0x1d1   :  { %2623 = vst [vmem:[#allocation2 + $0x10] sm:$0xf] %v6970_v12  ;;  %v6971_v6 = vpack.c.bf16 %v2483_v61, %v2483_v61  ;;  %v7419_v14 = vpop.f32.mrb[4].mxu0  ;;  %9947 = vst [vmem:[#allocation11_spill] sm:$0xff] %v9165_v37  ;;  %v9182_v30 = vld [vmem:[#allocation2 + $0xc8] sm:$0x1] }
 0x1d2   :  { %2626 = vst [vmem:[#allocation2 + $0x34] sm:$0xf] %v6973_v20  ;;  %v2472_v7 = vadd.f32 %v7419_v14, %v9107_v41  ;;  %v2396_v17 = vpop.f32.mrb[5].mxu0  ;;  %9949 = vst [vmem:[#allocation13_spill] sm:$0xff] %v9177_v62  ;;  %v9189_v59 = vrot.slane %v3692_v55, 5 }
 0x1d3   :  { %2624 = vst [vmem:[#allocation2 + $0x1c] sm:$0xf] %v6971_v6  ;;  %v2470_v61 = vadd.f32 %v9107_v41, %v2396_v17  ;;  %v7420_v11 = vpop.f32.mrb[6].mxu0  ;;  %9950 = vst [vmem:[#allocation14_spill] sm:$0xff] %v9180_v10 }
 0x1d4   :  { %v2488_v5 = vmax.f32 %v2472_v7, 0.0  ;;  %v2473_v14 = vadd.f32 %v7420_v11, %v9107_v41  ;;  %v2399_v44 = vpop.f32.mrb[7].mxu0  ;;  %9951 = vst [vmem:[#allocation15_spill] sm:$0xff] %v9182_v30  ;;  %9952 = vst [vmem:[#allocation16_spill] sm:$0xff] %v9189_v59 }
 0x1d5   :  { %v2486_v1 = vmax.f32 %v2470_v61, 0.0  ;;  %v2471_v12 = vadd.f32 %v9107_v41, %v2399_v44  ;;  %v9191_v61 = vrot.slane %v3706_v40, 5 }
 0x1d6   :  { %v6976_v36 = vpack.c.bf16 %v2488_v5, %v2488_v5  ;;  %v2489_v20 = vmax.f32 %v2473_v14, 0.0 }
 0x1d7   :  { %v6974_v6 = vpack.c.bf16 %v2486_v1, %v2486_v1  ;;  %v2487_v7 = vmax.f32 %v2471_v12, 0.0  ;;  %v2663_v17 = vld [vmem:[#allocation2 + $0x28] sm:$0xf]  ;;  %9953 = vst [vmem:[#allocation17_spill] sm:$0xff] %v9191_v61 }
 0x1d8   :  { %2629 = vst [vmem:[#allocation2 + $0x58] sm:$0xf] %v6976_v36  ;;  %v6977_v11 = vpack.c.bf16 %v2489_v20, %v2489_v20  ;;  %v2659_v44 = vld [vmem:[#allocation2 + $0x10] sm:$0xf]  ;;  %v2736_v25 = vshrl.u32 %v2663_v17, 16  ;;  %v2739_v5 = vshll.u32 %v2663_v17, 16 }
 0x1d9   :  { %2627 = vst [vmem:[#allocation2 + $0x40] sm:$0xf] %v6974_v6  ;;  %v6975_v53 = vpack.c.bf16 %v2487_v7, %v2487_v7  ;;  %v7423_v37 = vpop.f32.mrb[8].mxu0  ;;  %v2710_v60 = vshrl.u32 %v2659_v44, 16  ;;  %v2713_v55 = vshll.u32 %v2659_v44, 16  ;;  %v6697_v1 = vcombine.low %v9072_v33, %v2659_v44 }
 0x1da   :  { %v9196_v12 = vld [vmem:[#allocation2 + $0x34] sm:$0xf]  ;;  %2630 = vst [vmem:[#allocation2 + $0x64] sm:$0xf] %v6977_v11  ;;  %v7737_v40 = vadd.f32 %v7423_v37, %v9044_v19  ;;  %v2412_v9 = vpop.f32.mrb[9].mxu0  ;;  %v2738_v20 = vrot.slane %v2736_v25, 7 }
 0x1db   :  { %v2661_v36 = vld [vmem:[#allocation2 + $0x1c] sm:$0xf]  ;;  %v2749_v61 = vshrl.u32 %v9196_v12, 16  ;;  %v2752_v59 = vshll.u32 %v9196_v12, 16  ;;  %2628 = vst [vmem:[#allocation2 + $0x4c] sm:$0xf] %v6975_v53  ;;  %v7738_v6 = vadd.f32 %v2412_v9, %v9049_v21  ;;  %7495 = vmatprep.mubr.bf16.mxu1 %v6697_v1 }
 0x1dc   :  { %v7424_v7 = vpop.f32.mrb[10].mxu0  ;;  %v2712_v14 = vrot.slane %v2710_v60, 7  ;;  %v2723_v30 = vshrl.u32 %v2661_v36, 16  ;;  %v2726_v33 = vshll.u32 %v2661_v36, 16  ;;  %v2476_v44 = vadd.f32 %v7737_v40, %v9107_v41  ;;  %v8100_v25 = vld [vmem:[%s9928_s3 + $0x88] sm:$0xff]  }
 0x1dd   :  { %v7739_v11 = vadd.f32 %v7424_v7, %v9051_v22  ;;  %v2415_v19 = vpop.f32.mrb[11].mxu0  ;;  %v6698_v37 = vcombine.low %v2661_v36, %v2663_v17  ;;  %v2751_v62 = vrot.slane %v2749_v61, 7  ;;  %v2474_v53 = vadd.f32 %v7738_v6, %v9107_v41  ;;  %v5767_v54 = vld [vmem:[#allocation2 + $0x1c] sm:$0xf] }
 0x1de   :  { %v7740_v21 = vadd.f32 %v2415_v19, %v9053_v23  ;;  %v2725_v9 = vrot.slane %v2723_v30, 7  ;;  %v2715_v60 = vor.u32 %v2713_v55, %v2712_v14  ;;  %v2492_v1 = vmax.f32 %v2476_v44, 0.0 }
 0x1df   :  { %v2477_v10 = vadd.f32 %v7739_v11, %v9107_v41  ;;  %7496 = vmatmul.mubr.bf16.vlgmr.msra.gmra.mrb[8].mxu1 %v6698_v37  ;;  %v2741_v40 = vor.u32 %v2739_v5, %v2738_v20  ;;  %v9210_v35 = vor.u32 %v2752_v59, %v2751_v62  ;;  %v2490_v22 = vmax.f32 %v2474_v53, 0.0  ;;  %v2671_v11 = vld [vmem:[#allocation2 + $0x58] sm:$0xf] }
 0x1e0   :  { %v2475_v17 = vadd.f32 %v7740_v21, %v9107_v41  ;;  %7512 = vmatpush3.bf16.msra.mxu1 %v9058_v24  ;;  %v2716_v61 = vsel %vm9123_vm7, %v9082_v52, %v2715_v60  ;;  %v2728_v36 = vor.u32 %v2726_v33, %v2725_v9  ;;  %v6980_v23 = vpack.c.bf16 %v2492_v1, %v2492_v1  ;;  %v2667_v62 = vld [vmem:[#allocation2 + $0x40] sm:$0xf]  ;;  %v8102_v24 = vld [vmem:[%s9928_s3 + $0x90] sm:$0xff]  }
 0x1e1   :  { %v2493_v30 = vmax.f32 %v2477_v10, 0.0  ;;  %v9954_v14 = vsel %vm9123_vm7, %v9078_v50, %v9094_v18  ;;  %7513 = vmatprep.subr.bf16.mxu1 %v8100_v25  ;;  %v2742_v59 = vsel %vm9123_vm7, %v9080_v51, %v2741_v40  ;;  %v6978_v52 = vpack.c.bf16 %v2490_v22, %v2490_v22  ;;  %v7427_v20 = vpop.f32.mrb[12].mxu0 }
 0x1e2   :  { %v6649_v5 = vcombine.low %v9954_v14, %v2716_v61  ;;  %v2491_v55 = vmax.f32 %v2475_v17, 0.0  ;;  %v2762_v10 = vshrl.u32 %v2667_v62, 16  ;;  %v2765_v6 = vshll.u32 %v2667_v62, 16  ;;  %2633 = vst [vmem:[#allocation2 + $0xa0] sm:$0xf] %v6980_v23  ;;  %v2428_v18 = vpop.f32.mrb[13].mxu0 }
 0x1e3   :  { %v6981_v7 = vpack.c.bf16 %v2493_v30, %v2493_v30  ;;  %v7741_v50 = vadd.f32 %v7427_v20, %v9064_v26  ;;  %v6699_v33 = vcombine.low %v9196_v12, %v2667_v62  ;;  %v2729_v51 = vsel %vm9123_vm7, %v9085_v56, %v2728_v36  ;;  %v2669_v44 = vld [vmem:[#allocation2 + $0x4c] sm:$0xf]  ;;  %2631 = vst [vmem:[#allocation2 + $0x88] sm:$0xf] %v6978_v52  ;;  %v7428_v53 = vpop.f32.mrb[14].mxu0  ;;  %v8103_v56 = vld [vmem:[%s9928_s3 + $0x98] sm:$0xff]  }
 0x1e4   :  { %7445 = vmatprep.mubr.bf16.mxu0 %v6649_v5  ;;  %v6979_v19 = vpack.c.bf16 %v2491_v55, %v2491_v55  ;;  %v7742_v37 = vadd.f32 %v2428_v18, %v9066_v27  ;;  %v2764_v21 = vrot.slane %v2762_v10, 7  ;;  %v6650_v9 = vcombine.low %v2729_v51, %v2742_v59  ;;  %7514 = vmatpush3.bf16.msra.mxu1 %v8100_v25  ;;  %v2431_v12 = vpop.f32.mrb[15].mxu0  ;;  %v9242_v30 = vld [vmem:[#allocation2 + $0x10] sm:$0xf]  ;;  %v8106_v10 = vld [vmem:[%s9928_s3 + $0xa0] sm:$0xff]  }
 0x1e5   :  { %2634 = vst [vmem:[#allocation2 + $0xac] sm:$0xf] %v6981_v7  ;;  %v2480_v26 = vadd.f32 %v7741_v50, %v9107_v41  ;;  %v7743_v60 = vadd.f32 %v7428_v53, %v9068_v28  ;;  %7499 = vmatprep.mubr.bf16.mxu1 %v6699_v33  ;;  %v2775_v1 = vshrl.u32 %v2669_v44, 16  ;;  %v2778_v40 = vshll.u32 %v2669_v44, 16  ;;  %7515 = vmatprep.subr.bf16.mxu1 %v8102_v24  ;;  %v8107_v53 = vld [vmem:[%s9928_s3 + $0xa8] sm:$0xff]  }
 0x1e6   :  { %2632 = vst [vmem:[#allocation2 + $0x94] sm:$0xf] %v6979_v19  ;;  %v2478_v27 = vadd.f32 %v7742_v37, %v9107_v41  ;;  %v7744_v22 = vadd.f32 %v2431_v12, %v9070_v29  ;;  %7446 = vmatmul.mubr.bf16.vlgmr.msra.gmra.mrb[16].mxu0 %v6650_v9  ;;  %v2788_v25 = vshrl.u32 %v2671_v11, 16  ;;  %v2791_v17 = vshll.u32 %v2671_v11, 16  ;;  %v9266_v12 = vld [vmem:[#allocation2 + $0x28] sm:$0xf] }
 0x1e7   :  { %v2496_v61 = vmax.f32 %v2480_v26, 0.0  ;;  %v2481_v28 = vadd.f32 %v7743_v60, %v9107_v41  ;;  %v2777_v36 = vrot.slane %v2775_v1, 7  ;;  %v6700_v23 = vcombine.low %v2669_v44, %v2671_v11 }
 0x1e8   :  { %v2494_v14 = vmax.f32 %v2478_v27, 0.0  ;;  %v2479_v5 = vadd.f32 %v7744_v22, %v9107_v41  ;;  %v2790_v62 = vrot.slane %v2788_v25, 7  ;;  %7516 = vmatpush3.bf16.msra.mxu1 %v8102_v24  ;;  %v2755_v29 = vsel %vm9123_vm7, %v9087_v58, %v9210_v35  ;;  %v3486_v27 = vld [vmem:[#allocation2 + $0x1c] sm:$0xf] }
 0x1e9   :  { %v6984_v59 = vpack.c.bf16 %v2496_v61, %v2496_v61  ;;  %v2497_v52 = vmax.f32 %v2481_v28, 0.0  ;;  %7500 = vmatmul.mubr.bf16.gmra.mrb[12].mxu1 %v6700_v23  ;;  %v2767_v55 = vor.u32 %v2765_v6, %v2764_v21  ;;  %7517 = vmatprep.subr.bf16.mxu1 %v8103_v56  ;;  %v2780_v20 = vor.u32 %v2778_v40, %v2777_v36  ;;  %v2679_v18 = vld [vmem:[#allocation2 + $0xa0] sm:$0xf] }
 0x1ea   :  { %v6982_v7 = vpack.c.bf16 %v2494_v14, %v2494_v14  ;;  %v2495_v50 = vmax.f32 %v2479_v5, 0.0  ;;  %v2793_v41 = vor.u32 %v2791_v17, %v2790_v62  ;;  %v3529_v24 = vshrl.u32 %v9242_v30, 16  ;;  %v2675_v6 = vld [vmem:[#allocation2 + $0x88] sm:$0xf]  ;;  %v8110_v5 = vld [vmem:[%s9928_s3 + $0xb0] sm:$0xff]  }
 0x1eb   :  { %2637 = vst [vmem:[#allocation2 + $0xd0] sm:$0xf] %v6984_v59  ;;  %v6985_v33 = vpack.c.bf16 %v2497_v52, %v2497_v52  ;;  %v2768_v58 = vsel %vm9123_vm7, %v9096_v32, %v2767_v55  ;;  %v2781_v35 = vsel %vm9123_vm7, %v9102_v3, %v2780_v20  ;;  %v2840_v51 = vshrl.u32 %v2679_v18, 16 }
 0x1ec   :  { %2635 = vst [vmem:[#allocation2 + $0xb8] sm:$0xf] %v6982_v7  ;;  %v6983_v44 = vpack.c.bf16 %v2495_v50, %v2495_v50  ;;  %v6651_v11 = vcombine.low %v2755_v29, %v2768_v58  ;;  %v2794_v19 = vsel %vm9123_vm7, %v9098_v34, %v2793_v41  ;;  %7518 = vmatpush3.bf16.msra.mxu1 %v8103_v56  ;;  %v2814_v37 = vshrl.u32 %v2675_v6, 16  ;;  %v2681_v32 = vld [vmem:[#allocation2 + $0xac] sm:$0xf] }
 0x1ed   :  { %2638 = vst [vmem:[#allocation2 + $0xdc] sm:$0xf] %v6985_v33  ;;  %v6652_v21 = vcombine.low %v2781_v35, %v2794_v19  ;;  %v2817_v9 = vshll.u32 %v2675_v6, 16  ;;  %v6701_v3 = vcombine.low %v9075_v45, %v2675_v6  ;;  %v2677_v26 = vld [vmem:[#allocation2 + $0x94] sm:$0xf]  ;;  %v2842_v60 = vrot.slane %v2840_v51, 7  ;;  %7519 = vmatprep.subr.bf16.mxu1 %v8106_v10 }
 0x1ee   :  { %2636 = vst [vmem:[#allocation2 + $0xc4] sm:$0xf] %v6983_v44  ;;  %7449 = vmatprep.mubr.bf16.mxu0 %v6651_v11  ;;  %v2816_v34 = vrot.slane %v2814_v37, 7  ;;  %v2827_v1 = vshrl.u32 %v2677_v26, 16  ;;  %v2830_v40 = vshll.u32 %v2677_v26, 16  ;;  %v2843_v56 = vshll.u32 %v2679_v18, 16 }
 0x1ef   :  { %7450 = vmatmul.mubr.bf16.gmra.mrb[20].mxu0 %v6652_v21  ;;  %7503 = vmatprep.mubr.bf16.mxu1 %v6701_v3  ;;  %v6702_v22 = vcombine.low %v2677_v26, %v2679_v18  ;;  %v2853_v25 = vshrl.u32 %v2681_v32, 16  ;;  %v2856_v17 = vshll.u32 %v2681_v32, 16  ;;  %v3531_v61 = vrot.slane %v3529_v24, 4 }
 0x1f0   :  { %v2829_v28 = vrot.slane %v2827_v1, 7  ;;  %7520 = vmatpush3.bf16.msra.mxu1 %v8106_v10  ;;  %v2819_v45 = vor.u32 %v2817_v9, %v2816_v34  ;;  %v2845_v36 = vor.u32 %v2843_v56, %v2842_v60  ;;  %v3532_v23 = vshll.u32 %v9242_v30, 16 }
 0x1f1   :  { %7504 = vmatmul.mubr.bf16.gmra.mrb[16].mxu1 %v6702_v22  ;;  %7521 = vmatprep.subr.bf16.mxu1 %v8107_v53  ;;  %v2855_v14 = vrot.slane %v2853_v25, 7  ;;  %v3543_v62 = vshrl.u32 %v3486_v27, 16  ;;  %v3546_v29 = vshll.u32 %v3486_v27, 16  ;;  %v3557_v59 = vshrl.u32 %v9266_v12, 16  ;;  %v8112_v22 = vld [vmem:[%s9928_s3 + $0xc0] sm:$0xff]  }
 0x1f2   :  { %v2820_v52 = vsel %vm9123_vm7, %v9113_v46, %v2819_v45  ;;  %v2832_v55 = vor.u32 %v2830_v40, %v2829_v28  ;;  %v2846_v30 = vsel %vm9123_vm7, %v9117_v47, %v2845_v36  ;;  %v2687_v20 = vld [vmem:[#allocation2 + $0xd0] sm:$0xf]  ;;  %v3534_v10 = vrot.slane %v3532_v23, 5  ;;  %v3492_v25 = vld [vmem:[#allocation2 + $0x40] sm:$0xf] }
 0x1f3   :  { %v9955_v7 = vsel %vm9123_vm7, %v9109_v42, %v9111_v43  ;;  %v2683_v41 = vld [vmem:[#allocation2 + $0xb8] sm:$0xf]  ;;  %v2892_v18 = vshrl.u32 %v2687_v20, 16  ;;  %v2895_v24 = vshll.u32 %v2687_v20, 16  ;;  %v2858_v33 = vor.u32 %v2856_v17, %v2855_v14 }
 0x1f4   :  { %v6653_v50 = vcombine.low %v9955_v7, %v2820_v52  ;;  %7522 = vmatpush3.bf16.msra.mxu1 %v8107_v53  ;;  %v2866_v58 = vshrl.u32 %v2683_v41, 16  ;;  %v2869_v46 = vshll.u32 %v2683_v41, 16  ;;  %v6703_v35 = vcombine.low %v2681_v32, %v2683_v41  ;;  %v8111_v42 = vld [vmem:[%s9928_s3 + $0xb8] sm:$0xff]   ;;  %v3500_v7 = vld [vmem:[#allocation2 + $0x88] sm:$0xf] }
 0x1f5   :  { %v2833_v47 = vsel %vm9123_vm7, %v9115_v48, %v2832_v55  ;;  %v2685_v51 = vld [vmem:[#allocation2 + $0xc4] sm:$0xf]  ;;  %v2894_v44 = vrot.slane %v2892_v18, 7  ;;  %7523 = vmatprep.subr.bf16.mxu1 %v8110_v5  ;;  %v3535_v11 = vor.u32 %v3534_v10, %v3531_v61  ;;  %v2859_v43 = vsel %vm9123_vm7, %v9133_v4, %v2858_v33  ;;  %v3490_v48 = vld [vmem:[#allocation2 + $0x34] sm:$0xf] }
 0x1f6   :  { %7453 = vmatprep.mubr.bf16.mxu0 %v6653_v50  ;;  %v6654_v6 = vcombine.low %v2833_v47, %v2846_v30  ;;  %v2868_v19 = vrot.slane %v2866_v58, 7  ;;  %7507 = vmatprep.mubr.bf16.mxu1 %v6703_v35  ;;  %v2879_v37 = vshrl.u32 %v2685_v51, 16  ;;  %v2882_v53 = vshll.u32 %v2685_v51, 16  ;;  %v3496_v52 = vld [vmem:[#allocation2 + $0x58] sm:$0xf]  ;;  %v9959_v47 = vld [vmem:[#allocation8_spill] sm:$0xff] }
 0x1f7   :  { %v6704_v32 = vcombine.low %v2685_v51, %v2687_v20  ;;  %v3536_v21 = vrot.slane %v3535_v11, 4  ;;  %v2897_v9 = vor.u32 %v2895_v24, %v2894_v44  ;;  %v3545_v3 = vrot.slane %v3543_v62, 4  ;;  %v9957_v62 = vld [vmem:[#allocation9_spill] sm:$0xff] }
 0x1f8   :  { %7454 = vmatmul.mubr.bf16.gmra.mrb[24].mxu0 %v6654_v6  ;;  %v3548_v26 = vrot.slane %v3546_v29, 5  ;;  %v2881_v60 = vrot.slane %v2879_v37, 7  ;;  %7524 = vmatpush3.bf16.msra.mxu1 %v8110_v5  ;;  %v2871_v34 = vor.u32 %v2869_v46, %v2868_v19  ;;  %v3559_v1 = vrot.slane %v3557_v59, 4  ;;  %v8113_v37 = vld [vmem:[%s9928_s3 + $0xc8] sm:$0xff]  }
 0x1f9   :  { %v3560_v40 = vshll.u32 %v9266_v12, 16  ;;  %7508 = vmatmul.mubr.bf16.gmra.mrb[20].mxu1 %v6704_v32  ;;  %v3541_v4 = vsel %vm8336_vm4, %v3536_v21, %v9119_v49  ;;  %7525 = vmatprep.subr.bf16.mxu1 %v8111_v42  ;;  %v2898_v56 = vsel %vm9123_vm7, %v9154_v38, %v2897_v9  ;;  %v3571_v17 = vshrl.u32 %v3490_v48, 16  ;;  %v3494_v38 = vld [vmem:[#allocation2 + $0x4c] sm:$0xf] }
 0x1fa   :  { %v3549_v27 = vor.u32 %v3548_v26, %v3545_v3  ;;  %v9956_v12 = vsel %vm8336_vm4, %v9089_v63, %v9091_v0  ;;  %v2872_v49 = vsel %vm9123_vm7, %v9136_v13, %v2871_v34  ;;  %v2884_v28 = vor.u32 %v2882_v53, %v2881_v60  ;;  %v9958_v13 = vld [vmem:[#allocation7_spill] sm:$0xff] }
 0x1fb   :  { %v6729_v61 = vcombine.low %v9956_v12, %v3541_v4  ;;  %v3562_v45 = vrot.slane %v3560_v40, 5  ;;  %v6655_v36 = vcombine.low %v2859_v43, %v2872_v49  ;;  %v3573_v14 = vrot.slane %v3571_v17, 4  ;;  %v3506_v17 = vld [vmem:[#allocation2 + $0xac] sm:$0xf]  ;;  %v8114_v49 = vld [vmem:[%s9928_s3 + $0xd0] sm:$0xff]  }
 0x1fc   :  { %v3550_v23 = vrot.slane %v3549_v27, 4  ;;  %v3574_v5 = vshll.u32 %v3490_v48, 16  ;;  %7526 = vmatpush3.bf16.msra.mxu1 %v8111_v42  ;;  %v2885_v29 = vsel %vm9123_vm7, %v9957_v62, %v2884_v28  ;;  %v3585_v63 = vshrl.u32 %v3492_v25, 16  ;;  %v3502_v42 = vld [vmem:[#allocation2 + $0x94] sm:$0xf] }
 0x1fd   :  { %7527 = vmatprep.mubr.bf16.mxu1 %v6729_v61  ;;  %v3563_v59 = vor.u32 %v3562_v45, %v3559_v1  ;;  %v3588_v0 = vshll.u32 %v3492_v25, 16  ;;  %7457 = vmatprep.mubr.bf16.mxu0 %v6655_v36  ;;  %v6656_v55 = vcombine.low %v2885_v29, %v2898_v56  ;;  %v3599_v10 = vshrl.u32 %v3494_v38, 16  ;;  %v3504_v48 = vld [vmem:[#allocation2 + $0xa0] sm:$0xf]  ;;  %v3508_v45 = vld [vmem:[#allocation2 + $0xb8] sm:$0xf] }
 0x1fe   :  { %v3555_v30 = vsel %vm8336_vm4, %v3550_v23, %v9958_v13  ;;  %7543 = vmatprep.subr.bf16.mxu1 %v8112_v22  ;;  %v3576_v20 = vrot.slane %v3574_v5, 5  ;;  %v3587_v41 = vrot.slane %v3585_v63, 4  ;;  %v3602_v24 = vshll.u32 %v3494_v38, 16  ;;  %v3510_v29 = vld [vmem:[#allocation2 + $0xc4] sm:$0xf] }
 0x1ff   :  { %v3564_v50 = vrot.slane %v3563_v59, 4  ;;  %v3590_v18 = vrot.slane %v3588_v0, 5  ;;  %v3601_v58 = vrot.slane %v3599_v10, 4  ;;  %v3613_v46 = vshrl.u32 %v3496_v52, 16  ;;  %v8115_v0 = vld [vmem:[%s9928_s3 + $0xd8] sm:$0xff]  }
 0x200   :  { %7458 = vmatmul.mubr.bf16.gmra.mrb[28].mxu0 %v6656_v55  ;;  %v3577_v33 = vor.u32 %v3576_v20, %v3573_v14  ;;  %v3616_v35 = vshll.u32 %v3496_v52, 16  ;;  %v3604_v44 = vrot.slane %v3602_v24, 5  ;;  %v3641_v11 = vshrl.u32 %v3500_v7, 16  ;;  %v3512_v10 = vld [vmem:[#allocation2 + $0xd0] sm:$0xf] }
 0x201   :  { %v3569_v6 = vsel %vm8336_vm4, %v3564_v50, %v9959_v47  ;;  %v3591_v51 = vor.u32 %v3590_v18, %v3587_v41  ;;  %v3615_v53 = vrot.slane %v3613_v46, 4  ;;  %v3644_v26 = vshll.u32 %v3500_v7, 16  ;;  %v9344_v18 = vld [vmem:[#allocation2 + $0x10] sm:$0xf] }
 0x202   :  { %v6730_v43 = vcombine.low %v3555_v30, %v3569_v6  ;;  %v3578_v19 = vrot.slane %v3577_v33, 4  ;;  %v3618_v32 = vrot.slane %v3616_v35, 5  ;;  %v3605_v9 = vor.u32 %v3604_v44, %v3601_v58  ;;  %v9960_v24 = vld [vmem:[#allocation10_spill] sm:$0xff] }
 0x203   :  { %v3592_v21 = vrot.slane %v3591_v51, 4  ;;  %v3643_v3 = vrot.slane %v3641_v11, 4  ;;  %v3655_v1 = vshrl.u32 %v3502_v42, 16  ;;  %v3658_v40 = vshll.u32 %v3502_v42, 16  ;;  %v9962_v46 = vld [vmem:[#allocation14_spill] sm:$0xff] }
 0x204   :  { %7528 = vmatmul.mubr.bf16.vlgmr.msra.gmra.mrb[8].mxu1 %v6730_v43  ;;  %v3583_v60 = vsel %vm8336_vm4, %v3578_v19, %v9156_v16  ;;  %v3619_v34 = vor.u32 %v3618_v32, %v3615_v53  ;;  %v3606_v56 = vrot.slane %v3605_v9, 4  ;;  %v3646_v27 = vrot.slane %v3644_v26, 5  ;;  %v3954_v51 = vld [vmem:[#allocation2 + $0x30] sm:$0x8]  ;;  %v8116_v43 = vld [vmem:[%s9928_s3 + $0xe0] sm:$0xff]   ;;  %v9963_v9 = vld [vmem:[#allocation11_spill] sm:$0xff] }
 0x205   :  { %v3597_v4 = vsel %vm8336_vm4, %v3592_v21, %v9158_v8  ;;  %7544 = vmatpush3.bf16.msra.mxu1 %v8112_v22  ;;  %v3669_v25 = vshrl.u32 %v3504_v48, 16  ;;  %v3657_v16 = vrot.slane %v3655_v1, 4  ;;  %v3660_v28 = vrot.slane %v3658_v40, 5  ;;  %v9357_v53 = vld [vmem:[#allocation2 + $0x1c] sm:$0xf] }
 0x206   :  { %v6731_v12 = vcombine.low %v3583_v60, %v3597_v4  ;;  %7545 = vmatprep.subr.bf16.mxu1 %v8113_v37  ;;  %v3620_v61 = vrot.slane %v3619_v34, 4  ;;  %v3611_v38 = vsel %vm8336_vm4, %v3606_v56, %v9168_v15  ;;  %v3647_v8 = vor.u32 %v3646_v27, %v3643_v3  ;;  %v9965_v34 = vld [vmem:[#allocation12_spill] sm:$0xff]  ;;  %v9966_v56 = vld [vmem:[#allocation13_spill] sm:$0xff] }
 0x207   :  { %v3671_v22 = vrot.slane %v3669_v25, 4  ;;  %v3672_v36 = vshll.u32 %v3504_v48, 16  ;;  %v3661_v14 = vor.u32 %v3660_v28, %v3657_v16  ;;  %v3683_v5 = vshrl.u32 %v3506_v17, 16 }
 0x208   :  { %7531 = vmatprep.mubr.bf16.mxu1 %v6731_v12  ;;  %v3625_v23 = vsel %vm8336_vm4, %v3620_v61, %v9170_v39  ;;  %v3686_v62 = vshll.u32 %v3506_v17, 16  ;;  %v3648_v63 = vrot.slane %v3647_v8, 4  ;;  %v3697_v52 = vshrl.u32 %v3508_v45, 16  ;;  %v9968_v61 = vld [vmem:[#allocation15_spill] sm:$0xff] }
 0x209   :  { %7546 = vmatpush3.bf16.msra.mxu1 %v8113_v37  ;;  %v6732_v59 = vcombine.low %v3611_v38, %v3625_v23  ;;  %v3674_v15 = vrot.slane %v3672_v36, 5  ;;  %v3662_v55 = vrot.slane %v3661_v14, 4  ;;  %v3685_v13 = vrot.slane %v3683_v5, 4  ;;  %v9970_v38 = vld [vmem:[#allocation16_spill] sm:$0xff]  ;;  %v8117_v23 = vld [vmem:[%s9928_s3 + $0xe8] sm:$0xff]  }
 0x20a   :  { %7547 = vmatprep.subr.bf16.mxu1 %v8114_v49  ;;  %v3688_v30 = vrot.slane %v3686_v62, 5  ;;  %v3700_v20 = vshll.u32 %v3508_v45, 16  ;;  %v3653_v39 = vsel %vm8336_vm4, %v3648_v63, %v9173_v2  ;;  %v3699_v50 = vrot.slane %v3697_v52, 4  ;;  %v9372_v45 = vld [vmem:[#allocation2 + $0x34] sm:$0xf] }
 0x20b   :  { %v3675_v7 = vor.u32 %v3674_v15, %v3671_v22  ;;  %v3711_v41 = vshrl.u32 %v3510_v29, 16  ;;  %v9961_v33 = vsel %vm8336_vm4, %v9161_v31, %v9960_v24  ;;  %v3667_v35 = vsel %vm8336_vm4, %v3662_v55, %v9962_v46  ;;  %v9971_v22 = vld [vmem:[#allocation17_spill] sm:$0xff]  ;;  %v3952_v62 = vld [vmem:[#allocation2 + $0x24] sm:$0x8]  ;;  %v9386_v52 = vld [vmem:[#allocation2 + $0x40] sm:$0xf] }
 0x20c   :  { %7532 = vmatmul.mubr.bf16.gmra.mrb[12].mxu1 %v6732_v59  ;;  %v6733_v58 = vcombine.low %v9961_v33, %v3653_v39  ;;  %v3689_v47 = vor.u32 %v3688_v30, %v3685_v13  ;;  %v3702_v6 = vrot.slane %v3700_v20, 5  ;;  %v3714_v11 = vshll.u32 %v3510_v29, 16  ;;  %v9383_v29 = vld [vmem:[#allocation2 + $0x28] sm:$0xf]  ;;  %v3956_v30 = vld [vmem:[#allocation2 + $0x3c] sm:$0x8] }
 0x20d   :  { %7548 = vmatpush3.bf16.msra.mxu1 %v8114_v49  ;;  %v3676_v2 = vrot.slane %v3675_v7, 4  ;;  %v3713_v44 = vrot.slane %v3711_v41, 4  ;;  %v3725_v42 = vshrl.u32 %v3512_v10, 16  ;;  %v3728_v37 = vshll.u32 %v3512_v10, 16  ;;  %v9390_v20 = vld [vmem:[#allocation2 + $0x4c] sm:$0xf] }
 0x20e   :  { %7535 = vmatprep.mubr.bf16.mxu1 %v6733_v58  ;;  %7549 = vmatprep.subr.bf16.mxu1 %v8115_v0  ;;  %v3690_v31 = vrot.slane %v3689_v47, 4  ;;  %v3703_v19 = vor.u32 %v3702_v6, %v3699_v50  ;;  %v3986_v32 = vshrl.u32 %v9344_v18, 16  ;;  %v3716_v48 = vrot.slane %v3714_v11, 5  ;;  %v3958_v50 = vld [vmem:[#allocation2 + $0x48] sm:$0x8]  ;;  %v8118_v24 = vld [vmem:[%s9928_s3 + $0xf0] sm:$0xff]  }
 0x20f   :  { %v3727_v21 = vrot.slane %v3725_v42, 4  ;;  %v9964_v3 = vshrl.u32 %v9963_v9, 16  ;;  %v4020_v60 = vshrl.u32 %v3954_v51, 16  ;;  %v3681_v1 = vsel %vm8336_vm4, %v3676_v2, %v9965_v34  ;;  %v3962_v41 = vld [vmem:[#allocation2 + $0x60] sm:$0x8]  ;;  %v9972_v33 = vld [vmem:[#allocation6_spill] sm:$0xff] }
 0x210   :  { %v3704_v40 = vrot.slane %v3703_v19, 4  ;;  %v3730_v4 = vrot.slane %v3728_v37, 5  ;;  %v9967_v27 = vshll.u32 %v9966_v56, 16  ;;  %v6734_v17 = vcombine.low %v3667_v35, %v3681_v1  ;;  %v9405_v19 = vld [vmem:[#allocation2 + $0x64] sm:$0xf]  ;;  %v8119_v34 = vld [vmem:[%s9928_s3 + $0xf8] sm:$0xff]  }
 0x211   :  { %v9362_v26 = vrot.slane %v9964_v3, 11  ;;  %7550 = vmatpush3.bf16.msra.mxu1 %v8115_v0  ;;  %v3717_v12 = vor.u32 %v3716_v48, %v3713_v44  ;;  %v9969_v49 = vshll.u32 %v9968_v61, 16  ;;  %v3999_v28 = vshrl.u32 %v9357_v53, 16  ;;  %v9410_v3 = vld [vmem:[#allocation2 + $0x94] sm:$0xf] }
 0x212   :  { %v3736_v25 = vrot.slane %v9967_v27, 5  ;;  %7551 = vmatprep.subr.bf16.mxu1 %v8116_v43  ;;  %v3695_v8 = vsel %vm8336_vm4, %v3690_v31, %v9970_v38  ;;  %v3709_v36 = vsel %vm8336_vm4, %v3704_v40, %v9971_v22  ;;  %v3731_v14 = vor.u32 %v3730_v4, %v3727_v21  ;;  %v9418_v4 = vld [vmem:[#allocation2 + $0x58] sm:$0xf] }
 0x213   :  { %v3722_v16 = vrot.slane %v9969_v49, 5  ;;  %v3988_v5 = vrot.slane %v3986_v32, 7  ;;  %v6735_v59 = vcombine.low %v3695_v8, %v3709_v36  ;;  %v3718_v63 = vrot.slane %v3717_v12, 4  ;;  %v9422_v12 = vld [vmem:[#allocation2 + $0x88] sm:$0xf] }
 0x214   :  { %v4001_v0 = vrot.slane %v3999_v28, 7  ;;  %v4002_v15 = vshll.u32 %v9357_v53, 16  ;;  %7536 = vmatmul.mubr.bf16.gmra.mrb[16].mxu1 %v6734_v17  ;;  %v3989_v55 = vshll.u32 %v9344_v18, 16  ;;  %v4025_v13 = vshrl.u32 %v9372_v45, 16  ;;  %v3960_v28 = vld [vmem:[#allocation2 + $0x54] sm:$0x8] }
 0x215   :  { %7539 = vmatprep.mubr.bf16.mxu1 %v6735_v59  ;;  %7552 = vmatpush3.bf16.msra.mxu1 %v8116_v43  ;;  %v3732_v10 = vrot.slane %v3731_v14, 4  ;;  %v4012_v7 = vshrl.u32 %v9383_v29, 16  ;;  %v9973_v58 = vshrl.u32 %v9972_v33, 16  ;;  %v4007_v47 = vshrl.u32 %v3952_v62, 16  ;;  %v3966_v14 = vld [vmem:[#allocation2 + $0x90] sm:$0x8] }
 0x216   :  { %v4004_v39 = vor.u32 %v4002_v15, %v4001_v0  ;;  %7553 = vmatprep.subr.bf16.mxu1 %v8117_v23  ;;  %v3991_v35 = vor.u32 %v3989_v55, %v3988_v5  ;;  %v4038_v6 = vshrl.u32 %v9386_v52, 16  ;;  %v3723_v51 = vsel %vm8336_vm4, %v3718_v63, %v3722_v16  ;;  %v8120_v5 = vld [vmem:[%s9928_s3 + $0x100] sm:$0xff]   ;;  %v3970_v0 = vld [vmem:[#allocation2 + $0xa8] sm:$0x8] }
 0x217   :  { %v6745_v46 = vrot.slane %v9973_v58, 11  ;;  %v6748_v2 = vrot.slane %v4020_v60, 11  ;;  %v4027_v44 = vrot.slane %v4025_v13, 7  ;;  %v4051_v11 = vshrl.u32 %v9390_v20, 16 }
 0x218   :  { %v4005_v42 = vsel %vm9123_vm7, %v9362_v26, %v4004_v39  ;;  %v4033_v43 = vshrl.u32 %v3956_v30, 16  ;;  %v4046_v31 = vshrl.u32 %v3958_v50, 16  ;;  %v4072_v37 = vshrl.u32 %v3962_v41, 16  ;;  %v9435_v41 = vld [vmem:[#allocation2 + $0xac] sm:$0xf] }
 0x219   :  { %7554 = vmatpush3.bf16.msra.mxu1 %v8117_v23  ;;  %v3737_v32 = vsel %vm8336_vm4, %v3732_v10, %v3736_v25  ;;  %v4014_v48 = vrot.slane %v4012_v7, 7  ;;  %v4028_v21 = vshll.u32 %v9372_v45, 16  ;;  %v4053_v9 = vrot.slane %v4051_v11, 7  ;;  %v3964_v23 = vld [vmem:[#allocation2 + $0x84] sm:$0x8] }
 0x21a   :  { %v6736_v60 = vcombine.low %v3723_v51, %v3737_v32  ;;  %7555 = vmatprep.subr.bf16.mxu1 %v8118_v24  ;;  %v3992_v26 = vsel %vm9123_vm7, %v6745_v46, %v3991_v35  ;;  %v4040_v1 = vrot.slane %v4038_v6, 7  ;;  %v4054_v40 = vshll.u32 %v9390_v20, 16  ;;  %v9440_v35 = vld [vmem:[#allocation2 + $0xc4] sm:$0xf]  ;;  %v8121_v51 = vld [vmem:[%s9928_s3 + $0x108] sm:$0xff]  }
 0x21b   :  { %v6777_v56 = vcombine.low %v3992_v26, %v4005_v42  ;;  %v4015_v27 = vshll.u32 %v9383_v29, 16  ;;  %v4030_v25 = vor.u32 %v4028_v21, %v4027_v44  ;;  %v4077_v17 = vshrl.u32 %v9405_v19, 16  ;;  %v9448_v11 = vld [vmem:[#allocation2 + $0xa0] sm:$0xf]  ;;  %v9452_v32 = vld [vmem:[#allocation2 + $0xb8] sm:$0xf] }
 0x21c   :  { %7540 = vmatmul.mubr.bf16.gmra.mrb[20].mxu1 %v6736_v60  ;;  %v4041_v61 = vshll.u32 %v9386_v52, 16  ;;  %v6750_v49 = vrot.slane %v4046_v31, 11  ;;  %v4056_v16 = vor.u32 %v4054_v40, %v4053_v9  ;;  %v4103_v38 = vshrl.u32 %v9410_v3, 16  ;;  %v3968_v60 = vld [vmem:[#allocation2 + $0x9c] sm:$0x8] }
 0x21d   :  { %7556 = vmatpush3.bf16.msra.mxu1 %v8118_v24  ;;  %7559 = vmatprep.mubr.bf16.mxu1 %v6777_v56  ;;  %v6747_v8 = vrot.slane %v4007_v47, 11  ;;  %v4017_v22 = vor.u32 %v4015_v27, %v4014_v48  ;;  %v4064_v36 = vshrl.u32 %v9418_v4, 16  ;;  %v6749_v62 = vrot.slane %v4033_v43, 11  ;;  %v3974_v56 = vld [vmem:[#allocation2 + $0xc0] sm:$0x8]  ;;  %v8122_v27 = vld [vmem:[%s9928_s3 + $0x110] sm:$0xff]  }
 0x21e   :  { %7557 = vmatprep.subr.bf16.mxu1 %v8119_v34  ;;  %v4043_v59 = vor.u32 %v4041_v61, %v4040_v1  ;;  %v4090_v63 = vshrl.u32 %v9422_v12, 16  ;;  %v4031_v15 = vsel %vm9123_vm7, %v6748_v2, %v4030_v25  ;;  %v4059_v55 = vshrl.u32 %v3960_v28, 16  ;;  %v3972_v61 = vld [vmem:[#allocation2 + $0xb4] sm:$0x8] }
 0x21f   :  { %v6752_v13 = vrot.slane %v4072_v37, 11  ;;  %v4079_v30 = vrot.slane %v4077_v17, 7  ;;  %v4057_v10 = vsel %vm9123_vm7, %v6750_v49, %v4056_v16  ;;  %v4085_v39 = vshrl.u32 %v3964_v23, 16 }
 0x220   :  { %v4098_v7 = vshrl.u32 %v3966_v14, 16  ;;  %v4105_v50 = vrot.slane %v4103_v38, 7  ;;  %v4018_v24 = vsel %vm9123_vm7, %v6747_v8, %v4017_v22  ;;  %v4066_v33 = vrot.slane %v4064_v36, 7  ;;  %v9465_v14 = vld [vmem:[#allocation2 + $0xdc] sm:$0xf] }
 0x221   :  { %7558 = vmatpush3.bf16.msra.mxu1 %v8119_v34  ;;  %v4080_v58 = vshll.u32 %v9405_v19, 16  ;;  %v4124_v46 = vshrl.u32 %v3970_v0, 16  ;;  %v6778_v47 = vcombine.low %v4018_v24, %v4031_v15  ;;  %v4044_v6 = vsel %vm9123_vm7, %v6749_v62, %v4043_v59 }
 0x222   :  { %7575 = vmatprep.subr.bf16.mxu1 %v8120_v5  ;;  %v4092_v2 = vrot.slane %v4090_v63, 7  ;;  %v4106_v44 = vshll.u32 %v9410_v3, 16  ;;  %v6779_v42 = vcombine.low %v4044_v6, %v4057_v10  ;;  %v4067_v43 = vshll.u32 %v9418_v4, 16  ;;  %v9476_v10 = vld [vmem:[#allocation2 + $0xd0] sm:$0xf] }
 0x223   :  { %v4082_v31 = vor.u32 %v4080_v58, %v4079_v30  ;;  %v4129_v37 = vshrl.u32 %v9435_v41, 16  ;;  %v4093_v48 = vshll.u32 %v9422_v12, 16  ;;  %v6754_v21 = vrot.slane %v4098_v7, 11 }
 0x224   :  { %7560 = vmatmul.mubr.bf16.vlgmr.msra.gmra.mrb[8].mxu1 %v6778_v47  ;;  %v4108_v9 = vor.u32 %v4106_v44, %v4105_v50  ;;  %v4155_v26 = vshrl.u32 %v9440_v35, 16  ;;  %v6751_v34 = vrot.slane %v4059_v55, 11  ;;  %v4069_v1 = vor.u32 %v4067_v43, %v4066_v33  ;;  %v8123_v55 = vld [vmem:[%s9928_s3 + $0x118] sm:$0xff]   ;;  %v8124_v44 = vld [vmem:[%s9928_s3 + $0x120] sm:$0xff]  }
 0x225   :  { %7563 = vmatprep.mubr.bf16.mxu1 %v6779_v42  ;;  %7576 = vmatpush3.bf16.msra.mxu1 %v8120_v5  ;;  %v4116_v40 = vshrl.u32 %v9448_v11, 16  ;;  %v6753_v25 = vrot.slane %v4085_v39, 11  ;;  %v4095_v17 = vor.u32 %v4093_v48, %v4092_v2  ;;  %v4142_v49 = vshrl.u32 %v9452_v32, 16  ;;  %v3978_v47 = vld [vmem:[#allocation2 + $0xd8] sm:$0x8] }
 0x226   :  { %7577 = vmatprep.subr.bf16.mxu1 %v8121_v51  ;;  %v4083_v16 = vsel %vm9123_vm7, %v6752_v13, %v4082_v31  ;;  %v4111_v28 = vshrl.u32 %v3968_v60, 16  ;;  %v4131_v38 = vrot.slane %v4129_v37, 7  ;;  %v4109_v8 = vsel %vm9123_vm7, %v6754_v21, %v4108_v9  ;;  %v3976_v31 = vld [vmem:[#allocation2 + $0xcc] sm:$0x8] }
 0x227   :  { %v6756_v22 = vrot.slane %v4124_v46, 11  ;;  %v4150_v36 = vshrl.u32 %v3974_v56, 16  ;;  %v4157_v23 = vrot.slane %v4155_v26, 7  ;;  %v4070_v5 = vsel %vm9123_vm7, %v6751_v34, %v4069_v1 }
 0x228   :  { %v4118_v62 = vrot.slane %v4116_v40, 7  ;;  %v4132_v59 = vshll.u32 %v9435_v41, 16  ;;  %v4137_v63 = vshrl.u32 %v3972_v61, 16  ;;  %v6780_v0 = vcombine.low %v4070_v5, %v4083_v16 }
 0x229   :  { %7578 = vmatpush3.bf16.msra.mxu1 %v8121_v51  ;;  %v4096_v15 = vsel %vm9123_vm7, %v6753_v25, %v4095_v17  ;;  %v4144_v13 = vrot.slane %v4142_v49, 7  ;;  %v4158_v30 = vshll.u32 %v9440_v35, 16  ;;  %v4119_v7 = vshll.u32 %v9448_v11, 16 }
 0x22a   :  { %7579 = vmatprep.subr.bf16.mxu1 %v8122_v27  ;;  %v6781_v39 = vcombine.low %v4096_v15, %v4109_v8  ;;  %v4134_v50 = vor.u32 %v4132_v59, %v4131_v38  ;;  %v4181_v24 = vshrl.u32 %v9465_v14, 16  ;;  %v4145_v33 = vshll.u32 %v9452_v32, 16  ;;  %v8126_v38 = vld [vmem:[%s9928_s3 + $0x130] sm:$0xff]   ;;  %v4626_v15 = vld [vmem:[#allocation2 + $0x1c] sm:$0xf] }
 0x22b   :  { %v6758_v58 = vrot.slane %v4150_v36, 11  ;;  %v4160_v46 = vor.u32 %v4158_v30, %v4157_v23  ;;  %v6755_v6 = vrot.slane %v4111_v28, 11  ;;  %v4121_v51 = vor.u32 %v4119_v7, %v4118_v62  ;;  %v8128_v23 = vld [vmem:[%s9928_s3 + $0x138] sm:$0xff]   ;;  %v8130_v62 = vld [vmem:[%s9928_s3 + $0x140] sm:$0xff]   ;;  %v4629_v30 = vld [vmem:[#allocation2 + $0x2c] sm:$0x1] }
 0x22c   :  { %7564 = vmatmul.mubr.bf16.gmra.mrb[12].mxu1 %v6780_v0  ;;  %v4168_v2 = vshrl.u32 %v9476_v10, 16  ;;  %v6757_v42 = vrot.slane %v4137_v63, 11  ;;  %v4147_v43 = vor.u32 %v4145_v33, %v4144_v13  ;;  %v4135_v37 = vsel %vm9123_vm7, %v6756_v22, %v4134_v50  ;;  %v8132_v63 = vld [vmem:[%s9928_s3 + $0x148] sm:$0xff]   ;;  %v4625_v0 = vld [vmem:[#allocation2 + $0x14] sm:$0x1] }
 0x22d   :  { %7567 = vmatprep.mubr.bf16.mxu1 %v6781_v39  ;;  %7580 = vmatpush3.bf16.msra.mxu1 %v8122_v27  ;;  %v4176_v48 = vshrl.u32 %v3978_v47, 16  ;;  %v4183_v21 = vrot.slane %v4181_v24, 7  ;;  %v4161_v9 = vsel %vm9123_vm7, %v6758_v58, %v4160_v46  ;;  %v4122_v60 = vsel %vm9123_vm7, %v6755_v6, %v4121_v51  ;;  %v8125_v27 = vld [vmem:[%s9928_s3 + $0x128] sm:$0xff]   ;;  %v4631_v50 = vld [vmem:[#allocation2 + $0x38] sm:$0x1] }
 0x22e   :  { %7581 = vmatprep.subr.bf16.mxu1 %v8123_v55  ;;  %v4163_v26 = vshrl.u32 %v3976_v31, 16  ;;  %v4170_v34 = vrot.slane %v4168_v2, 7  ;;  %v4184_v1 = vshll.u32 %v9465_v14, 16  ;;  %v6782_v40 = vcombine.low %v4122_v60, %v4135_v37  ;;  %v8136_v58 = vld [vmem:[%s9928_s3 + $0x158] sm:$0xff]   ;;  %v4630_v46 = vld [vmem:[#allocation2 + $0x34] sm:$0xf] }
 0x22f   :  { %v4148_v56 = vsel %vm9123_vm7, %v6757_v42, %v4147_v43  ;;  %v4171_v17 = vshll.u32 %v9476_v10, 16  ;;  %v6760_v61 = vrot.slane %v4176_v48, 11  ;;  %v6809_v5 = vcombine.low %v9344_v18, %v9357_v53  ;;  %v4627_v53 = vld [vmem:[#allocation2 + $0x20] sm:$0x1]  ;;  %v9530_v6 = vld [vmem:[#allocation2 + $0x18] sm:$0x8] }
 0x230   :  { %v6783_v25 = vcombine.low %v4148_v56, %v4161_v9  ;;  %v4186_v49 = vor.u32 %v4184_v1, %v4183_v21  ;;  %v6759_v16 = vrot.slane %v4163_v26, 11  ;;  %v6810_v59 = vcombine.low %v9383_v29, %v9372_v45  ;;  %v8134_v45 = vld [vmem:[%s9928_s3 + $0x150] sm:$0xff]   ;;  %v4633_v42 = vld [vmem:[#allocation2 + $0x44] sm:$0x1]  ;;  %v4637_v43 = vld [vmem:[#allocation2 + $0x5c] sm:$0x1] }
 0x231   :  { %7582 = vmatpush3.bf16.msra.mxu1 %v8123_v55  ;;  %v4173_v28 = vor.u32 %v4171_v17, %v4170_v34  ;;  %v6811_v18 = vcombine.low %v9386_v52, %v9390_v20  ;;  %v4666_v55 = vshll.u32 %v4625_v0, 16  ;;  %v4624_v29 = vld [vmem:[#allocation2 + $0x10] sm:$0xf]  ;;  %v4680_v13 = vshll.u32 %v4627_v53, 16  ;;  %v4639_v37 = vld [vmem:[#allocation2 + $0x68] sm:$0x1] }
 0x232   :  { %7583 = vmatprep.subr.bf16.mxu1 %v8124_v44  ;;  %v4187_v8 = vsel %vm9123_vm7, %v6760_v61, %v4186_v49  ;;  %v4671_v39 = vshrl.u32 %v4626_v15, 16  ;;  %v4674_v7 = vshll.u32 %v4626_v15, 16  ;;  %v4657_v24 = vshrl.u32 %v4624_v29, 16  ;;  %v4634_v26 = vld [vmem:[#allocation2 + $0x4c] sm:$0xf] }
 0x233   :  { %v4174_v22 = vsel %vm9123_vm7, %v6759_v16, %v4173_v28  ;;  %v4660_v52 = vshll.u32 %v4624_v29, 16  ;;  %v9523_v20 = vrot.slane %v4666_v55, 5  ;;  %v6812_v33 = vcombine.low %v9418_v4, %v9405_v19  ;;  %v4628_v4 = vld [vmem:[#allocation2 + $0x28] sm:$0xf]  ;;  %v4635_v34 = vld [vmem:[#allocation2 + $0x50] sm:$0x1] }
 0x234   :  { %7568 = vmatmul.mubr.bf16.gmra.mrb[16].mxu1 %v6782_v40  ;;  %v6784_v36 = vcombine.low %v4174_v22, %v4187_v8  ;;  %v4694_v47 = vshll.u32 %v4629_v30, 16  ;;  %v6813_v51 = vcombine.low %v9422_v12, %v9410_v3  ;;  %v9534_v2 = vrot.slane %v4680_v13, 5  ;;  %v8138_v3 = vld [vmem:[%s9928_s3 + $0x160] sm:$0xff]   ;;  %v4636_v30 = vld [vmem:[#allocation2 + $0x58] sm:$0xf] }
 0x235   :  { %7571 = vmatprep.mubr.bf16.mxu1 %v6783_v25  ;;  %7584 = vmatpush3.bf16.msra.mxu1 %v8124_v44  ;;  %v4708_v44 = vshll.u32 %v4631_v50, 16  ;;  %v4673_v31 = vrot.slane %v4671_v39, 4  ;;  %v4676_v19 = vrot.slane %v4674_v7, 5  ;;  %v4659_v48 = vrot.slane %v4657_v24, 4  ;;  %v4632_v17 = vld [vmem:[#allocation2 + $0x40] sm:$0xf] }
 0x236   :  { %7585 = vmatprep.subr.bf16.mxu1 %v8125_v27  ;;  %v4662_v21 = vrot.slane %v4660_v52, 5  ;;  %v4699_v9 = vshrl.u32 %v4630_v46, 16  ;;  %v4702_v60 = vshll.u32 %v4630_v46, 16  ;;  %v9539_v12 = vrot.slane %v4694_v47, 5  ;;  %v4638_v55 = vld [vmem:[#allocation2 + $0x64] sm:$0xf] }
 0x237   :  { %v4750_v1 = vshll.u32 %v4637_v43, 16  ;;  %v5124_v40 = vshrl.u32 %v9530_v6, 16  ;;  %v4685_v56 = vshrl.u32 %v4628_v4, 16  ;;  %v9542_v25 = vrot.slane %v4708_v44, 5  ;;  %v8142_v39 = vld [vmem:[%s9928_s3 + $0x170] sm:$0xff]  }
 0x238   :  { %v4722_v61 = vshll.u32 %v4633_v42, 16  ;;  %v4677_v49 = vor.u32 %v4676_v19, %v4673_v31  ;;  %v4727_v16 = vshrl.u32 %v4634_v26, 16  ;;  %v4730_v28 = vshll.u32 %v4634_v26, 16  ;;  %v4642_v24 = vld [vmem:[#allocation2 + $0x94] sm:$0xf] }
 0x239   :  { %7586 = vmatpush3.bf16.msra.mxu1 %v8125_v27  ;;  %v4688_v27 = vshll.u32 %v4628_v4, 16  ;;  %v4663_v8 = vor.u32 %v4662_v21, %v4659_v48  ;;  %v4701_v22 = vrot.slane %v4699_v9, 4  ;;  %v9549_v0 = vrot.slane %v4750_v1, 5  ;;  %v4640_v47 = vld [vmem:[#allocation2 + $0x88] sm:$0xf] }
 0x23a   :  { %7587 = vmatprep.subr.bf16.mxu1 %v8126_v38  ;;  %v4687_v53 = vrot.slane %v4685_v56, 4  ;;  %v4678_v29 = vrot.slane %v4677_v49, 4  ;;  %v4732_v13 = vrot.slane %v4730_v28, 5  ;;  %v4758_v46 = vshll.u32 %v4638_v55, 16  ;;  %v9570_v26 = vld [vmem:[#allocation2 + $0xb0] sm:$0x1] }
 0x23b   :  { %v4690_v15 = vrot.slane %v4688_v27, 5  ;;  %v4664_v7 = vrot.slane %v4663_v8, 4  ;;  %v4741_v44 = vshrl.u32 %v4636_v30, 16  ;;  %v4744_v42 = vshll.u32 %v4636_v30, 16  ;;  %v4643_v27 = vld [vmem:[#allocation2 + $0x98] sm:$0x1] }
 0x23c   :  { %7572 = vmatmul.mubr.bf16.gmra.mrb[20].mxu1 %v6784_v36  ;;  %v4704_v36 = vrot.slane %v4702_v60, 5  ;;  %v4683_v31 = vsel %vm8336_vm4, %v4678_v29, %v9534_v2  ;;  %v4783_v4 = vshrl.u32 %v4642_v24, 16  ;;  %v6816_v48 = vcombine.low %v9476_v10, %v9465_v14  ;;  %v8143_v2 = vld [vmem:[%s9928_s3 + $0x178] sm:$0xff]   ;;  %v4646_v49 = vld [vmem:[#allocation2 + $0xac] sm:$0xf] }
 0x23d   :  { %7588 = vmatpush3.bf16.msra.mxu1 %v8126_v38  ;;  %7591 = vmatprep.mubr.bf16.mxu1 %v6809_v5  ;;  %v4764_v38 = vshll.u32 %v4639_v37, 16  ;;  %v6814_v5 = vcombine.low %v9448_v11, %v9435_v41  ;;  %v9555_v41 = vrot.slane %v4722_v61, 5  ;;  %v4729_v11 = vrot.slane %v4727_v16, 4  ;;  %v4644_v8 = vld [vmem:[#allocation2 + $0xa0] sm:$0xf] }
 0x23e   :  { %7589 = vmatprep.subr.bf16.mxu1 %v8128_v23  ;;  %v4786_v37 = vshll.u32 %v4642_v24, 16  ;;  %v4769_v9 = vshrl.u32 %v4640_v47, 16  ;;  %v4772_v60 = vshll.u32 %v4640_v47, 16  ;;  %v4760_v56 = vrot.slane %v4758_v46, 5  ;;  %v8145_v46 = vld [vmem:[%s9928_s3 + $0x188] sm:$0xff]  }
 0x23f   :  { %v9562_v50 = vrot.slane %v4764_v38, 5  ;;  %v4733_v19 = vor.u32 %v4732_v13, %v4729_v11  ;;  %v4743_v10 = vrot.slane %v4741_v44, 4  ;;  %v4746_v61 = vrot.slane %v4744_v42, 5 }
 0x240   :  { %v4785_v28 = vrot.slane %v4783_v4, 4  ;;  %v4788_v38 = vrot.slane %v4786_v37, 5  ;;  %v4800_v13 = vshll.u32 %v4644_v8, 16  ;;  %v4654_v37 = vld [vmem:[#allocation2 + $0xdc] sm:$0xf] }
 0x241   :  { %7590 = vmatpush3.bf16.msra.mxu1 %v8128_v23  ;;  %v4736_v23 = vshll.u32 %v4635_v34, 16  ;;  %v4734_v16 = vrot.slane %v4733_v19, 4  ;;  %v4747_v11 = vor.u32 %v4746_v61, %v4743_v10  ;;  %v4649_v10 = vld [vmem:[#allocation2 + $0xbc] sm:$0x1]  ;;  %v4867_v61 = vshrl.u32 %v4654_v37, 16 }
 0x242   :  { %7607 = vmatprep.subr.bf16.mxu1 %v8130_v62  ;;  %v4802_v4 = vrot.slane %v4800_v13, 5  ;;  %v9619_v13 = vld [vmem:[#allocation2 + $0x28] sm:$0xf] }
 0x244   :  { %7592 = vmatmul.mubr.bf16.vlgmr.msra.gmra.mrb[8].mxu1 %v6810_v59  ;;  %v4713_v59 = vshrl.u32 %v4632_v17, 16 }
 0x245   :  { %7595 = vmatprep.mubr.bf16.mxu1 %v6811_v18  ;;  %7608 = vmatpush3.bf16.msra.mxu1 %v8130_v62  ;;  %v8140_v62 = vld [vmem:[%s9928_s3 + $0x168] sm:$0xff]   ;;  %v6815_v18 = vcombine.low %v9452_v32, %v9440_v35  ;;  %v4705_v35 = vor.u32 %v4704_v36, %v4701_v22  ;;  %v9560_v32 = vrot.slane %v4736_v23, 5  ;;  %v4771_v36 = vrot.slane %v4769_v9, 4 }
 0x246   :  { %7609 = vmatprep.subr.bf16.mxu1 %v8132_v63  ;;  %v4715_v52 = vrot.slane %v4713_v59, 4  ;;  %v4774_v23 = vrot.slane %v4772_v60, 5  ;;  %v8144_v59 = vld [vmem:[%s9928_s3 + $0x180] sm:$0xff]   ;;  %v4651_v9 = vld [vmem:[#allocation2 + $0xc8] sm:$0x1] }
 0x247   :  { %v4706_v21 = vrot.slane %v4705_v35, 4  ;;  %v4739_v30 = vsel %vm8336_vm4, %v4734_v16, %v9560_v32 }
 0x249   :  { %7610 = vmatpush3.bf16.msra.mxu1 %v8132_v63  ;;  %v4716_v63 = vshll.u32 %v4632_v17, 16  ;;  %v4711_v22 = vsel %vm8336_vm4, %v4706_v21, %v9542_v25  ;;  %v4797_v25 = vshrl.u32 %v4644_v8, 16 }
 0x24a   :  { %7611 = vmatprep.subr.bf16.mxu1 %v8134_v45 }
 0x24b   :  { %v4799_v19 = vrot.slane %v4797_v25, 4 }
 0x24c   :  { %7596 = vmatmul.mubr.bf16.gmra.mrb[12].mxu1 %v6812_v33  ;;  %v4718_v33 = vrot.slane %v4716_v63, 5 }
 0x24d   :  { %7599 = vmatprep.mubr.bf16.mxu1 %v6813_v51  ;;  %7612 = vmatpush3.bf16.msra.mxu1 %v8134_v45  ;;  %v9553_v45 = vld [vmem:[#allocation2 + $0x8c] sm:$0x1]  ;;  %v4691_v51 = vor.u32 %v4690_v15, %v4687_v53  ;;  %v4811_v53 = vshrl.u32 %v4646_v49, 16  ;;  %v4814_v15 = vshll.u32 %v4646_v49, 16  ;;  %v4870_v49 = vshll.u32 %v4654_v37, 16 }
 0x24e   :  { %7613 = vmatprep.subr.bf16.mxu1 %v8136_v58  ;;  %v4778_v43 = vshll.u32 %v9553_v45, 16  ;;  %v4719_v34 = vor.u32 %v4718_v33, %v4715_v52  ;;  %v4775_v52 = vor.u32 %v4774_v23, %v4771_v36 }
 0x24f   :  { %v4692_v14 = vrot.slane %v4691_v51, 4  ;;  %v4645_v51 = vld [vmem:[#allocation2 + $0xa4] sm:$0x1]  ;;  %v4813_v32 = vrot.slane %v4811_v53, 4  ;;  %v4816_v44 = vrot.slane %v4814_v15, 5  ;;  %v4869_v15 = vrot.slane %v4867_v61, 4 }
 0x250   :  { %v4720_v63 = vrot.slane %v4719_v34, 4  ;;  %v4806_v16 = vshll.u32 %v4645_v51, 16  ;;  %v4655_v53 = vld [vmem:[#allocation2 + $0xe0] sm:$0x1]  ;;  %v5142_v51 = vshrl.u32 %v9619_v13, 16 }
 0x251   :  { %7614 = vmatpush3.bf16.msra.mxu1 %v8136_v58  ;;  %v4755_v58 = vshrl.u32 %v4638_v55, 16  ;;  %v4648_v55 = vld [vmem:[#allocation2 + $0xb8] sm:$0xf]  ;;  %v4697_v29 = vsel %vm8336_vm4, %v4692_v14, %v9539_v12  ;;  %v4817_v14 = vor.u32 %v4816_v44, %v4813_v32  ;;  %v5095_v32 = vld [vmem:[#allocation2 + $0x30] sm:$0x8] }
 0x252   :  { %7615 = vmatprep.subr.bf16.mxu1 %v8138_v3  ;;  %v6842_v24 = vcombine.low %v4697_v29, %v4711_v22  ;;  %v4825_v33 = vshrl.u32 %v4648_v55, 16  ;;  %v4725_v12 = vsel %vm8336_vm4, %v4720_v63, %v9555_v41  ;;  %v4776_v41 = vrot.slane %v4775_v52, 4  ;;  %v8147_v63 = vld [vmem:[%s9928_s3 + $0x198] sm:$0xff]   ;;  %v5093_v29 = vld [vmem:[#allocation2 + $0x24] sm:$0x8] }
 0x253   :  { %v4757_v1 = vrot.slane %v4755_v58, 4  ;;  %v4828_v58 = vshll.u32 %v4648_v55, 16  ;;  %v6843_v42 = vcombine.low %v4725_v12, %v4739_v30  ;;  %v4872_v55 = vrot.slane %v4870_v49, 5 }
 0x254   :  { %7600 = vmatmul.mubr.bf16.gmra.mrb[16].mxu1 %v6814_v5  ;;  %v4792_v5 = vshll.u32 %v4643_v27, 16  ;;  %v4827_v34 = vrot.slane %v4825_v33, 4 }
 0x255   :  { %7603 = vmatprep.mubr.bf16.mxu1 %v6815_v18  ;;  %7616 = vmatpush3.bf16.msra.mxu1 %v8138_v3  ;;  %v4669_v3 = vsel %vm8336_vm4, %v4664_v7, %v9523_v20  ;;  %v4820_v20 = vshll.u32 %v9570_v26, 16  ;;  %v4761_v18 = vor.u32 %v4760_v56, %v4757_v1  ;;  %v4830_v1 = vrot.slane %v4828_v58, 5  ;;  %v4652_v56 = vld [vmem:[#allocation2 + $0xd0] sm:$0xf] }
 0x256   :  { %7617 = vmatprep.subr.bf16.mxu1 %v8140_v62  ;;  %v6841_v17 = vcombine.low %v4669_v3, %v4683_v31  ;;  %v4748_v31 = vrot.slane %v4747_v11, 4  ;;  %v4794_v21 = vrot.slane %v4792_v5, 5  ;;  %v4856_v22 = vshll.u32 %v4652_v56, 16 }
 0x257   :  { %v4762_v47 = vrot.slane %v4761_v18, 4  ;;  %v4822_v23 = vrot.slane %v4820_v20, 5  ;;  %v4831_v5 = vor.u32 %v4830_v1, %v4827_v34  ;;  %v4818_v18 = vrot.slane %v4817_v14, 4  ;;  %v8149_v34 = vld [vmem:[%s9928_s3 + $0x1a8] sm:$0xff]   ;;  %v5101_v14 = vld [vmem:[#allocation2 + $0x54] sm:$0x8] }
 0x258   :  { %v4753_v45 = vsel %vm8336_vm4, %v4748_v31, %v9549_v0  ;;  %v4808_v20 = vrot.slane %v4806_v16, 5  ;;  %v4876_v58 = vshll.u32 %v4655_v53, 16  ;;  %v5137_v31 = vshrl.u32 %v5093_v29, 16  ;;  %v9664_v29 = vld [vmem:[#allocation2 + $0x64] sm:$0xf] }
 0x259   :  { %7618 = vmatpush3.bf16.msra.mxu1 %v8140_v62  ;;  %v4650_v62 = vld [vmem:[#allocation2 + $0xc4] sm:$0xf]  ;;  %v4767_v27 = vsel %vm8336_vm4, %v4762_v47, %v9562_v50  ;;  %v4853_v50 = vshrl.u32 %v4652_v56, 16  ;;  %v4832_v52 = vrot.slane %v4831_v5, 4  ;;  %v4823_v12 = vsel %vm8336_vm4, %v4818_v18, %v4822_v23 }
 0x25a   :  { %7619 = vmatprep.subr.bf16.mxu1 %v8142_v39  ;;  %v4839_v7 = vshrl.u32 %v4650_v62, 16  ;;  %v4842_v35 = vshll.u32 %v4650_v62, 16  ;;  %v6844_v36 = vcombine.low %v4753_v45, %v4767_v27  ;;  %v4834_v62 = vshll.u32 %v4649_v10, 16  ;;  %v9650_v45 = vld [vmem:[#allocation2 + $0x58] sm:$0xf] }
 0x25b   :  { %v4873_v47 = vor.u32 %v4872_v55, %v4869_v15  ;;  %v5144_v27 = vrot.slane %v5142_v51, 7  ;;  %v5194_v18 = vshrl.u32 %v9650_v45, 16  ;;  %v5189_v55 = vshrl.u32 %v5101_v14, 16  ;;  %v5109_v14 = vld [vmem:[#allocation2 + $0x9c] sm:$0x8] }
 0x25c   :  { %7604 = vmatmul.mubr.bf16.gmra.mrb[20].mxu1 %v6816_v48  ;;  %v4841_v60 = vrot.slane %v4839_v7, 4  ;;  %v4844_v3 = vrot.slane %v4842_v35, 5  ;;  %v4855_v7 = vrot.slane %v4853_v50, 4  ;;  %v4858_v35 = vrot.slane %v4856_v22, 5 }
 0x25d   :  { %7620 = vmatpush3.bf16.msra.mxu1 %v8142_v39  ;;  %7623 = vmatprep.mubr.bf16.mxu1 %v6841_v17  ;;  %v4789_v39 = vor.u32 %v4788_v38, %v4785_v28  ;;  %v8146_v17 = vld [vmem:[%s9928_s3 + $0x190] sm:$0xff]   ;;  %v4848_v28 = vshll.u32 %v4651_v9, 16  ;;  %v4836_v33 = vrot.slane %v4834_v62, 5  ;;  %v4874_v1 = vrot.slane %v4873_v47, 4 }
 0x25e   :  { %7621 = vmatprep.subr.bf16.mxu1 %v8143_v2  ;;  %v4845_v8 = vor.u32 %v4844_v3, %v4841_v60  ;;  %v9638_v9 = vld [vmem:[#allocation2 + $0x34] sm:$0xf]  ;;  %v5097_v3 = vld [vmem:[#allocation2 + $0x3c] sm:$0x8]  ;;  %v6858_v22 = vrot.slane %v5137_v31, 11  ;;  %v5196_v51 = vrot.slane %v5194_v18, 7 }
 0x25f   :  { %v4790_v48 = vrot.slane %v4789_v39, 4  ;;  %v4850_v25 = vrot.slane %v4848_v28, 5  ;;  %v4653_v39 = vld [vmem:[#allocation2 + $0xd4] sm:$0x1]  ;;  %v4837_v6 = vsel %vm8336_vm4, %v4832_v52, %v4836_v33  ;;  %v5155_v49 = vshrl.u32 %v9638_v9, 16 }
 0x260   :  { %v4846_v30 = vrot.slane %v4845_v8, 4  ;;  %v4862_v44 = vshll.u32 %v4653_v39, 16  ;;  %v5099_v8 = vld [vmem:[#allocation2 + $0x48] sm:$0x8]  ;;  %v5163_v23 = vshrl.u32 %v5097_v3, 16  ;;  %v8150_v62 = vld [vmem:[%s9928_s3 + $0x1b0] sm:$0xff]  }
 0x261   :  { %7622 = vmatpush3.bf16.msra.mxu1 %v8143_v2  ;;  %v4780_v2 = vrot.slane %v4778_v43, 5  ;;  %v4803_v43 = vor.u32 %v4802_v4, %v4799_v19  ;;  %v4795_v38 = vsel %vm8336_vm4, %v4790_v48, %v4794_v21  ;;  %v9632_v19 = vld [vmem:[#allocation2 + $0x40] sm:$0xf]  ;;  %v4859_v48 = vor.u32 %v4858_v35, %v4855_v7  ;;  %v5105_v7 = vld [vmem:[#allocation2 + $0x6c] sm:$0x8] }
 0x262   :  { %7639 = vmatprep.subr.bf16.mxu1 %v8144_v59  ;;  %v4851_v37 = vsel %vm8336_vm4, %v4846_v30, %v4850_v25  ;;  %v4864_v61 = vrot.slane %v4862_v44, 5  ;;  %v5157_v53 = vrot.slane %v5155_v49, 7  ;;  %v5176_v15 = vshrl.u32 %v5099_v8, 16  ;;  %v5103_v39 = vld [vmem:[#allocation2 + $0x60] sm:$0x8] }
 0x263   :  { %v4781_v0 = vsel %vm8336_vm4, %v4776_v41, %v4780_v2  ;;  %v4804_v26 = vrot.slane %v4803_v43, 4  ;;  %v5150_v41 = vshrl.u32 %v5095_v32, 16  ;;  %v9642_v2 = vld [vmem:[#allocation2 + $0x4c] sm:$0xf]  ;;  %v6847_v10 = vcombine.low %v4837_v6, %v4851_v37  ;;  %v9652_v43 = vld [vmem:[#allocation2 + $0x70] sm:$0xf] }
 0x264   :  { %7624 = vmatmul.mubr.bf16.vlgmr.msra.gmra.mrb[8].mxu1 %v6842_v24  ;;  %v6845_v11 = vcombine.low %v4781_v0, %v4795_v38  ;;  %v4860_v16 = vrot.slane %v4859_v48, 4  ;;  %v5145_v38 = vshll.u32 %v9619_v13, 16  ;;  %v5181_v50 = vshrl.u32 %v9642_v2, 16  ;;  %v9683_v37 = vld [vmem:[#allocation2 + $0xa0] sm:$0xf] }
 0x265   :  { %7627 = vmatprep.mubr.bf16.mxu1 %v6843_v42  ;;  %7640 = vmatpush3.bf16.msra.mxu1 %v8144_v59  ;;  %v9612_v59 = vld [vmem:[#allocation2 + $0x1c] sm:$0xf]  ;;  %v9630_v42 = vrot.slane %v5124_v40, 11  ;;  %v4809_v4 = vsel %vm8336_vm4, %v4804_v26, %v4808_v20  ;;  %v4878_v40 = vrot.slane %v4876_v58, 5  ;;  %v5171_v25 = vshll.u32 %v9632_v19, 16 }
 0x266   :  { %7641 = vmatprep.subr.bf16.mxu1 %v8145_v46  ;;  %v5129_v24 = vshrl.u32 %v9612_v59, 16  ;;  %v6846_v60 = vcombine.low %v4809_v4, %v4823_v12  ;;  %v5132_v56 = vshll.u32 %v9612_v59, 16  ;;  %v5147_v0 = vor.u32 %v5145_v38, %v5144_v27  ;;  %v9675_v58 = vld [vmem:[#allocation2 + $0x94] sm:$0xf] }
 0x267   :  { %v4879_v5 = vsel %vm8336_vm4, %v4874_v1, %v4878_v40  ;;  %v4865_v26 = vsel %vm8336_vm4, %v4860_v16, %v4864_v61  ;;  %v5183_v30 = vrot.slane %v5181_v50, 7  ;;  %v6860_v52 = vrot.slane %v5163_v23, 11 }
 0x268   :  { %v5131_v21 = vrot.slane %v5129_v24, 7  ;;  %v6848_v35 = vcombine.low %v4865_v26, %v4879_v5  ;;  %v5158_v24 = vshll.u32 %v9638_v9, 16  ;;  %v5184_v33 = vshll.u32 %v9642_v2, 16  ;;  %v8153_v5 = vld [vmem:[%s9928_s3 + $0x1c8] sm:$0xff]  }
 0x269   :  { %7642 = vmatpush3.bf16.msra.mxu1 %v8145_v46  ;;  %v8148_v46 = vld [vmem:[%s9928_s3 + $0x1a0] sm:$0xff]   ;;  %v5148_v12 = vsel %vm9123_vm7, %v6858_v22, %v5147_v0  ;;  %v5207_v32 = vshrl.u32 %v9664_v29, 16  ;;  %v5202_v31 = vshrl.u32 %v5103_v39, 16  ;;  %v5215_v4 = vshrl.u32 %v5105_v7, 16 }
 0x26a   :  { %7643 = vmatprep.subr.bf16.mxu1 %v8146_v17  ;;  %v5134_v28 = vor.u32 %v5132_v56, %v5131_v21  ;;  %v6861_v48 = vrot.slane %v5176_v15, 11  ;;  %v5186_v21 = vor.u32 %v5184_v33, %v5183_v30  ;;  %v5233_v6 = vshrl.u32 %v9675_v58, 16  ;;  %v8152_v56 = vld [vmem:[%s9928_s3 + $0x1c0] sm:$0xff]  }
 0x26b   :  { %v6862_v40 = vrot.slane %v5189_v55, 11  ;;  %v6863_v49 = vrot.slane %v5202_v31, 11  ;;  %v6864_v16 = vrot.slane %v5215_v4, 11  ;;  %v5210_v8 = vshll.u32 %v9664_v29, 16  ;;  %v9710_v55 = vld [vmem:[#allocation2 + $0xac] sm:$0xf] }
 0x26c   :  { %7628 = vmatmul.mubr.bf16.gmra.mrb[12].mxu1 %v6844_v36  ;;  %v9656_v36 = vrot.slane %v5150_v41, 11  ;;  %v5135_v20 = vsel %vm9123_vm7, %v9630_v42, %v5134_v28  ;;  %v5160_v42 = vor.u32 %v5158_v24, %v5157_v53  ;;  %v5223_v41 = vshll.u32 %v9652_v43, 16  ;;  %v9697_v28 = vld [vmem:[#allocation2 + $0xb8] sm:$0xf] }
 0x26d   :  { %7631 = vmatprep.mubr.bf16.mxu1 %v6845_v11  ;;  %7644 = vmatpush3.bf16.msra.mxu1 %v8146_v17  ;;  %v5168_v17 = vshrl.u32 %v9632_v19, 16  ;;  %v5220_v11 = vshrl.u32 %v9652_v43, 16  ;;  %v6889_v44 = vcombine.low %v5135_v20, %v5148_v12  ;;  %v5187_v38 = vsel %vm9123_vm7, %v6861_v48, %v5186_v21  ;;  %v5117_v48 = vld [vmem:[#allocation2 + $0xcc] sm:$0x8]  ;;  %v9726_v21 = vld [vmem:[#allocation2 + $0xdc] sm:$0xf] }
 0x26e   :  { %7645 = vmatprep.subr.bf16.mxu1 %v8147_v63  ;;  %v5161_v61 = vsel %vm9123_vm7, %v9656_v36, %v5160_v42  ;;  %v5235_v22 = vrot.slane %v5233_v6, 7  ;;  %v5236_v36 = vshll.u32 %v9675_v58, 16  ;;  %v5241_v0 = vshrl.u32 %v5109_v14, 16  ;;  %v8155_v14 = vld [vmem:[%s9928_s3 + $0x1d8] sm:$0xff]  }
 0x26f   :  { %v5222_v3 = vrot.slane %v5220_v11, 7  ;;  %v5113_v11 = vld [vmem:[#allocation2 + $0xb4] sm:$0x8]  ;;  %v5272_v26 = vshrl.u32 %v9697_v28, 16  ;;  %v5249_v7 = vshll.u32 %v9683_v37, 16  ;;  %v5259_v12 = vshrl.u32 %v9710_v55, 16 }
 0x270   :  { %v5238_v39 = vor.u32 %v5236_v36, %v5235_v22  ;;  %v6866_v33 = vrot.slane %v5241_v0, 11  ;;  %v5275_v6 = vshll.u32 %v9697_v28, 16  ;;  %v5121_v36 = vld [vmem:[#allocation2 + $0xe4] sm:$0x8] }
 0x271   :  { %7646 = vmatpush3.bf16.msra.mxu1 %v8147_v63  ;;  %v5170_v63 = vrot.slane %v5168_v17, 7  ;;  %v5209_v17 = vrot.slane %v5207_v32, 7  ;;  %v8154_v32 = vld [vmem:[%s9928_s3 + $0x1d0] sm:$0xff]   ;;  %v5274_v42 = vrot.slane %v5272_v26, 7 }
 0x272   :  { %7647 = vmatprep.subr.bf16.mxu1 %v8148_v46 }
 0x273   :  { %v5173_v47 = vor.u32 %v5171_v25, %v5170_v63  ;;  %v9706_v63 = vld [vmem:[#allocation2 + $0xc4] sm:$0xf]  ;;  %v5212_v53 = vor.u32 %v5210_v8, %v5209_v17  ;;  %v9713_v25 = vld [vmem:[#allocation2 + $0xd0] sm:$0xf]  ;;  %v5119_v8 = vld [vmem:[#allocation2 + $0xd8] sm:$0x8] }
 0x274   :  { %7632 = vmatmul.mubr.bf16.gmra.mrb[16].mxu1 %v6846_v60  ;;  %v5197_v60 = vshll.u32 %v9650_v45, 16  ;;  %v5285_v24 = vshrl.u32 %v9706_v63, 16  ;;  %v5298_v31 = vshrl.u32 %v9713_v25, 16 }
 0x275   :  { %7635 = vmatprep.mubr.bf16.mxu1 %v6847_v10  ;;  %7648 = vmatpush3.bf16.msra.mxu1 %v8148_v46  ;;  %v8151_v46 = vld [vmem:[%s9928_s3 + $0x1b8] sm:$0xff]   ;;  %v5174_v1 = vsel %vm9123_vm7, %v6860_v52, %v5173_v47  ;;  %v5246_v10 = vshrl.u32 %v9683_v37, 16  ;;  %v5115_v47 = vld [vmem:[#allocation2 + $0xc0] sm:$0x8] }
 0x276   :  { %7649 = vmatprep.subr.bf16.mxu1 %v8149_v34  ;;  %v5199_v27 = vor.u32 %v5197_v60, %v5196_v51  ;;  %v6890_v23 = vcombine.low %v5161_v61, %v5174_v1  ;;  %v5213_v51 = vsel %vm9123_vm7, %v6863_v49, %v5212_v53  ;;  %v5261_v1 = vrot.slane %v5259_v12, 7 }
 0x277   :  { %v5248_v15 = vrot.slane %v5246_v10, 7  ;;  %v5277_v10 = vor.u32 %v5275_v6, %v5274_v42  ;;  %v5293_v61 = vshrl.u32 %v5117_v48, 16  ;;  %v5300_v49 = vrot.slane %v5298_v31, 7 }
 0x278   :  { %v5200_v18 = vsel %vm9123_vm7, %v6862_v40, %v5199_v27  ;;  %v5280_v40 = vshrl.u32 %v5115_v47, 16  ;;  %v5288_v27 = vshll.u32 %v9706_v63, 16  ;;  %v8157_v47 = vld [vmem:[%s9928_s3 + $0x1e8] sm:$0xff]  }
 0x279   :  { %7650 = vmatpush3.bf16.msra.mxu1 %v8149_v34  ;;  %v5107_v34 = vld [vmem:[#allocation2 + $0x90] sm:$0x8]  ;;  %v6891_v20 = vcombine.low %v5187_v38, %v5200_v18  ;;  %v5262_v38 = vshll.u32 %v9710_v55, 16 }
 0x27a   :  { %7651 = vmatprep.subr.bf16.mxu1 %v8150_v62  ;;  %v5228_v50 = vshrl.u32 %v5107_v34, 16 }
 0x27b   :  { %v5264_v18 = vor.u32 %v5262_v38, %v5261_v1  ;;  %v6922_v1 = vcombine.low %v9638_v9, %v9632_v19  ;;  %v8166_v19 = vld [vmem:[%s9928_s3 + $0x210] sm:$0xff]  }
 0x27c   :  { %7636 = vmatmul.mubr.bf16.gmra.mrb[20].mxu1 %v6848_v35  ;;  %v6865_v30 = vrot.slane %v5228_v50, 11  ;;  %v5111_v35 = vld [vmem:[#allocation2 + $0xa8] sm:$0x8]  ;;  %v5311_v50 = vshrl.u32 %v9726_v21, 16  ;;  %v5771_v9 = vld [vmem:[#allocation2 + $0x34] sm:$0xf] }
 0x27d   :  { %7652 = vmatpush3.bf16.msra.mxu1 %v8150_v62  ;;  %7655 = vmatprep.mubr.bf16.mxu1 %v6889_v44  ;;  %v5225_v62 = vor.u32 %v5223_v41, %v5222_v3  ;;  %v5251_v44 = vor.u32 %v5249_v7, %v5248_v15  ;;  %v5254_v4 = vshrl.u32 %v5111_v35, 16  ;;  %v5287_v3 = vrot.slane %v5285_v24, 7  ;;  %v9731_v41 = vld [vmem:[#allocation2 + $0xe8] sm:$0xf]  ;;  %v8156_v15 = vld [vmem:[%s9928_s3 + $0x1e0] sm:$0xff]  }
 0x27e   :  { %7653 = vmatprep.subr.bf16.mxu1 %v8151_v46  ;;  %v5239_v60 = vsel %vm9123_vm7, %v6865_v30, %v5238_v39  ;;  %v5324_v22 = vshrl.u32 %v9731_v41, 16  ;;  %v5313_v30 = vrot.slane %v5311_v50, 7  ;;  %v5319_v39 = vshrl.u32 %v5121_v36, 16 }
 0x27f   :  { %v5226_v52 = vsel %vm9123_vm7, %v6864_v16, %v5225_v62  ;;  %v5252_v17 = vsel %vm9123_vm7, %v6866_v33, %v5251_v44  ;;  %v5301_v62 = vshll.u32 %v9713_v25, 16  ;;  %v6867_v0 = vrot.slane %v5254_v4, 11  ;;  %v8158_v4 = vld [vmem:[%s9928_s3 + $0x1f0] sm:$0xff]  }
 0x280   :  { %v6892_v34 = vcombine.low %v5213_v51, %v5226_v52  ;;  %v6893_v16 = vcombine.low %v5239_v60, %v5252_v17  ;;  %v5326_v7 = vrot.slane %v5324_v22, 7  ;;  %v5327_v35 = vshll.u32 %v9731_v41, 16 }
 0x281   :  { %7654 = vmatpush3.bf16.msra.mxu1 %v8151_v46  ;;  %v5267_v46 = vshrl.u32 %v5113_v11, 16  ;;  %v6870_v11 = vrot.slane %v5293_v61, 11  ;;  %v5303_v26 = vor.u32 %v5301_v62, %v5300_v49  ;;  %v5265_v52 = vsel %vm9123_vm7, %v6867_v0, %v5264_v18  ;;  %v5773_v61 = vld [vmem:[#allocation2 + $0x40] sm:$0xf]  ;;  %v5775_v18 = vld [vmem:[#allocation2 + $0x4c] sm:$0xf] }
 0x282   :  { %7671 = vmatprep.subr.bf16.mxu1 %v8152_v56  ;;  %v5314_v33 = vshll.u32 %v9726_v21, 16  ;;  %v6872_v42 = vrot.slane %v5319_v39, 11  ;;  %v5329_v31 = vor.u32 %v5327_v35, %v5326_v7  ;;  %v5803_v17 = vshll.u32 %v5767_v54, 16  ;;  %v5768_v49 = vld [vmem:[#allocation2 + $0x20] sm:$0x1] }
 0x283   :  { %v5828_v50 = vshrl.u32 %v5771_v9, 16  ;;  %v5831_v22 = vshll.u32 %v5771_v9, 16  ;;  %v5842_v62 = vshrl.u32 %v5773_v61, 16  ;;  %v5845_v36 = vshll.u32 %v5773_v61, 16  ;;  %v8170_v7 = vld [vmem:[%s9928_s3 + $0x220] sm:$0xff]  }
 0x284   :  { %7656 = vmatmul.mubr.bf16.vlgmr.msra.gmra.mrb[8].mxu1 %v6890_v23  ;;  %v6869_v23 = vrot.slane %v5280_v40, 11  ;;  %v5316_v44 = vor.u32 %v5314_v33, %v5313_v30  ;;  %v5330_v60 = vsel %vm9123_vm7, %v6872_v42, %v5329_v31  ;;  %v8160_v40 = vld [vmem:[%s9928_s3 + $0x1f8] sm:$0xff]   ;;  %v5805_v38 = vrot.slane %v5803_v17, 5  ;;  %v5779_v42 = vld [vmem:[#allocation2 + $0x64] sm:$0xf] }
 0x285   :  { %7659 = vmatprep.mubr.bf16.mxu1 %v6891_v20  ;;  %7672 = vmatpush3.bf16.msra.mxu1 %v8152_v56  ;;  %v6868_v56 = vrot.slane %v5267_v46, 11  ;;  %v5306_v20 = vshrl.u32 %v5119_v8, 16  ;;  %v5304_v46 = vsel %vm9123_vm7, %v6870_v11, %v5303_v26  ;;  %v5770_v8 = vld [vmem:[#allocation2 + $0x2c] sm:$0x1]  ;;  %v6925_v0 = vcombine.low %v9675_v58, %v9683_v37  ;;  %v5777_v11 = vld [vmem:[#allocation2 + $0x58] sm:$0xf] }
 0x286   :  { %7673 = vmatprep.subr.bf16.mxu1 %v8153_v5  ;;  %v5830_v30 = vrot.slane %v5828_v50, 4  ;;  %v5833_v39 = vrot.slane %v5831_v22, 5  ;;  %v5844_v35 = vrot.slane %v5842_v62, 4  ;;  %v5847_v58 = vrot.slane %v5845_v36, 5  ;;  %v5780_v9 = vld [vmem:[#allocation2 + $0x68] sm:$0x1] }
 0x287   :  { %v5278_v53 = vsel %vm9123_vm7, %v6868_v56, %v5277_v10  ;;  %v6871_v51 = vrot.slane %v5306_v20, 11  ;;  %v8164_v56 = vld [vmem:[%s9928_s3 + $0x208] sm:$0xff]   ;;  %v5856_v37 = vshrl.u32 %v5775_v18, 16  ;;  %v5870_v33 = vshrl.u32 %v5777_v11, 16  ;;  %v5785_v50 = vld [vmem:[#allocation2 + $0xa0] sm:$0xf] }
 0x288   :  { %v6894_v12 = vcombine.low %v5265_v52, %v5278_v53  ;;  %v5809_v53 = vshll.u32 %v5768_v49, 16  ;;  %v6926_v52 = vcombine.low %v9710_v55, %v9697_v28  ;;  %v8172_v28 = vld [vmem:[%s9928_s3 + $0x228] sm:$0xff]   ;;  %v5834_v55 = vor.u32 %v5833_v39, %v5830_v30  ;;  %v8175_v39 = vld [vmem:[%s9928_s3 + $0x238] sm:$0xff]  }
 0x289   :  { %7674 = vmatpush3.bf16.msra.mxu1 %v8153_v5  ;;  %v5290_v5 = vor.u32 %v5288_v27, %v5287_v3  ;;  %v5317_v48 = vsel %vm9123_vm7, %v6871_v51, %v5316_v44  ;;  %v6921_v3 = vcombine.low %v9612_v59, %v9619_v13  ;;  %v5769_v27 = vld [vmem:[#allocation2 + $0x28] sm:$0xf]  ;;  %v6923_v59 = vcombine.low %v9642_v2, %v9650_v45  ;;  %v5776_v44 = vld [vmem:[#allocation2 + $0x50] sm:$0x1] }
 0x28a   :  { %7675 = vmatprep.subr.bf16.mxu1 %v8154_v32  ;;  %v6896_v6 = vcombine.low %v5317_v48, %v5330_v60  ;;  %v5800_v13 = vshrl.u32 %v5767_v54, 16  ;;  %v5817_v10 = vshll.u32 %v5769_v27, 16  ;;  %v5811_v51 = vrot.slane %v5809_v53, 5 }
 0x28b   :  { %v5291_v24 = vsel %vm9123_vm7, %v6869_v23, %v5290_v5  ;;  %v6924_v23 = vcombine.low %v9664_v29, %v9652_v43  ;;  %v8168_v5 = vld [vmem:[%s9928_s3 + $0x218] sm:$0xff]   ;;  %v5774_v29 = vld [vmem:[#allocation2 + $0x44] sm:$0x1]  ;;  %v5872_v54 = vrot.slane %v5870_v33, 4  ;;  %v5835_v22 = vrot.slane %v5834_v55, 4 }
 0x28c   :  { %7660 = vmatmul.mubr.bf16.gmra.mrb[12].mxu1 %v6892_v34  ;;  %v8162_v34 = vld [vmem:[%s9928_s3 + $0x200] sm:$0xff]   ;;  %v5819_v45 = vrot.slane %v5817_v10, 5  ;;  %v5772_v43 = vld [vmem:[#allocation2 + $0x38] sm:$0x1]  ;;  %v5851_v60 = vshll.u32 %v5774_v29, 16  ;;  %v5929_v29 = vshll.u32 %v5785_v50, 16 }
 0x28d   :  { %7663 = vmatprep.mubr.bf16.mxu1 %v6893_v16  ;;  %7676 = vmatpush3.bf16.msra.mxu1 %v8154_v32  ;;  %v6895_v32 = vcombine.low %v5291_v24, %v5304_v46  ;;  %v5802_v16 = vrot.slane %v5800_v13, 4  ;;  %v5859_v24 = vshll.u32 %v5775_v18, 16  ;;  %v6927_v46 = vcombine.low %v9706_v63, %v9713_v25  ;;  %v5791_v55 = vld [vmem:[#allocation2 + $0xc4] sm:$0xf] }
 0x28e   :  { %7677 = vmatprep.subr.bf16.mxu1 %v8155_v14  ;;  %v5848_v63 = vor.u32 %v5847_v58, %v5844_v35  ;;  %v5858_v25 = vrot.slane %v5856_v37, 4  ;;  %v5865_v13 = vshll.u32 %v5776_v44, 16  ;;  %v5893_v37 = vshll.u32 %v5780_v9, 16  ;;  %v5790_v9 = vld [vmem:[#allocation2 + $0xbc] sm:$0x1] }
 0x28f   :  { %v5806_v26 = vor.u32 %v5805_v38, %v5802_v16  ;;  %v8174_v16 = vld [vmem:[%s9928_s3 + $0x230] sm:$0xff]  }
 0x290   :  { %v5867_v18 = vrot.slane %v5865_v13, 5  ;;  %v5971_v13 = vshll.u32 %v5791_v55, 16 }
 0x291   :  { %7678 = vmatpush3.bf16.msra.mxu1 %v8155_v14  ;;  %v5814_v14 = vshrl.u32 %v5769_v27, 16  ;;  %v5807_v31 = vrot.slane %v5806_v26, 4  ;;  %v5887_v27 = vshll.u32 %v5779_v42, 16 }
 0x292   :  { %7679 = vmatprep.subr.bf16.mxu1 %v8156_v15 }
 0x293   :  { %v5816_v2 = vrot.slane %v5814_v14, 4  ;;  %v5812_v10 = vsel %vm8336_vm4, %v5807_v31, %v5811_v51  ;;  %v5889_v36 = vrot.slane %v5887_v27, 5  ;;  %v5789_v51 = vld [vmem:[#allocation2 + $0xb8] sm:$0xf]  ;;  %v5786_v31 = vld [vmem:[#allocation2 + $0xa4] sm:$0x1] }
 0x294   :  { %7664 = vmatmul.mubr.bf16.gmra.mrb[16].mxu1 %v6894_v12  ;;  %v5873_v12 = vshll.u32 %v5777_v11, 16  ;;  %v5784_v11 = vld [vmem:[#allocation2 + $0x98] sm:$0x1]  ;;  %v5935_v27 = vshll.u32 %v5786_v31, 16 }
 0x295   :  { %7667 = vmatprep.mubr.bf16.mxu1 %v6895_v32  ;;  %7680 = vmatpush3.bf16.msra.mxu1 %v8156_v15  ;;  %v5823_v15 = vshll.u32 %v5770_v8, 16  ;;  %v5820_v20 = vor.u32 %v5819_v45, %v5816_v2  ;;  %v5837_v32 = vshll.u32 %v5772_v43, 16  ;;  %v5849_v8 = vrot.slane %v5848_v63, 4 }
 0x296   :  { %7681 = vmatprep.subr.bf16.mxu1 %v8157_v47  ;;  %v5926_v43 = vshrl.u32 %v5785_v50, 16  ;;  %v5954_v63 = vshrl.u32 %v5789_v51, 16  ;;  %v5788_v50 = vld [vmem:[#allocation2 + $0xb0] sm:$0x1] }
 0x297   :  { %v5825_v48 = vrot.slane %v5823_v15, 5 }
 0x299   :  { %7682 = vmatpush3.bf16.msra.mxu1 %v8157_v47  ;;  %v6928_v47 = vcombine.low %v9726_v21, %v9731_v41  ;;  %v5895_v41 = vrot.slane %v5893_v37, 5  ;;  %v5794_v37 = vld [vmem:[#allocation2 + $0xd4] sm:$0x1] }
 0x29a   :  { %7683 = vmatprep.subr.bf16.mxu1 %v8158_v4 }
 0x29c   :  { %7668 = vmatmul.mubr.bf16.gmra.mrb[20].mxu1 %v6896_v6  ;;  %v5781_v6 = vld [vmem:[#allocation2 + $0x70] sm:$0xf] }
 0x29d   :  { %7684 = vmatpush3.bf16.msra.mxu1 %v8158_v4  ;;  %7687 = vmatprep.mubr.bf16.mxu1 %v6921_v3  ;;  %v5821_v4 = vrot.slane %v5820_v20, 4  ;;  %v5783_v3 = vld [vmem:[#allocation2 + $0x94] sm:$0xf]  ;;  %v5898_v17 = vshrl.u32 %v5781_v6, 16  ;;  %v5901_v14 = vshll.u32 %v5781_v6, 16  ;;  %v5928_v6 = vrot.slane %v5926_v43, 4 }
 0x29e   :  { %7685 = vmatprep.subr.bf16.mxu1 %v8160_v40  ;;  %v5912_v61 = vshrl.u32 %v5783_v3, 16  ;;  %v5915_v49 = vshll.u32 %v5783_v3, 16  ;;  %v5963_v43 = vshll.u32 %v5790_v9, 16 }
 0x29f   :  { %v5826_v38 = vsel %vm8336_vm4, %v5821_v4, %v5825_v48  ;;  %v5900_v53 = vrot.slane %v5898_v17, 4  ;;  %v5903_v15 = vrot.slane %v5901_v14, 5 }
 0x2a0   :  { %v5914_v26 = vrot.slane %v5912_v61, 4  ;;  %v5917_v20 = vrot.slane %v5915_v49, 5  ;;  %v5956_v61 = vrot.slane %v5954_v63, 4 }
 0x2a1   :  { %7686 = vmatpush3.bf16.msra.mxu1 %v8160_v40  ;;  %v5861_v40 = vrot.slane %v5859_v24, 5 }
 0x2a2   :  { %7703 = vmatprep.subr.bf16.mxu1 %v8162_v34 }
 0x2a3   :  { %v5862_v2 = vor.u32 %v5861_v40, %v5858_v25  ;;  %v5957_v25 = vshll.u32 %v5789_v51, 16  ;;  %v5949_v51 = vshll.u32 %v5788_v50, 16 }
 0x2a4   :  { %7688 = vmatmul.mubr.bf16.vlgmr.msra.gmra.mrb[8].mxu1 %v6922_v1  ;;  %v5875_v1 = vrot.slane %v5873_v12, 5 }
 0x2a5   :  { %7691 = vmatprep.mubr.bf16.mxu1 %v6923_v59  ;;  %7704 = vmatpush3.bf16.msra.mxu1 %v8162_v34  ;;  %v5778_v34 = vld [vmem:[#allocation2 + $0x5c] sm:$0x1]  ;;  %v5839_v59 = vrot.slane %v5837_v32, 5  ;;  %v5863_v35 = vrot.slane %v5862_v2, 4  ;;  %v5959_v49 = vrot.slane %v5957_v25, 5 }
 0x2a6   :  { %7705 = vmatprep.subr.bf16.mxu1 %v8164_v56  ;;  %v5879_v45 = vshll.u32 %v5778_v34, 16 }
 0x2a7   :  { %v5840_v44 = vsel %vm8336_vm4, %v5835_v22, %v5839_v59  ;;  %v5868_v21 = vsel %vm8336_vm4, %v5863_v35, %v5867_v18  ;;  %v5968_v59 = vshrl.u32 %v5791_v55, 16  ;;  %v5792_v22 = vld [vmem:[#allocation2 + $0xc8] sm:$0x1]  ;;  %v5973_v18 = vrot.slane %v5971_v13, 5 }
 0x2a8   :  { %v5881_v58 = vrot.slane %v5879_v45, 5 }
 0x2a9   :  { %7706 = vmatpush3.bf16.msra.mxu1 %v8164_v56  ;;  %v5884_v56 = vshrl.u32 %v5779_v42, 16  ;;  %v5904_v42 = vor.u32 %v5903_v15, %v5900_v53  ;;  %v5797_v53 = vld [vmem:[#allocation2 + $0xe8] sm:$0xf] }
 0x2aa   :  { %7707 = vmatprep.subr.bf16.mxu1 %v8166_v19 }
 0x2ab   :  { %v5886_v62 = vrot.slane %v5884_v56, 4  ;;  %v5905_v56 = vrot.slane %v5904_v42, 4  ;;  %v5977_v42 = vshll.u32 %v5792_v22, 16 }
 0x2ac   :  { %7692 = vmatmul.mubr.bf16.gmra.mrb[12].mxu1 %v6924_v23  ;;  %v5876_v23 = vor.u32 %v5875_v1, %v5872_v54  ;;  %v5793_v1 = vld [vmem:[#allocation2 + $0xd0] sm:$0xf] }
 0x2ad   :  { %7695 = vmatprep.mubr.bf16.mxu1 %v6925_v0  ;;  %7708 = vmatpush3.bf16.msra.mxu1 %v8166_v19  ;;  %v5853_v19 = vrot.slane %v5851_v60, 5  ;;  %v6953_v0 = vcombine.low %v5812_v10, %v5826_v38  ;;  %v5890_v33 = vor.u32 %v5889_v36, %v5886_v62  ;;  %v5918_v60 = vor.u32 %v5917_v20, %v5914_v26 }
 0x2ae   :  { %7709 = vmatprep.subr.bf16.mxu1 %v8168_v5  ;;  %v5985_v38 = vshll.u32 %v5793_v1, 16  ;;  %v5937_v36 = vrot.slane %v5935_v27, 5  ;;  %v5798_v27 = vld [vmem:[#allocation2 + $0xec] sm:$0x1] }
 0x2af   :  { %v5891_v3 = vrot.slane %v5890_v33, 4  ;;  %v5919_v17 = vrot.slane %v5918_v60, 4 }
 0x2b1   :  { %7710 = vmatpush3.bf16.msra.mxu1 %v8168_v5  ;;  %v5782_v5 = vld [vmem:[#allocation2 + $0x74] sm:$0x1]  ;;  %v5896_v45 = vsel %vm8336_vm4, %v5891_v3, %v5895_v41  ;;  %v5991_v41 = vshll.u32 %v5794_v37, 16 }
 0x2b2   :  { %7711 = vmatprep.subr.bf16.mxu1 %v8170_v7  ;;  %v5907_v12 = vshll.u32 %v5782_v5, 16 }
 0x2b4   :  { %7696 = vmatmul.mubr.bf16.gmra.mrb[16].mxu1 %v6926_v52  ;;  %v5877_v52 = vrot.slane %v5876_v23, 4  ;;  %v5909_v34 = vrot.slane %v5907_v12, 5  ;;  %v5795_v23 = vld [vmem:[#allocation2 + $0xdc] sm:$0xf]  ;;  %v6010_v12 = vshrl.u32 %v5797_v53, 16 }
 0x2b5   :  { %7699 = vmatprep.mubr.bf16.mxu1 %v6927_v46  ;;  %7712 = vmatpush3.bf16.msra.mxu1 %v8170_v7  ;;  %v5854_v7 = vsel %vm8336_vm4, %v5849_v8, %v5853_v19  ;;  %v5921_v46 = vshll.u32 %v5784_v11, 16  ;;  %v5999_v33 = vshll.u32 %v5795_v23, 16 }
 0x2b6   :  { %7713 = vmatprep.subr.bf16.mxu1 %v8172_v28  ;;  %v6954_v48 = vcombine.low %v5840_v44, %v5854_v7  ;;  %v5882_v40 = vsel %vm8336_vm4, %v5877_v52, %v5881_v58  ;;  %v5910_v62 = vsel %vm8336_vm4, %v5905_v56, %v5909_v34  ;;  %v5960_v7 = vor.u32 %v5959_v49, %v5956_v61 }
 0x2b7   :  { %v5923_v54 = vrot.slane %v5921_v46, 5  ;;  %v6955_v2 = vcombine.low %v5868_v21, %v5882_v40  ;;  %v5987_v58 = vrot.slane %v5985_v38, 5  ;;  %v5996_v52 = vshrl.u32 %v5795_v23, 16 }
 0x2b8   :  { %v6013_v46 = vshll.u32 %v5797_v53, 16  ;;  %v6956_v31 = vcombine.low %v5896_v45, %v5910_v62  ;;  %v5961_v55 = vrot.slane %v5960_v7, 4  ;;  %v6001_v40 = vrot.slane %v5999_v33, 5 }
 0x2b9   :  { %7714 = vmatpush3.bf16.msra.mxu1 %v8172_v28  ;;  %v9810_v30 = vpop.f32.mrb[16].mxu0  ;;  %v5931_v28 = vrot.slane %v5929_v29, 5  ;;  %v5998_v25 = vrot.slane %v5996_v52, 4  ;;  %v6012_v3 = vrot.slane %v6010_v12, 4  ;;  %v5979_v56 = vrot.slane %v5977_v42, 5 }
 0x2ba   :  { %7715 = vmatprep.subr.bf16.mxu1 %v8174_v16  ;;  %v9817_v24 = vpop.f32.mrb[17].mxu0  ;;  %v6015_v34 = vrot.slane %v6013_v46, 5  ;;  %v6019_v38 = vshll.u32 %v5798_v27, 16 }
 0x2bb   :  { %v9822_v32 = vpop.f32.mrb[18].mxu0  ;;  %v5932_v14 = vor.u32 %v5931_v28, %v5928_v6  ;;  %v5965_v6 = vrot.slane %v5963_v43, 5  ;;  %v6002_v49 = vor.u32 %v6001_v40, %v5998_v25 }
 0x2bc   :  { %7700 = vmatmul.mubr.bf16.gmra.mrb[20].mxu1 %v6928_v47  ;;  %v9826_v4 = vpop.f32.mrb[19].mxu0  ;;  %v5787_v47 = vld [vmem:[#allocation2 + $0xac] sm:$0xf]  ;;  %v6021_v53 = vrot.slane %v6019_v38, 5 }
 0x2bd   :  { %7716 = vmatpush3.bf16.msra.mxu1 %v8174_v16  ;;  %7719 = vmatprep.mubr.bf16.mxu1 %v6953_v0  ;;  %v5940_v10 = vshrl.u32 %v5787_v47, 16  ;;  %v5943_v19 = vshll.u32 %v5787_v47, 16  ;;  %v5982_v16 = vshrl.u32 %v5793_v1, 16  ;;  %v5970_v0 = vrot.slane %v5968_v59, 4  ;;  %v5796_v47 = vld [vmem:[#allocation2 + $0xe0] sm:$0x1] }
 0x2be   :  { %7717 = vmatprep.subr.bf16.mxu1 %v8175_v39  ;;  %v5933_v11 = vrot.slane %v5932_v14, 4  ;;  %v6005_v9 = vshll.u32 %v5796_v47, 16  ;;  %v5966_v61 = vsel %vm8336_vm4, %v5961_v55, %v5965_v6 }
 0x2bf   :  { %v5942_v26 = vrot.slane %v5940_v10, 4  ;;  %v5945_v20 = vrot.slane %v5943_v19, 5  ;;  %v5984_v35 = vrot.slane %v5982_v16, 4  ;;  %v5974_v44 = vor.u32 %v5973_v18, %v5970_v0 }
 0x2c0   :  { %v5993_v19 = vrot.slane %v5991_v41, 5  ;;  %v6016_v16 = vor.u32 %v6015_v34, %v6012_v3  ;;  %v6007_v23 = vrot.slane %v6005_v9, 5  ;;  %v6003_v0 = vrot.slane %v6002_v49, 4 }
 0x2c1   :  { %7718 = vmatpush3.bf16.msra.mxu1 %v8175_v39  ;;  %v5924_v39 = vsel %vm8336_vm4, %v5919_v17, %v5923_v54  ;;  %v5946_v60 = vor.u32 %v5945_v20, %v5942_v26  ;;  %v5988_v21 = vor.u32 %v5987_v58, %v5984_v35  ;;  %v5975_v1 = vrot.slane %v5974_v44, 4  ;;  %v9879_v58 = vld [vmem:[%s9929_s4] ss:$0 sm:$0xff]  ;;  %s8201_s4 = smov [#allocation3]  }
 0x2c2   :  { %v9832_v8 = vpop.f32.mrb[20].mxu0  ;;  %v5951_v17 = vrot.slane %v5949_v51, 5  ;;  %v6017_v18 = vrot.slane %v6016_v16, 4  ;;  %v6008_v43 = vsel %vm8336_vm4, %v6003_v0, %v6007_v23  ;;  %s6309_s24 = sshll.u32 %s8201_s4, 4  ;;  %s6310_s24 = int_to_ptr.vmem [resolvable:$true] %s6309_s24 }
 0x2c3   :  { %v9836_v5 = vpop.f32.mrb[21].mxu0  ;;  %v5947_v13 = vrot.slane %v5946_v60, 4  ;;  %v5989_v10 = vrot.slane %v5988_v21, 4  ;;  %s8176_s2 = scalar_lea.vmem %s6310_s24, 1024  ;;  %p8181_p1 = scmp.lt.s32.totalorder %s6310_s24, %s6310_s24 }
 0x2c4   :  { %7720 = vmatmul.mubr.bf16.vlgmr.msra.gmra.mrb[8].mxu1 %v6954_v48  ;;  %v9840_v15 = vpop.f32.mrb[22].mxu0  ;;  %v5938_v48 = vsel %vm8336_vm4, %v5933_v11, %v5937_v36  ;;  %p8177_p0 = scmp.ne.s32.totalorder %s6310_s24, %s8176_s2  ;;  %p8182_p2 = scmp.lt.s32.totalorder %s8176_s2, %s8176_s2 }
 0x2c5   :  { %7723 = vmatprep.mubr.bf16.mxu1 %v6955_v2  ;;  %v9842_v29 = vpop.f32.mrb[23].mxu0  ;;  %v6957_v28 = vcombine.low %v5924_v39, %v5938_v48  ;;  %v5980_v2 = vsel %vm8336_vm4, %v5975_v1, %v5979_v56  ;;  %v5952_v45 = vsel %vm8336_vm4, %v5947_v13, %v5951_v17  ;;  %v5994_v22 = vsel %vm8336_vm4, %v5989_v10, %v5993_v19 }
 0x2c6   :  { %v6958_v50 = vcombine.low %v5952_v45, %v5966_v61  ;;  %v6959_v62 = vcombine.low %v5980_v2, %v5994_v22  ;;  %v6022_v39 = vsel %vm8336_vm4, %v6017_v18, %v6021_v53  ;;  %p8183_p3 = por %p8182_p2, %p8181_p1 }
 0x2c7   :  { %v6960_v7 = vcombine.low %v6008_v43, %v6022_v39 }
 0x2c8   :  { %p8184_p4 = pnand %p8183_p3, %p8177_p0 }
 0x2cb   :  { %v9848_v63 = vpop.f32.mrb[24].mxu0 }
 0x2cc   :  { %7724 = vmatmul.mubr.bf16.gmra.mrb[12].mxu1 %v6956_v31  ;;  %v9850_v54 = vpop.f32.mrb[25].mxu0 }
 0x2cd   :  { %7727 = vmatprep.mubr.bf16.mxu1 %v6957_v28  ;;  %v9852_v59 = vpop.f32.mrb[26].mxu0 }
 0x2ce   :  { %v9854_v14 = vpop.f32.mrb[27].mxu0 }
 0x2d3   :  { %v9864_v36 = vpop.f32.mrb[28].mxu0 }
 0x2d4   :  { %7728 = vmatmul.mubr.bf16.gmra.mrb[16].mxu1 %v6958_v50  ;;  %v9866_v11 = vpop.f32.mrb[29].mxu0 }
 0x2d5   :  { %7731 = vmatprep.mubr.bf16.mxu1 %v6959_v62  ;;  %v9868_v26 = vpop.f32.mrb[30].mxu0 }
 0x2d6   :  { %v9870_v20 = vpop.f32.mrb[31].mxu0 }
 0x2dc   :  { %7732 = vmatmul.mubr.bf16.gmra.mrb[20].mxu1 %v6960_v7 }
 0x397   :  { %v7721_v35 = vpop.f32.mrb[8].mxu1 }
 0x398   :  { %v7745_v37 = vadd.f32 %v7721_v35, %v9810_v30  ;;  %v6154_v52 = vpop.f32.mrb[9].mxu1 }
 0x399   :  { %v7746_v33 = vadd.f32 %v6154_v52, %v9817_v24  ;;  %v7722_v12 = vpop.f32.mrb[10].mxu1 }
 0x39a   :  { %v6242_v46 = vadd.f32 %v7745_v37, %v9879_v58  ;;  %v7747_v51 = vadd.f32 %v7722_v12, %v9822_v32  ;;  %v6157_v57 = vpop.f32.mrb[11].mxu1 }
 0x39b   :  { %v6240_v44 = vadd.f32 %v7746_v33, %v9879_v58  ;;  %v7748_v42 = vadd.f32 %v6157_v57, %v9826_v4 }
 0x39c   :  { %v6243_v31 = vadd.f32 %v7747_v51, %v9879_v58  ;;  %v6258_v60 = vmax.f32 %v6242_v46, 0.0 }
 0x39d   :  { %v6241_v48 = vadd.f32 %v7748_v42, %v9879_v58  ;;  %v6256_v30 = vmax.f32 %v6240_v44, 0.0 }
 0x39e   :  { %v6259_v6 = vmax.f32 %v6243_v31, 0.0 }
 0x39f   :  { %v6257_v28 = vmax.f32 %v6241_v48, 0.0  ;;  %v7725_v55 = vpop.f32.mrb[12].mxu1 }
 0x3a0   :  { %v6994_v24 = vpack.c.bf16 %v6259_v6, %v6258_v60  ;;  %v7749_v21 = vadd.f32 %v7725_v55, %v9832_v8  ;;  %v6170_v41 = vpop.f32.mrb[13].mxu1 }
 0x3a1   :  { %v6989_v47 = vpack.c.bf16 %v6257_v28, %v6256_v30  ;;  %v7750_v32 = vadd.f32 %v6170_v41, %v9836_v5  ;;  %v7726_v25 = vpop.f32.mrb[14].mxu1 }
 0x3a2   :  { %7026 = vst [vmem:[#allocation3 + $0x8] sm:$0xff] %v6994_v24   ;;  %v6246_v4 = vadd.f32 %v7749_v21, %v9879_v58  ;;  %v7751_v40 = vadd.f32 %v7726_v25, %v9840_v15  ;;  %v6173_v3 = vpop.f32.mrb[15].mxu1 }
 0x3a3   :  { %6990 = vst [vmem:[#allocation3] sm:$0xff] %v6989_v47   ;;  %v6244_v34 = vadd.f32 %v7750_v32, %v9879_v58  ;;  %v7752_v1 = vadd.f32 %v6173_v3, %v9842_v29 }
 0x3a4   :  { %v6247_v56 = vadd.f32 %v7751_v40, %v9879_v58  ;;  %v6262_v27 = vmax.f32 %v6246_v4, 0.0 }
 0x3a5   :  { %v6245_v8 = vadd.f32 %v7752_v1, %v9879_v58  ;;  %v6260_v17 = vmax.f32 %v6244_v34, 0.0 }
 0x3a6   :  { %v6263_v13 = vmax.f32 %v6247_v56, 0.0 }
 0x3a7   :  { %v6261_v5 = vmax.f32 %v6245_v8, 0.0  ;;  %v7729_v10 = vpop.f32.mrb[16].mxu1 }
 0x3a8   :  { %v7004_v19 = vpack.c.bf16 %v6263_v13, %v6262_v27  ;;  %v7753_v9 = vadd.f32 %v7729_v10, %v9848_v63  ;;  %v6186_v61 = vpop.f32.mrb[17].mxu1 }
 0x3a9   :  { %v6999_v15 = vpack.c.bf16 %v6261_v5, %v6260_v17  ;;  %v7754_v49 = vadd.f32 %v6186_v61, %v9850_v54  ;;  %v7730_v16 = vpop.f32.mrb[18].mxu1 }
 0x3aa   :  { %7028 = vst [vmem:[#allocation3 + $0x18] sm:$0xff] %v7004_v19   ;;  %v6250_v29 = vadd.f32 %v7753_v9, %v9879_v58  ;;  %v7755_v38 = vadd.f32 %v7730_v16, %v9852_v59  ;;  %v6189_v2 = vpop.f32.mrb[19].mxu1 }
 0x3ab   :  { %7027 = vst [vmem:[#allocation3 + $0x10] sm:$0xff] %v6999_v15   ;;  %v6248_v45 = vadd.f32 %v7754_v49, %v9879_v58  ;;  %v7756_v50 = vadd.f32 %v6189_v2, %v9854_v14 }
 0x3ac   :  { %v6251_v22 = vadd.f32 %v7755_v38, %v9879_v58  ;;  %v6266_v23 = vmax.f32 %v6250_v29, 0.0 }
 0x3ad   :  { %v6249_v63 = vadd.f32 %v7756_v50, %v9879_v58  ;;  %v6264_v0 = vmax.f32 %v6248_v45, 0.0 }
 0x3ae   :  { %v6267_v62 = vmax.f32 %v6251_v22, 0.0 }
 0x3af   :  { %v6265_v54 = vmax.f32 %v6249_v63, 0.0  ;;  %v7733_v18 = vpop.f32.mrb[20].mxu1 }
 0x3b0   :  { %v7014_v53 = vpack.c.bf16 %v6267_v62, %v6266_v23  ;;  %v7757_v43 = vadd.f32 %v7733_v18, %v9864_v36  ;;  %v6202_v39 = vpop.f32.mrb[21].mxu1 }
 0x3b1   :  { %v7009_v59 = vpack.c.bf16 %v6265_v54, %v6264_v0  ;;  %v7758_v7 = vadd.f32 %v6202_v39, %v9866_v11  ;;  %v7734_v35 = vpop.f32.mrb[22].mxu1 }
 0x3b2   :  { %7030 = vst [vmem:[#allocation3 + $0x28] sm:$0xff] %v7014_v53   ;;  %v6254_v14 = vadd.f32 %v7757_v43, %v9879_v58  ;;  %v7759_v37 = vadd.f32 %v7734_v35, %v9868_v26  ;;  %v6205_v52 = vpop.f32.mrb[23].mxu1 }
 0x3b3   :  { %7029 = vst [vmem:[#allocation3 + $0x20] sm:$0xff] %v7009_v59   ;;  %v6252_v33 = vadd.f32 %v7758_v7, %v9879_v58  ;;  %v7760_v12 = vadd.f32 %v6205_v52, %v9870_v20 }
 0x3b4   :  { %v6255_v46 = vadd.f32 %v7759_v37, %v9879_v58  ;;  %v6270_v51 = vmax.f32 %v6254_v14, 0.0 }
 0x3b5   :  { %v6253_v36 = vadd.f32 %v7760_v12, %v9879_v58  ;;  %v6268_v11 = vmax.f32 %v6252_v33, 0.0 }
 0x3b6   :  { %v6271_v57 = vmax.f32 %v6255_v46, 0.0 }
 0x3b7   :  { %v6269_v44 = vmax.f32 %v6253_v36, 0.0 }
 0x3b8   :  { %v7024_v42 = vpack.c.bf16 %v6271_v57, %v6270_v51 }
 0x3b9   :  { %v7019_v31 = vpack.c.bf16 %v6269_v44, %v6268_v11 }
 0x3ba   :  { %7032 = vst [vmem:[#allocation3 + $0x38] sm:$0xff] %v7024_v42  }
 0x3bb   :  { %7031 = vst [vmem:[#allocation3 + $0x30] sm:$0xff] %v7019_v31  }
 0x3bc   :  { %8187 = shalt.err (!%p8184_p4)
}
 0x3bd   :  { %s8188_s27 = scalar_lea.hbm %s9932_s7, 1024 }
 0x3be   :  { %p8189_p5 = scmp.ne.s32.totalorder %s9932_s7, %s8188_s27  ;;  %p8192_p6 = scmp.lt.u32.totalorder %s8188_s27, %s9932_s7 }
 0x3c0   :  { %p8194_p7 = pnand %p8192_p6, %p8189_p5 }
 0x3c2   :  { %8197 = shalt.err (!%p8194_p7)
}
 0x3c3   :  { %s8202_s30 = smov 64   ;;  %s8203_s8 = smov 4  }
 0x3c4   :  { %6315 = dma.vmem_to_hbm [thread:$0]  %s6310_s24, 1024, %s9932_s7, [#allocation4], %s8202_s30, %s8202_s30, %s8203_s8  }
 0x3c5   :  { %8198 = dma.done.wait [#allocation4], 1024  }
 0x3c6   :  { %8199 = vsyncadd [#allocation4], 4294966272 }
 0x3c7   :  { %6319 = vsyncpa [#allocation4], 1 }

</bundles_post_ra>
